<compile_context>
chip_gen: v5e
topology: v5e:2x2
jax: 0.10.0
libtpu: 0.0.40
codegen_flags: <defaults>
</compile_context>

<pallas_src>
import math

import jax
import jax.numpy as jnp
from jax.experimental import pallas as pl
from jax.experimental.pallas import tpu as pltpu

DIM = 512            # hidden width fixed inside the PyTorch module
OUT_DIM = 1
NUM_RES_BLOCKS = 3
LAYERS_PER_BLOCK = 3
NUM_RES_LAYERS = NUM_RES_BLOCKS * LAYERS_PER_BLOCK   # 9
INV_SQRT2 = 1.0 / math.sqrt(2.0)

# Rows of the packed [VEC_ROWS, DIM] f32 "vector table" (avoids per-row sublane padding).
# rows 0..8 : res-layer biases
ROW_W_MAP = NUM_RES_LAYERS   # 9   Linear(1,512) weight as a row (scale)
ROW_B_MAP = 10               #     Linear(1,512) bias (shift)
ROW_B_Z = 11                 #     z-branch bias
ROW_B_O1 = 12                #     out_module first Linear bias
ROW_W_O2 = 13                #     Linear(512,1) weight as a row
ROW_B_O2 = 14                #     Linear(512,1) bias (broadcast across the row)
VEC_ROWS = 16                # pad to a multiple of 8 sublanes


def _leaky(h):
    return jnp.where(h > 0, h, 0.2 * h)   # LeakyReLU(0.2)


def _round_up(n, m):
    return ((n + m - 1) // m) * m


# ---------------------------------------------------------------------------
# Pallas kernel: the Toy_Generator forward hot path (per batch tile)
# ---------------------------------------------------------------------------
def toy_generator_kernel(
    x_ref,        # [TB, 1]            f32
    z_ref,        # [TB, nz]           f32
    tbias_ref,    # [1, DIM]           f32   precomputed t_out @ W_o1x (row-constant t branch)
    w_res_ref,    # [9, DIM, DIM]      bf16
    w_z_ref,      # [nz, DIM]          bf16
    w_o1x_ref,    # [DIM, DIM]         bf16  (first half of out_module Linear(2*DIM, DIM))
    w_o1z_ref,    # [DIM, DIM]         bf16  (second half)
    vecs_ref,     # [VEC_ROWS, DIM]    f32   packed biases / row vectors
    out_ref,      # [TB, OUT_DIM]      f32
):
    f32, bf16 = jnp.float32, jnp.bfloat16
    row = lambda r: vecs_ref[r:r + 1, :]          # static [1, DIM] slice of the vector table

    # ---- z branch: PixelNorm -> Linear(nz, 512) -> LeakyReLU (bf16 matmul, f32 accum) ----
    z = z_ref[...]
    z = z * jax.lax.rsqrt(jnp.mean(z * z, axis=1, keepdims=True) + 1e-8)
    z_out = _leaky(
        jnp.dot(z.astype(bf16), w_z_ref[...], preferred_element_type=f32) + row(ROW_B_Z)
    )

    # ---- x branch: ResNet_FC(data_dim=1, hidden=512, 3 res blocks) ------------------------
    # map = Linear(1, 512): with data_dim == 1 this is a broadcasted scale + shift.
    h = x_ref[...] * row(ROW_W_MAP) + row(ROW_B_MAP)
    for blk in range(NUM_RES_BLOCKS):
        r = h
        for layer in range(LAYERS_PER_BLOCK):
            idx = blk * LAYERS_PER_BLOCK + layer
            r = _leaky(
                jnp.dot(r.astype(bf16), w_res_ref[idx], preferred_element_type=f32)
                + row(idx)
            )
        h = (h + r) * INV_SQRT2

    # ---- combine + output head -------------------------------------------------------------
    # cat([h + t_out, z_out], 1) @ W_o1  ==  h @ W_o1x + z_out @ W_o1z + (t_out @ W_o1x)
    # and the row-constant term t_out @ W_o1x arrives precomputed in tbias_ref.
    o = _leaky(
        jnp.dot(h.astype(bf16), w_o1x_ref[...], preferred_element_type=f32)
        + jnp.dot(z_out.astype(bf16), w_o1z_ref[...], preferred_element_type=f32)
        + tbias_ref[...]
        + row(ROW_B_O1)
    )
    # Linear(512, 1) as a lane reduction (avoids a lane-width-1 MXU operand).
    out_ref[...] = (
        jnp.sum(o * row(ROW_W_O2), axis=1, keepdims=True)
        + vecs_ref[ROW_B_O2:ROW_B_O2 + 1, 0:1]
    )


# ---------------------------------------------------------------------------
# Glue: timestep embedding, parameter init / packing, pallas_call wrapper
# ---------------------------------------------------------------------------
def timestep_embedding(t_vec, dim, max_period=10000.0):
    half = dim // 2
    freqs = jnp.exp(-math.log(max_period) * jnp.arange(half, dtype=jnp.float32) / half)
    args = t_vec[:, None].astype(jnp.float32) * freqs[None, :]
    emb = jnp.concatenate([jnp.cos(args), jnp.sin(args)], axis=-1)
    if dim % 2:
        emb = jnp.concatenate([emb, jnp.zeros_like(emb[:, :1])], axis=-1)
    return emb


def init_params(key, time_embed_dim, nz):
    """Deterministic synthetic f32 weights (Linear weights stored as [in, out], biases [out])."""
    def linear(key, fan_in, fan_out):
        kw, kb = jax.random.split(key)
        bound = 1.0 / math.sqrt(fan_in)
        w = jax.random.uniform(kw, (fan_in, fan_out), jnp.float32, -bound, bound)
        b = jax.random.uniform(kb, (fan_out,), jnp.float32, -bound, bound)
        return w, b

    keys = jax.random.split(key, 16)
    p = {}
    p["w_map"], p["b_map"] = linear(keys[0], 1, DIM)           # [1,DIM], [DIM]
    w_res, b_res = [], []
    for i in range(NUM_RES_LAYERS):
        w, b = linear(keys[1 + i], DIM, DIM)
        w_res.append(w)
        b_res.append(b)
    p["w_res"] = jnp.stack(w_res)                              # [9, DIM, DIM]
    p["b_res"] = jnp.stack(b_res)                              # [9, DIM]
    p["w_t1"], p["b_t1"] = linear(keys[10], time_embed_dim, DIM)
    p["w_t2"], p["b_t2"] = linear(keys[11], DIM, DIM)
    p["w_z"], p["b_z"] = linear(keys[12], nz, DIM)
    w_o1, p["b_o1"] = linear(keys[13], 2 * DIM, DIM)
    p["w_o1x"], p["w_o1z"] = w_o1[:DIM], w_o1[DIM:]            # split concat matmul
    p["w_o2"], p["b_o2"] = linear(keys[14], DIM, OUT_DIM)      # [DIM,1], [1]
    return p


def prepare_kernel_weights(p):
    """One-time prep: cast big matmul weights to bf16, pack row vectors into one f32 table."""
    bf16 = jnp.bfloat16
    vecs = jnp.zeros((VEC_ROWS, DIM), jnp.float32)
    vecs = vecs.at[0:NUM_RES_LAYERS].set(p["b_res"])
    vecs = vecs.at[ROW_W_MAP].set(p["w_map"][0])
    vecs = vecs.at[ROW_B_MAP].set(p["b_map"])
    vecs = vecs.at[ROW_B_Z].set(p["b_z"])
    vecs = vecs.at[ROW_B_O1].set(p["b_o1"])
    vecs = vecs.at[ROW_W_O2].set(p["w_o2"][:, 0])
    vecs = vecs.at[ROW_B_O2].set(jnp.full((DIM,), p["b_o2"][0], jnp.float32))
    return {
        "w_res": p["w_res"].astype(bf16),     # [9, DIM, DIM]  4.5 MiB
        "w_z": p["w_z"].astype(bf16),         # [nz, DIM]
        "w_o1x": p["w_o1x"].astype(bf16),     # [DIM, DIM]
        "w_o1z": p["w_o1z"].astype(bf16),     # [DIM, DIM]
        "vecs": vecs,                         # [16, DIM] f32
    }


def toy_generator_forward(x, t, z, params, kweights, time_embed_dim, tile_b=128):
    """x: [B,1] f32, t: scalar int timestep, z: [B,nz] f32."""
    # TODO(synk): list[int] timesteps (per-mini-batch t) not supported; scalar int only.
    B = x.shape[0]
    nz = z.shape[1]

    # ---- hoisted, row-constant t branch (tiny f32 work; cacheable per timestep) ------------
    t_vec = jnp.full((1,), t, dtype=jnp.float32)
    t_emb = timestep_embedding(t_vec, time_embed_dim)                       # [1, ted]
    t_h = _leaky(t_emb @ params["w_t1"] + params["b_t1"])
    t_out = t_h @ params["w_t2"] + params["b_t2"]                           # [1, DIM]
    t_bias = t_out @ params["w_o1x"]                                        # [1, DIM]

    # ---- batch tiling: weights stay VMEM-resident across tiles (constant index_maps) -------
    tile_b = max(8, min(tile_b, _round_up(B, 8)))
    b_pad = _round_up(B, tile_b)
    if b_pad != B:
        x = jnp.pad(x, ((0, b_pad - B), (0, 0)))
        z = jnp.pad(z, ((0, b_pad - B), (0, 0)))
    n_tiles = b_pad // tile_b

    const2 = lambda i: (0, 0)
    grid_spec = pltpu.PrefetchScalarGridSpec(
        num_scalar_prefetch=0,
        grid=(n_tiles,),
        in_specs=[
            pl.BlockSpec((tile_b, 1), lambda i: (i, 0)),                    # x
            pl.BlockSpec((tile_b, nz), lambda i: (i, 0)),                   # z
            pl.BlockSpec((1, DIM), const2),                                 # t_bias
            pl.BlockSpec((NUM_RES_LAYERS, DIM, DIM), lambda i: (0, 0, 0)),  # w_res  (bf16)
            pl.BlockSpec((nz, DIM), const2),                                # w_z    (bf16)
            pl.BlockSpec((DIM, DIM), const2),                               # w_o1x  (bf16)
            pl.BlockSpec((DIM, DIM), const2),                               # w_o1z  (bf16)
            pl.BlockSpec((VEC_ROWS, DIM), const2),                          # vecs   (f32)
        ],
        out_specs=pl.BlockSpec((tile_b, OUT_DIM), lambda i: (i, 0)),
    )

    out = pl.pallas_call(
        toy_generator_kernel,
        out_shape=jax.ShapeDtypeStruct((b_pad, OUT_DIM), jnp.float32),
        grid_spec=grid_spec,
        compiler_params=pltpu.CompilerParams(
            dimension_semantics=("parallel",),          # batch tiles can split across TCs (v7x)
            vmem_limit_bytes=32 * 1024 * 1024,
        ),
    )(x, z, t_bias, kweights["w_res"], kweights["w_z"],
      kweights["w_o1x"], kweights["w_o1z"], kweights["vecs"])
    return out[:B]


# ---------------------------------------------------------------------------
# References
# ---------------------------------------------------------------------------
def ref_forward_f32(x, t, z, params, time_embed_dim):
    """Pure-JAX f32 reference mirroring the PyTorch module exactly."""
    B = x.shape[0]
    t_vec = jnp.full((B,), t, dtype=jnp.float32)
    t_emb = timestep_embedding(t_vec, time_embed_dim)

    zn = z / jnp.sqrt(jnp.mean(z ** 2, axis=1, keepdims=True) + 1e-8)
    z_out = _leaky(zn @ params["w_z"] + params["b_z"])

    t_h = _leaky(t_emb @ params["w_t1"] + params["b_t1"])
    t_out = t_h @ params["w_t2"] + params["b_t2"]

    h = x * params["w_map"] + params["b_map"]
    for blk in range(NUM_RES_BLOCKS):
        r = h
        for layer in range(LAYERS_PER_BLOCK):
            idx = blk * LAYERS_PER_BLOCK + layer
            r = _leaky(r @ params["w_res"][idx] + params["b_res"][idx])
        h = (h + r) * INV_SQRT2

    x_out = h + t_out
    cat = jnp.concatenate([x_out, z_out], axis=1)
    w_o1 = jnp.concatenate([params["w_o1x"], params["w_o1z"]], axis=0)
    o = _leaky(cat @ w_o1 + params["b_o1"])
    return o @ params["w_o2"] + params["b_o2"]


def ref_forward_mirror(x, t, z, params, kweights, time_embed_dim):
    """Pure-JAX reference mirroring the kernel's bf16-matmul / f32-accumulate numerics."""
    f32, bf16 = jnp.float32, jnp.bfloat16
    t_emb = timestep_embedding(jnp.full((1,), t, dtype=f32), time_embed_dim)
    t_out = _leaky(t_emb @ params["w_t1"] + params["b_t1"]) @ params["w_t2"] + params["b_t2"]
    t_bias = t_out @ params["w_o1x"]

    zn = z * jax.lax.rsqrt(jnp.mean(z * z, axis=1, keepdims=True) + 1e-8)
    z_out = _leaky(jnp.dot(zn.astype(bf16), kweights["w_z"], preferred_element_type=f32)
                   + params["b_z"])

    h = x * params["w_map"] + params["b_map"]
    for blk in range(NUM_RES_BLOCKS):
        r = h
        for layer in range(LAYERS_PER_BLOCK):
            idx = blk * LAYERS_PER_BLOCK + layer
            r = _leaky(jnp.dot(r.astype(bf16), kweights["w_res"][idx],
                               preferred_element_type=f32) + params["b_res"][idx])
        h = (h + r) * INV_SQRT2

    o = _leaky(jnp.dot(h.astype(bf16), kweights["w_o1x"], preferred_element_type=f32)
               + jnp.dot(z_out.astype(bf16), kweights["w_o1z"], preferred_element_type=f32)
               + params["b_o1"] + t_bias)
    return jnp.sum(o * params["w_o2"][:, 0][None, :], axis=1, keepdims=True) + params["b_o2"]


if __name__ == "__main__":
    B = 16               # small demo batch; use 128-256 in production to fill MXU rows
    TIME_EMBED_DIM = 32
    NZ = 8
    T_INT = 3
    TILE_B = 8           # small demo tile -> exercises the multi-tile grid path

    key = jax.random.PRNGKey(0)
    kx, kz, kp = jax.random.split(key, 3)
    x = jax.random.normal(kx, (B, 1), dtype=jnp.float32)      # data_dim = 1
    z = jax.random.normal(kz, (B, NZ), dtype=jnp.float32)
    params = init_params(kp, TIME_EMBED_DIM, NZ)
    kweights = prepare_kernel_weights(params)                  # bf16 weights, packed vectors

    out = toy_generator_forward(x, T_INT, z, params, kweights, TIME_EMBED_DIM, tile_b=TILE_B)
    out = jax.block_until_ready(out)
    assert out.shape == (B, OUT_DIM)

    # Tight check against a reference with identical bf16/f32 numerics.
    ref_m = ref_forward_mirror(x, T_INT, z, params, kweights, TIME_EMBED_DIM)
    assert jnp.allclose(out, ref_m, rtol=5e-3, atol=5e-3), (out, ref_m)

    # Loose check against the full-f32 PyTorch-equivalent reference (bf16 weight rounding).
    ref_f = ref_forward_f32(x, T_INT, z, params, TIME_EMBED_DIM)
    assert jnp.allclose(out, ref_f, rtol=1e-1, atol=5e-2), (out, ref_f)

    print("KERNEL_OK")
</pallas_src>

<mosaic_0001>
module attributes {stable_mosaic.version = 11 : i64} {
  func.func @toy_generator_kernel(%arg0: i32, %arg1: memref<8x1xf32, #tpu.memory_space<vmem>>, %arg2: memref<8x8xf32, #tpu.memory_space<vmem>>, %arg3: memref<1x512xf32, #tpu.memory_space<vmem>>, %arg4: memref<9x512x512xbf16, #tpu.memory_space<vmem>>, %arg5: memref<8x512xbf16, #tpu.memory_space<vmem>>, %arg6: memref<512x512xbf16, #tpu.memory_space<vmem>>, %arg7: memref<512x512xbf16, #tpu.memory_space<vmem>>, %arg8: memref<16x512xf32, #tpu.memory_space<vmem>>, %arg9: memref<8x1xf32, #tpu.memory_space<vmem>>) attributes {dimension_semantics = [#tpu.dimension_semantics<parallel>], iteration_bounds = array<i64: 2>, scalar_prefetch = 0 : i64, scratch_operands = 0 : i64, tpu.core_type = #tpu.core_type<tc>, window_params = [{transform_indices = @transform_0, window_bounds = array<i64: 8, 1>}, {transform_indices = @transform_1, window_bounds = array<i64: 8, 8>}, {pipeline_mode = #tpu.pipeline_mode<synchronous>, transform_indices = @transform_2, window_bounds = array<i64: 1, 512>}, {pipeline_mode = #tpu.pipeline_mode<synchronous>, transform_indices = @transform_3, window_bounds = array<i64: 9, 512, 512>}, {pipeline_mode = #tpu.pipeline_mode<synchronous>, transform_indices = @transform_4, window_bounds = array<i64: 8, 512>}, {pipeline_mode = #tpu.pipeline_mode<synchronous>, transform_indices = @transform_5, window_bounds = array<i64: 512, 512>}, {pipeline_mode = #tpu.pipeline_mode<synchronous>, transform_indices = @transform_6, window_bounds = array<i64: 512, 512>}, {pipeline_mode = #tpu.pipeline_mode<synchronous>, transform_indices = @transform_7, window_bounds = array<i64: 16, 512>}, {transform_indices = @transform_8, window_bounds = array<i64: 8, 1>}]} {
    %c0 = arith.constant 0 : index
    %c0_0 = arith.constant 0 : index
    %0 = vector.load %arg2[%c0, %c0_0] : memref<8x8xf32, #tpu.memory_space<vmem>>, vector<8x8xf32>
    %1 = arith.mulf %0, %0 : vector<8x8xf32>
    %cst = arith.constant dense<0.000000e+00> : vector<8xf32>
    %2 = vector.multi_reduction <add>, %1, %cst [1] : vector<8x8xf32> to vector<8xf32>
    %3 = vector.shape_cast %2 : vector<8xf32> to vector<8x1xf32>
    %cst_1 = arith.constant 8.000000e+00 : f32
    %4 = vector.broadcast %cst_1 : f32 to vector<8x1xf32>
    %5 = arith.divf %3, %4 : vector<8x1xf32>
    %cst_2 = arith.constant 9.99999993E-9 : f32
    %6 = vector.broadcast %cst_2 : f32 to vector<8x1xf32>
    %7 = arith.addf %5, %6 : vector<8x1xf32>
    %8 = math.rsqrt %7 : vector<8x1xf32>
    %9 = vector.broadcast %8 : vector<8x1xf32> to vector<8x8xf32>
    %10 = arith.mulf %0, %9 : vector<8x8xf32>
    %11 = arith.truncf %10 : vector<8x8xf32> to vector<8x8xbf16>
    %c0_3 = arith.constant 0 : index
    %c0_4 = arith.constant 0 : index
    %12 = vector.load %arg5[%c0_3, %c0_4] : memref<8x512xbf16, #tpu.memory_space<vmem>>, vector<8x512xbf16>
    %cst_5 = arith.constant dense<0.000000e+00> : vector<8x512xf32>
    %13 = tpu.matmul %11, %12, %cst_5 {dimension_numbers = #tpu.dot_dimension_numbers<[1], [0], [0], [1], [0, 0, 1, 1], [], []>} : vector<8x8xbf16>, vector<8x512xbf16>, vector<8x512xf32> -> vector<8x512xf32>
    %c11 = arith.constant 11 : index
    %c0_6 = arith.constant 0 : index
    %14 = vector.load %arg8[%c11, %c0_6] : memref<16x512xf32, #tpu.memory_space<vmem>>, vector<1x512xf32>
    %15 = vector.broadcast %14 : vector<1x512xf32> to vector<8x512xf32>
    %16 = arith.addf %13, %15 : vector<8x512xf32>
    %cst_7 = arith.constant 0.000000e+00 : f32
    %17 = vector.broadcast %cst_7 : f32 to vector<8x512xf32>
    %18 = arith.cmpf ogt, %16, %17 : vector<8x512xf32>
    %cst_8 = arith.constant 2.000000e-01 : f32
    %19 = vector.broadcast %cst_8 : f32 to vector<8x512xf32>
    %20 = arith.mulf %19, %16 : vector<8x512xf32>
    %21 = arith.select %18, %16, %20 : vector<8x512xi1>, vector<8x512xf32>
    %c0_9 = arith.constant 0 : index
    %c0_10 = arith.constant 0 : index
    %22 = vector.load %arg1[%c0_9, %c0_10] : memref<8x1xf32, #tpu.memory_space<vmem>>, vector<8x1xf32>
    %c9 = arith.constant 9 : index
    %c0_11 = arith.constant 0 : index
    %23 = vector.load %arg8[%c9, %c0_11] : memref<16x512xf32, #tpu.memory_space<vmem>>, vector<1x512xf32>
    %24 = vector.broadcast %22 : vector<8x1xf32> to vector<8x512xf32>
    %25 = vector.broadcast %23 : vector<1x512xf32> to vector<8x512xf32>
    %26 = arith.mulf %24, %25 : vector<8x512xf32>
    %c10 = arith.constant 10 : index
    %c0_12 = arith.constant 0 : index
    %27 = vector.load %arg8[%c10, %c0_12] : memref<16x512xf32, #tpu.memory_space<vmem>>, vector<1x512xf32>
    %28 = vector.broadcast %27 : vector<1x512xf32> to vector<8x512xf32>
    %29 = arith.addf %26, %28 : vector<8x512xf32>
    %30 = arith.truncf %29 : vector<8x512xf32> to vector<8x512xbf16>
    %c0_13 = arith.constant 0 : index
    %c0_14 = arith.constant 0 : index
    %c0_15 = arith.constant 0 : index
    %31 = vector.load %arg4[%c0_13, %c0_14, %c0_15] : memref<9x512x512xbf16, #tpu.memory_space<vmem>>, vector<1x512x512xbf16>
    %32 = vector.shape_cast %31 : vector<1x512x512xbf16> to vector<512x512xbf16>
    %cst_16 = arith.constant dense<0.000000e+00> : vector<8x512xf32>
    %33 = tpu.matmul %30, %32, %cst_16 {dimension_numbers = #tpu.dot_dimension_numbers<[1], [0], [0], [1], [0, 0, 1, 1], [], []>} : vector<8x512xbf16>, vector<512x512xbf16>, vector<8x512xf32> -> vector<8x512xf32>
    %c0_17 = arith.constant 0 : index
    %c0_18 = arith.constant 0 : index
    %34 = vector.load %arg8[%c0_17, %c0_18] : memref<16x512xf32, #tpu.memory_space<vmem>>, vector<1x512xf32>
    %35 = vector.broadcast %34 : vector<1x512xf32> to vector<8x512xf32>
    %36 = arith.addf %33, %35 : vector<8x512xf32>
    %cst_19 = arith.constant 0.000000e+00 : f32
    %37 = vector.broadcast %cst_19 : f32 to vector<8x512xf32>
    %38 = arith.cmpf ogt, %36, %37 : vector<8x512xf32>
    %cst_20 = arith.constant 2.000000e-01 : f32
    %39 = vector.broadcast %cst_20 : f32 to vector<8x512xf32>
    %40 = arith.mulf %39, %36 : vector<8x512xf32>
    %41 = arith.select %38, %36, %40 : vector<8x512xi1>, vector<8x512xf32>
    %42 = arith.truncf %41 : vector<8x512xf32> to vector<8x512xbf16>
    %c1 = arith.constant 1 : index
    %c0_21 = arith.constant 0 : index
    %c0_22 = arith.constant 0 : index
    %43 = vector.load %arg4[%c1, %c0_21, %c0_22] : memref<9x512x512xbf16, #tpu.memory_space<vmem>>, vector<1x512x512xbf16>
    %44 = vector.shape_cast %43 : vector<1x512x512xbf16> to vector<512x512xbf16>
    %cst_23 = arith.constant dense<0.000000e+00> : vector<8x512xf32>
    %45 = tpu.matmul %42, %44, %cst_23 {dimension_numbers = #tpu.dot_dimension_numbers<[1], [0], [0], [1], [0, 0, 1, 1], [], []>} : vector<8x512xbf16>, vector<512x512xbf16>, vector<8x512xf32> -> vector<8x512xf32>
    %c1_24 = arith.constant 1 : index
    %c0_25 = arith.constant 0 : index
    %46 = vector.load %arg8[%c1_24, %c0_25] : memref<16x512xf32, #tpu.memory_space<vmem>>, vector<1x512xf32>
    %47 = vector.broadcast %46 : vector<1x512xf32> to vector<8x512xf32>
    %48 = arith.addf %45, %47 : vector<8x512xf32>
    %cst_26 = arith.constant 0.000000e+00 : f32
    %49 = vector.broadcast %cst_26 : f32 to vector<8x512xf32>
    %50 = arith.cmpf ogt, %48, %49 : vector<8x512xf32>
    %cst_27 = arith.constant 2.000000e-01 : f32
    %51 = vector.broadcast %cst_27 : f32 to vector<8x512xf32>
    %52 = arith.mulf %51, %48 : vector<8x512xf32>
    %53 = arith.select %50, %48, %52 : vector<8x512xi1>, vector<8x512xf32>
    %54 = arith.truncf %53 : vector<8x512xf32> to vector<8x512xbf16>
    %c2 = arith.constant 2 : index
    %c0_28 = arith.constant 0 : index
    %c0_29 = arith.constant 0 : index
    %55 = vector.load %arg4[%c2, %c0_28, %c0_29] : memref<9x512x512xbf16, #tpu.memory_space<vmem>>, vector<1x512x512xbf16>
    %56 = vector.shape_cast %55 : vector<1x512x512xbf16> to vector<512x512xbf16>
    %cst_30 = arith.constant dense<0.000000e+00> : vector<8x512xf32>
    %57 = tpu.matmul %54, %56, %cst_30 {dimension_numbers = #tpu.dot_dimension_numbers<[1], [0], [0], [1], [0, 0, 1, 1], [], []>} : vector<8x512xbf16>, vector<512x512xbf16>, vector<8x512xf32> -> vector<8x512xf32>
    %c2_31 = arith.constant 2 : index
    %c0_32 = arith.constant 0 : index
    %58 = vector.load %arg8[%c2_31, %c0_32] : memref<16x512xf32, #tpu.memory_space<vmem>>, vector<1x512xf32>
    %59 = vector.broadcast %58 : vector<1x512xf32> to vector<8x512xf32>
    %60 = arith.addf %57, %59 : vector<8x512xf32>
    %cst_33 = arith.constant 0.000000e+00 : f32
    %61 = vector.broadcast %cst_33 : f32 to vector<8x512xf32>
    %62 = arith.cmpf ogt, %60, %61 : vector<8x512xf32>
    %cst_34 = arith.constant 2.000000e-01 : f32
    %63 = vector.broadcast %cst_34 : f32 to vector<8x512xf32>
    %64 = arith.mulf %63, %60 : vector<8x512xf32>
    %65 = arith.select %62, %60, %64 : vector<8x512xi1>, vector<8x512xf32>
    %66 = arith.addf %29, %65 : vector<8x512xf32>
    %cst_35 = arith.constant 0.707106769 : f32
    %67 = vector.broadcast %cst_35 : f32 to vector<8x512xf32>
    %68 = arith.mulf %66, %67 : vector<8x512xf32>
    %69 = arith.truncf %68 : vector<8x512xf32> to vector<8x512xbf16>
    %c3 = arith.constant 3 : index
    %c0_36 = arith.constant 0 : index
    %c0_37 = arith.constant 0 : index
    %70 = vector.load %arg4[%c3, %c0_36, %c0_37] : memref<9x512x512xbf16, #tpu.memory_space<vmem>>, vector<1x512x512xbf16>
    %71 = vector.shape_cast %70 : vector<1x512x512xbf16> to vector<512x512xbf16>
    %cst_38 = arith.constant dense<0.000000e+00> : vector<8x512xf32>
    %72 = tpu.matmul %69, %71, %cst_38 {dimension_numbers = #tpu.dot_dimension_numbers<[1], [0], [0], [1], [0, 0, 1, 1], [], []>} : vector<8x512xbf16>, vector<512x512xbf16>, vector<8x512xf32> -> vector<8x512xf32>
    %c3_39 = arith.constant 3 : index
    %c0_40 = arith.constant 0 : index
    %73 = vector.load %arg8[%c3_39, %c0_40] : memref<16x512xf32, #tpu.memory_space<vmem>>, vector<1x512xf32>
    %74 = vector.broadcast %73 : vector<1x512xf32> to vector<8x512xf32>
    %75 = arith.addf %72, %74 : vector<8x512xf32>
    %cst_41 = arith.constant 0.000000e+00 : f32
    %76 = vector.broadcast %cst_41 : f32 to vector<8x512xf32>
    %77 = arith.cmpf ogt, %75, %76 : vector<8x512xf32>
    %cst_42 = arith.constant 2.000000e-01 : f32
    %78 = vector.broadcast %cst_42 : f32 to vector<8x512xf32>
    %79 = arith.mulf %78, %75 : vector<8x512xf32>
    %80 = arith.select %77, %75, %79 : vector<8x512xi1>, vector<8x512xf32>
    %81 = arith.truncf %80 : vector<8x512xf32> to vector<8x512xbf16>
    %c4 = arith.constant 4 : index
    %c0_43 = arith.constant 0 : index
    %c0_44 = arith.constant 0 : index
    %82 = vector.load %arg4[%c4, %c0_43, %c0_44] : memref<9x512x512xbf16, #tpu.memory_space<vmem>>, vector<1x512x512xbf16>
    %83 = vector.shape_cast %82 : vector<1x512x512xbf16> to vector<512x512xbf16>
    %cst_45 = arith.constant dense<0.000000e+00> : vector<8x512xf32>
    %84 = tpu.matmul %81, %83, %cst_45 {dimension_numbers = #tpu.dot_dimension_numbers<[1], [0], [0], [1], [0, 0, 1, 1], [], []>} : vector<8x512xbf16>, vector<512x512xbf16>, vector<8x512xf32> -> vector<8x512xf32>
    %c4_46 = arith.constant 4 : index
    %c0_47 = arith.constant 0 : index
    %85 = vector.load %arg8[%c4_46, %c0_47] : memref<16x512xf32, #tpu.memory_space<vmem>>, vector<1x512xf32>
    %86 = vector.broadcast %85 : vector<1x512xf32> to vector<8x512xf32>
    %87 = arith.addf %84, %86 : vector<8x512xf32>
    %cst_48 = arith.constant 0.000000e+00 : f32
    %88 = vector.broadcast %cst_48 : f32 to vector<8x512xf32>
    %89 = arith.cmpf ogt, %87, %88 : vector<8x512xf32>
    %cst_49 = arith.constant 2.000000e-01 : f32
    %90 = vector.broadcast %cst_49 : f32 to vector<8x512xf32>
    %91 = arith.mulf %90, %87 : vector<8x512xf32>
    %92 = arith.select %89, %87, %91 : vector<8x512xi1>, vector<8x512xf32>
    %93 = arith.truncf %92 : vector<8x512xf32> to vector<8x512xbf16>
    %c5 = arith.constant 5 : index
    %c0_50 = arith.constant 0 : index
    %c0_51 = arith.constant 0 : index
    %94 = vector.load %arg4[%c5, %c0_50, %c0_51] : memref<9x512x512xbf16, #tpu.memory_space<vmem>>, vector<1x512x512xbf16>
    %95 = vector.shape_cast %94 : vector<1x512x512xbf16> to vector<512x512xbf16>
    %cst_52 = arith.constant dense<0.000000e+00> : vector<8x512xf32>
    %96 = tpu.matmul %93, %95, %cst_52 {dimension_numbers = #tpu.dot_dimension_numbers<[1], [0], [0], [1], [0, 0, 1, 1], [], []>} : vector<8x512xbf16>, vector<512x512xbf16>, vector<8x512xf32> -> vector<8x512xf32>
    %c5_53 = arith.constant 5 : index
    %c0_54 = arith.constant 0 : index
    %97 = vector.load %arg8[%c5_53, %c0_54] : memref<16x512xf32, #tpu.memory_space<vmem>>, vector<1x512xf32>
    %98 = vector.broadcast %97 : vector<1x512xf32> to vector<8x512xf32>
    %99 = arith.addf %96, %98 : vector<8x512xf32>
    %cst_55 = arith.constant 0.000000e+00 : f32
    %100 = vector.broadcast %cst_55 : f32 to vector<8x512xf32>
    %101 = arith.cmpf ogt, %99, %100 : vector<8x512xf32>
    %cst_56 = arith.constant 2.000000e-01 : f32
    %102 = vector.broadcast %cst_56 : f32 to vector<8x512xf32>
    %103 = arith.mulf %102, %99 : vector<8x512xf32>
    %104 = arith.select %101, %99, %103 : vector<8x512xi1>, vector<8x512xf32>
    %105 = arith.addf %68, %104 : vector<8x512xf32>
    %cst_57 = arith.constant 0.707106769 : f32
    %106 = vector.broadcast %cst_57 : f32 to vector<8x512xf32>
    %107 = arith.mulf %105, %106 : vector<8x512xf32>
    %108 = arith.truncf %107 : vector<8x512xf32> to vector<8x512xbf16>
    %c6 = arith.constant 6 : index
    %c0_58 = arith.constant 0 : index
    %c0_59 = arith.constant 0 : index
    %109 = vector.load %arg4[%c6, %c0_58, %c0_59] : memref<9x512x512xbf16, #tpu.memory_space<vmem>>, vector<1x512x512xbf16>
    %110 = vector.shape_cast %109 : vector<1x512x512xbf16> to vector<512x512xbf16>
    %cst_60 = arith.constant dense<0.000000e+00> : vector<8x512xf32>
    %111 = tpu.matmul %108, %110, %cst_60 {dimension_numbers = #tpu.dot_dimension_numbers<[1], [0], [0], [1], [0, 0, 1, 1], [], []>} : vector<8x512xbf16>, vector<512x512xbf16>, vector<8x512xf32> -> vector<8x512xf32>
    %c6_61 = arith.constant 6 : index
    %c0_62 = arith.constant 0 : index
    %112 = vector.load %arg8[%c6_61, %c0_62] : memref<16x512xf32, #tpu.memory_space<vmem>>, vector<1x512xf32>
    %113 = vector.broadcast %112 : vector<1x512xf32> to vector<8x512xf32>
    %114 = arith.addf %111, %113 : vector<8x512xf32>
    %cst_63 = arith.constant 0.000000e+00 : f32
    %115 = vector.broadcast %cst_63 : f32 to vector<8x512xf32>
    %116 = arith.cmpf ogt, %114, %115 : vector<8x512xf32>
    %cst_64 = arith.constant 2.000000e-01 : f32
    %117 = vector.broadcast %cst_64 : f32 to vector<8x512xf32>
    %118 = arith.mulf %117, %114 : vector<8x512xf32>
    %119 = arith.select %116, %114, %118 : vector<8x512xi1>, vector<8x512xf32>
    %120 = arith.truncf %119 : vector<8x512xf32> to vector<8x512xbf16>
    %c7 = arith.constant 7 : index
    %c0_65 = arith.constant 0 : index
    %c0_66 = arith.constant 0 : index
    %121 = vector.load %arg4[%c7, %c0_65, %c0_66] : memref<9x512x512xbf16, #tpu.memory_space<vmem>>, vector<1x512x512xbf16>
    %122 = vector.shape_cast %121 : vector<1x512x512xbf16> to vector<512x512xbf16>
    %cst_67 = arith.constant dense<0.000000e+00> : vector<8x512xf32>
    %123 = tpu.matmul %120, %122, %cst_67 {dimension_numbers = #tpu.dot_dimension_numbers<[1], [0], [0], [1], [0, 0, 1, 1], [], []>} : vector<8x512xbf16>, vector<512x512xbf16>, vector<8x512xf32> -> vector<8x512xf32>
    %c7_68 = arith.constant 7 : index
    %c0_69 = arith.constant 0 : index
    %124 = vector.load %arg8[%c7_68, %c0_69] : memref<16x512xf32, #tpu.memory_space<vmem>>, vector<1x512xf32>
    %125 = vector.broadcast %124 : vector<1x512xf32> to vector<8x512xf32>
    %126 = arith.addf %123, %125 : vector<8x512xf32>
    %cst_70 = arith.constant 0.000000e+00 : f32
    %127 = vector.broadcast %cst_70 : f32 to vector<8x512xf32>
    %128 = arith.cmpf ogt, %126, %127 : vector<8x512xf32>
    %cst_71 = arith.constant 2.000000e-01 : f32
    %129 = vector.broadcast %cst_71 : f32 to vector<8x512xf32>
    %130 = arith.mulf %129, %126 : vector<8x512xf32>
    %131 = arith.select %128, %126, %130 : vector<8x512xi1>, vector<8x512xf32>
    %132 = arith.truncf %131 : vector<8x512xf32> to vector<8x512xbf16>
    %c8 = arith.constant 8 : index
    %c0_72 = arith.constant 0 : index
    %c0_73 = arith.constant 0 : index
    %133 = vector.load %arg4[%c8, %c0_72, %c0_73] : memref<9x512x512xbf16, #tpu.memory_space<vmem>>, vector<1x512x512xbf16>
    %134 = vector.shape_cast %133 : vector<1x512x512xbf16> to vector<512x512xbf16>
    %cst_74 = arith.constant dense<0.000000e+00> : vector<8x512xf32>
    %135 = tpu.matmul %132, %134, %cst_74 {dimension_numbers = #tpu.dot_dimension_numbers<[1], [0], [0], [1], [0, 0, 1, 1], [], []>} : vector<8x512xbf16>, vector<512x512xbf16>, vector<8x512xf32> -> vector<8x512xf32>
    %c8_75 = arith.constant 8 : index
    %c0_76 = arith.constant 0 : index
    %136 = vector.load %arg8[%c8_75, %c0_76] : memref<16x512xf32, #tpu.memory_space<vmem>>, vector<1x512xf32>
    %137 = vector.broadcast %136 : vector<1x512xf32> to vector<8x512xf32>
    %138 = arith.addf %135, %137 : vector<8x512xf32>
    %cst_77 = arith.constant 0.000000e+00 : f32
    %139 = vector.broadcast %cst_77 : f32 to vector<8x512xf32>
    %140 = arith.cmpf ogt, %138, %139 : vector<8x512xf32>
    %cst_78 = arith.constant 2.000000e-01 : f32
    %141 = vector.broadcast %cst_78 : f32 to vector<8x512xf32>
    %142 = arith.mulf %141, %138 : vector<8x512xf32>
    %143 = arith.select %140, %138, %142 : vector<8x512xi1>, vector<8x512xf32>
    %144 = arith.addf %107, %143 : vector<8x512xf32>
    %cst_79 = arith.constant 0.707106769 : f32
    %145 = vector.broadcast %cst_79 : f32 to vector<8x512xf32>
    %146 = arith.mulf %144, %145 : vector<8x512xf32>
    %147 = arith.truncf %146 : vector<8x512xf32> to vector<8x512xbf16>
    %c0_80 = arith.constant 0 : index
    %c0_81 = arith.constant 0 : index
    %148 = vector.load %arg6[%c0_80, %c0_81] : memref<512x512xbf16, #tpu.memory_space<vmem>>, vector<512x512xbf16>
    %cst_82 = arith.constant dense<0.000000e+00> : vector<8x512xf32>
    %149 = tpu.matmul %147, %148, %cst_82 {dimension_numbers = #tpu.dot_dimension_numbers<[1], [0], [0], [1], [0, 0, 1, 1], [], []>} : vector<8x512xbf16>, vector<512x512xbf16>, vector<8x512xf32> -> vector<8x512xf32>
    %150 = arith.truncf %21 : vector<8x512xf32> to vector<8x512xbf16>
    %c0_83 = arith.constant 0 : index
    %c0_84 = arith.constant 0 : index
    %151 = vector.load %arg7[%c0_83, %c0_84] : memref<512x512xbf16, #tpu.memory_space<vmem>>, vector<512x512xbf16>
    %cst_85 = arith.constant dense<0.000000e+00> : vector<8x512xf32>
    %152 = tpu.matmul %150, %151, %cst_85 {dimension_numbers = #tpu.dot_dimension_numbers<[1], [0], [0], [1], [0, 0, 1, 1], [], []>} : vector<8x512xbf16>, vector<512x512xbf16>, vector<8x512xf32> -> vector<8x512xf32>
    %153 = arith.addf %149, %152 : vector<8x512xf32>
    %c0_86 = arith.constant 0 : index
    %c0_87 = arith.constant 0 : index
    %154 = vector.load %arg3[%c0_86, %c0_87] : memref<1x512xf32, #tpu.memory_space<vmem>>, vector<1x512xf32>
    %155 = vector.broadcast %154 : vector<1x512xf32> to vector<8x512xf32>
    %156 = arith.addf %153, %155 : vector<8x512xf32>
    %c12 = arith.constant 12 : index
    %c0_88 = arith.constant 0 : index
    %157 = vector.load %arg8[%c12, %c0_88] : memref<16x512xf32, #tpu.memory_space<vmem>>, vector<1x512xf32>
    %158 = vector.broadcast %157 : vector<1x512xf32> to vector<8x512xf32>
    %159 = arith.addf %156, %158 : vector<8x512xf32>
    %cst_89 = arith.constant 0.000000e+00 : f32
    %160 = vector.broadcast %cst_89 : f32 to vector<8x512xf32>
    %161 = arith.cmpf ogt, %159, %160 : vector<8x512xf32>
    %cst_90 = arith.constant 2.000000e-01 : f32
    %162 = vector.broadcast %cst_90 : f32 to vector<8x512xf32>
    %163 = arith.mulf %162, %159 : vector<8x512xf32>
    %164 = arith.select %161, %159, %163 : vector<8x512xi1>, vector<8x512xf32>
    %c13 = arith.constant 13 : index
    %c0_91 = arith.constant 0 : index
    %165 = vector.load %arg8[%c13, %c0_91] : memref<16x512xf32, #tpu.memory_space<vmem>>, vector<1x512xf32>
    %166 = vector.broadcast %165 : vector<1x512xf32> to vector<8x512xf32>
    %167 = arith.mulf %164, %166 : vector<8x512xf32>
    %cst_92 = arith.constant dense<0.000000e+00> : vector<8xf32>
    %168 = vector.multi_reduction <add>, %167, %cst_92 [1] : vector<8x512xf32> to vector<8xf32>
    %169 = vector.shape_cast %168 : vector<8xf32> to vector<8x1xf32>
    %c14 = arith.constant 14 : index
    %c0_93 = arith.constant 0 : index
    %170 = vector.load %arg8[%c14, %c0_93] : memref<16x512xf32, #tpu.memory_space<vmem>>, vector<1x1xf32>
    %171 = vector.broadcast %170 : vector<1x1xf32> to vector<8x1xf32>
    %172 = arith.addf %169, %171 : vector<8x1xf32>
    %c0_94 = arith.constant 0 : index
    %c0_95 = arith.constant 0 : index
    %173 = vector.load %arg9[%c0_94, %c0_95] : memref<8x1xf32, #tpu.memory_space<vmem>>, vector<8x1xf32>
    tpu.vector_store %arg9[%c0_94, %c0_95], %172 {strides = array<i32>} : memref<8x1xf32, #tpu.memory_space<vmem>>, vector<8x1xf32>,
    return
  }
  func.func @transform_0(%arg0: i32) -> (i32, i32) {
    %c0_i32 = arith.constant 0 : i32
    %c0_i32_0 = arith.constant 0 : i32
    return %arg0, %c0_i32 : i32, i32
  }
  func.func @transform_1(%arg0: i32) -> (i32, i32) {
    %c0_i32 = arith.constant 0 : i32
    %c0_i32_0 = arith.constant 0 : i32
    return %arg0, %c0_i32 : i32, i32
  }
  func.func @transform_2(%arg0: i32) -> (i32, i32) {
    %c0_i32 = arith.constant 0 : i32
    %c0_i32_0 = arith.constant 0 : i32
    %c0_i32_1 = arith.constant 0 : i32
    return %c0_i32, %c0_i32_0 : i32, i32
  }
  func.func @transform_3(%arg0: i32) -> (i32, i32, i32) {
    %c0_i32 = arith.constant 0 : i32
    %c0_i32_0 = arith.constant 0 : i32
    %c0_i32_1 = arith.constant 0 : i32
    %c0_i32_2 = arith.constant 0 : i32
    return %c0_i32, %c0_i32_0, %c0_i32_1 : i32, i32, i32
  }
  func.func @transform_4(%arg0: i32) -> (i32, i32) {
    %c0_i32 = arith.constant 0 : i32
    %c0_i32_0 = arith.constant 0 : i32
    %c0_i32_1 = arith.constant 0 : i32
    return %c0_i32, %c0_i32_0 : i32, i32
  }
  func.func @transform_5(%arg0: i32) -> (i32, i32) {
    %c0_i32 = arith.constant 0 : i32
    %c0_i32_0 = arith.constant 0 : i32
    %c0_i32_1 = arith.constant 0 : i32
    return %c0_i32, %c0_i32_0 : i32, i32
  }
  func.func @transform_6(%arg0: i32) -> (i32, i32) {
    %c0_i32 = arith.constant 0 : i32
    %c0_i32_0 = arith.constant 0 : i32
    %c0_i32_1 = arith.constant 0 : i32
    return %c0_i32, %c0_i32_0 : i32, i32
  }
  func.func @transform_7(%arg0: i32) -> (i32, i32) {
    %c0_i32 = arith.constant 0 : i32
    %c0_i32_0 = arith.constant 0 : i32
    %c0_i32_1 = arith.constant 0 : i32
    return %c0_i32, %c0_i32_0 : i32, i32
  }
  func.func @transform_8(%arg0: i32) -> (i32, i32) {
    %c0_i32 = arith.constant 0 : i32
    %c0_i32_0 = arith.constant 0 : i32
    return %arg0, %c0_i32 : i32, i32
  }
}

</mosaic_0001>

<bundles_post_ra>
// kernel: tpu_custom_call.1
= control target key start
LH: loop header
LB: loop body
LE: loop exit
PB: predicated region body
PF: predicated region fallthrough
CT: control target
= control target key end

     0   :  { %13 = vsyncpa [#allocation3], 0  ;;  %s20032_s0 = inlined_call_operand.vmem [shape: f32[16,1], index: 0, kind: input, shape index: {}]   ;;  %s20033_s1 = inlined_call_operand.vmem [shape: f32[16,8], index: 1, kind: input, shape index: {}]   ;;  %s20034_s2 = inlined_call_operand.hbm [shape: f32[1,512], index: 2, kind: input, shape index: {}]   ;;  %s20035_s3 = inlined_call_operand.hbm [shape: bf16[9,512,512], index: 3, kind: input, shape index: {}]   ;;  %s20036_s4 = inlined_call_operand.hbm [shape: bf16[8,512], index: 4, kind: input, shape index: {}]   ;;  %s20037_s5 = inlined_call_operand.hbm [shape: bf16[512,512], index: 5, kind: input, shape index: {}]   ;;  %s20038_s6 = inlined_call_operand.hbm [shape: bf16[512,512], index: 6, kind: input, shape index: {}]   ;;  %s20039_s7 = inlined_call_operand.hbm [shape: f32[16,512], index: 7, kind: input, shape index: {}]   ;;  %s20040_s8 = inlined_call_operand.vmem [shape: f32[16,1], index: 8, kind: output, shape index: {}]  }
   0x1   :  { %14 = vsyncpa [#allocation5], 0 }
   0x2   :  { %15 = vsyncpa [#allocation8], 0 }
   0x3   :  { %16 = vsyncpa [#allocation11], 0  ;;  %s19196_s27 = smov 0  }
   0x4 LB: > { %s254_s30 = sshll.u32 %s20035_s3, 4  ;;  %s19205_s9 = sadd.s32 4294967295, %s19137_s27   ;;  %s19137_s27 = sphi %s19196_s27, %s22_s27   ;;  %s255_s30 = int_to_ptr.hbm [resolvable:$true] %s254_s30 }
   0x5   : > { %p11791_p0 = scmp.ge.s32.totalorder %s19137_s27, 1  ;;  %p231_p1 = scmp.lt.s32.totalorder %s19137_s27, 3 }
   0x6   : > { %p18898_p2 = scmp.eq.s32.totalorder %s19205_s9, 0  ;;  %s19139_s11 = smov [#allocation4]  }
   0x7   : > { %p19210_p3 = pnand %p11791_p0, %p231_p1  ;;  %s256_s12 = sshll.u32 %s19139_s11, 4  ;;  %s257_s12 = int_to_ptr.vmem [resolvable:$true] %s256_s12 }
   0x8   : > { %s280_s15 = sshll.u32 %s20037_s5, 4  ;;  %s19140_s17 = smov [#allocation7]   ;;  %s281_s15 = int_to_ptr.hbm [resolvable:$true] %s280_s15 }
   0x9   : > { %p18879_p4 = pneg %p19210_p3  ;;  %s282_s18 = sshll.u32 %s19140_s17, 4  ;;  %s283_s18 = int_to_ptr.vmem [resolvable:$true] %s282_s18 }
   0xa   : > { %s243_s21 = sshll.u32 %s20034_s2, 4  ;;  %s19141_s22 = smov 256   ;;  %s244_s21 = int_to_ptr.hbm [resolvable:$true] %s243_s21 }
   0xb   : > { %p19221_p5 = pnand %p18898_p2, %p18879_p4  ;;  %s19142_s23 = smov 16  }
   0xc   : > { %s19143_s24 = smov [#allocation2]   ;;  %s269_s29 = sshll.u32 %s20036_s4, 4  ;;  %s270_s29 = int_to_ptr.hbm [resolvable:$true] %s269_s29 }
   0xd   : > { %18885 = dma.hbm_to_vmem [thread:$0]  (!%p19221_p5), %s255_s30, 147456, %s257_s12, [#allocation5], %s19141_s22, %s19141_s22, %s19142_s23  }
   0xe   : > { %18891 = dma.hbm_to_vmem [thread:$0]  (!%p19221_p5), %s281_s15, 16384, %s283_s18, [#allocation8], %s19141_s22, %s19141_s22, %s19142_s23  }
   0xf   : > { %s245_s25 = sshll.u32 %s19143_s24, 4  ;;  %s294_s14 = sshll.u32 %s20038_s6, 4  ;;  %s246_s25 = int_to_ptr.vmem [resolvable:$true] %s245_s25  ;;  %s295_s14 = int_to_ptr.hbm [resolvable:$true] %s294_s14 }
  0x10   : > { %18882 = dma.hbm_to_vmem [thread:$0]  (!%p19221_p5), %s244_s21, 64, %s246_s25, [#allocation3]  }
  0x11   : > { %s19144_s17 = smov [#allocation6]   ;;  %s19145_s12 = smov [#allocation9]  }
  0x12   : > { %s271_s30 = sshll.u32 %s19144_s17, 4  ;;  %s296_s15 = sshll.u32 %s19145_s12, 4  ;;  %s272_s30 = int_to_ptr.vmem [resolvable:$true] %s271_s30  ;;  %s297_s15 = int_to_ptr.vmem [resolvable:$true] %s296_s15 }
  0x13   : > { %18888 = dma.hbm_to_vmem [thread:$0]  (!%p19221_p5), %s270_s29, 256, %s272_s30, [#allocation5]  }
  0x14   : > { %s308_s20 = sshll.u32 %s20039_s7, 4  ;;  %s19146_s21 = smov [#allocation10]   ;;  %s309_s20 = int_to_ptr.hbm [resolvable:$true] %s308_s20 }
  0x15   : > { %18894 = dma.hbm_to_vmem [thread:$0]  (!%p19221_p5), %s295_s14, 16384, %s297_s15, [#allocation8], %s19141_s22, %s19141_s22, %s19142_s23  }
  0x16   : > { %s310_s24 = sshll.u32 %s19146_s21, 4  ;;  %s19147_s25 = smov 512   ;;  %s311_s24 = int_to_ptr.vmem [resolvable:$true] %s310_s24 }
  0x17   : > { %s19148_s26 = smov 32   ;;  %340 = sbr.rel (%p19210_p3) target bundleno = 2439 (0x987), region = 52 }
  0x18   : > { %18897 = dma.hbm_to_vmem [thread:$0]  (!%p19221_p5), %s309_s20, 1024, %s311_s24, [#allocation11], %s19147_s25, %s19147_s25, %s19148_s26  }
  0x1c   : > { %19120 = dma.done.wait (%p18898_p2), [#allocation3], 64  }
  0x1d   : > { %19122 = vsyncadd (%p18898_p2), [#allocation3], 4294967232 }
  0x1e   : > { %19124 = dma.done.wait (%p18898_p2), [#allocation5], 147712  }
  0x1f   : > { %19126 = vsyncadd (%p18898_p2), [#allocation5], 4294819584 }
  0x20   : > { %19128 = dma.done.wait (%p18898_p2), [#allocation8], 32768  }
  0x21   : > { %19130 = vsyncadd (%p18898_p2), [#allocation8], 4294934528 }
  0x22   : > { %19132 = dma.done.wait (%p18898_p2), [#allocation11], 1024  }
  0x23   : > { %19134 = vsyncadd (%p18898_p2), [#allocation11], 4294966272  ;;  %p402_p6 = scmp.lt.s32.totalorder %s19205_s9, 1  ;;  %v19149_v0 = vmov 0   ;;  %vm417_vm0 = vcmask 64512   ;;  %v442_v2 = vld [vmem:[#allocation6] sm:$0xff] }
  0x24   : > { %18930 = vset.pattern.permute.xlu0 %v19149_v0  ;;  %v457_v4 = vunpack.c.l.b16 %v442_v2  ;;  %vm468_vm1 = vcmask 1043456   ;;  %v458_v5 = vunpack.c.h.b16 %v442_v2  ;;  %v443_v6 = vld [vmem:[#allocation6 + $0x8] sm:$0xff]  ;;  %v11927_v7 = vld [vmem:[#allocation4 + $0xe0] sm:$0xf]  ;;  %v17477_v8 = vld [vmem:[#allocation4 + $0xec] sm:$0xf0] }
  0x25   : > { %s20044_s9 = smov (!%p402_p6, %s19205_s9), 1  ;;  %v459_v9 = vunpack.c.l.b16 %v443_v6  ;;  %v460_v10 = vunpack.c.h.b16 %v443_v6  ;;  %v12055_v11 = vld [vmem:[#allocation4 + $0x1e0] sm:$0xf]  ;;  %v17509_v12 = vld [vmem:[#allocation4 + $0x1ec] sm:$0xf0]  ;;  %v11928_v21 = vor.u32 %v17477_v8, %v11927_v7  ;;  %v19150_v50 = vmov 8.0  }
  0x26   : > { %s19269_s10 = sshll.u32 %s20044_s9, 3  ;;  %v12183_v13 = vld [vmem:[#allocation4 + $0x2e0] sm:$0xf]  ;;  %v461_v15 = vpack.c.b16 %v457_v4, %v457_v4  ;;  %v462_v16 = vpack.c.b16 %v458_v5, %v458_v5  ;;  %v17541_v17 = vld [vmem:[#allocation4 + $0x2ec] sm:$0xf0]  ;;  %v12056_v22 = vor.u32 %v17509_v12, %v12055_v11  ;;  %18931 = vrcp.f32 %v19150_v50 }
  0x27   : > { %s409_s23 = scalar_lea.vmem %s20033_s1, %s19269_s10  ;;  %v12311_v18 = vld [vmem:[#allocation4 + $0x3e0] sm:$0xf]  ;;  %v463_v19 = vpack.c.b16 %v459_v9, %v459_v9  ;;  %v464_v20 = vpack.c.b16 %v460_v10, %v460_v10  ;;  %v17573_v23 = vld [vmem:[#allocation4 + $0x3ec] sm:$0xf0]  ;;  %v12184_v26 = vor.u32 %v17541_v17, %v12183_v13  ;;  %s405_s29 = scalar_lea.vmem %s20032_s0, %s19269_s10 }
  0x28   : > { %v19275_v1 = vld [vmem:[%s409_s23] sm:$0xff]  ;;  %v470_v24 = vsel %vm468_vm1, %v461_v15, 0  ;;  %v473_v25 = vsel %vm468_vm1, %v462_v16, 0  ;;  %v12312_v27 = vor.u32 %v17573_v23, %v12311_v18  ;;  %v17473_v32 = vld [vmem:[#allocation4 + $0xcc] sm:$0xf0]  ;;  %s413_s14 = scalar_lea.vmem %s20040_s8, %s19269_s10 }
  0x29   : > { %v416_v3 = vmul.f32 %v19275_v1, %v19275_v1  ;;  %488 = vmatpush.bf16.msra.mxu0 %v470_v24  ;;  %501 = vmatpush.bf16.msra.mxu1 %v473_v25  ;;  %v476_v28 = vsel %vm468_vm1, %v463_v19, 0  ;;  %v479_v29 = vsel %vm468_vm1, %v464_v20, 0  ;;  %v545_v30 = vld [vmem:[%s405_s29] sm:$0xff]  ;;  %v17505_v35 = vld [vmem:[#allocation4 + $0x1cc] sm:$0xf0] }
  0x2a   : > { %514 = vmatpush.bf16.msra.mxu2 %v476_v28  ;;  %527 = vmatpush.bf16.msra.mxu3 %v479_v29  ;;  %v11911_v31 = vld [vmem:[#allocation4 + $0xc0] sm:$0xf]  ;;  %v17537_v37 = vld [vmem:[#allocation4 + $0x2cc] sm:$0xf0] }
  0x2b   : > { %v418_v14 = vsel %vm417_vm0, %v416_v3, 0.0  ;;  %v12039_v33 = vld [vmem:[#allocation4 + $0x1c0] sm:$0xf]  ;;  %v11912_v34 = vor.u32 %v17473_v32, %v11911_v31  ;;  %v17569_v41 = vld [vmem:[#allocation4 + $0x3cc] sm:$0xf0] }
  0x2c   : > { %419 = vadd.xlane.f32.xlu0 %v418_v14  ;;  %v12167_v36 = vld [vmem:[#allocation4 + $0x2c0] sm:$0xf]  ;;  %v12040_v38 = vor.u32 %v17505_v35, %v12039_v33  ;;  %v17469_v44 = vld [vmem:[#allocation4 + $0xac] sm:$0xf0]  ;;  %v19288_v5 = vpop.eup %18931 }
  0x2d   : > { %1363 = vmatpush.bf16.msrb.mxu0 %v11928_v21  ;;  %1376 = vmatpush.bf16.msrb.mxu1 %v12056_v22  ;;  %v12168_v39 = vor.u32 %v17537_v37, %v12167_v36  ;;  %v12295_v40 = vld [vmem:[#allocation4 + $0x3c0] sm:$0xf]  ;;  %v17501_v47 = vld [vmem:[#allocation4 + $0x1ac] sm:$0xf0]  ;;  %v422_v17 = vmul.f32 8.0, %v19288_v5  ;;  %vm426_vm2 = vweird.f32 %v19288_v5 }
  0x2e   : > { %1389 = vmatpush.bf16.msrb.mxu2 %v12184_v26  ;;  %1402 = vmatpush.bf16.msrb.mxu3 %v12312_v27  ;;  %v12296_v42 = vor.u32 %v17569_v41, %v12295_v40  ;;  %v11895_v43 = vld [vmem:[#allocation4 + $0xa0] sm:$0xf]  ;;  %v17533_v49 = vld [vmem:[#allocation4 + $0x2ac] sm:$0xf0] }
  0x2f   : > { %v12023_v45 = vld [vmem:[#allocation4 + $0x1a0] sm:$0xf]  ;;  %v11896_v46 = vor.u32 %v17469_v44, %v11895_v43  ;;  %v17565_v54 = vld [vmem:[#allocation4 + $0x3ac] sm:$0xf0] }
  0x30   : > { %v12151_v48 = vld [vmem:[#allocation4 + $0x2a0] sm:$0xf]  ;;  %v12024_v51 = vor.u32 %v17501_v47, %v12023_v45  ;;  %v17465_v57 = vld [vmem:[#allocation4 + $0x8c] sm:$0xf0] }
  0x31   : > { %1364 = vmatpush.bf16.msrb.mxu0 %v11912_v34  ;;  %1377 = vmatpush.bf16.msrb.mxu1 %v12040_v38  ;;  %v12152_v52 = vor.u32 %v17533_v49, %v12151_v48  ;;  %v12279_v53 = vld [vmem:[#allocation4 + $0x3a0] sm:$0xf]  ;;  %v17497_v60 = vld [vmem:[#allocation4 + $0x18c] sm:$0xf0] }
  0x32   : > { %1390 = vmatpush.bf16.msrb.mxu2 %v12168_v39  ;;  %1403 = vmatpush.bf16.msrb.mxu3 %v12296_v42  ;;  %v12280_v55 = vor.u32 %v17565_v54, %v12279_v53  ;;  %v11879_v56 = vld [vmem:[#allocation4 + $0x80] sm:$0xf]  ;;  %v17529_v62 = vld [vmem:[#allocation4 + $0x28c] sm:$0xf0] }
  0x33   : > { %v12007_v58 = vld [vmem:[#allocation4 + $0x180] sm:$0xf]  ;;  %v11880_v59 = vor.u32 %v17465_v57, %v11879_v56  ;;  %v17561_v3 = vld [vmem:[#allocation4 + $0x38c] sm:$0xf0] }
  0x34   : > { %v12135_v61 = vld [vmem:[#allocation4 + $0x280] sm:$0xf]  ;;  %v12008_v63 = vor.u32 %v17497_v60, %v12007_v58  ;;  %v17461_v7 = vld [vmem:[#allocation4 + $0x6c] sm:$0xf0] }
  0x35   : > { %1365 = vmatpush.bf16.msrb.mxu0 %v11896_v46  ;;  %1378 = vmatpush.bf16.msrb.mxu1 %v12024_v51  ;;  %v12136_v0 = vor.u32 %v17529_v62, %v12135_v61  ;;  %v12263_v2 = vld [vmem:[#allocation4 + $0x380] sm:$0xf]  ;;  %v17493_v10 = vld [vmem:[#allocation4 + $0x16c] sm:$0xf0] }
  0x36   : > { %1391 = vmatpush.bf16.msrb.mxu2 %v12152_v52  ;;  %1404 = vmatpush.bf16.msrb.mxu3 %v12280_v55  ;;  %v12264_v4 = vor.u32 %v17561_v3, %v12263_v2  ;;  %v11863_v6 = vld [vmem:[#allocation4 + $0x60] sm:$0xf]  ;;  %v17525_v12 = vld [vmem:[#allocation4 + $0x26c] sm:$0xf0] }
  0x37   : > { %v11991_v8 = vld [vmem:[#allocation4 + $0x160] sm:$0xf]  ;;  %v11864_v9 = vor.u32 %v17461_v7, %v11863_v6  ;;  %v17557_v16 = vld [vmem:[#allocation4 + $0x36c] sm:$0xf0]  ;;  %v17475_v6 = vld [vmem:[#allocation4 + $0xe4] sm:$0xf] }
  0x38   : > { %v12119_v11 = vld [vmem:[#allocation4 + $0x260] sm:$0xf]  ;;  %v11992_v13 = vor.u32 %v17493_v10, %v11991_v8  ;;  %v17457_v20 = vld [vmem:[#allocation4 + $0x4c] sm:$0xf0]  ;;  %v11929_v7 = vld [vmem:[#allocation4 + $0xf0] sm:$0xf0] }
  0x39   : > { %1366 = vmatpush.bf16.msrb.mxu0 %v11880_v59  ;;  %1379 = vmatpush.bf16.msrb.mxu1 %v12008_v63  ;;  %v12120_v14 = vor.u32 %v17525_v12, %v12119_v11  ;;  %v12247_v15 = vld [vmem:[#allocation4 + $0x360] sm:$0xf]  ;;  %v17489_v23 = vld [vmem:[#allocation4 + $0x14c] sm:$0xf0]  ;;  %v12057_v10 = vld [vmem:[#allocation4 + $0x1f0] sm:$0xf0] }
  0x3a   : > { %1392 = vmatpush.bf16.msrb.mxu2 %v12136_v0  ;;  %1405 = vmatpush.bf16.msrb.mxu3 %v12264_v4  ;;  %v12248_v18 = vor.u32 %v17557_v16, %v12247_v15  ;;  %v11847_v19 = vld [vmem:[#allocation4 + $0x40] sm:$0xf]  ;;  %v17521_v25 = vld [vmem:[#allocation4 + $0x24c] sm:$0xf0]  ;;  %v17539_v11 = vld [vmem:[#allocation4 + $0x2e4] sm:$0xf] }
  0x3b   : > { %v11975_v21 = vld [vmem:[#allocation4 + $0x140] sm:$0xf]  ;;  %v11848_v22 = vor.u32 %v17457_v20, %v11847_v19  ;;  %v17553_v29 = vld [vmem:[#allocation4 + $0x34c] sm:$0xf0]  ;;  %v12185_v12 = vld [vmem:[#allocation4 + $0x2f0] sm:$0xf0] }
  0x3c   : > { %v12103_v24 = vld [vmem:[#allocation4 + $0x240] sm:$0xf]  ;;  %v11976_v26 = vor.u32 %v17489_v23, %v11975_v21  ;;  %v17453_v33 = vld [vmem:[#allocation4 + $0x2c] sm:$0xf0]  ;;  %v17471_v19 = vld [vmem:[#allocation4 + $0xc4] sm:$0xf] }
  0x3d   : > { %1367 = vmatpush.bf16.msrb.mxu0 %v11864_v9  ;;  %1380 = vmatpush.bf16.msrb.mxu1 %v11992_v13  ;;  %v12104_v27 = vor.u32 %v17521_v25, %v12103_v24  ;;  %v12231_v28 = vld [vmem:[#allocation4 + $0x340] sm:$0xf]  ;;  %v17485_v36 = vld [vmem:[#allocation4 + $0x12c] sm:$0xf0]  ;;  %v17507_v9 = vld [vmem:[#allocation4 + $0x1e4] sm:$0xf] }
  0x3e   : > { %1393 = vmatpush.bf16.msrb.mxu2 %v12120_v14  ;;  %1406 = vmatpush.bf16.msrb.mxu3 %v12248_v18  ;;  %v12232_v31 = vor.u32 %v17553_v29, %v12231_v28  ;;  %v11831_v32 = vld [vmem:[#allocation4 + $0x20] sm:$0xf]  ;;  %v17517_v38 = vld [vmem:[#allocation4 + $0x22c] sm:$0xf0]  ;;  %v17571_v13 = vld [vmem:[#allocation4 + $0x3e4] sm:$0xf]  ;;  %v12060_v18 = vor.u32 %v17507_v9, %v12057_v10 }
  0x3f   : > { %v11959_v34 = vld [vmem:[#allocation4 + $0x120] sm:$0xf]  ;;  %v11832_v35 = vor.u32 %v17453_v33, %v11831_v32  ;;  %v17549_v42 = vld [vmem:[#allocation4 + $0x32c] sm:$0xf0]  ;;  %v12313_v14 = vld [vmem:[#allocation4 + $0x3f0] sm:$0xf0] }
  0x40   : > { %550 = vperm.xlu0 %18930, %v545_v30   ;;  %v423_v30 = vsub.f32 1.0, %v422_v17  ;;  %v12087_v37 = vld [vmem:[#allocation4 + $0x220] sm:$0xf]  ;;  %v11960_v39 = vor.u32 %v17485_v36, %v11959_v34  ;;  %v17449_v46 = vld [vmem:[#allocation4 + $0xc] sm:$0xf0]  ;;  %v11932_v17 = vor.u32 %v17475_v6, %v11929_v7  ;;  %v12316_v23 = vor.u32 %v17571_v13, %v12313_v14 }
  0x41   : > { %1368 = vmatpush.bf16.msrb.mxu0 %v11848_v22  ;;  %1381 = vmatpush.bf16.msrb.mxu1 %v11976_v26  ;;  %v12088_v40 = vor.u32 %v17517_v38, %v12087_v37  ;;  %v12215_v41 = vld [vmem:[#allocation4 + $0x320] sm:$0xf]  ;;  %v17481_v49 = vld [vmem:[#allocation4 + $0x10c] sm:$0xf0]  ;;  %v11913_v20 = vld [vmem:[#allocation4 + $0xd0] sm:$0xf0]  ;;  %v12188_v22 = vor.u32 %v17539_v11, %v12185_v12 }
  0x42   : > { %1394 = vmatpush.bf16.msrb.mxu2 %v12104_v27  ;;  %1407 = vmatpush.bf16.msrb.mxu3 %v12232_v31  ;;  %v424_v43 = vmul.f32 %v19288_v5, %v423_v30  ;;  %v12216_v44 = vor.u32 %v17549_v42, %v12215_v41  ;;  %v11815_v45 = vld [vmem:[#allocation4] sm:$0xf]  ;;  %v17513_v51 = vld [vmem:[#allocation4 + $0x20c] sm:$0xf0]  ;;  %v17503_v21 = vld [vmem:[#allocation4 + $0x1c4] sm:$0xf]  ;;  %v11916_v34 = vor.u32 %v17471_v19, %v11913_v20 }
  0x43   : > { %v11943_v47 = vld [vmem:[#allocation4 + $0x100] sm:$0xf]  ;;  %v11816_v48 = vor.u32 %v17449_v46, %v11815_v45  ;;  %v17545_v55 = vld [vmem:[#allocation4 + $0x30c] sm:$0xf0]  ;;  %v12041_v24 = vld [vmem:[#allocation4 + $0x1d0] sm:$0xf0] }
  0x44   : > { %v12071_v50 = vld [vmem:[#allocation4 + $0x200] sm:$0xf]  ;;  %v11944_v52 = vor.u32 %v17481_v49, %v11943_v47  ;;  %v425_v57 = vadd.f32 %v19288_v5, %v424_v43  ;;  %v17535_v25 = vld [vmem:[#allocation4 + $0x2c4] sm:$0xf]  ;;  %v12169_v26 = vld [vmem:[#allocation4 + $0x2d0] sm:$0xf0] }
  0x45   : > { %1369 = vmatpush.bf16.msrb.mxu0 %v11832_v35  ;;  %1382 = vmatpush.bf16.msrb.mxu1 %v11960_v39  ;;  %v12072_v53 = vor.u32 %v17513_v51, %v12071_v50  ;;  %v12199_v54 = vld [vmem:[#allocation4 + $0x300] sm:$0xf]  ;;  %v12297_v27 = vld [vmem:[#allocation4 + $0x3d0] sm:$0xf0]  ;;  %v12044_v35 = vor.u32 %v17503_v21, %v12041_v24  ;;  %v17467_v36 = vld [vmem:[#allocation4 + $0xa4] sm:$0xf]  ;;  %v12172_v39 = vor.u32 %v17535_v25, %v12169_v26 }
  0x46   : > { %1395 = vmatpush.bf16.msrb.mxu2 %v12088_v40  ;;  %1408 = vmatpush.bf16.msrb.mxu3 %v12216_v44  ;;  %v12200_v56 = vor.u32 %v17545_v55, %v12199_v54  ;;  %v427_v58 = vsel %vm426_vm2, %v19288_v5, %v425_v57  ;;  %v547_v15 = vld [vmem:[#allocation10 + $0x21] ss:$8 sm:$0xf]  ;;  %v567_v32 = vld [vmem:[#allocation10 + $0x22] ss:$8 sm:$0xf] }
  0x47   : > { %v554_v28 = vperm.slane %v547_v15, 0  ;;  %v555_v29 = vperm.slane %v547_v15, 1  ;;  %v556_v30 = vperm.slane %v547_v15, 2  ;;  %v557_v31 = vperm.slane %v547_v15, 3  ;;  %v11897_v37 = vld [vmem:[#allocation4 + $0xb0] sm:$0xf0] }
  0x48   : > { %v17499_v38 = vld [vmem:[#allocation4 + $0x1a4] sm:$0xf]  ;;  %v12025_v41 = vld [vmem:[#allocation4 + $0x1b0] sm:$0xf0]  ;;  %v569_v46 = vperm.slane %v567_v32, 0  ;;  %v570_v47 = vperm.slane %v567_v32, 1  ;;  %v11900_v54 = vor.u32 %v17467_v36, %v11897_v37 }
  0x49   : > { %1370 = vmatpush.bf16.msrb.mxu0 %v11816_v48  ;;  %1383 = vmatpush.bf16.msrb.mxu1 %v11944_v52  ;;  %v17531_v42 = vld [vmem:[#allocation4 + $0x2a4] sm:$0xf]  ;;  %v12153_v43 = vld [vmem:[#allocation4 + $0x2b0] sm:$0xf0]  ;;  %v571_v50 = vperm.slane %v567_v32, 2  ;;  %v572_v51 = vperm.slane %v567_v32, 3  ;;  %v12028_v55 = vor.u32 %v17499_v38, %v12025_v41 }
  0x4a   : > { %1396 = vmatpush.bf16.msrb.mxu2 %v12072_v53  ;;  %1409 = vmatpush.bf16.msrb.mxu3 %v12200_v56  ;;  %v17563_v44 = vld [vmem:[#allocation4 + $0x3a4] sm:$0xf]  ;;  %v12281_v45 = vld [vmem:[#allocation4 + $0x3b0] sm:$0xf0] }
  0x4b   : > { %v17463_v56 = vld [vmem:[#allocation4 + $0x84] sm:$0xf]  ;;  %v11881_v57 = vld [vmem:[#allocation4 + $0x90] sm:$0xf0] }
  0x4c   : > { %v17459_v10 = vld [vmem:[#allocation4 + $0x64] sm:$0xf]  ;;  %v11865_v11 = vld [vmem:[#allocation4 + $0x70] sm:$0xf0] }
  0x4d   : > { %v17491_v13 = vld [vmem:[#allocation4 + $0x164] sm:$0xf]  ;;  %v11993_v14 = vld [vmem:[#allocation4 + $0x170] sm:$0xf0] }
  0x4e   : > { %v17523_v15 = vld [vmem:[#allocation4 + $0x264] sm:$0xf]  ;;  %v12249_v20 = vld [vmem:[#allocation4 + $0x370] sm:$0xf0]  ;;  %v11996_v24 = vor.u32 %v17491_v13, %v11993_v14  ;;  %v11919_v13 = vld [vmem:[#allocation4 + $0xc8] sm:$0xf] }
  0x4f   : > { %v17555_v19 = vld [vmem:[#allocation4 + $0x364] sm:$0xf]  ;;  %v11849_v26 = vld [vmem:[#allocation4 + $0x50] sm:$0xf0]  ;;  %v17474_v14 = vld [vmem:[#allocation4 + $0xd4] sm:$0xf0] }
  0x50   : > { %v17455_v25 = vld [vmem:[#allocation4 + $0x44] sm:$0xf]  ;;  %v11833_v37 = vld [vmem:[#allocation4 + $0x30] sm:$0xf0] }
  0x51   : > { %v17551_v32 = vld [vmem:[#allocation4 + $0x344] sm:$0xf]  ;;  %v11961_v41 = vld [vmem:[#allocation4 + $0x130] sm:$0xf0] }
  0x52   : > { %v17451_v36 = vld [vmem:[#allocation4 + $0x24] sm:$0xf] }
  0x9f   : > { %v420_v59 = vpop.xlane.xlu0 %419 }
  0xa0   : > { %v428_v60 = vmul.f32 %v427_v58, %v420_v59  ;;  %v12156_v58 = vor.u32 %v17531_v42, %v12153_v43  ;;  %v12284_v59 = vor.u32 %v17563_v44, %v12281_v45  ;;  %v17515_v42 = vld [vmem:[#allocation4 + $0x224] sm:$0xf]  ;;  %v12089_v43 = vld [vmem:[#allocation4 + $0x230] sm:$0xf0] }
  0xa1   : > { %v17547_v44 = vld [vmem:[#allocation4 + $0x324] sm:$0xf]  ;;  %v12217_v45 = vld [vmem:[#allocation4 + $0x330] sm:$0xf0] }
  0xa2   : > { %v429_v61 = vadd.f32 1e-08, %v428_v60  ;;  %v17495_v60 = vld [vmem:[#allocation4 + $0x184] sm:$0xf] }
  0xa4   : > { %18933 = vrsqrt.f32 %v429_v61  ;;  %vm436_vm4 = vweird.f32 %v429_v61 }
  0xaa   : > { %v18934_v62 = vpop.eup %18933 }
  0xab   : > { %v431_v63 = vmul.f32 %v18934_v62, %v429_v61  ;;  %vm437_vm3 = vweird.f32 %v18934_v62  ;;  %v12009_v61 = vld [vmem:[#allocation4 + $0x190] sm:$0xf0] }
  0xac   : > { %vm438_vm5 = vmor %vm436_vm4, %vm437_vm3  ;;  %v12012_v9 = vor.u32 %v17495_v60, %v12009_v61  ;;  %v12063_v60 = vld [vmem:[#allocation4 + $0x1e8] sm:$0xf]  ;;  %v17510_v61 = vld [vmem:[#allocation4 + $0x1f4] sm:$0xf0] }
  0xad   : > { %v432_v0 = vmul.f32 %v18934_v62, %v431_v63 }
  0xaf   : > { %v433_v2 = vmul.f32 0.5, %v432_v0 }
  0xb1   : > { %v434_v3 = vsub.f32 1.5, %v433_v2  ;;  %v12137_v2 = vld [vmem:[#allocation4 + $0x290] sm:$0xf0] }
  0xb2   : > { %v551_v33 = vpop.permute.xlu0 %550 }
  0xb3   : > { %v435_v4 = vmul.f32 %v18934_v62, %v434_v3  ;;  %v562_v48 = vmul.f32 %v554_v28, %v551_v33  ;;  %v563_v49 = vmul.f32 %v555_v29, %v551_v33  ;;  %v564_v52 = vmul.f32 %v556_v30, %v551_v33  ;;  %v17559_v3 = vld [vmem:[#allocation4 + $0x384] sm:$0xf]  ;;  %v11977_v29 = vld [vmem:[#allocation4 + $0x150] sm:$0xf0] }
  0xb4   : > { %v565_v53 = vmul.f32 %v557_v31, %v551_v33  ;;  %v17487_v28 = vld [vmem:[#allocation4 + $0x144] sm:$0xf]  ;;  %v12105_v31 = vld [vmem:[#allocation4 + $0x250] sm:$0xf0] }
  0xb5   : > { %v439_v8 = vsel %vm438_vm5, %v18934_v62, %v435_v4  ;;  %v17527_v62 = vld [vmem:[#allocation4 + $0x284] sm:$0xf]  ;;  %v19300_v63 = vadd.f32 %v569_v46, %v562_v48  ;;  %v19302_v0 = vadd.f32 %v570_v47, %v563_v49  ;;  %v12265_v4 = vld [vmem:[#allocation4 + $0x390] sm:$0xf0]  ;;  %v19304_v6 = vadd.f32 %v571_v50, %v564_v52 }
  0xb6   : > { %v440_v5 = vmul.f32 %v439_v8, %v19275_v1  ;;  %v17567_v1 = vld [vmem:[#allocation4 + $0x3c4] sm:$0xf]  ;;  %v19306_v7 = vadd.f32 %v572_v51, %v565_v53  ;;  %v11884_v8 = vor.u32 %v17463_v56, %v11881_v57  ;;  %v12268_v12 = vor.u32 %v17559_v3, %v12265_v4  ;;  %v12233_v33 = vld [vmem:[#allocation4 + $0x350] sm:$0xf0]  ;;  %v17542_v4 = vld [vmem:[#allocation4 + $0x2f4] sm:$0xf0] }
  0xb7   : > { %v12300_v40 = vor.u32 %v17567_v1, %v12297_v27  ;;  %v19318_v21 = vpack.c.bf16 %v19304_v6, %v19304_v6  ;;  %v12252_v27 = vor.u32 %v17555_v19, %v12249_v20  ;;  %v17519_v30 = vld [vmem:[#allocation4 + $0x244] sm:$0xf]  ;;  %v11836_v47 = vor.u32 %v17451_v36, %v11833_v37  ;;  %v11817_v49 = vld [vmem:[#allocation4 + $0x10] sm:$0xf0]  ;;  %v12047_v19 = vld [vmem:[#allocation4 + $0x1c8] sm:$0xf] }
  0xb8   : > { %v441_v16 = vpack.c.bf16 %v440_v5, %v440_v5  ;;  %v12140_v5 = vor.u32 %v17527_v62, %v12137_v2  ;;  %v12108_v38 = vor.u32 %v17519_v30, %v12105_v31  ;;  %v17447_v46 = vld [vmem:[#allocation4 + $0x4] sm:$0xf]  ;;  %v11945_v51 = vld [vmem:[#allocation4 + $0x110] sm:$0xf0]  ;;  %v12092_v52 = vor.u32 %v17515_v42, %v12089_v43  ;;  %v12191_v62 = vld [vmem:[#allocation4 + $0x2e8] sm:$0xf] }
  0xb9   : > { %v17479_v50 = vld [vmem:[#allocation4 + $0x104] sm:$0xf]  ;;  %v12220_v53 = vor.u32 %v17547_v44, %v12217_v45  ;;  %v12201_v57 = vld [vmem:[#allocation4 + $0x310] sm:$0xf0]  ;;  %v11820_v2 = vor.u32 %v17447_v46, %v11817_v49  ;;  %v17506_v20 = vld [vmem:[#allocation4 + $0x1d4] sm:$0xf0] }
  0xba   : > { %11809 = vmatmul.msk.bf16.vlgmr.msra.gmra.mxu0 %vm417_vm0, %v441_v16  ;;  %11810 = vmatmul.msk.bf16.vlgmr.msra.gmra.mxu1 %vm417_vm0, %v441_v16  ;;  %v17543_v56 = vld [vmem:[#allocation4 + $0x304] sm:$0xf]  ;;  %v11948_v3 = vor.u32 %v17479_v50, %v11945_v51  ;;  %v12287_v36 = vld [vmem:[#allocation4 + $0x3a8] sm:$0xf]  ;;  %v17566_v37 = vld [vmem:[#allocation4 + $0x3b4] sm:$0xf0] }
  0xbb   : > { %11811 = vmatmul.msk.bf16.vlgmr.msra.gmra.mxu2 %vm417_vm0, %v441_v16  ;;  %11812 = vmatmul.msk.bf16.vlgmr.msra.gmra.mxu3 %vm417_vm0, %v441_v16  ;;  %v19310_v16 = vpack.c.bf16 %v19300_v63, %v19300_v63  ;;  %v12288_v43 = vor.u32 %v17566_v37, %v12287_v36  ;;  %v12015_v44 = vld [vmem:[#allocation4 + $0x188] sm:$0xf]  ;;  %v17498_v45 = vld [vmem:[#allocation4 + $0x194] sm:$0xf0] }
  0xbc   : > { %1415 = vmatpush.bf16.msra.mxu0 %v11932_v17  ;;  %1428 = vmatpush.bf16.msra.mxu1 %v12060_v18  ;;  %v19314_v17 = vpack.c.bf16 %v19302_v0, %v19302_v0  ;;  %v12121_v18 = vld [vmem:[#allocation4 + $0x270] sm:$0xf0]  ;;  %v12143_v46 = vld [vmem:[#allocation4 + $0x288] sm:$0xf]  ;;  %v17562_v49 = vld [vmem:[#allocation4 + $0x394] sm:$0xf0]  ;;  %v12016_v51 = vor.u32 %v17498_v45, %v12015_v44 }
  0xbd   : > { %1441 = vmatpush.bf16.msra.mxu2 %v12188_v22  ;;  %1454 = vmatpush.bf16.msra.mxu3 %v12316_v23  ;;  %v19322_v22 = vpack.c.bf16 %v19306_v7, %v19306_v7  ;;  %v11868_v23 = vor.u32 %v17459_v10, %v11865_v11  ;;  %v12124_v1 = vor.u32 %v17523_v15, %v12121_v18  ;;  %v17508_v44 = vld [vmem:[#allocation4 + $0x1ec] sm:$0xf]  ;;  %v12065_v45 = vld [vmem:[#allocation4 + $0x1f8] sm:$0xf0] }
  0xbe   : > { %v12204_v11 = vor.u32 %v17543_v56, %v12201_v57  ;;  %v12192_v15 = vor.u32 %v17542_v4, %v12191_v62  ;;  %v11999_v56 = vld [vmem:[#allocation4 + $0x168] sm:$0xf]  ;;  %v17494_v57 = vld [vmem:[#allocation4 + $0x174] sm:$0xf0] }
  0xbf   : > { %v17458_v4 = vld [vmem:[#allocation4 + $0x54] sm:$0xf0] }
  0xc0   : > { %1416 = vmatpush.bf16.msra.mxu0 %v11916_v34  ;;  %1429 = vmatpush.bf16.msra.mxu1 %v12044_v35  ;;  %v11852_v34 = vor.u32 %v17455_v25, %v11849_v26  ;;  %v11980_v35 = vor.u32 %v17487_v28, %v11977_v29  ;;  %v12303_v25 = vld [vmem:[#allocation4 + $0x3c8] sm:$0xf]  ;;  %v17570_v26 = vld [vmem:[#allocation4 + $0x3d4] sm:$0xf0] }
  0xc1   : > { %1442 = vmatpush.bf16.msra.mxu2 %v12172_v39  ;;  %1455 = vmatpush.bf16.msra.mxu3 %v12300_v40  ;;  %v12236_v39 = vor.u32 %v17551_v32, %v12233_v33  ;;  %v17483_v40 = vld [vmem:[#allocation4 + $0x124] sm:$0xf]  ;;  %v11903_v28 = vld [vmem:[#allocation4 + $0xa8] sm:$0xf]  ;;  %v17470_v29 = vld [vmem:[#allocation4 + $0xb4] sm:$0xf0]  ;;  %v12304_v31 = vor.u32 %v17570_v26, %v12303_v25 }
  0xc2   : > { %v11964_v48 = vor.u32 %v17483_v40, %v11961_v41  ;;  %v12031_v32 = vld [vmem:[#allocation4 + $0x1a8] sm:$0xf]  ;;  %v17502_v33 = vld [vmem:[#allocation4 + $0x1b4] sm:$0xf0] }
  0xc3   : > { %v11887_v40 = vld [vmem:[#allocation4 + $0x88] sm:$0xf]  ;;  %v17466_v41 = vld [vmem:[#allocation4 + $0x94] sm:$0xf0] }
  0xc4   : > { %1417 = vmatpush.bf16.msra.mxu0 %v11900_v54  ;;  %1430 = vmatpush.bf16.msra.mxu1 %v12028_v55  ;;  %v17511_v54 = vld [vmem:[#allocation4 + $0x204] sm:$0xf]  ;;  %v12073_v55 = vld [vmem:[#allocation4 + $0x210] sm:$0xf0]  ;;  %v11888_v50 = vor.u32 %v17466_v41, %v11887_v40  ;;  %v11967_v25 = vld [vmem:[#allocation4 + $0x128] sm:$0xf] }
  0xc5   : > { %1443 = vmatpush.bf16.msra.mxu2 %v12156_v58  ;;  %1456 = vmatpush.bf16.msra.mxu3 %v12284_v59  ;;  %v11935_v58 = vld [vmem:[#allocation4 + $0xe8] sm:$0xf]  ;;  %v17478_v59 = vld [vmem:[#allocation4 + $0xf4] sm:$0xf0]  ;;  %v12076_v10 = vor.u32 %v17511_v54, %v12073_v55 }
  0xc6   : > { %v17486_v26 = vld [vmem:[#allocation4 + $0x134] sm:$0xf0]  ;;  %v12207_v40 = vld [vmem:[#allocation4 + $0x308] sm:$0xf] }
  0xc7   : > { %v17546_v41 = vld [vmem:[#allocation4 + $0x314] sm:$0xf0] }
  0xc8   : > { %1418 = vmatpush.bf16.msra.mxu0 %v11884_v8  ;;  %1431 = vmatpush.bf16.msra.mxu1 %v12012_v9  ;;  %v12319_v8 = vld [vmem:[#allocation4 + $0x3e8] sm:$0xf]  ;;  %v17574_v9 = vld [vmem:[#allocation4 + $0x3f4] sm:$0xf0] }
  0xc9   : > { %1444 = vmatpush.bf16.msra.mxu2 %v12140_v5  ;;  %1457 = vmatpush.bf16.msra.mxu3 %v12268_v12  ;;  %v11936_v5 = vor.u32 %v17478_v59, %v11935_v58  ;;  %v12064_v12 = vor.u32 %v17510_v61, %v12063_v60  ;;  %v12320_v18 = vor.u32 %v17574_v9, %v12319_v8  ;;  %v12127_v58 = vld [vmem:[#allocation4 + $0x268] sm:$0xf]  ;;  %v17526_v59 = vld [vmem:[#allocation4 + $0x274] sm:$0xf0] }
  0xca   : > { %1371 = vmatmul.bf16.vlgmr.msrb.gmra.mxu0 %v19310_v16  ;;  %1384 = vmatmul.bf16.vlgmr.msrb.gmra.mxu1 %v19314_v17  ;;  %v12255_v60 = vld [vmem:[#allocation4 + $0x368] sm:$0xf]  ;;  %v17558_v61 = vld [vmem:[#allocation4 + $0x374] sm:$0xf0]  ;;  %v12128_v8 = vor.u32 %v17526_v59, %v12127_v58 }
  0xcb   : > { %1397 = vmatmul.bf16.vlgmr.msrb.gmra.mxu2 %v19318_v21  ;;  %1410 = vmatmul.bf16.vlgmr.msrb.gmra.mxu3 %v19322_v22  ;;  %v12256_v9 = vor.u32 %v17558_v61, %v12255_v60  ;;  %v17504_v60 = vld [vmem:[#allocation4 + $0x1cc] sm:$0xf]  ;;  %v12049_v61 = vld [vmem:[#allocation4 + $0x1d8] sm:$0xf0] }
  0xcc   : > { %1419 = vmatpush.bf16.msra.mxu0 %v11868_v23  ;;  %1432 = vmatpush.bf16.msra.mxu1 %v11996_v24  ;;  %v12175_v23 = vld [vmem:[#allocation4 + $0x2c8] sm:$0xf]  ;;  %v17538_v24 = vld [vmem:[#allocation4 + $0x2d4] sm:$0xf0] }
  0xcd   : > { %1445 = vmatpush.bf16.msra.mxu2 %v12124_v1  ;;  %1458 = vmatpush.bf16.msra.mxu3 %v12252_v27  ;;  %v11920_v1 = vor.u32 %v17474_v14, %v11919_v13  ;;  %v12048_v27 = vor.u32 %v17506_v20, %v12047_v19  ;;  %v12176_v30 = vor.u32 %v17538_v24, %v12175_v23  ;;  %v12239_v13 = vld [vmem:[#allocation4 + $0x348] sm:$0xf]  ;;  %v17554_v14 = vld [vmem:[#allocation4 + $0x354] sm:$0xf0] }
  0xce   : > { %v11839_v19 = vld [vmem:[#allocation4 + $0x28] sm:$0xf]  ;;  %v17454_v20 = vld [vmem:[#allocation4 + $0x34] sm:$0xf0]  ;;  %v12240_v24 = vor.u32 %v17554_v14, %v12239_v13  ;;  %v17500_v13 = vld [vmem:[#allocation4 + $0x1ac] sm:$0xf] }
  0xcf   : > { %v12033_v14 = vld [vmem:[#allocation4 + $0x1b8] sm:$0xf0] }
  0xd0   : > { %1420 = vmatpush.bf16.msra.mxu0 %v11852_v34  ;;  %1433 = vmatpush.bf16.msra.mxu1 %v11980_v35  ;;  %v12159_v34 = vld [vmem:[#allocation4 + $0x2a8] sm:$0xf]  ;;  %v17534_v35 = vld [vmem:[#allocation4 + $0x2b4] sm:$0xf0] }
  0xd1   : > { %1446 = vmatpush.bf16.msra.mxu2 %v12108_v38  ;;  %1459 = vmatpush.bf16.msra.mxu3 %v12236_v39  ;;  %v11904_v38 = vor.u32 %v17470_v29, %v11903_v28  ;;  %v12032_v39 = vor.u32 %v17502_v33, %v12031_v32  ;;  %v12160_v42 = vor.u32 %v17534_v35, %v12159_v34  ;;  %v12223_v28 = vld [vmem:[#allocation4 + $0x328] sm:$0xf]  ;;  %v17550_v29 = vld [vmem:[#allocation4 + $0x334] sm:$0xf0] }
  0xd2   : > { %v11968_v32 = vor.u32 %v17486_v26, %v11967_v25  ;;  %v17450_v33 = vld [vmem:[#allocation4 + $0x14] sm:$0xf0]  ;;  %v11951_v34 = vld [vmem:[#allocation4 + $0x108] sm:$0xf]  ;;  %v12224_v37 = vor.u32 %v17550_v29, %v12223_v28  ;;  %v17464_v25 = vld [vmem:[#allocation4 + $0x8c] sm:$0xf] }
  0xd3   : > { %v17482_v35 = vld [vmem:[#allocation4 + $0x114] sm:$0xf0]  ;;  %v11889_v26 = vld [vmem:[#allocation4 + $0x98] sm:$0xf0]  ;;  %v17496_v28 = vld [vmem:[#allocation4 + $0x18c] sm:$0xf] }
  0xd4   : > { %1421 = vmatpush.bf16.msra.mxu0 %v11836_v47  ;;  %1434 = vmatpush.bf16.msra.mxu1 %v11964_v48  ;;  %v17530_v47 = vld [vmem:[#allocation4 + $0x294] sm:$0xf0]  ;;  %v12271_v48 = vld [vmem:[#allocation4 + $0x388] sm:$0xf]  ;;  %v12017_v29 = vld [vmem:[#allocation4 + $0x198] sm:$0xf0] }
  0xd5   : > { %1447 = vmatpush.bf16.msra.mxu2 %v12092_v52  ;;  %1460 = vmatpush.bf16.msra.mxu3 %v12220_v53  ;;  %v11871_v52 = vld [vmem:[#allocation4 + $0x68] sm:$0xf]  ;;  %v17462_v53 = vld [vmem:[#allocation4 + $0x74] sm:$0xf0]  ;;  %v12144_v54 = vor.u32 %v17530_v47, %v12143_v46  ;;  %v12272_v55 = vor.u32 %v17562_v49, %v12271_v48  ;;  %v17540_v46 = vld [vmem:[#allocation4 + $0x2ec] sm:$0xf]  ;;  %v11952_v48 = vor.u32 %v17482_v35, %v11951_v34 }
  0xd6   : > { %v11872_v62 = vor.u32 %v17462_v53, %v11871_v52  ;;  %v12193_v49 = vld [vmem:[#allocation4 + $0x2f8] sm:$0xf0]  ;;  %v12208_v53 = vor.u32 %v17546_v41, %v12207_v40  ;;  %v11892_v34 = vor.u32 %v17464_v25, %v11889_v26  ;;  %v12020_v35 = vor.u32 %v17496_v28, %v12017_v29  ;;  %v17492_v40 = vld [vmem:[#allocation4 + $0x16c] sm:$0xf]  ;;  %v12567_v28 = vld [vmem:[#allocation4 + $0x5e0] sm:$0xf] }
  0xd7   : > { %v12196_v58 = vor.u32 %v17540_v46, %v12193_v49  ;;  %v12001_v41 = vld [vmem:[#allocation4 + $0x178] sm:$0xf0]  ;;  %v17544_v25 = vld [vmem:[#allocation4 + $0x30c] sm:$0xf]  ;;  %v17637_v29 = vld [vmem:[#allocation4 + $0x5ec] sm:$0xf0] }
  0xd8   : > { %1422 = vmatpush.bf16.msra.mxu0 %v11820_v2  ;;  %1435 = vmatpush.bf16.msra.mxu1 %v11948_v3  ;;  %v12000_v2 = vor.u32 %v17494_v57, %v11999_v56  ;;  %v11855_v3 = vld [vmem:[#allocation4 + $0x48] sm:$0xf]  ;;  %v17472_v56 = vld [vmem:[#allocation4 + $0xcc] sm:$0xf]  ;;  %v11921_v57 = vld [vmem:[#allocation4 + $0xd8] sm:$0xf0] }
  0xd9   : > { %1448 = vmatpush.bf16.msra.mxu2 %v12076_v10  ;;  %1461 = vmatpush.bf16.msra.mxu3 %v12204_v11  ;;  %v11983_v10 = vld [vmem:[#allocation4 + $0x148] sm:$0xf]  ;;  %v17490_v11 = vld [vmem:[#allocation4 + $0x154] sm:$0xf0]  ;;  %v11857_v49 = vld [vmem:[#allocation4 + $0x58] sm:$0xf0] }
  0xda   : > { %v12209_v26 = vld [vmem:[#allocation4 + $0x318] sm:$0xf0] }
  0xdb   : > { %1423 = vmatmul.bf16.vlgmr.msra.gmra.mxu0 %v19310_v16  ;;  %1436 = vmatmul.bf16.vlgmr.msra.gmra.mxu1 %v19314_v17 }
  0xdc   : > { %1467 = vmatpush.bf16.msrb.mxu0 %v11936_v5  ;;  %1480 = vmatpush.bf16.msrb.mxu1 %v12064_v12  ;;  %v12111_v5 = vld [vmem:[#allocation4 + $0x248] sm:$0xf]  ;;  %v17522_v12 = vld [vmem:[#allocation4 + $0x254] sm:$0xf0] }
  0xdd   : > { %1493 = vmatpush.bf16.msrb.mxu2 %v12192_v15  ;;  %1506 = vmatpush.bf16.msrb.mxu3 %v12320_v18  ;;  %v11856_v15 = vor.u32 %v17458_v4, %v11855_v3  ;;  %v11984_v18 = vor.u32 %v17490_v11, %v11983_v10  ;;  %v12112_v23 = vor.u32 %v17522_v12, %v12111_v5  ;;  %v17568_v3 = vld [vmem:[#allocation4 + $0x3cc] sm:$0xf]  ;;  %v12305_v4 = vld [vmem:[#allocation4 + $0x3d8] sm:$0xf0] }
  0xde   : > { %1449 = vmatmul.bf16.vlgmr.msra.gmra.mxu2 %v19318_v21  ;;  %1462 = vmatmul.bf16.vlgmr.msra.gmra.mxu3 %v19322_v22  ;;  %v17468_v10 = vld [vmem:[#allocation4 + $0xac] sm:$0xf]  ;;  %v11905_v11 = vld [vmem:[#allocation4 + $0xb8] sm:$0xf0]  ;;  %v12308_v12 = vor.u32 %v17568_v3, %v12305_v4 }
  0xdf   : > { %v17484_v3 = vld [vmem:[#allocation4 + $0x12c] sm:$0xf]  ;;  %v11969_v4 = vld [vmem:[#allocation4 + $0x138] sm:$0xf0] }
  0xe0   : > { %1468 = vmatpush.bf16.msrb.mxu0 %v11920_v1  ;;  %1481 = vmatpush.bf16.msrb.mxu1 %v12048_v27  ;;  %v12095_v1 = vld [vmem:[#allocation4 + $0x228] sm:$0xf]  ;;  %v17518_v27 = vld [vmem:[#allocation4 + $0x234] sm:$0xf0] }
  0xe1   : > { %1494 = vmatpush.bf16.msrb.mxu2 %v12176_v30  ;;  %1507 = vmatpush.bf16.msrb.mxu3 %v12304_v31  ;;  %v11823_v30 = vld [vmem:[#allocation4 + $0x8] sm:$0xf]  ;;  %v11840_v31 = vor.u32 %v17454_v20, %v11839_v19  ;;  %v12096_v36 = vor.u32 %v17518_v27, %v12095_v1  ;;  %v17564_v19 = vld [vmem:[#allocation4 + $0x3ac] sm:$0xf]  ;;  %v12289_v20 = vld [vmem:[#allocation4 + $0x3b8] sm:$0xf0] }
  0xe2   : > { %v11824_v47 = vor.u32 %v17450_v33, %v11823_v30  ;;  %v12292_v27 = vor.u32 %v17564_v19, %v12289_v20  ;;  %v17528_v30 = vld [vmem:[#allocation4 + $0x28c] sm:$0xf]  ;;  %v12273_v33 = vld [vmem:[#allocation4 + $0x398] sm:$0xf0] }
  0xe3   : > { %v11953_v20 = vld [vmem:[#allocation4 + $0x118] sm:$0xf0] }
  0xe4   : > { %1469 = vmatpush.bf16.msrb.mxu0 %v11904_v38  ;;  %1482 = vmatpush.bf16.msrb.mxu1 %v12032_v39  ;;  %v12079_v38 = vld [vmem:[#allocation4 + $0x208] sm:$0xf]  ;;  %v17514_v39 = vld [vmem:[#allocation4 + $0x214] sm:$0xf0] }
  0xe5   : > { %1495 = vmatpush.bf16.msrb.mxu2 %v12160_v42  ;;  %1508 = vmatpush.bf16.msrb.mxu3 %v12288_v43  ;;  %v17476_v42 = vld [vmem:[#allocation4 + $0xec] sm:$0xf]  ;;  %v11937_v43 = vld [vmem:[#allocation4 + $0xf8] sm:$0xf0]  ;;  %v12080_v52 = vor.u32 %v17514_v39, %v12079_v38 }
  0xe8   : > { %1470 = vmatpush.bf16.msrb.mxu0 %v11888_v50  ;;  %1483 = vmatpush.bf16.msrb.mxu1 %v12016_v51  ;;  %v17572_v50 = vld [vmem:[#allocation4 + $0x3ec] sm:$0xf]  ;;  %v12321_v51 = vld [vmem:[#allocation4 + $0x3f8] sm:$0xf0] }
  0xe9   : > { %1496 = vmatpush.bf16.msrb.mxu2 %v12144_v54  ;;  %1509 = vmatpush.bf16.msrb.mxu3 %v12272_v55  ;;  %v11940_v54 = vor.u32 %v17476_v42, %v11937_v43  ;;  %v12068_v55 = vor.u32 %v17508_v44, %v12065_v45  ;;  %v12324_v59 = vor.u32 %v17572_v50, %v12321_v51  ;;  %v17524_v42 = vld [vmem:[#allocation4 + $0x26c] sm:$0xf]  ;;  %v12129_v43 = vld [vmem:[#allocation4 + $0x278] sm:$0xf0] }
  0xea   : > { %v17556_v44 = vld [vmem:[#allocation4 + $0x36c] sm:$0xf]  ;;  %v12257_v45 = vld [vmem:[#allocation4 + $0x378] sm:$0xf0]  ;;  %v12132_v50 = vor.u32 %v17524_v42, %v12129_v43  ;;  %v17597_v43 = vld [vmem:[#allocation4 + $0x4ac] sm:$0xf0] }
  0xeb   : > { %v12260_v51 = vor.u32 %v17556_v44, %v12257_v45  ;;  %v12535_v44 = vld [vmem:[#allocation4 + $0x5a0] sm:$0xf]  ;;  %v17629_v45 = vld [vmem:[#allocation4 + $0x5ac] sm:$0xf0] }
  0xec   : > { %1471 = vmatpush.bf16.msrb.mxu0 %v11872_v62  ;;  %1484 = vmatpush.bf16.msrb.mxu1 %v12000_v2  ;;  %v17536_v62 = vld [vmem:[#allocation4 + $0x2cc] sm:$0xf]  ;;  %v12177_v2 = vld [vmem:[#allocation4 + $0x2d8] sm:$0xf0] }
  0xed   : > { %1497 = vmatpush.bf16.msrb.mxu2 %v12128_v8  ;;  %1510 = vmatpush.bf16.msrb.mxu3 %v12256_v9  ;;  %v11924_v8 = vor.u32 %v17472_v56, %v11921_v57  ;;  %v12052_v9 = vor.u32 %v17504_v60, %v12049_v61  ;;  %v12180_v5 = vor.u32 %v17536_v62, %v12177_v2  ;;  %v17552_v56 = vld [vmem:[#allocation4 + $0x34c] sm:$0xf]  ;;  %v12241_v57 = vld [vmem:[#allocation4 + $0x358] sm:$0xf0] }
  0xee   : > { %v17452_v60 = vld [vmem:[#allocation4 + $0x2c] sm:$0xf]  ;;  %v11841_v61 = vld [vmem:[#allocation4 + $0x38] sm:$0xf0]  ;;  %v12244_v2 = vor.u32 %v17552_v56, %v12241_v57  ;;  %v12359_v56 = vld [vmem:[#allocation4 + $0x440] sm:$0xf] }
  0xef   : > { %v17585_v57 = vld [vmem:[#allocation4 + $0x44c] sm:$0xf0] }
  0xf0   : > { %1472 = vmatpush.bf16.msrb.mxu0 %v11856_v15  ;;  %1485 = vmatpush.bf16.msrb.mxu1 %v11984_v18  ;;  %v17532_v15 = vld [vmem:[#allocation4 + $0x2ac] sm:$0xf]  ;;  %v12161_v18 = vld [vmem:[#allocation4 + $0x2b8] sm:$0xf0] }
  0xf1   : > { %1498 = vmatpush.bf16.msrb.mxu2 %v12112_v23  ;;  %1511 = vmatpush.bf16.msrb.mxu3 %v12240_v24  ;;  %v11908_v23 = vor.u32 %v17468_v10, %v11905_v11  ;;  %v12036_v24 = vor.u32 %v17500_v13, %v12033_v14  ;;  %v12164_v1 = vor.u32 %v17532_v15, %v12161_v18  ;;  %v17548_v10 = vld [vmem:[#allocation4 + $0x32c] sm:$0xf]  ;;  %v12225_v11 = vld [vmem:[#allocation4 + $0x338] sm:$0xf0] }
  0xf2   : > { %v17448_v13 = vld [vmem:[#allocation4 + $0xc] sm:$0xf]  ;;  %v11825_v14 = vld [vmem:[#allocation4 + $0x18] sm:$0xf0]  ;;  %v12228_v19 = vor.u32 %v17548_v10, %v12225_v11  ;;  %v17577_v10 = vld [vmem:[#allocation4 + $0x40c] sm:$0xf0] }
  0xf3   : > { %v17480_v15 = vld [vmem:[#allocation4 + $0x10c] sm:$0xf]  ;;  %v17603_v11 = vld [vmem:[#allocation4 + $0x4e4] sm:$0xf] }
  0xf4   : > { %1473 = vmatpush.bf16.msrb.mxu0 %v11840_v31  ;;  %1486 = vmatpush.bf16.msrb.mxu1 %v11968_v32  ;;  %v12145_v31 = vld [vmem:[#allocation4 + $0x298] sm:$0xf0]  ;;  %v17560_v32 = vld [vmem:[#allocation4 + $0x38c] sm:$0xf] }
  0xf5   : > { %1499 = vmatpush.bf16.msrb.mxu2 %v12096_v36  ;;  %1512 = vmatpush.bf16.msrb.mxu3 %v12224_v37  ;;  %v17460_v36 = vld [vmem:[#allocation4 + $0x6c] sm:$0xf]  ;;  %v11873_v37 = vld [vmem:[#allocation4 + $0x78] sm:$0xf0]  ;;  %v12148_v38 = vor.u32 %v17528_v30, %v12145_v31  ;;  %v12276_v39 = vor.u32 %v17560_v32, %v12273_v33  ;;  %v11828_v30 = vor.u32 %v17448_v13, %v11825_v14  ;;  %v12455_v13 = vld [vmem:[#allocation4 + $0x500] sm:$0xf] }
  0xf6   : > { %v11876_v46 = vor.u32 %v17460_v36, %v11873_v37  ;;  %v11956_v31 = vor.u32 %v17480_v15, %v11953_v20  ;;  %v12212_v33 = vor.u32 %v17544_v25, %v12209_v26  ;;  %v12568_v36 = vor.u32 %v17637_v29, %v12567_v28  ;;  %v17601_v37 = vld [vmem:[#allocation4 + $0x4cc] sm:$0xf0]  ;;  %v17635_v20 = vld [vmem:[#allocation4 + $0x5e4] sm:$0xf] }
  0xf7   : > { %v17609_v14 = vld [vmem:[#allocation4 + $0x50c] sm:$0xf0]  ;;  %v17599_v29 = vld [vmem:[#allocation4 + $0x4c4] sm:$0xf] }
  0xf8   : > { %1474 = vmatpush.bf16.msrb.mxu0 %v11824_v47  ;;  %1487 = vmatpush.bf16.msrb.mxu1 %v11952_v48  ;;  %v12004_v47 = vor.u32 %v17492_v40, %v12001_v41  ;;  %v17456_v48 = vld [vmem:[#allocation4 + $0x4c] sm:$0xf]  ;;  %v12407_v41 = vld [vmem:[#allocation4 + $0x4a0] sm:$0xf]  ;;  %v17669_v15 = vld [vmem:[#allocation4 + $0x6ec] sm:$0xf0]  ;;  %v12456_v25 = vor.u32 %v17609_v14, %v12455_v13 }
  0xf9   : > { %1500 = vmatpush.bf16.msrb.mxu2 %v12080_v52  ;;  %1513 = vmatpush.bf16.msrb.mxu3 %v12208_v53  ;;  %v17488_v52 = vld [vmem:[#allocation4 + $0x14c] sm:$0xf]  ;;  %v11985_v53 = vld [vmem:[#allocation4 + $0x158] sm:$0xf0]  ;;  %v17665_v28 = vld [vmem:[#allocation4 + $0x6cc] sm:$0xf0] }
  0xfa   : > { %v12489_v13 = vld [vmem:[#allocation4 + $0x550] sm:$0xf0] }
  0xfb   : > { %1475 = vmatmul.bf16.vlgmr.msrb.gmra.mxu0 %v19310_v16  ;;  %1488 = vmatmul.bf16.vlgmr.msrb.gmra.mxu1 %v19314_v17 }
  0xfc   : > { %1519 = vmatpush.bf16.msra.mxu0 %v11940_v54  ;;  %1532 = vmatpush.bf16.msra.mxu1 %v12068_v55  ;;  %v17520_v54 = vld [vmem:[#allocation4 + $0x24c] sm:$0xf]  ;;  %v12113_v55 = vld [vmem:[#allocation4 + $0x258] sm:$0xf0] }
  0xfd   : > { %1545 = vmatpush.bf16.msra.mxu2 %v12196_v58  ;;  %1558 = vmatpush.bf16.msra.mxu3 %v12324_v59  ;;  %v11860_v58 = vor.u32 %v17456_v48, %v11857_v49  ;;  %v11988_v59 = vor.u32 %v17488_v52, %v11985_v53  ;;  %v12116_v62 = vor.u32 %v17520_v54, %v12113_v55  ;;  %v12391_v48 = vld [vmem:[#allocation4 + $0x480] sm:$0xf]  ;;  %v17593_v49 = vld [vmem:[#allocation4 + $0x48c] sm:$0xf0] }
  0xfe   : > { %1501 = vmatmul.bf16.vlgmr.msrb.gmra.mxu2 %v19318_v21  ;;  %1514 = vmatmul.bf16.vlgmr.msrb.gmra.mxu3 %v19322_v22  ;;  %v12392_v52 = vor.u32 %v17593_v49, %v12391_v48  ;;  %v17589_v53 = vld [vmem:[#allocation4 + $0x46c] sm:$0xf0]  ;;  %v12503_v54 = vld [vmem:[#allocation4 + $0x560] sm:$0xf]  ;;  %v17591_v48 = vld [vmem:[#allocation4 + $0x484] sm:$0xf] }
  0xff   : > { %v17621_v55 = vld [vmem:[#allocation4 + $0x56c] sm:$0xf0] }
 0x100   : > { %1520 = vmatpush.bf16.msra.mxu0 %v11924_v8  ;;  %1533 = vmatpush.bf16.msra.mxu1 %v12052_v9  ;;  %v17516_v8 = vld [vmem:[#allocation4 + $0x22c] sm:$0xf]  ;;  %v12097_v9 = vld [vmem:[#allocation4 + $0x238] sm:$0xf0] }
 0x101   : > { %1546 = vmatpush.bf16.msra.mxu2 %v12180_v5  ;;  %1559 = vmatpush.bf16.msra.mxu3 %v12308_v12  ;;  %v11844_v5 = vor.u32 %v17452_v60, %v11841_v61  ;;  %v11972_v12 = vor.u32 %v17484_v3, %v11969_v4  ;;  %v12100_v18 = vor.u32 %v17516_v8, %v12097_v9  ;;  %v12343_v61 = vld [vmem:[#allocation4 + $0x420] sm:$0xf]  ;;  %v17613_v4 = vld [vmem:[#allocation4 + $0x52c] sm:$0xf0] }
 0x102   : > { %v12360_v60 = vor.u32 %v17585_v57, %v12359_v56  ;;  %v12471_v3 = vld [vmem:[#allocation4 + $0x520] sm:$0xf]  ;;  %v12377_v56 = vld [vmem:[#allocation4 + $0x470] sm:$0xf0]  ;;  %v17619_v57 = vld [vmem:[#allocation4 + $0x564] sm:$0xf] }
 0x103   : > { %v12327_v8 = vld [vmem:[#allocation4 + $0x400] sm:$0xf] }
 0x104   : > { %1521 = vmatpush.bf16.msra.mxu0 %v11908_v23  ;;  %1534 = vmatpush.bf16.msra.mxu1 %v12036_v24  ;;  %v17512_v23 = vld [vmem:[#allocation4 + $0x20c] sm:$0xf]  ;;  %v12081_v24 = vld [vmem:[#allocation4 + $0x218] sm:$0xf0] }
 0x105   : > { %1547 = vmatpush.bf16.msra.mxu2 %v12164_v1  ;;  %1560 = vmatpush.bf16.msra.mxu3 %v12292_v27  ;;  %v12439_v1 = vld [vmem:[#allocation4 + $0x4e0] sm:$0xf]  ;;  %v17605_v27 = vld [vmem:[#allocation4 + $0x4ec] sm:$0xf0]  ;;  %v12084_v32 = vor.u32 %v17512_v23, %v12081_v24  ;;  %v12569_v23 = vld [vmem:[#allocation4 + $0x5f0] sm:$0xf0]  ;;  %v12328_v24 = vor.u32 %v17577_v10, %v12327_v8 }
 0x106   : > { %v17649_v10 = vld [vmem:[#allocation4 + $0x64c] sm:$0xf0] }
 0x108   : > { %1522 = vmatpush.bf16.msra.mxu0 %v11892_v34  ;;  %1535 = vmatpush.bf16.msra.mxu1 %v12020_v35  ;;  %v12440_v34 = vor.u32 %v17605_v27, %v12439_v1  ;;  %v12423_v35 = vld [vmem:[#allocation4 + $0x4c0] sm:$0xf]  ;;  %v12572_v1 = vor.u32 %v17635_v20, %v12569_v23  ;;  %v17645_v23 = vld [vmem:[#allocation4 + $0x62c] sm:$0xf0] }
 0x109   : > { %1548 = vmatpush.bf16.msra.mxu2 %v12148_v38  ;;  %1561 = vmatpush.bf16.msra.mxu3 %v12276_v39  ;;  %v12551_v38 = vld [vmem:[#allocation4 + $0x5c0] sm:$0xf]  ;;  %v17633_v39 = vld [vmem:[#allocation4 + $0x5cc] sm:$0xf0]  ;;  %v12424_v40 = vor.u32 %v17601_v37, %v12423_v35 }
 0x10a   : > { %v12552_v42 = vor.u32 %v17633_v39, %v12551_v38  ;;  %v12679_v27 = vld [vmem:[#allocation4 + $0x6c0] sm:$0xf]  ;;  %v17661_v37 = vld [vmem:[#allocation4 + $0x6ac] sm:$0xf0]  ;;  %v17595_v38 = vld [vmem:[#allocation4 + $0x4a4] sm:$0xf] }
 0x10b   : > { %v12409_v39 = vld [vmem:[#allocation4 + $0x4b0] sm:$0xf0]  ;;  %v12599_v20 = vld [vmem:[#allocation4 + $0x620] sm:$0xf] }
 0x10c   : > { %1523 = vmatpush.bf16.msra.mxu0 %v11876_v46  ;;  %1536 = vmatpush.bf16.msra.mxu1 %v12004_v47  ;;  %v12408_v46 = vor.u32 %v17597_v43, %v12407_v41  ;;  %v12536_v47 = vor.u32 %v17629_v45, %v12535_v44  ;;  %v17627_v41 = vld [vmem:[#allocation4 + $0x5a4] sm:$0xf]  ;;  %v12647_v43 = vld [vmem:[#allocation4 + $0x680] sm:$0xf]  ;;  %v17657_v44 = vld [vmem:[#allocation4 + $0x68c] sm:$0xf0] }
 0x10d   : > { %1549 = vmatpush.bf16.msra.mxu2 %v12132_v50  ;;  %1562 = vmatpush.bf16.msra.mxu3 %v12260_v51  ;;  %v12519_v50 = vld [vmem:[#allocation4 + $0x580] sm:$0xf]  ;;  %v17625_v51 = vld [vmem:[#allocation4 + $0x58c] sm:$0xf0] }
 0x110   : > { %1524 = vmatpush.bf16.msra.mxu0 %v11860_v58  ;;  %1537 = vmatpush.bf16.msra.mxu1 %v11988_v59  ;;  %v12487_v58 = vld [vmem:[#allocation4 + $0x540] sm:$0xf]  ;;  %v17617_v59 = vld [vmem:[#allocation4 + $0x54c] sm:$0xf0] }
 0x111   : > { %1550 = vmatpush.bf16.msra.mxu2 %v12116_v62  ;;  %1563 = vmatpush.bf16.msra.mxu3 %v12244_v2  ;;  %v12488_v62 = vor.u32 %v17617_v59, %v12487_v58  ;;  %v17581_v2 = vld [vmem:[#allocation4 + $0x42c] sm:$0xf0]  ;;  %v12505_v58 = vld [vmem:[#allocation4 + $0x570] sm:$0xf0] }
 0x112   : > { %v12344_v9 = vor.u32 %v17581_v2, %v12343_v61  ;;  %v19348_v61 = vld [vmem:[#allocation10] ss:$8 sm:$0xf]  ;;  %v12508_v8 = vor.u32 %v17619_v57, %v12505_v58 }
 0x113   : > { %v715_v14 = vperm.slane %v19348_v61, 0 }
 0x114   : > { %1525 = vmatpush.bf16.msra.mxu0 %v11844_v5  ;;  %1538 = vmatpush.bf16.msra.mxu1 %v11972_v12  ;;  %v12472_v5 = vor.u32 %v17613_v4, %v12471_v3  ;;  %v12695_v12 = vld [vmem:[#allocation4 + $0x6e0] sm:$0xf]  ;;  %v17583_v4 = vld [vmem:[#allocation4 + $0x444] sm:$0xf] }
 0x115   : > { %1551 = vmatpush.bf16.msra.mxu2 %v12100_v18  ;;  %1564 = vmatpush.bf16.msra.mxu3 %v12228_v19  ;;  %v12441_v18 = vld [vmem:[#allocation4 + $0x4f0] sm:$0xf0]  ;;  %v12696_v19 = vor.u32 %v17669_v15, %v12695_v12  ;;  %v17615_v12 = vld [vmem:[#allocation4 + $0x544] sm:$0xf] }
 0x116   : > { %v12444_v26 = vor.u32 %v17603_v11, %v12441_v18  ;;  %v12361_v11 = vld [vmem:[#allocation4 + $0x450] sm:$0xf0]  ;;  %v17579_v18 = vld [vmem:[#allocation4 + $0x424] sm:$0xf] }
 0x117   : > { %v12364_v15 = vor.u32 %v17583_v4, %v12361_v11  ;;  %v12447_v11 = vld [vmem:[#allocation4 + $0x4e8] sm:$0xf] }
 0x118   : > { %1526 = vmatpush.bf16.msra.mxu0 %v11828_v30  ;;  %1539 = vmatpush.bf16.msra.mxu1 %v11956_v31  ;;  %v12425_v30 = vld [vmem:[#allocation4 + $0x4d0] sm:$0xf0]  ;;  %v12680_v31 = vor.u32 %v17665_v28, %v12679_v27 }
 0x119   : > { %1552 = vmatpush.bf16.msra.mxu2 %v12084_v32  ;;  %1565 = vmatpush.bf16.msra.mxu3 %v12212_v33  ;;  %v17631_v32 = vld [vmem:[#allocation4 + $0x5c4] sm:$0xf]  ;;  %v12553_v33 = vld [vmem:[#allocation4 + $0x5d0] sm:$0xf0] }
 0x11a   : > { %v12556_v35 = vor.u32 %v17631_v32, %v12553_v33  ;;  %v12329_v33 = vld [vmem:[#allocation4 + $0x410] sm:$0xf0] }
 0x11b   : > { %1527 = vmatmul.bf16.vlgmr.msra.gmra.mxu0 %v19310_v16  ;;  %1540 = vmatmul.bf16.vlgmr.msra.gmra.mxu1 %v19314_v17  ;;  %v12375_v16 = vld [vmem:[#allocation4 + $0x460] sm:$0xf]  ;;  %v12520_v17 = vor.u32 %v17625_v51, %v12519_v50  ;;  %v12393_v50 = vld [vmem:[#allocation4 + $0x490] sm:$0xf0]  ;;  %v12648_v51 = vor.u32 %v17657_v44, %v12647_v43  ;;  %v17667_v44 = vld [vmem:[#allocation4 + $0x6e4] sm:$0xf] }
 0x11c   : > { %2367 = vmatpush.bf16.msrb.mxu0 %v12440_v34  ;;  %2380 = vmatpush.bf16.msrb.mxu1 %v12568_v36  ;;  %v12428_v34 = vor.u32 %v17599_v29, %v12425_v30  ;;  %v12663_v36 = vld [vmem:[#allocation4 + $0x6a0] sm:$0xf]  ;;  %v17575_v29 = vld [vmem:[#allocation4 + $0x404] sm:$0xf]  ;;  %v12457_v43 = vld [vmem:[#allocation4 + $0x510] sm:$0xf0] }
 0x11d   : > { %1553 = vmatmul.bf16.vlgmr.msra.gmra.mxu2 %v19318_v21  ;;  %1566 = vmatmul.bf16.vlgmr.msra.gmra.mxu3 %v19322_v22  ;;  %v12376_v21 = vor.u32 %v17589_v53, %v12375_v16  ;;  %v12504_v22 = vor.u32 %v17621_v55, %v12503_v54  ;;  %v12521_v16 = vld [vmem:[#allocation4 + $0x590] sm:$0xf0]  ;;  %v17587_v53 = vld [vmem:[#allocation4 + $0x464] sm:$0xf]  ;;  %v12631_v55 = vld [vmem:[#allocation4 + $0x660] sm:$0xf] }
 0x11e   : > { %2393 = vmatpush.bf16.msrb.mxu2 %v12696_v19  ;;  %v12380_v3 = vor.u32 %v17587_v53, %v12377_v56  ;;  %v12492_v19 = vor.u32 %v17615_v12, %v12489_v13  ;;  %v17663_v53 = vld [vmem:[#allocation4 + $0x6c4] sm:$0xf]  ;;  %v12775_v13 = vld [vmem:[#allocation4 + $0x780] sm:$0xf] }
 0x120   : > { %2368 = vmatpush.bf16.msrb.mxu0 %v12424_v40  ;;  %2381 = vmatpush.bf16.msrb.mxu1 %v12552_v42  ;;  %v12664_v40 = vor.u32 %v17661_v37, %v12663_v36  ;;  %v12537_v42 = vld [vmem:[#allocation4 + $0x5b0] sm:$0xf0]  ;;  %v17641_v36 = vld [vmem:[#allocation4 + $0x60c] sm:$0xf0] }
 0x121   : > { %v12540_v49 = vor.u32 %v17627_v41, %v12537_v42  ;;  %v17607_v41 = vld [vmem:[#allocation4 + $0x504] sm:$0xf] }
 0x122   : > { %2394 = vmatpush.bf16.msrb.mxu2 %v12680_v31 }
 0x124   : > { %2369 = vmatpush.bf16.msrb.mxu0 %v12408_v46  ;;  %2382 = vmatpush.bf16.msrb.mxu1 %v12536_v47  ;;  %v12412_v47 = vor.u32 %v17595_v38, %v12409_v39  ;;  %v12823_v39 = vld [vmem:[#allocation4 + $0x7e0] sm:$0xf] }
 0x126   : > { %2395 = vmatpush.bf16.msrb.mxu2 %v12664_v40  ;;  %v17701_v40 = vld [vmem:[#allocation4 + $0x7ec] sm:$0xf0] }
 0x127   : > { %v12824_v42 = vor.u32 %v17701_v40, %v12823_v39  ;;  %v17598_v39 = vld [vmem:[#allocation4 + $0x4b4] sm:$0xf0] }
 0x128   : > { %2370 = vmatpush.bf16.msrb.mxu0 %v12392_v52  ;;  %2383 = vmatpush.bf16.msrb.mxu1 %v12520_v17  ;;  %v17623_v52 = vld [vmem:[#allocation4 + $0x584] sm:$0xf]  ;;  %v12396_v17 = vor.u32 %v17591_v48, %v12393_v50  ;;  %v12332_v50 = vor.u32 %v17575_v29, %v12329_v33  ;;  %v716_v29 = vperm.slane %v19348_v61, 1 }
 0x129   : > { %v12524_v54 = vor.u32 %v17623_v52, %v12521_v16  ;;  %v12807_v52 = vld [vmem:[#allocation4 + $0x7c0] sm:$0xf]  ;;  %v17697_v16 = vld [vmem:[#allocation4 + $0x7cc] sm:$0xf0]  ;;  %2406 = vmatpush.bf16.msrb.mxu3 %v12824_v42 }
 0x12a   : > { %2396 = vmatpush.bf16.msrb.mxu2 %v12648_v51  ;;  %v12460_v51 = vor.u32 %v17607_v41, %v12457_v43  ;;  %v12743_v42 = vld [vmem:[#allocation4 + $0x740] sm:$0xf]  ;;  %v17681_v43 = vld [vmem:[#allocation4 + $0x74c] sm:$0xf0] }
 0x12c   : > { %2371 = vmatpush.bf16.msrb.mxu0 %v12376_v21  ;;  %2384 = vmatpush.bf16.msrb.mxu1 %v12504_v22  ;;  %v17653_v21 = vld [vmem:[#allocation4 + $0x66c] sm:$0xf0] }
 0x12d   : > { %v12632_v22 = vor.u32 %v17653_v21, %v12631_v55 }
 0x12f   : > { %2397 = vmatpush.bf16.msrb.mxu2 %v12632_v22 }
 0x130   : > { %2372 = vmatpush.bf16.msrb.mxu0 %v12360_v60  ;;  %2385 = vmatpush.bf16.msrb.mxu1 %v12488_v62 }
 0x134   : > { %2373 = vmatpush.bf16.msrb.mxu0 %v12344_v9  ;;  %2386 = vmatpush.bf16.msrb.mxu1 %v12472_v5  ;;  %v12615_v9 = vld [vmem:[#allocation4 + $0x640] sm:$0xf] }
 0x135   : > { %v12616_v5 = vor.u32 %v17649_v10, %v12615_v9 }
 0x137   : > { %v19340_v45 = vpop.f32.mrf.mxu0  ;;  %v19342_v46 = vpop.f32.mrf.mxu1  ;;  %2398 = vmatpush.bf16.msrb.mxu2 %v12616_v5  ;;  %v17606_v5 = vld [vmem:[#allocation4 + $0x4f4] sm:$0xf0] }
 0x138   : > { %2374 = vmatpush.bf16.msrb.mxu0 %v12328_v24  ;;  %2387 = vmatpush.bf16.msrb.mxu1 %v12456_v25  ;;  %v12345_v24 = vld [vmem:[#allocation4 + $0x430] sm:$0xf0]  ;;  %v12600_v25 = vor.u32 %v17645_v23, %v12599_v20  ;;  %v12448_v20 = vor.u32 %v17606_v5, %v12447_v11  ;;  %v17638_v11 = vld [vmem:[#allocation4 + $0x5f4] sm:$0xf0]  ;;  %v12367_v5 = vld [vmem:[#allocation4 + $0x448] sm:$0xf] }
 0x139   : > { %v12348_v32 = vor.u32 %v17579_v18, %v12345_v24  ;;  %v12649_v18 = vld [vmem:[#allocation4 + $0x690] sm:$0xf0] }
 0x13b   : > { %2399 = vmatpush.bf16.msrb.mxu2 %v12600_v25 }
 0x13c   : > { %2419 = vmatpush.bf16.msra.mxu0 %v12444_v26  ;;  %2432 = vmatpush.bf16.msra.mxu1 %v12572_v1  ;;  %v17611_v26 = vld [vmem:[#allocation4 + $0x524] sm:$0xf]  ;;  %v12473_v1 = vld [vmem:[#allocation4 + $0x530] sm:$0xf0] }
 0x13e   : > { %v19344_v59 = vpop.f32.mrf.mxu2  ;;  %v19346_v60 = vpop.f32.mrf.mxu3 }
 0x13f   : > { %v492_v62 = vpop.f32.mrf.mxu0  ;;  %v505_v2 = vpop.f32.mrf.mxu1 }
 0x140   : > { %2420 = vmatpush.bf16.msra.mxu0 %v12428_v34  ;;  %2433 = vmatpush.bf16.msra.mxu1 %v12556_v35  ;;  %v12476_v34 = vor.u32 %v17611_v26, %v12473_v1  ;;  %v12583_v35 = vld [vmem:[#allocation4 + $0x600] sm:$0xf]  ;;  %v17693_v2 = vld [vmem:[#allocation4 + $0x7ac] sm:$0xf0] }
 0x141   : > { %v12584_v38 = vor.u32 %v17641_v36, %v12583_v35  ;;  %v12791_v62 = vld [vmem:[#allocation4 + $0x7a0] sm:$0xf] }
 0x142   : > { %v12792_v4 = vor.u32 %v17693_v2, %v12791_v62  ;;  %v12601_v2 = vld [vmem:[#allocation4 + $0x630] sm:$0xf0] }
 0x143   : > { %2400 = vmatpush.bf16.msrb.mxu2 %v12584_v38  ;;  %v12415_v38 = vld [vmem:[#allocation4 + $0x4a8] sm:$0xf] }
 0x144   : > { %2421 = vmatpush.bf16.msra.mxu0 %v12412_v47  ;;  %2434 = vmatpush.bf16.msra.mxu1 %v12540_v49  ;;  %v12697_v47 = vld [vmem:[#allocation4 + $0x6f0] sm:$0xf0] }
 0x145   : > { %v12700_v48 = vor.u32 %v17667_v44, %v12697_v47  ;;  %v17647_v44 = vld [vmem:[#allocation4 + $0x644] sm:$0xf]  ;;  %v12416_v47 = vor.u32 %v17598_v39, %v12415_v38  ;;  %v12351_v38 = vld [vmem:[#allocation4 + $0x428] sm:$0xf]  ;;  %v17582_v39 = vld [vmem:[#allocation4 + $0x434] sm:$0xf0] }
 0x146   : > { %v518_v27 = vpop.f32.mrf.mxu2  ;;  %v531_v28 = vpop.f32.mrf.mxu3 }
 0x147   : > { %v1372_v30 = vpop.f32.mrf.mxu0  ;;  %v1385_v31 = vpop.f32.mrf.mxu1  ;;  %2445 = vmatpush.bf16.msra.mxu2 %v12700_v48  ;;  %v12431_v27 = vld [vmem:[#allocation4 + $0x4c8] sm:$0xf]  ;;  %v17602_v28 = vld [vmem:[#allocation4 + $0x4d4] sm:$0xf0]  ;;  %v12744_v48 = vor.u32 %v17681_v43, %v12743_v42 }
 0x148   : > { %2422 = vmatpush.bf16.msra.mxu0 %v12396_v17  ;;  %2435 = vmatpush.bf16.msra.mxu1 %v12524_v54  ;;  %v1373_v37 = vadd.f32 %v1372_v30, %v715_v14  ;;  %v12808_v17 = vor.u32 %v17697_v16, %v12807_v52  ;;  %v12681_v54 = vld [vmem:[#allocation4 + $0x6d0] sm:$0xf0]  ;;  %v17689_v14 = vld [vmem:[#allocation4 + $0x78c] sm:$0xf0]  ;;  %v12759_v30 = vld [vmem:[#allocation4 + $0x760] sm:$0xf]  ;;  %v12432_v35 = vor.u32 %v17602_v28, %v12431_v27 }
 0x149   : > { %v12684_v55 = vor.u32 %v17663_v53, %v12681_v54  ;;  %v12776_v23 = vor.u32 %v17689_v14, %v12775_v13  ;;  %v12727_v54 = vld [vmem:[#allocation4 + $0x720] sm:$0xf]  ;;  %v17673_v13 = vld [vmem:[#allocation4 + $0x70c] sm:$0xf0]  ;;  %v17639_v14 = vld [vmem:[#allocation4 + $0x604] sm:$0xf] }
 0x14a   : > { %v1386_v49 = vadd.f32 %v1385_v31, %v1373_v37  ;;  %2407 = vmatpush.bf16.msrb.mxu3 %v12808_v17  ;;  %v17685_v31 = vld [vmem:[#allocation4 + $0x76c] sm:$0xf0]  ;;  %v12633_v37 = vld [vmem:[#allocation4 + $0x670] sm:$0xf0]  ;;  %v12543_v42 = vld [vmem:[#allocation4 + $0x5a8] sm:$0xf] }
 0x14b   : > { %2446 = vmatpush.bf16.msra.mxu2 %v12684_v55  ;;  %v12760_v36 = vor.u32 %v17685_v31, %v12759_v30  ;;  %v17677_v55 = vld [vmem:[#allocation4 + $0x72c] sm:$0xf0]  ;;  %v17630_v43 = vld [vmem:[#allocation4 + $0x5b4] sm:$0xf0] }
 0x14c   : > { %2423 = vmatpush.bf16.msra.mxu0 %v12380_v3  ;;  %2436 = vmatpush.bf16.msra.mxu1 %v12508_v8  ;;  %v17659_v3 = vld [vmem:[#allocation4 + $0x6a4] sm:$0xf]  ;;  %v12665_v8 = vld [vmem:[#allocation4 + $0x6b0] sm:$0xf0]  ;;  %v12728_v62 = vor.u32 %v17677_v55, %v12727_v54  ;;  %v17626_v54 = vld [vmem:[#allocation4 + $0x594] sm:$0xf0] }
 0x14d   : > { %v12668_v10 = vor.u32 %v17659_v3, %v12665_v8  ;;  %v12383_v3 = vld [vmem:[#allocation4 + $0x468] sm:$0xf] }
 0x14e   : > { %v1398_v21 = vpop.f32.mrf.mxu2  ;;  %v1411_v56 = vpop.f32.mrf.mxu3  ;;  %2408 = vmatpush.bf16.msrb.mxu3 %v12792_v4  ;;  %v17590_v4 = vld [vmem:[#allocation4 + $0x474] sm:$0xf0] }
 0x14f   : > { %v1399_v22 = vadd.f32 %v1398_v21, %v1386_v49  ;;  %v1374_v57 = vpop.f32.mrf.mxu0  ;;  %v1387_v58 = vpop.f32.mrf.mxu1  ;;  %2447 = vmatpush.bf16.msra.mxu2 %v12668_v10  ;;  %v12617_v49 = vld [vmem:[#allocation4 + $0x650] sm:$0xf0]  ;;  %v17643_v21 = vld [vmem:[#allocation4 + $0x624] sm:$0xf]  ;;  %v12575_v10 = vld [vmem:[#allocation4 + $0x5e8] sm:$0xf] }
 0x150   : > { %2424 = vmatpush.bf16.msra.mxu0 %v12364_v15  ;;  %2437 = vmatpush.bf16.msra.mxu1 %v12492_v19  ;;  %v17655_v15 = vld [vmem:[#allocation4 + $0x684] sm:$0xf]  ;;  %v12620_v52 = vor.u32 %v17647_v44, %v12617_v49  ;;  %v12604_v8 = vor.u32 %v17643_v21, %v12601_v2  ;;  %v12576_v28 = vor.u32 %v17638_v11, %v12575_v10  ;;  %v12335_v49 = vld [vmem:[#allocation4 + $0x408] sm:$0xf]  ;;  %v12433_v2 = vld [vmem:[#allocation4 + $0x4d8] sm:$0xf0] }
 0x151   : > { %v1412_v9 = vadd.f32 %v1411_v56, %v1399_v22  ;;  %v12652_v24 = vor.u32 %v17655_v15, %v12649_v18  ;;  %v12384_v18 = vor.u32 %v17590_v4, %v12383_v3  ;;  %v12352_v44 = vor.u32 %v17582_v39, %v12351_v38  ;;  %v17687_v21 = vld [vmem:[#allocation4 + $0x784] sm:$0xf]  ;;  %v12511_v3 = vld [vmem:[#allocation4 + $0x568] sm:$0xf]  ;;  %v17622_v4 = vld [vmem:[#allocation4 + $0x574] sm:$0xf0] }
 0x152   : > { %2409 = vmatpush.bf16.msrb.mxu3 %v12776_v23  ;;  %v17586_v23 = vld [vmem:[#allocation4 + $0x454] sm:$0xf0]  ;;  %v17683_v10 = vld [vmem:[#allocation4 + $0x764] sm:$0xf]  ;;  %v12761_v11 = vld [vmem:[#allocation4 + $0x770] sm:$0xf0] }
 0x153   : > { %vm1571_vm6 = vcmp.gt.f32.partialorder %v1412_v9, 0.0  ;;  %v1575_v12 = vmul.f32 0.2, %v1412_v9  ;;  %2448 = vmatpush.bf16.msra.mxu2 %v12652_v24  ;;  %v17675_v38 = vld [vmem:[#allocation4 + $0x724] sm:$0xf] }
 0x154   : > { %2425 = vmatpush.bf16.msra.mxu0 %v12348_v32  ;;  %2438 = vmatpush.bf16.msra.mxu1 %v12476_v34  ;;  %v17651_v32 = vld [vmem:[#allocation4 + $0x664] sm:$0xf]  ;;  %v12729_v39 = vld [vmem:[#allocation4 + $0x730] sm:$0xf0] }
 0x155   : > { %v1579_v19 = vsel %vm1571_vm6, %v1412_v9, %v1575_v12  ;;  %v12636_v40 = vor.u32 %v17651_v32, %v12633_v37  ;;  %v12711_v12 = vld [vmem:[#allocation4 + $0x700] sm:$0xf]  ;;  %v12809_v37 = vld [vmem:[#allocation4 + $0x7d0] sm:$0xf0] }
 0x156   : > { %v19351_v25 = vpack.c.bf16 %v1579_v19, %v1579_v19  ;;  %v1400_v26 = vpop.f32.mrf.mxu2  ;;  %v1413_v1 = vpop.f32.mrf.mxu3  ;;  %2410 = vmatpush.bf16.msrb.mxu3 %v12760_v36  ;;  %v12712_v19 = vor.u32 %v17673_v13, %v12711_v12  ;;  %v17695_v36 = vld [vmem:[#allocation4 + $0x7c4] sm:$0xf]  ;;  %v12512_v13 = vor.u32 %v17622_v4, %v12511_v3 }
 0x157   : > { %2449 = vmatpush.bf16.msra.mxu2 %v12636_v40  ;;  %v17699_v26 = vld [vmem:[#allocation4 + $0x7e4] sm:$0xf]  ;;  %v12825_v1 = vld [vmem:[#allocation4 + $0x7f0] sm:$0xf0]  ;;  %v12812_v40 = vor.u32 %v17695_v36, %v12809_v37 }
 0x158   : > { %2426 = vmatpush.bf16.msra.mxu0 %v12332_v50  ;;  %2439 = vmatpush.bf16.msra.mxu1 %v12460_v51  ;;  %v1424_v33 = vpop.f32.mrf.mxu0  ;;  %v1437_v34 = vpop.f32.mrf.mxu1  ;;  %v12399_v50 = vld [vmem:[#allocation4 + $0x488] sm:$0xf]  ;;  %v17594_v51 = vld [vmem:[#allocation4 + $0x494] sm:$0xf0] }
 0x159   : > { %2375 = vmatmul.bf16.vlgmr.msrb.gmra.mxu0 %v19351_v25  ;;  %v1425_v41 = vadd.f32 %v1424_v33, %v716_v29  ;;  %v12400_v58 = vor.u32 %v17594_v51, %v12399_v50  ;;  %v12828_v29 = vor.u32 %v17699_v26, %v12825_v1  ;;  %v12559_v33 = vld [vmem:[#allocation4 + $0x5c8] sm:$0xf]  ;;  %v17578_v50 = vld [vmem:[#allocation4 + $0x414] sm:$0xf0]  ;;  %v17679_v26 = vld [vmem:[#allocation4 + $0x744] sm:$0xf] }
 0x15a   : > { %2411 = vmatpush.bf16.msrb.mxu3 %v12744_v48  ;;  %v12793_v48 = vld [vmem:[#allocation4 + $0x7b0] sm:$0xf0]  ;;  %v12336_v55 = vor.u32 %v17578_v50, %v12335_v49  ;;  %v12463_v49 = vld [vmem:[#allocation4 + $0x508] sm:$0xf]  ;;  %v17610_v50 = vld [vmem:[#allocation4 + $0x514] sm:$0xf0] }
 0x15b   : > { %v1438_v16 = vadd.f32 %v1437_v34, %v1425_v41  ;;  %2450 = vmatpush.bf16.msra.mxu2 %v12620_v52  ;;  %v17634_v34 = vld [vmem:[#allocation4 + $0x5d4] sm:$0xf0]  ;;  %v12544_v52 = vor.u32 %v17630_v43, %v12543_v42  ;;  %v12745_v1 = vld [vmem:[#allocation4 + $0x750] sm:$0xf0] }
 0x15c   : > { %2471 = vmatpush.bf16.msrb.mxu0 %v12448_v20  ;;  %v12585_v20 = vld [vmem:[#allocation4 + $0x610] sm:$0xf0]  ;;  %v12560_v41 = vor.u32 %v17634_v34, %v12559_v33  ;;  %v17614_v33 = vld [vmem:[#allocation4 + $0x534] sm:$0xf0] }
 0x15d   : > { %v12588_v24 = vor.u32 %v17639_v14, %v12585_v20  ;;  %v17596_v14 = vld [vmem:[#allocation4 + $0x4ac] sm:$0xf]  ;;  %v17618_v20 = vld [vmem:[#allocation4 + $0x554] sm:$0xf0] }
 0x15e   : > { %2412 = vmatpush.bf16.msrb.mxu3 %v12728_v62  ;;  %v17600_v62 = vld [vmem:[#allocation4 + $0x4cc] sm:$0xf] }
 0x15f   : > { %2451 = vmatpush.bf16.msra.mxu2 %v12604_v8  ;;  %v717_v8 = vperm.slane %v19348_v61, 2 }
 0x160   : > { %2472 = vmatpush.bf16.msrb.mxu0 %v12432_v35  ;;  %v1426_v22 = vpop.f32.mrf.mxu0  ;;  %v1439_v57 = vpop.f32.mrf.mxu1  ;;  %v12368_v35 = vor.u32 %v17586_v23, %v12367_v5 }
 0x161   : > { %v1450_v17 = vpop.f32.mrf.mxu2  ;;  %v1463_v53 = vpop.f32.mrf.mxu3 }
 0x162   : > { %v1451_v56 = vadd.f32 %v1450_v17, %v1438_v16  ;;  %2413 = vmatpush.bf16.msrb.mxu3 %v12712_v19  ;;  %v17604_v16 = vld [vmem:[#allocation4 + $0x4ec] sm:$0xf]  ;;  %v12449_v17 = vld [vmem:[#allocation4 + $0x4f8] sm:$0xf0]  ;;  %v12495_v19 = vld [vmem:[#allocation4 + $0x548] sm:$0xf] }
 0x163   : > { %2452 = vmatpush.bf16.msra.mxu2 %v12588_v24  ;;  %v12452_v22 = vor.u32 %v17604_v16, %v12449_v17  ;;  %v17670_v16 = vld [vmem:[#allocation4 + $0x6f4] sm:$0xf0]  ;;  %v17636_v17 = vld [vmem:[#allocation4 + $0x5ec] sm:$0xf] }
 0x164   : > { %2473 = vmatpush.bf16.msrb.mxu0 %v12416_v47  ;;  %v1464_v9 = vadd.f32 %v1463_v53, %v1451_v56  ;;  %v17691_v47 = vld [vmem:[#allocation4 + $0x7a4] sm:$0xf]  ;;  %v12527_v53 = vld [vmem:[#allocation4 + $0x588] sm:$0xf]  ;;  %v12777_v56 = vld [vmem:[#allocation4 + $0x790] sm:$0xf0] }
 0x165   : > { %v12796_v51 = vor.u32 %v17691_v47, %v12793_v48  ;;  %v12780_v57 = vor.u32 %v17687_v21, %v12777_v56  ;;  %v12385_v47 = vld [vmem:[#allocation4 + $0x478] sm:$0xf0]  ;;  %v12732_v48 = vor.u32 %v17675_v38, %v12729_v39  ;;  %v17671_v21 = vld [vmem:[#allocation4 + $0x704] sm:$0xf]  ;;  %v12713_v56 = vld [vmem:[#allocation4 + $0x710] sm:$0xf0] }
 0x166   : > { %vm1572_vm7 = vcmp.gt.f32.partialorder %v1464_v9, 0.0  ;;  %v1576_v15 = vmul.f32 0.2, %v1464_v9  ;;  %2458 = vmatpush.bf16.msra.mxu3 %v12828_v29  ;;  %v12401_v29 = vld [vmem:[#allocation4 + $0x498] sm:$0xf0] }
 0x168   : > { %2474 = vmatpush.bf16.msrb.mxu0 %v12400_v58  ;;  %v1580_v27 = vsel %vm1572_vm7, %v1464_v9, %v1576_v15  ;;  %v12528_v58 = vor.u32 %v17626_v54, %v12527_v53  ;;  %v12436_v9 = vor.u32 %v17600_v62, %v12433_v2  ;;  %v12417_v15 = vld [vmem:[#allocation4 + $0x4b8] sm:$0xf0]  ;;  %v12716_v62 = vor.u32 %v17671_v21, %v12713_v56 }
 0x169   : > { %v19355_v30 = vpack.c.bf16 %v1580_v27, %v1580_v27  ;;  %v1452_v31 = vpop.f32.mrf.mxu2  ;;  %v1465_v32 = vpop.f32.mrf.mxu3  ;;  %2427 = vmatmul.bf16.vlgmr.msra.gmra.mxu0 %v19351_v25  ;;  %v12420_v24 = vor.u32 %v17596_v14, %v12417_v15  ;;  %v12496_v27 = vor.u32 %v17618_v20, %v12495_v19  ;;  %v12577_v53 = vld [vmem:[#allocation4 + $0x5f8] sm:$0xf0]  ;;  %v17580_v15 = vld [vmem:[#allocation4 + $0x42c] sm:$0xf] }
 0x16a   : > { %2459 = vmatpush.bf16.msra.mxu3 %v12812_v40  ;;  %v12748_v31 = vor.u32 %v17679_v26, %v12745_v1  ;;  %v12479_v32 = vld [vmem:[#allocation4 + $0x528] sm:$0xf]  ;;  %v12580_v2 = vor.u32 %v17636_v17, %v12577_v53  ;;  %v17662_v1 = vld [vmem:[#allocation4 + $0x6b4] sm:$0xf0]  ;;  %v12481_v21 = vld [vmem:[#allocation4 + $0x538] sm:$0xf0] }
 0x16b   : > { %2388 = vmatmul.bf16.vlgmr.msrb.gmra.mxu1 %v19355_v30  ;;  %v12480_v43 = vor.u32 %v17614_v33, %v12479_v32  ;;  %v12671_v26 = vld [vmem:[#allocation4 + $0x6a8] sm:$0xf]  ;;  %v17624_v33 = vld [vmem:[#allocation4 + $0x58c] sm:$0xf]  ;;  %v17650_v53 = vld [vmem:[#allocation4 + $0x654] sm:$0xf0] }
 0x16c   : > { %2475 = vmatpush.bf16.msrb.mxu0 %v12384_v18  ;;  %2484 = vmatpush.bf16.msrb.mxu1 %v12576_v28  ;;  %v12764_v18 = vor.u32 %v17683_v10, %v12761_v11  ;;  %v17592_v28 = vld [vmem:[#allocation4 + $0x48c] sm:$0xf]  ;;  %v12672_v32 = vor.u32 %v17662_v1, %v12671_v26  ;;  %v12623_v17 = vld [vmem:[#allocation4 + $0x648] sm:$0xf] }
 0x16d   : > { %v12404_v37 = vor.u32 %v17592_v28, %v12401_v29  ;;  %v17576_v28 = vld [vmem:[#allocation4 + $0x40c] sm:$0xf]  ;;  %v12337_v29 = vld [vmem:[#allocation4 + $0x418] sm:$0xf0] }
 0x16e   : > { %2460 = vmatpush.bf16.msra.mxu3 %v12796_v51  ;;  %v12703_v51 = vld [vmem:[#allocation4 + $0x6e8] sm:$0xf] }
 0x16f   : > { %v12704_v4 = vor.u32 %v17670_v16, %v12703_v51  ;;  %v17616_v51 = vld [vmem:[#allocation4 + $0x54c] sm:$0xf] }
 0x170   : > { %2476 = vmatpush.bf16.msrb.mxu0 %v12368_v35  ;;  %2485 = vmatpush.bf16.msrb.mxu1 %v12560_v41 }
 0x172   : > { %2461 = vmatpush.bf16.msra.mxu3 %v12780_v57  ;;  %v12464_v57 = vor.u32 %v17610_v50, %v12463_v49 }
 0x174   : > { %2477 = vmatpush.bf16.msrb.mxu0 %v12352_v44  ;;  %2486 = vmatpush.bf16.msrb.mxu1 %v12544_v52  ;;  %v17588_v44 = vld [vmem:[#allocation4 + $0x46c] sm:$0xf] }
 0x175   : > { %v12388_v54 = vor.u32 %v17588_v44, %v12385_v47  ;;  %v17654_v44 = vld [vmem:[#allocation4 + $0x674] sm:$0xf0] }
 0x176   : > { %2462 = vmatpush.bf16.msra.mxu3 %v12764_v18  ;;  %v12353_v18 = vld [vmem:[#allocation4 + $0x438] sm:$0xf0] }
 0x178   : > { %2478 = vmatpush.bf16.msrb.mxu0 %v12336_v55  ;;  %v1476_v5 = vpop.f32.mrf.mxu0  ;;  %v1489_v12 = vpop.f32.mrf.mxu1  ;;  %2487 = vmatpush.bf16.msrb.mxu1 %v12528_v58  ;;  %v17584_v55 = vld [vmem:[#allocation4 + $0x44c] sm:$0xf]  ;;  %v12369_v58 = vld [vmem:[#allocation4 + $0x458] sm:$0xf0] }
 0x179   : > { %v1477_v23 = vadd.f32 %v1476_v5, %v717_v8  ;;  %v17632_v8 = vld [vmem:[#allocation4 + $0x5cc] sm:$0xf]  ;;  %v12372_v14 = vor.u32 %v17584_v55, %v12369_v58 }
 0x17a   : > { %2463 = vmatpush.bf16.msra.mxu3 %v12748_v31  ;;  %v17612_v55 = vld [vmem:[#allocation4 + $0x52c] sm:$0xf] }
 0x17b   : > { %2479 = vmatmul.bf16.vlgmr.msrb.gmra.mxu0 %v19351_v25  ;;  %2440 = vmatmul.bf16.vlgmr.msra.gmra.mxu1 %v19355_v30  ;;  %v1490_v34 = vadd.f32 %v1489_v12, %v1477_v23  ;;  %v12687_v12 = vld [vmem:[#allocation4 + $0x6c8] sm:$0xf]  ;;  %v17628_v23 = vld [vmem:[#allocation4 + $0x5ac] sm:$0xf] }
 0x17c   : > { %2523 = vmatpush.bf16.msra.mxu0 %v12452_v22  ;;  %2488 = vmatpush.bf16.msrb.mxu1 %v12512_v13  ;;  %v17666_v13 = vld [vmem:[#allocation4 + $0x6d4] sm:$0xf0] }
 0x17d   : > { %v12688_v20 = vor.u32 %v17666_v13, %v12687_v12  ;;  %v12591_v12 = vld [vmem:[#allocation4 + $0x608] sm:$0xf]  ;;  %v17642_v13 = vld [vmem:[#allocation4 + $0x614] sm:$0xf0] }
 0x17e   : > { %2464 = vmatpush.bf16.msra.mxu3 %v12732_v48 }
 0x180   : > { %2524 = vmatpush.bf16.msra.mxu0 %v12436_v9  ;;  %v1478_v41 = vpop.f32.mrf.mxu0  ;;  %v1491_v42 = vpop.f32.mrf.mxu1  ;;  %2489 = vmatpush.bf16.msrb.mxu1 %v12496_v27  ;;  %v12561_v9 = vld [vmem:[#allocation4 + $0x5d8] sm:$0xf0]  ;;  %v12356_v27 = vor.u32 %v17580_v15, %v12353_v18  ;;  %v17702_v15 = vld [vmem:[#allocation4 + $0x7f4] sm:$0xf0]  ;;  %v17668_v18 = vld [vmem:[#allocation4 + $0x6ec] sm:$0xf] }
 0x181   : > { %v1502_v35 = vpop.f32.mrf.mxu2  ;;  %v1515_v36 = vpop.f32.mrf.mxu3  ;;  %v12564_v19 = vor.u32 %v17632_v8, %v12561_v9  ;;  %v12513_v41 = vld [vmem:[#allocation4 + $0x578] sm:$0xf0]  ;;  %v718_v42 = vperm.slane %v19348_v61, 3  ;;  %v17608_v9 = vld [vmem:[#allocation4 + $0x50c] sm:$0xf] }
 0x182   : > { %v1503_v40 = vadd.f32 %v1502_v35, %v1490_v34  ;;  %2465 = vmatpush.bf16.msra.mxu3 %v12716_v62  ;;  %v12529_v34 = vld [vmem:[#allocation4 + $0x598] sm:$0xf0]  ;;  %v12655_v35 = vld [vmem:[#allocation4 + $0x688] sm:$0xf] }
 0x183   : > { %v12532_v38 = vor.u32 %v17624_v33, %v12529_v34  ;;  %v17698_v33 = vld [vmem:[#allocation4 + $0x7d4] sm:$0xf0]  ;;  %v17664_v34 = vld [vmem:[#allocation4 + $0x6cc] sm:$0xf] }
 0x184   : > { %2525 = vmatpush.bf16.msra.mxu0 %v12420_v24  ;;  %v1516_v52 = vadd.f32 %v1515_v36, %v1503_v40  ;;  %2490 = vmatpush.bf16.msrb.mxu1 %v12480_v43  ;;  %v12545_v24 = vld [vmem:[#allocation4 + $0x5b8] sm:$0xf0]  ;;  %v17658_v36 = vld [vmem:[#allocation4 + $0x694] sm:$0xf0]  ;;  %v17620_v40 = vld [vmem:[#allocation4 + $0x56c] sm:$0xf] }
 0x185   : > { %v12548_v31 = vor.u32 %v17628_v23, %v12545_v24  ;;  %v12656_v39 = vor.u32 %v17658_v36, %v12655_v35  ;;  %v12639_v43 = vld [vmem:[#allocation4 + $0x668] sm:$0xf]  ;;  %v12516_v49 = vor.u32 %v17620_v40, %v12513_v41  ;;  %v12592_v24 = vor.u32 %v17642_v13, %v12591_v12  ;;  %v12689_v35 = vld [vmem:[#allocation4 + $0x6d8] sm:$0xf0]  ;;  %v17660_v40 = vld [vmem:[#allocation4 + $0x6ac] sm:$0xf] }
 0x186   : > { %vm1573_vm8 = vcmp.gt.f32.partialorder %v1516_v52, 0.0  ;;  %v1577_v22 = vmul.f32 0.2, %v1516_v52  ;;  %v12640_v50 = vor.u32 %v17654_v44, %v12639_v43  ;;  %v12673_v41 = vld [vmem:[#allocation4 + $0x6b8] sm:$0xf0] }
 0x187   : > { %v12676_v43 = vor.u32 %v17660_v40, %v12673_v41  ;;  %v12783_v44 = vld [vmem:[#allocation4 + $0x788] sm:$0xf]  ;;  %v17700_v12 = vld [vmem:[#allocation4 + $0x7ec] sm:$0xf]  ;;  %v12833_v13 = vld [vmem:[#allocation4 + $0x7f8] sm:$0xf0] }
 0x188   : > { %2526 = vmatpush.bf16.msra.mxu0 %v12404_v37  ;;  %v1581_v3 = vsel %vm1573_vm8, %v1516_v52, %v1577_v22  ;;  %2491 = vmatpush.bf16.msrb.mxu1 %v12464_v57  ;;  %v12340_v37 = vor.u32 %v17576_v28, %v12337_v29  ;;  %v12497_v52 = vld [vmem:[#allocation4 + $0x558] sm:$0xf0]  ;;  %v12607_v22 = vld [vmem:[#allocation4 + $0x628] sm:$0xf]  ;;  %v17646_v57 = vld [vmem:[#allocation4 + $0x634] sm:$0xf0] }
 0x189   : > { %v19362_v10 = vpack.c.bf16 %v1581_v3, %v1581_v3  ;;  %v1504_v11 = vpop.f32.mrf.mxu2  ;;  %v1517_v5 = vpop.f32.mrf.mxu3  ;;  %v12500_v61 = vor.u32 %v17616_v51, %v12497_v52  ;;  %v12608_v8 = vor.u32 %v17646_v57, %v12607_v22  ;;  %v12815_v28 = vld [vmem:[#allocation4 + $0x7c8] sm:$0xf]  ;;  %v17676_v40 = vld [vmem:[#allocation4 + $0x72c] sm:$0xf]  ;;  %v12737_v41 = vld [vmem:[#allocation4 + $0x738] sm:$0xf0] }
 0x18a   : > { %v12465_v11 = vld [vmem:[#allocation4 + $0x518] sm:$0xf0]  ;;  %v12816_v36 = vor.u32 %v17698_v33, %v12815_v28  ;;  %v12767_v52 = vld [vmem:[#allocation4 + $0x768] sm:$0xf] }
 0x18b   : > { %2401 = vmatmul.bf16.vlgmr.msrb.gmra.mxu2 %v19362_v10  ;;  %2492 = vmatmul.bf16.vlgmr.msrb.gmra.mxu1 %v19355_v30  ;;  %v12468_v23 = vor.u32 %v17608_v9, %v12465_v11  ;;  %v17674_v9 = vld [vmem:[#allocation4 + $0x714] sm:$0xf0]  ;;  %v17640_v11 = vld [vmem:[#allocation4 + $0x60c] sm:$0xf]  ;;  %v12785_v28 = vld [vmem:[#allocation4 + $0x798] sm:$0xf0] }
 0x18c   : > { %2527 = vmatpush.bf16.msra.mxu0 %v12388_v54  ;;  %2536 = vmatpush.bf16.msra.mxu1 %v12580_v2  ;;  %v12624_v54 = vor.u32 %v17650_v53, %v12623_v17  ;;  %v12641_v17 = vld [vmem:[#allocation4 + $0x678] sm:$0xf0] }
 0x18d   : > { %2497 = vmatpush.bf16.msrb.mxu2 %v12704_v4  ;;  %v12484_v4 = vor.u32 %v17612_v55, %v12481_v21  ;;  %v17682_v55 = vld [vmem:[#allocation4 + $0x754] sm:$0xf0]  ;;  %v17648_v21 = vld [vmem:[#allocation4 + $0x64c] sm:$0xf]  ;;  %v12769_v33 = vld [vmem:[#allocation4 + $0x778] sm:$0xf0] }
 0x190   : > { %2528 = vmatpush.bf16.msra.mxu0 %v12372_v14  ;;  %2537 = vmatpush.bf16.msra.mxu1 %v12564_v19  ;;  %v12831_v14 = vld [vmem:[#allocation4 + $0x7e8] sm:$0xf]  ;;  %v12705_v19 = vld [vmem:[#allocation4 + $0x6f8] sm:$0xf0] }
 0x191   : > { %2498 = vmatpush.bf16.msrb.mxu2 %v12688_v20  ;;  %v12832_v1 = vor.u32 %v17702_v15, %v12831_v14 }
 0x194   : > { %2529 = vmatpush.bf16.msra.mxu0 %v12356_v27  ;;  %2538 = vmatpush.bf16.msra.mxu1 %v12548_v31  ;;  %v12708_v27 = vor.u32 %v17668_v18, %v12705_v19  ;;  %v12836_v18 = vor.u32 %v17700_v12, %v12833_v13  ;;  %v17696_v19 = vld [vmem:[#allocation4 + $0x7cc] sm:$0xf]  ;;  %v17709_v12 = vld [vmem:[#allocation4 + $0x82c] sm:$0xf0]  ;;  %v13047_v13 = vld [vmem:[#allocation4 + $0x9a0] sm:$0xf] }
 0x195   : > { %2499 = vmatpush.bf16.msrb.mxu2 %v12672_v32 }
 0x198   : > { %2530 = vmatpush.bf16.msra.mxu0 %v12340_v37  ;;  %v1528_v47 = vpop.f32.mrf.mxu0  ;;  %v1541_v48 = vpop.f32.mrf.mxu1  ;;  %2539 = vmatpush.bf16.msra.mxu1 %v12532_v38  ;;  %v12692_v37 = vor.u32 %v17664_v34, %v12689_v35  ;;  %v12799_v38 = vld [vmem:[#allocation4 + $0x7a8] sm:$0xf]  ;;  %v12951_v35 = vld [vmem:[#allocation4 + $0x8e0] sm:$0xf] }
 0x199   : > { %2500 = vmatpush.bf16.msrb.mxu2 %v12656_v39  ;;  %v1529_v16 = vadd.f32 %v1528_v47, %v718_v42  ;;  %v17694_v39 = vld [vmem:[#allocation4 + $0x7b4] sm:$0xf0] }
 0x19a   : > { %v12800_v42 = vor.u32 %v17694_v39, %v12799_v38  ;;  %v17690_v47 = vld [vmem:[#allocation4 + $0x794] sm:$0xf0]  ;;  %v12753_v38 = vld [vmem:[#allocation4 + $0x758] sm:$0xf0] }
 0x19b   : > { %2531 = vmatmul.bf16.vlgmr.msra.gmra.mxu0 %v19351_v25  ;;  %2453 = vmatmul.bf16.vlgmr.msra.gmra.mxu2 %v19362_v10  ;;  %v1542_v56 = vadd.f32 %v1541_v48, %v1529_v16  ;;  %v17656_v48 = vld [vmem:[#allocation4 + $0x68c] sm:$0xf]  ;;  %v17686_v16 = vld [vmem:[#allocation4 + $0x774] sm:$0xf0] }
 0x19c   : > { %2540 = vmatpush.bf16.msra.mxu1 %v12516_v49  ;;  %v12657_v49 = vld [vmem:[#allocation4 + $0x698] sm:$0xf0]  ;;  %v12768_v53 = vor.u32 %v17686_v16, %v12767_v52  ;;  %v17725_v52 = vld [vmem:[#allocation4 + $0x8ac] sm:$0xf0] }
 0x19d   : > { %2501 = vmatpush.bf16.msrb.mxu2 %v12640_v50  ;;  %v12784_v50 = vor.u32 %v17690_v47, %v12783_v44  ;;  %v12660_v51 = vor.u32 %v17656_v48, %v12657_v49  ;;  %v17672_v44 = vld [vmem:[#allocation4 + $0x70c] sm:$0xf]  ;;  %v12721_v47 = vld [vmem:[#allocation4 + $0x718] sm:$0xf0]  ;;  %v12935_v48 = vld [vmem:[#allocation4 + $0x8c0] sm:$0xf] }
 0x19e   : > { %v17729_v49 = vld [vmem:[#allocation4 + $0x8cc] sm:$0xf0]  ;;  %v12724_v16 = vor.u32 %v17672_v44, %v12721_v47  ;;  %v13191_v47 = vld [vmem:[#allocation4 + $0xac0] sm:$0xf] }
 0x1a0   : > { %v1554_v58 = vpop.f32.mrf.mxu2  ;;  %v1567_v62 = vpop.f32.mrf.mxu3  ;;  %2541 = vmatpush.bf16.msra.mxu1 %v12500_v61 }
 0x1a1   : > { %v1555_v2 = vadd.f32 %v1554_v58, %v1542_v56  ;;  %v1530_v25 = vpop.f32.mrf.mxu0  ;;  %v1543_v3 = vpop.f32.mrf.mxu1  ;;  %2502 = vmatpush.bf16.msrb.mxu2 %v12624_v54  ;;  %v12751_v54 = vld [vmem:[#allocation4 + $0x748] sm:$0xf]  ;;  %v12625_v56 = vld [vmem:[#allocation4 + $0x658] sm:$0xf0] }
 0x1a2   : > { %v12752_v22 = vor.u32 %v17682_v55, %v12751_v54  ;;  %v12628_v57 = vor.u32 %v17648_v21, %v12625_v56  ;;  %v12735_v58 = vld [vmem:[#allocation4 + $0x728] sm:$0xf]  ;;  %v12609_v25 = vld [vmem:[#allocation4 + $0x638] sm:$0xf0]  ;;  %v12887_v54 = vld [vmem:[#allocation4 + $0x860] sm:$0xf] }
 0x1a3   : > { %v1568_v5 = vadd.f32 %v1567_v62, %v1555_v2  ;;  %v17678_v62 = vld [vmem:[#allocation4 + $0x734] sm:$0xf0]  ;;  %v17644_v2 = vld [vmem:[#allocation4 + $0x62c] sm:$0xf]  ;;  %v17717_v21 = vld [vmem:[#allocation4 + $0x86c] sm:$0xf0] }
 0x1a4   : > { %2542 = vmatpush.bf16.msra.mxu1 %v12484_v4  ;;  %v12736_v3 = vor.u32 %v17678_v62, %v12735_v58  ;;  %v12612_v4 = vor.u32 %v17644_v2, %v12609_v25  ;;  %v13079_v56 = vld [vmem:[#allocation4 + $0x9e0] sm:$0xf]  ;;  %v12888_v58 = vor.u32 %v17717_v21, %v12887_v54  ;;  %v17789_v21 = vld [vmem:[#allocation4 + $0xaac] sm:$0xf0] }
 0x1a5   : > { %vm1574_vm9 = vcmp.gt.f32.partialorder %v1568_v5, 0.0  ;;  %v1578_v20 = vmul.f32 0.2, %v1568_v5  ;;  %2503 = vmatpush.bf16.msrb.mxu2 %v12608_v8  ;;  %v12719_v8 = vld [vmem:[#allocation4 + $0x708] sm:$0xf] }
 0x1a6   : > { %v12720_v14 = vor.u32 %v17674_v9, %v12719_v8  ;;  %v12871_v25 = vld [vmem:[#allocation4 + $0x840] sm:$0xf]  ;;  %v17761_v9 = vld [vmem:[#allocation4 + $0x9cc] sm:$0xf0] }
 0x1a7   : > { %v1582_v26 = vsel %vm1574_vm9, %v1568_v5, %v1578_v20  ;;  %v12593_v5 = vld [vmem:[#allocation4 + $0x618] sm:$0xf0] }
 0x1a8   : > { %v19369_v29 = vpack.c.bf16 %v1582_v26, %v1582_v26  ;;  %v1556_v31 = vpop.f32.mrf.mxu2  ;;  %v1569_v32 = vpop.f32.mrf.mxu3  ;;  %2543 = vmatpush.bf16.msra.mxu1 %v12468_v23  ;;  %v12596_v15 = vor.u32 %v17640_v11, %v12593_v5  ;;  %v12817_v20 = vld [vmem:[#allocation4 + $0x7d8] sm:$0xf0]  ;;  %v12855_v5 = vld [vmem:[#allocation4 + $0x820] sm:$0xf] }
 0x1a9   : > { %2504 = vmatpush.bf16.msrb.mxu2 %v12592_v24  ;;  %v12820_v23 = vor.u32 %v17696_v19, %v12817_v20  ;;  %v17692_v24 = vld [vmem:[#allocation4 + $0x7ac] sm:$0xf]  ;;  %v12801_v26 = vld [vmem:[#allocation4 + $0x7b8] sm:$0xf0]  ;;  %v12839_v20 = vld [vmem:[#allocation4 + $0x800] sm:$0xf] }
 0x1aa   : > { %2414 = vmatmul.bf16.vlgmr.msrb.gmra.mxu3 %v19369_v29  ;;  %v17684_v32 = vld [vmem:[#allocation4 + $0x76c] sm:$0xf] }
 0x1ab   : > { %2510 = vmatpush.bf16.msrb.mxu3 %v12832_v1  ;;  %2544 = vmatmul.bf16.vlgmr.msra.gmra.mxu1 %v19355_v30  ;;  %v17652_v30 = vld [vmem:[#allocation4 + $0x66c] sm:$0xf]  ;;  %v12804_v1 = vor.u32 %v17692_v24, %v12801_v26  ;;  %v12772_v34 = vor.u32 %v17684_v32, %v12769_v33  ;;  %v13031_v24 = vld [vmem:[#allocation4 + $0x980] sm:$0xf] }
 0x1ac   : > { %2505 = vmatmul.bf16.vlgmr.msrb.gmra.mxu2 %v19362_v10  ;;  %v12644_v61 = vor.u32 %v17652_v30, %v12641_v17  ;;  %v13015_v33 = vld [vmem:[#allocation4 + $0x960] sm:$0xf] }
 0x1ad   : > { %2549 = vmatpush.bf16.msra.mxu2 %v12708_v27  ;;  %v17688_v27 = vld [vmem:[#allocation4 + $0x78c] sm:$0xf] }
 0x1ae   : > { %v12788_v31 = vor.u32 %v17688_v27, %v12785_v28  ;;  %v17731_v28 = vld [vmem:[#allocation4 + $0x8e4] sm:$0xf] }
 0x1af   : > { %2511 = vmatpush.bf16.msrb.mxu3 %v12816_v36  ;;  %v17733_v36 = vld [vmem:[#allocation4 + $0x8ec] sm:$0xf0] }
 0x1b0   : > { %v12952_v39 = vor.u32 %v17733_v36, %v12951_v35  ;;  %v13207_v36 = vld [vmem:[#allocation4 + $0xae0] sm:$0xf] }
 0x1b1   : > { %2550 = vmatpush.bf16.msra.mxu2 %v12692_v37  ;;  %v17680_v37 = vld [vmem:[#allocation4 + $0x74c] sm:$0xf] }
 0x1b2   : > { %3371 = vmatpush.bf16.msrb.mxu0 %v12952_v39 }
 0x1b3   : > { %2512 = vmatpush.bf16.msrb.mxu3 %v12800_v42 }
 0x1b5   : > { %2551 = vmatpush.bf16.msra.mxu2 %v12676_v43  ;;  %v12740_v43 = vor.u32 %v17676_v40, %v12737_v41  ;;  %v12937_v40 = vld [vmem:[#allocation4 + $0x8d0] sm:$0xf0]  ;;  %v12999_v41 = vld [vmem:[#allocation4 + $0x940] sm:$0xf] }
 0x1b7   : > { %2513 = vmatpush.bf16.msrb.mxu3 %v12784_v50  ;;  %v12936_v50 = vor.u32 %v17729_v49, %v12935_v48  ;;  %v17793_v48 = vld [vmem:[#allocation4 + $0xacc] sm:$0xf0] }
 0x1b9   : > { %2552 = vmatpush.bf16.msra.mxu2 %v12660_v51  ;;  %v12919_v51 = vld [vmem:[#allocation4 + $0x8a0] sm:$0xf]  ;;  %3372 = vmatpush.bf16.msrb.mxu0 %v12936_v50  ;;  %v13192_v50 = vor.u32 %v17793_v48, %v13191_v47  ;;  %v17773_v47 = vld [vmem:[#allocation4 + $0xa2c] sm:$0xf0] }
 0x1ba   : > { %2466 = vmatmul.bf16.vlgmr.msra.gmra.mxu3 %v19369_v29  ;;  %v12920_v30 = vor.u32 %v17725_v52, %v12919_v51  ;;  %v17723_v52 = vld [vmem:[#allocation4 + $0x8a4] sm:$0xf] }
 0x1bb   : > { %2514 = vmatpush.bf16.msrb.mxu3 %v12768_v53  ;;  %v12903_v53 = vld [vmem:[#allocation4 + $0x880] sm:$0xf] }
 0x1bd   : > { %2553 = vmatpush.bf16.msra.mxu2 %v12644_v61  ;;  %3373 = vmatpush.bf16.msrb.mxu0 %v12920_v30  ;;  %v17721_v61 = vld [vmem:[#allocation4 + $0x88c] sm:$0xf0] }
 0x1be   : > { %v12904_v55 = vor.u32 %v17721_v61, %v12903_v53  ;;  %v17741_v53 = vld [vmem:[#allocation4 + $0x92c] sm:$0xf0]  ;;  %v13175_v61 = vld [vmem:[#allocation4 + $0xaa0] sm:$0xf] }
 0x1bf   : > { %2515 = vmatpush.bf16.msrb.mxu3 %v12752_v22  ;;  %v17765_v22 = vld [vmem:[#allocation4 + $0x9ec] sm:$0xf0] }
 0x1c1   : > { %2554 = vmatpush.bf16.msra.mxu2 %v12628_v57  ;;  %v13080_v57 = vor.u32 %v17765_v22, %v13079_v56  ;;  %3374 = vmatpush.bf16.msrb.mxu0 %v12904_v55  ;;  %v17719_v56 = vld [vmem:[#allocation4 + $0x884] sm:$0xf]  ;;  %v12905_v22 = vld [vmem:[#allocation4 + $0x890] sm:$0xf0] }
 0x1c3   : > { %2516 = vmatpush.bf16.msrb.mxu3 %v12736_v3  ;;  %3384 = vmatpush.bf16.msrb.mxu1 %v13080_v57  ;;  %v17713_v3 = vld [vmem:[#allocation4 + $0x84c] sm:$0xf0]  ;;  %v13176_v57 = vor.u32 %v17789_v21, %v13175_v61  ;;  %v13095_v61 = vld [vmem:[#allocation4 + $0xa00] sm:$0xf] }
 0x1c4   : > { %v12872_v8 = vor.u32 %v17713_v3, %v12871_v25  ;;  %v12967_v25 = vld [vmem:[#allocation4 + $0x900] sm:$0xf]  ;;  %v17737_v3 = vld [vmem:[#allocation4 + $0x90c] sm:$0xf0] }
 0x1c5   : > { %2555 = vmatpush.bf16.msra.mxu2 %v12612_v4  ;;  %3375 = vmatpush.bf16.msrb.mxu0 %v12888_v58  ;;  %v13063_v4 = vld [vmem:[#allocation4 + $0x9c0] sm:$0xf]  ;;  %v12908_v58 = vor.u32 %v17719_v56, %v12905_v22  ;;  %v17829_v56 = vld [vmem:[#allocation4 + $0xbec] sm:$0xf0]  ;;  %v17747_v22 = vld [vmem:[#allocation4 + $0x964] sm:$0xf] }
 0x1c6   : > { %v13064_v11 = vor.u32 %v17761_v9, %v13063_v4  ;;  %v13159_v4 = vld [vmem:[#allocation4 + $0xa80] sm:$0xf]  ;;  %v17785_v9 = vld [vmem:[#allocation4 + $0xa8c] sm:$0xf0] }
 0x1c7   : > { %2517 = vmatpush.bf16.msrb.mxu3 %v12720_v14  ;;  %v12856_v14 = vor.u32 %v17709_v12, %v12855_v5  ;;  %v13160_v5 = vor.u32 %v17785_v9, %v13159_v4  ;;  %v17715_v12 = vld [vmem:[#allocation4 + $0x864] sm:$0xf] }
 0x1c8   : > { %3385 = vmatpush.bf16.msrb.mxu1 %v13064_v11  ;;  %v12968_v11 = vor.u32 %v17737_v3, %v12967_v25  ;;  %v17795_v4 = vld [vmem:[#allocation4 + $0xae4] sm:$0xf] }
 0x1c9   : > { %2556 = vmatpush.bf16.msra.mxu2 %v12596_v15  ;;  %3376 = vmatpush.bf16.msrb.mxu0 %v12872_v8  ;;  %v17757_v15 = vld [vmem:[#allocation4 + $0x9ac] sm:$0xf0] }
 0x1ca   : > { %2518 = vmatmul.bf16.vlgmr.msrb.gmra.mxu3 %v19369_v29 }
 0x1cb   : > { %2562 = vmatpush.bf16.msra.mxu3 %v12836_v18  ;;  %v13048_v18 = vor.u32 %v17757_v15, %v13047_v13  ;;  %v12889_v13 = vld [vmem:[#allocation4 + $0x870] sm:$0xf0] }
 0x1cc   : > { %2557 = vmatmul.bf16.vlgmr.msra.gmra.mxu2 %v19362_v10  ;;  %v12756_v10 = vor.u32 %v17680_v37, %v12753_v38  ;;  %v17797_v37 = vld [vmem:[#allocation4 + $0xaec] sm:$0xf0]  ;;  %v17727_v38 = vld [vmem:[#allocation4 + $0x8c4] sm:$0xf]  ;;  %v13081_v15 = vld [vmem:[#allocation4 + $0x9f0] sm:$0xf0] }
 0x1cd   : > { %3377 = vmatpush.bf16.msrb.mxu0 %v12856_v14  ;;  %3386 = vmatpush.bf16.msrb.mxu1 %v13048_v18  ;;  %v12940_v44 = vor.u32 %v17727_v38, %v12937_v40  ;;  %v12892_v14 = vor.u32 %v17715_v12, %v12889_v13  ;;  %v17755_v38 = vld [vmem:[#allocation4 + $0x9a4] sm:$0xf]  ;;  %v13049_v40 = vld [vmem:[#allocation4 + $0x9b0] sm:$0xf0]  ;;  %v17825_v12 = vld [vmem:[#allocation4 + $0xbcc] sm:$0xf0] }
 0x1cf   : > { %2563 = vmatpush.bf16.msra.mxu3 %v12820_v23  ;;  %v17705_v23 = vld [vmem:[#allocation4 + $0x80c] sm:$0xf0] }
 0x1d0   : > { %v12840_v26 = vor.u32 %v17705_v23, %v12839_v20  ;;  %v17781_v20 = vld [vmem:[#allocation4 + $0xa6c] sm:$0xf0] }
 0x1d2   : > { %3378 = vmatpush.bf16.msrb.mxu0 %v12840_v26  ;;  %v12873_v26 = vld [vmem:[#allocation4 + $0x850] sm:$0xf0] }
 0x1d3   : > { %2564 = vmatpush.bf16.msra.mxu3 %v12804_v1  ;;  %v17753_v1 = vld [vmem:[#allocation4 + $0x98c] sm:$0xf0] }
 0x1d4   : > { %v13032_v27 = vor.u32 %v17753_v1, %v13031_v24  ;;  %v17711_v24 = vld [vmem:[#allocation4 + $0x844] sm:$0xf] }
 0x1d5   : > { %v17759_v1 = vld [vmem:[#allocation4 + $0x9c4] sm:$0xf] }
 0x1d6   : > { %v19377_v42 = vpop.f32.mrf.mxu0  ;;  %3387 = vmatpush.bf16.msrb.mxu1 %v13032_v27  ;;  %v12876_v27 = vor.u32 %v17711_v24, %v12873_v26  ;;  %v17821_v24 = vld [vmem:[#allocation4 + $0xbac] sm:$0xf0] }
 0x1d7   : > { %2565 = vmatpush.bf16.msra.mxu3 %v12788_v31  ;;  %v12953_v31 = vld [vmem:[#allocation4 + $0x8f0] sm:$0xf0] }
 0x1d8   : > { %v12956_v32 = vor.u32 %v17731_v28, %v12953_v31  ;;  %v13065_v28 = vld [vmem:[#allocation4 + $0x9d0] sm:$0xf0] }
 0x1da   : > { %3423 = vmatpush.bf16.msra.mxu0 %v12956_v32  ;;  %v13068_v32 = vor.u32 %v17759_v1, %v13065_v28  ;;  %v17739_v1 = vld [vmem:[#allocation4 + $0x924] sm:$0xf] }
 0x1db   : > { %2566 = vmatpush.bf16.msra.mxu3 %v12772_v34  ;;  %v17749_v34 = vld [vmem:[#allocation4 + $0x96c] sm:$0xf0]  ;;  %v17787_v28 = vld [vmem:[#allocation4 + $0xaa4] sm:$0xf] }
 0x1dc   : > { %v13016_v35 = vor.u32 %v17749_v34, %v13015_v33  ;;  %v13127_v33 = vld [vmem:[#allocation4 + $0xa40] sm:$0xf]  ;;  %v17777_v34 = vld [vmem:[#allocation4 + $0xa4c] sm:$0xf0] }
 0x1de   : > { %v2378_v17 = vpop.f32.mrf.mxu0  ;;  %3388 = vmatpush.bf16.msrb.mxu1 %v13016_v35  ;;  %3424 = vmatpush.bf16.msra.mxu0 %v12940_v44  ;;  %v13128_v35 = vor.u32 %v17777_v34, %v13127_v33  ;;  %v13111_v44 = vld [vmem:[#allocation4 + $0xa20] sm:$0xf]  ;;  %v13177_v34 = vld [vmem:[#allocation4 + $0xab0] sm:$0xf0] }
 0x1df   : > { %2567 = vmatpush.bf16.msra.mxu3 %v12756_v10  ;;  %v13208_v10 = vor.u32 %v17797_v37, %v13207_v36  ;;  %v12983_v17 = vld [vmem:[#allocation4 + $0x920] sm:$0xf]  ;;  %v17707_v36 = vld [vmem:[#allocation4 + $0x824] sm:$0xf]  ;;  %v12857_v37 = vld [vmem:[#allocation4 + $0x830] sm:$0xf0]  ;;  %v13112_v48 = vor.u32 %v17773_v47, %v13111_v44 }
 0x1e0   : > { %v12984_v55 = vor.u32 %v17741_v53, %v12983_v17  ;;  %v12969_v44 = vld [vmem:[#allocation4 + $0x910] sm:$0xf0]  ;;  %v17783_v47 = vld [vmem:[#allocation4 + $0xa84] sm:$0xf] }
 0x1e1   : > { %3397 = vmatpush.bf16.msrb.mxu2 %v13208_v10  ;;  %v12860_v10 = vor.u32 %v17707_v36, %v12857_v37  ;;  %v13180_v37 = vor.u32 %v17787_v28, %v13177_v34  ;;  %v17801_v28 = vld [vmem:[#allocation4 + $0xb0c] sm:$0xf0] }
 0x1e3   : > { %2568 = vmatpush.bf16.msra.mxu3 %v12740_v43  ;;  %v17745_v43 = vld [vmem:[#allocation4 + $0x94c] sm:$0xf0] }
 0x1e4   : > { %v13000_v51 = vor.u32 %v17745_v43, %v12999_v41  ;;  %v13052_v43 = vor.u32 %v17755_v38, %v13049_v40  ;;  %v13287_v38 = vld [vmem:[#allocation4 + $0xb80] sm:$0xf] }
 0x1e5   : > { %3398 = vmatpush.bf16.msrb.mxu2 %v13192_v50  ;;  %v17703_v50 = vld [vmem:[#allocation4 + $0x804] sm:$0xf] }
 0x1e6   : > { %v19380_v62 = vpop.f32.mrf.mxu0  ;;  %3389 = vmatpush.bf16.msrb.mxu1 %v13000_v51  ;;  %v12841_v51 = vld [vmem:[#allocation4 + $0x810] sm:$0xf0] }
 0x1e7   : > { %2569 = vmatpush.bf16.msra.mxu3 %v12724_v16  ;;  %v12921_v16 = vld [vmem:[#allocation4 + $0x8b0] sm:$0xf0] }
 0x1e8   : > { %v19382_v2 = vpop.f32.mrf.mxu1  ;;  %v12924_v30 = vor.u32 %v17723_v52, %v12921_v16  ;;  %v17751_v52 = vld [vmem:[#allocation4 + $0x984] sm:$0xf]  ;;  %v12844_v16 = vor.u32 %v17703_v50, %v12841_v51  ;;  %v13161_v50 = vld [vmem:[#allocation4 + $0xa90] sm:$0xf0] }
 0x1e9   : > { %3399 = vmatpush.bf16.msrb.mxu2 %v13176_v57  ;;  %v13017_v57 = vld [vmem:[#allocation4 + $0x970] sm:$0xf0] }
 0x1ea   : > { %2570 = vmatmul.bf16.vlgmr.msra.gmra.mxu3 %v19369_v29  ;;  %3425 = vmatpush.bf16.msra.mxu0 %v12924_v30  ;;  %v13033_v30 = vld [vmem:[#allocation4 + $0x990] sm:$0xf0]  ;;  %v13020_v3 = vor.u32 %v17747_v22, %v13017_v57  ;;  %v13255_v22 = vld [vmem:[#allocation4 + $0xb40] sm:$0xf]  ;;  %v17809_v57 = vld [vmem:[#allocation4 + $0xb4c] sm:$0xf0] }
 0x1eb   : > { %3390 = vmatpush.bf16.msrb.mxu1 %v12984_v55  ;;  %v13036_v53 = vor.u32 %v17751_v52, %v13033_v30  ;;  %v13335_v55 = vld [vmem:[#allocation4 + $0xbe0] sm:$0xf]  ;;  %v13164_v52 = vor.u32 %v17783_v47, %v13161_v50  ;;  %v17813_v30 = vld [vmem:[#allocation4 + $0xb6c] sm:$0xf0] }
 0x1ec   : > { %v13336_v25 = vor.u32 %v17829_v56, %v13335_v55 }
 0x1ed   : > { %3400 = vmatpush.bf16.msrb.mxu2 %v13160_v5  ;;  %v13319_v5 = vld [vmem:[#allocation4 + $0xbc0] sm:$0xf] }
 0x1ee   : > { %v2430_v29 = vpop.f32.mrf.mxu0  ;;  %3426 = vmatpush.bf16.msra.mxu0 %v12908_v58  ;;  %3410 = vmatpush.bf16.msrb.mxu3 %v13336_v25  ;;  %v13320_v13 = vor.u32 %v17825_v12, %v13319_v5  ;;  %v13239_v12 = vld [vmem:[#allocation4 + $0xb20] sm:$0xf] }
 0x1ef   : > { %v17763_v29 = vld [vmem:[#allocation4 + $0x9e4] sm:$0xf]  ;;  %3391 = vmatpush.bf16.msrb.mxu1 %v12968_v11 }
 0x1f0   : > { %v2391_v19 = vpop.f32.mrf.mxu1  ;;  %v13084_v18 = vor.u32 %v17763_v29, %v13081_v15  ;;  %v17743_v29 = vld [vmem:[#allocation4 + $0x944] sm:$0xf] }
 0x1f1   : > { %v13143_v19 = vld [vmem:[#allocation4 + $0xa60] sm:$0xf]  ;;  %v17791_v15 = vld [vmem:[#allocation4 + $0xac4] sm:$0xf] }
 0x1f2   : > { %3427 = vmatpush.bf16.msra.mxu0 %v12892_v14  ;;  %v13144_v23 = vor.u32 %v17781_v20, %v13143_v19  ;;  %v13001_v14 = vld [vmem:[#allocation4 + $0x950] sm:$0xf0]  ;;  %3411 = vmatpush.bf16.msrb.mxu3 %v13320_v13  ;;  %v17805_v13 = vld [vmem:[#allocation4 + $0xb2c] sm:$0xf0] }
 0x1f3   : > { %3436 = vmatpush.bf16.msra.mxu1 %v13084_v18  ;;  %v13004_v18 = vor.u32 %v17743_v29, %v13001_v14  ;;  %v13193_v19 = vld [vmem:[#allocation4 + $0xad0] sm:$0xf0]  ;;  %v13240_v29 = vor.u32 %v17805_v13, %v13239_v12  ;;  %v17771_v14 = vld [vmem:[#allocation4 + $0xa24] sm:$0xf]  ;;  %v13087_v12 = vld [vmem:[#allocation4 + $0x9e8] sm:$0xf] }
 0x1f4   : > { %3401 = vmatpush.bf16.msrb.mxu2 %v13144_v23  ;;  %v13196_v20 = vor.u32 %v17791_v15, %v13193_v19  ;;  %v13303_v23 = vld [vmem:[#allocation4 + $0xba0] sm:$0xf]  ;;  %v13113_v15 = vld [vmem:[#allocation4 + $0xa30] sm:$0xf0]  ;;  %v17734_v19 = vld [vmem:[#allocation4 + $0x8f4] sm:$0xf0] }
 0x1f5   : > { %v13304_v26 = vor.u32 %v17821_v24, %v13303_v23  ;;  %v17766_v13 = vld [vmem:[#allocation4 + $0x9f4] sm:$0xf0] }
 0x1f6   : > { %3428 = vmatpush.bf16.msra.mxu0 %v12876_v27  ;;  %v12985_v27 = vld [vmem:[#allocation4 + $0x930] sm:$0xf0] }
 0x1f7   : > { %3437 = vmatpush.bf16.msra.mxu1 %v13068_v32  ;;  %v12988_v33 = vor.u32 %v17739_v1, %v12985_v27  ;;  %3412 = vmatpush.bf16.msrb.mxu3 %v13304_v26  ;;  %v12943_v26 = vld [vmem:[#allocation4 + $0x8c8] sm:$0xf] }
 0x1f8   : > { %v19384_v39 = vpop.f32.mrf.mxu0  ;;  %v19386_v49 = vpop.f32.mrf.mxu1  ;;  %3402 = vmatpush.bf16.msrb.mxu2 %v13128_v35  ;;  %v19394_v35 = vld [vmem:[#allocation10 + $0x1] ss:$8 sm:$0xf] }
 0x1f9   : > { %v1719_v51 = vperm.slane %v19394_v35, 0 }
 0x1fa   : > { %3429 = vmatpush.bf16.msra.mxu0 %v12860_v10  ;;  %v17817_v10 = vld [vmem:[#allocation4 + $0xb8c] sm:$0xf0] }
 0x1fb   : > { %3438 = vmatpush.bf16.msra.mxu1 %v13052_v43  ;;  %v13288_v40 = vor.u32 %v17817_v10, %v13287_v38  ;;  %v17735_v43 = vld [vmem:[#allocation4 + $0x904] sm:$0xf]  ;;  %v2377_v55 = vadd.f32 %v19377_v42, %v1719_v51  ;;  %v12927_v51 = vld [vmem:[#allocation4 + $0x8a8] sm:$0xf] }
 0x1fc   : > { %3403 = vmatpush.bf16.msrb.mxu2 %v13112_v48  ;;  %v12972_v48 = vor.u32 %v17735_v43, %v12969_v44  ;;  %v13337_v43 = vld [vmem:[#allocation4 + $0xbf0] sm:$0xf0]  ;;  %v1720_v44 = vperm.slane %v19394_v35, 1 }
 0x1fd   : > { %3413 = vmatpush.bf16.msrb.mxu3 %v13288_v40  ;;  %v2390_v25 = vadd.f32 %v19382_v2, %v2377_v55  ;;  %v17827_v40 = vld [vmem:[#allocation4 + $0xbe4] sm:$0xf] }
 0x1fe   : > { %3430 = vmatpush.bf16.msra.mxu0 %v12844_v16  ;;  %v13271_v16 = vld [vmem:[#allocation4 + $0xb60] sm:$0xf]  ;;  %v13340_v47 = vor.u32 %v17827_v40, %v13337_v43  ;;  %v13055_v40 = vld [vmem:[#allocation4 + $0x9a8] sm:$0xf]  ;;  %v17758_v43 = vld [vmem:[#allocation4 + $0x9b4] sm:$0xf0] }
 0x1ff   : > { %3439 = vmatpush.bf16.msra.mxu1 %v13036_v53  ;;  %v17779_v53 = vld [vmem:[#allocation4 + $0xa64] sm:$0xf] }
 0x200   : > { %v2482_v54 = vpop.f32.mrf.mxu0  ;;  %v2443_v8 = vpop.f32.mrf.mxu1 }
 0x201   : > { %v17769_v54 = vld [vmem:[#allocation4 + $0xa0c] sm:$0xf0]  ;;  %v13209_v8 = vld [vmem:[#allocation4 + $0xaf0] sm:$0xf0] }
 0x202   : > { %v13096_v21 = vor.u32 %v17769_v54, %v13095_v61  ;;  %v13212_v11 = vor.u32 %v17795_v4, %v13209_v8  ;;  %v13145_v61 = vld [vmem:[#allocation4 + $0xa70] sm:$0xf0]  ;;  %v17775_v4 = vld [vmem:[#allocation4 + $0xa44] sm:$0xf] }
 0x203   : > { %3440 = vmatpush.bf16.msra.mxu1 %v13020_v3  ;;  %v13148_v54 = vor.u32 %v17779_v53, %v13145_v61  ;;  %v13256_v3 = vor.u32 %v17809_v57, %v13255_v22  ;;  %v13129_v8 = vld [vmem:[#allocation4 + $0xa50] sm:$0xf0]  ;;  %v17722_v22 = vld [vmem:[#allocation4 + $0x894] sm:$0xf0]  ;;  %v17819_v57 = vld [vmem:[#allocation4 + $0xba4] sm:$0xf] }
 0x204   : > { %3404 = vmatpush.bf16.msrb.mxu2 %v13096_v21 }
 0x207   : > { %3441 = vmatpush.bf16.msra.mxu1 %v13004_v18  ;;  %v12959_v18 = vld [vmem:[#allocation4 + $0x8e8] sm:$0xf] }
 0x208   : > { %v19388_v31 = vpop.f32.mrf.mxu1  ;;  %3449 = vmatpush.bf16.msra.mxu2 %v13212_v11  ;;  %v12960_v27 = vor.u32 %v17734_v19, %v12959_v18  ;;  %v13088_v19 = vor.u32 %v17766_v13, %v13087_v12  ;;  %v17728_v13 = vld [vmem:[#allocation4 + $0x8cc] sm:$0xf] }
 0x20b   : > { %3442 = vmatpush.bf16.msra.mxu1 %v12988_v33  ;;  %v13097_v33 = vld [vmem:[#allocation4 + $0xa10] sm:$0xf0] }
 0x20c   : > { %3450 = vmatpush.bf16.msra.mxu2 %v13196_v20  ;;  %v13116_v20 = vor.u32 %v17771_v14, %v13113_v15 }
 0x20e   : > { %v19390_v41 = vpop.f32.mrf.mxu2 }
 0x20f   : > { %3443 = vmatpush.bf16.msra.mxu1 %v12972_v48  ;;  %v2403_v11 = vadd.f32 %v19390_v41, %v2390_v25  ;;  %v13223_v41 = vld [vmem:[#allocation4 + $0xb00] sm:$0xf]  ;;  %v13305_v25 = vld [vmem:[#allocation4 + $0xbb0] sm:$0xf0] }
 0x210   : > { %v2495_v17 = vpop.f32.mrf.mxu1  ;;  %3451 = vmatpush.bf16.msra.mxu2 %v13180_v37  ;;  %v17730_v37 = vld [vmem:[#allocation4 + $0x8d4] sm:$0xf0]  ;;  %v13224_v38 = vor.u32 %v17801_v28, %v13223_v41  ;;  %v17811_v41 = vld [vmem:[#allocation4 + $0xb64] sm:$0xf] }
 0x211   : > { %v13272_v17 = vor.u32 %v17813_v30, %v13271_v16  ;;  %v12944_v50 = vor.u32 %v17730_v37, %v12943_v26  ;;  %v17823_v16 = vld [vmem:[#allocation4 + $0xbc4] sm:$0xf]  ;;  %v13321_v30 = vld [vmem:[#allocation4 + $0xbd0] sm:$0xf0]  ;;  %v17762_v26 = vld [vmem:[#allocation4 + $0x9d4] sm:$0xf0] }
 0x212   : > { %v13324_v61 = vor.u32 %v17823_v16, %v13321_v30  ;;  %v13056_v16 = vor.u32 %v17758_v43, %v13055_v40  ;;  %v12847_v30 = vld [vmem:[#allocation4 + $0x808] sm:$0xf]  ;;  %v17742_v43 = vld [vmem:[#allocation4 + $0x934] sm:$0xf0] }
 0x213   : > { %3414 = vmatpush.bf16.msrb.mxu3 %v13272_v17  ;;  %v2429_v17 = vadd.f32 %v19380_v62, %v1720_v44  ;;  %v17718_v62 = vld [vmem:[#allocation4 + $0x874] sm:$0xf0]  ;;  %v17807_v44 = vld [vmem:[#allocation4 + $0xb44] sm:$0xf]  ;;  %v12991_v40 = vld [vmem:[#allocation4 + $0x928] sm:$0xf] }
 0x214   : > { %3452 = vmatpush.bf16.msra.mxu2 %v13164_v52  ;;  %v17726_v52 = vld [vmem:[#allocation4 + $0x8b4] sm:$0xf0] }
 0x215   : > { %v12928_v55 = vor.u32 %v17726_v52, %v12927_v51 }
 0x216   : > { %v2404_v9 = vpop.f32.mrf.mxu2 }
 0x217   : > { %v13132_v9 = vor.u32 %v17775_v4, %v13129_v8  ;;  %3415 = vmatpush.bf16.msrb.mxu3 %v13256_v3  ;;  %v13308_v4 = vor.u32 %v17819_v57, %v13305_v25  ;;  %v12961_v57 = vld [vmem:[#allocation4 + $0x8f8] sm:$0xf0] }
 0x218   : > { %v19392_v58 = vpop.f32.mrf.mxu0  ;;  %3453 = vmatpush.bf16.msra.mxu2 %v13148_v54  ;;  %v2442_v54 = vadd.f32 %v19386_v49, %v2429_v17  ;;  %v17815_v49 = vld [vmem:[#allocation4 + $0xb84] sm:$0xf]  ;;  %v17706_v17 = vld [vmem:[#allocation4 + $0x814] sm:$0xf0] }
 0x21b   : > { %3416 = vmatpush.bf16.msrb.mxu3 %v13240_v29 }
 0x21c   : > { %3454 = vmatpush.bf16.msra.mxu2 %v13132_v9 }
 0x21e   : > { %v19396_v36 = vpop.f32.mrf.mxu2 }
 0x21f   : > { %3417 = vmatpush.bf16.msrb.mxu3 %v13224_v38  ;;  %v2455_v3 = vadd.f32 %v19396_v36, %v2442_v54  ;;  %v12879_v36 = vld [vmem:[#allocation4 + $0x848] sm:$0xf]  ;;  %v17803_v54 = vld [vmem:[#allocation4 + $0xb24] sm:$0xf] }
 0x220   : > { %v2534_v32 = vpop.f32.mrf.mxu0  ;;  %3455 = vmatpush.bf16.msra.mxu2 %v13116_v20  ;;  %v17714_v20 = vld [vmem:[#allocation4 + $0x854] sm:$0xf0]  ;;  %v12863_v38 = vld [vmem:[#allocation4 + $0x828] sm:$0xf] }
 0x221   : > { %v17767_v32 = vld [vmem:[#allocation4 + $0xa04] sm:$0xf] }
 0x222   : > { %v13100_v10 = vor.u32 %v17767_v32, %v13097_v33  ;;  %v12880_v33 = vor.u32 %v17714_v20, %v12879_v36 }
 0x223   : > { %3462 = vmatpush.bf16.msra.mxu3 %v13340_v47  ;;  %v13257_v47 = vld [vmem:[#allocation4 + $0xb50] sm:$0xf0] }
 0x224   : > { %3456 = vmatpush.bf16.msra.mxu2 %v13100_v10  ;;  %v17710_v10 = vld [vmem:[#allocation4 + $0x834] sm:$0xf0] }
 0x225   : > { %v12864_v52 = vor.u32 %v17710_v10, %v12863_v38 }
 0x226   : > { %v2456_v21 = vpop.f32.mrf.mxu2 }
 0x227   : > { %v12911_v21 = vld [vmem:[#allocation4 + $0x888] sm:$0xf]  ;;  %3463 = vmatpush.bf16.msra.mxu3 %v13324_v61  ;;  %v17754_v61 = vld [vmem:[#allocation4 + $0x994] sm:$0xf0] }
 0x228   : > { %v19400_v56 = vpop.f32.mrf.mxu1 }
 0x22b   : > { %3464 = vmatpush.bf16.msra.mxu3 %v13308_v4 }
 0x22d   : > { %v2415_v5 = vpop.f32.mrf.mxu3 }
 0x22e   : > { %v2416_v42 = vadd.f32 %v2415_v5, %v2403_v11  ;;  %v12912_v11 = vor.u32 %v17722_v22, %v12911_v21  ;;  %v12895_v5 = vld [vmem:[#allocation4 + $0x868] sm:$0xf]  ;;  %v17732_v22 = vld [vmem:[#allocation4 + $0x8ec] sm:$0xf] }
 0x22f   : > { %v19404_v23 = vpop.f32.mrf.mxu2  ;;  %v12896_v18 = vor.u32 %v17718_v62, %v12895_v5  ;;  %v13215_v5 = vld [vmem:[#allocation4 + $0xae8] sm:$0xf]  ;;  %v17798_v62 = vld [vmem:[#allocation4 + $0xaf4] sm:$0xf0]  ;;  %v12964_v12 = vor.u32 %v17732_v22, %v12961_v57  ;;  %v13089_v22 = vld [vmem:[#allocation4 + $0x9f8] sm:$0xf0] }
 0x230   : > { %vm2575_vm10 = vcmp.gt.f32.partialorder %v2416_v42, 0.0  ;;  %v2579_v2 = vmul.f32 0.2, %v2416_v42  ;;  %v2547_v24 = vpop.f32.mrf.mxu1  ;;  %v13216_v36 = vor.u32 %v17798_v62, %v13215_v5  ;;  %v1722_v5 = vperm.slane %v19394_v35, 3  ;;  %v17760_v62 = vld [vmem:[#allocation4 + $0x9cc] sm:$0xf] }
 0x232   : > { %v2583_v1 = vsel %vm2575_vm10, %v2416_v42, %v2579_v2  ;;  %v13289_v42 = vld [vmem:[#allocation4 + $0xb90] sm:$0xf0]  ;;  %v13071_v2 = vld [vmem:[#allocation4 + $0x9c8] sm:$0xf] }
 0x233   : > { %v19406_v34 = vpack.c.bf16 %v2583_v1, %v2583_v1  ;;  %v13292_v14 = vor.u32 %v17815_v49, %v13289_v42  ;;  %v13273_v1 = vld [vmem:[#allocation4 + $0xb70] sm:$0xf0]  ;;  %v13072_v37 = vor.u32 %v17762_v26, %v13071_v2  ;;  %v17799_v49 = vld [vmem:[#allocation4 + $0xb04] sm:$0xf]  ;;  %v13007_v2 = vld [vmem:[#allocation4 + $0x948] sm:$0xf] }
 0x234   : > { %v13276_v28 = vor.u32 %v17811_v41, %v13273_v1  ;;  %v17746_v26 = vld [vmem:[#allocation4 + $0x954] sm:$0xf0]  ;;  %v13199_v41 = vld [vmem:[#allocation4 + $0xac8] sm:$0xf] }
 0x235   : > { %v2417_v48 = vpop.f32.mrf.mxu3  ;;  %3379 = vmatmul.bf16.vlgmr.msrb.gmra.mxu0 %v19406_v34  ;;  %3465 = vmatpush.bf16.msra.mxu3 %v13292_v14  ;;  %v17794_v1 = vld [vmem:[#allocation4 + $0xad4] sm:$0xf0] }
 0x236   : > { %3475 = vmatpush.bf16.msrb.mxu0 %v12960_v27  ;;  %v1721_v27 = vperm.slane %v19394_v35, 2  ;;  %v13200_v38 = vor.u32 %v17794_v1, %v13199_v41  ;;  %v17756_v35 = vld [vmem:[#allocation4 + $0x9ac] sm:$0xf]  ;;  %v13119_v41 = vld [vmem:[#allocation4 + $0xa28] sm:$0xf] }
 0x237   : > { %v2508_v53 = vpop.f32.mrf.mxu2 }
 0x238   : > { %v2481_v48 = vadd.f32 %v19384_v39, %v1721_v27  ;;  %v13039_v53 = vld [vmem:[#allocation4 + $0x988] sm:$0xf]  ;;  %v17724_v27 = vld [vmem:[#allocation4 + $0x8ac] sm:$0xf] }
 0x239   : > { %3466 = vmatpush.bf16.msra.mxu3 %v13276_v28  ;;  %v12929_v28 = vld [vmem:[#allocation4 + $0x8b8] sm:$0xf0] }
 0x23a   : > { %3476 = vmatpush.bf16.msrb.mxu0 %v12944_v50  ;;  %v13260_v50 = vor.u32 %v17807_v44, %v13257_v47  ;;  %v2494_v51 = vadd.f32 %v19388_v31, %v2481_v48  ;;  %v13023_v31 = vld [vmem:[#allocation4 + $0x968] sm:$0xf]  ;;  %v12932_v10 = vor.u32 %v17724_v27, %v12929_v28  ;;  %v17790_v47 = vld [vmem:[#allocation4 + $0xab4] sm:$0xf0]  ;;  %v17720_v48 = vld [vmem:[#allocation4 + $0x88c] sm:$0xf] }
 0x23b   : > { %v13183_v44 = vld [vmem:[#allocation4 + $0xaa8] sm:$0xf]  ;;  %v17774_v27 = vld [vmem:[#allocation4 + $0xa34] sm:$0xf0]  ;;  %v17704_v28 = vld [vmem:[#allocation4 + $0x80c] sm:$0xf] }
 0x23c   : > { %v2507_v21 = vadd.f32 %v19404_v23, %v2494_v51  ;;  %v13225_v23 = vld [vmem:[#allocation4 + $0xb10] sm:$0xf0]  ;;  %v12992_v51 = vor.u32 %v17742_v43, %v12991_v40 }
 0x23d   : > { %v2467_v8 = vpop.f32.mrf.mxu3  ;;  %3467 = vmatpush.bf16.msra.mxu3 %v13260_v50  ;;  %v13228_v14 = vor.u32 %v17799_v49, %v13225_v23  ;;  %v12913_v50 = vld [vmem:[#allocation4 + $0x898] sm:$0xf0]  ;;  %v13135_v23 = vld [vmem:[#allocation4 + $0xa48] sm:$0xf] }
 0x23e   : > { %v2468_v9 = vadd.f32 %v2467_v8, %v2455_v3  ;;  %3477 = vmatpush.bf16.msrb.mxu0 %v12928_v55  ;;  %v13241_v55 = vld [vmem:[#allocation4 + $0xb30] sm:$0xf0]  ;;  %v12848_v8 = vor.u32 %v17706_v17, %v12847_v30  ;;  %v12975_v30 = vld [vmem:[#allocation4 + $0x908] sm:$0xf]  ;;  %v17738_v17 = vld [vmem:[#allocation4 + $0x914] sm:$0xf0] }
 0x23f   : > { %v13244_v25 = vor.u32 %v17803_v54, %v13241_v55  ;;  %v17716_v54 = vld [vmem:[#allocation4 + $0x86c] sm:$0xf]  ;;  %v12897_v55 = vld [vmem:[#allocation4 + $0x878] sm:$0xf0]  ;;  %v12976_v57 = vor.u32 %v17738_v17, %v12975_v30 }
 0x240   : > { %vm2576_vm11 = vcmp.gt.f32.partialorder %v2468_v9, 0.0  ;;  %v2580_v29 = vmul.f32 0.2, %v2468_v9 }
 0x241   : > { %3468 = vmatpush.bf16.msra.mxu3 %v13244_v25 }
 0x242   : > { %v2584_v15 = vsel %vm2576_vm11, %v2468_v9, %v2580_v29  ;;  %3478 = vmatpush.bf16.msrb.mxu0 %v12912_v11  ;;  %v13040_v9 = vor.u32 %v17754_v61, %v13039_v53  ;;  %v17750_v11 = vld [vmem:[#allocation4 + $0x974] sm:$0xf0]  ;;  %v12945_v29 = vld [vmem:[#allocation4 + $0x8d8] sm:$0xf0]  ;;  %v13167_v53 = vld [vmem:[#allocation4 + $0xa88] sm:$0xf] }
 0x243   : > { %v19413_v24 = vpack.c.bf16 %v2584_v15, %v2584_v15  ;;  %v12948_v20 = vor.u32 %v17728_v13, %v12945_v29  ;;  %v17786_v61 = vld [vmem:[#allocation4 + $0xa94] sm:$0xf0] }
 0x244   : > { %v13168_v25 = vor.u32 %v17786_v61, %v13167_v53  ;;  %v17778_v29 = vld [vmem:[#allocation4 + $0xa54] sm:$0xf0] }
 0x245   : > { %v2469_v32 = vpop.f32.mrf.mxu3  ;;  %3392 = vmatmul.bf16.vlgmr.msrb.gmra.mxu1 %v19413_v24  ;;  %3431 = vmatmul.bf16.vlgmr.msra.gmra.mxu0 %v19406_v34 }
 0x246   : > { %3479 = vmatpush.bf16.msrb.mxu0 %v12896_v18  ;;  %3488 = vmatpush.bf16.msrb.mxu1 %v13088_v19  ;;  %v13024_v18 = vor.u32 %v17750_v11, %v13023_v31  ;;  %v13151_v31 = vld [vmem:[#allocation4 + $0xa68] sm:$0xf]  ;;  %v12881_v11 = vld [vmem:[#allocation4 + $0x858] sm:$0xf0] }
 0x247   : > { %3469 = vmatpush.bf16.msra.mxu3 %v13228_v14  ;;  %v17708_v14 = vld [vmem:[#allocation4 + $0x82c] sm:$0xf] }
 0x24a   : > { %3480 = vmatpush.bf16.msrb.mxu0 %v12880_v33  ;;  %3489 = vmatpush.bf16.msrb.mxu1 %v13072_v37  ;;  %v13008_v37 = vor.u32 %v17746_v26, %v13007_v2  ;;  %v13136_v2 = vor.u32 %v17778_v29, %v13135_v23  ;;  %v17788_v23 = vld [vmem:[#allocation4 + $0xaac] sm:$0xf] }
 0x24d   : > { %v2519_v3 = vpop.f32.mrf.mxu3 }
 0x24e   : > { %v2520_v4 = vadd.f32 %v2519_v3, %v2507_v21  ;;  %3481 = vmatpush.bf16.msrb.mxu0 %v12864_v52  ;;  %3490 = vmatpush.bf16.msrb.mxu1 %v13056_v16  ;;  %v13184_v52 = vor.u32 %v17790_v47, %v13183_v44  ;;  %v12916_v16 = vor.u32 %v17720_v48, %v12913_v50  ;;  %v17764_v21 = vld [vmem:[#allocation4 + $0x9ec] sm:$0xf]  ;;  %v17770_v44 = vld [vmem:[#allocation4 + $0xa14] sm:$0xf0]  ;;  %v13343_v47 = vld [vmem:[#allocation4 + $0xbe8] sm:$0xf] }
 0x24f   : > { %v19421_v39 = vpop.f32.mrf.mxu2  ;;  %v12900_v3 = vor.u32 %v17716_v54, %v12897_v55  ;;  %v17830_v48 = vld [vmem:[#allocation4 + $0xbf4] sm:$0xf0] }
 0x250   : > { %vm2577_vm12 = vcmp.gt.f32.partialorder %v2520_v4, 0.0  ;;  %v2581_v42 = vmul.f32 0.2, %v2520_v4  ;;  %v13344_v61 = vor.u32 %v17830_v48, %v13343_v47  ;;  %v13247_v47 = vld [vmem:[#allocation4 + $0xb28] sm:$0xf] }
 0x251   : > { %v17806_v48 = vld [vmem:[#allocation4 + $0xb34] sm:$0xf0] }
 0x252   : > { %v2585_v15 = vsel %vm2577_vm12, %v2520_v4, %v2581_v42  ;;  %3482 = vmatpush.bf16.msrb.mxu0 %v12848_v8  ;;  %3491 = vmatpush.bf16.msrb.mxu1 %v13040_v9  ;;  %v13092_v4 = vor.u32 %v17764_v21, %v13089_v22  ;;  %v17782_v8 = vld [vmem:[#allocation4 + $0xa74] sm:$0xf0]  ;;  %v17712_v9 = vld [vmem:[#allocation4 + $0x84c] sm:$0xf]  ;;  %v13327_v22 = vld [vmem:[#allocation4 + $0xbc8] sm:$0xf] }
 0x253   : > { %v19423_v19 = vpack.c.bf16 %v2585_v15, %v2585_v15  ;;  %v13152_v13 = vor.u32 %v17782_v8, %v13151_v31  ;;  %v12884_v49 = vor.u32 %v17712_v9, %v12881_v11  ;;  %v12865_v15 = vld [vmem:[#allocation4 + $0x838] sm:$0xf0]  ;;  %v17792_v31 = vld [vmem:[#allocation4 + $0xacc] sm:$0xf] }
 0x254   : > { %v12868_v26 = vor.u32 %v17708_v14, %v12865_v15  ;;  %v13295_v15 = vld [vmem:[#allocation4 + $0xb88] sm:$0xf] }
 0x255   : > { %v2521_v33 = vpop.f32.mrf.mxu3  ;;  %3405 = vmatmul.bf16.vlgmr.msrb.gmra.mxu2 %v19423_v19  ;;  %3444 = vmatmul.bf16.vlgmr.msra.gmra.mxu1 %v19413_v24 }
 0x256   : > { %3527 = vmatpush.bf16.msra.mxu0 %v12964_v12  ;;  %3492 = vmatpush.bf16.msrb.mxu1 %v13024_v18  ;;  %v13073_v12 = vld [vmem:[#allocation4 + $0x9d8] sm:$0xf0]  ;;  %v2533_v18 = vadd.f32 %v19392_v58, %v1722_v5  ;;  %v17752_v33 = vld [vmem:[#allocation4 + $0x98c] sm:$0xf] }
 0x257   : > { %v2560_v32 = vpop.f32.mrf.mxu2  ;;  %3483 = vmatmul.bf16.vlgmr.msrb.gmra.mxu0 %v19406_v34  ;;  %3501 = vmatpush.bf16.msrb.mxu2 %v13216_v36  ;;  %v13076_v42 = vor.u32 %v17760_v62, %v13073_v12  ;;  %v13057_v36 = vld [vmem:[#allocation4 + $0x9b8] sm:$0xf0]  ;;  %v13311_v62 = vld [vmem:[#allocation4 + $0xba8] sm:$0xf]  ;;  %v17822_v12 = vld [vmem:[#allocation4 + $0xbb4] sm:$0xf0] }
 0x258   : > { %v13060_v1 = vor.u32 %v17756_v35, %v13057_v36  ;;  %v12849_v32 = vld [vmem:[#allocation4 + $0x818] sm:$0xf0]  ;;  %v13312_v29 = vor.u32 %v17822_v12, %v13311_v62  ;;  %v17736_v35 = vld [vmem:[#allocation4 + $0x90c] sm:$0xf] }
 0x259   : > { %v12852_v43 = vor.u32 %v17704_v28, %v12849_v32  ;;  %v12977_v36 = vld [vmem:[#allocation4 + $0x918] sm:$0xf0]  ;;  %v17814_v28 = vld [vmem:[#allocation4 + $0xb74] sm:$0xf0]  ;;  %v17780_v32 = vld [vmem:[#allocation4 + $0xa6c] sm:$0xf] }
 0x25a   : > { %3528 = vmatpush.bf16.msra.mxu0 %v12948_v20  ;;  %3493 = vmatpush.bf16.msrb.mxu1 %v13008_v37  ;;  %v2546_v20 = vadd.f32 %v19400_v56, %v2533_v18  ;;  %v13041_v37 = vld [vmem:[#allocation4 + $0x998] sm:$0xf0]  ;;  %v13120_v56 = vor.u32 %v17774_v27, %v13119_v41  ;;  %v17818_v18 = vld [vmem:[#allocation4 + $0xb94] sm:$0xf0]  ;;  %v12980_v41 = vor.u32 %v17736_v35, %v12977_v36  ;;  %v13279_v27 = vld [vmem:[#allocation4 + $0xb68] sm:$0xf] }
 0x25b   : > { %3502 = vmatpush.bf16.msrb.mxu2 %v13200_v38  ;;  %v13044_v50 = vor.u32 %v17752_v33, %v13041_v37  ;;  %v13280_v33 = vor.u32 %v17814_v28, %v13279_v27  ;;  %v17812_v62 = vld [vmem:[#allocation4 + $0xb6c] sm:$0xf]  ;;  %v13281_v12 = vld [vmem:[#allocation4 + $0xb78] sm:$0xf0]  ;;  %v17853_v27 = vld [vmem:[#allocation4 + $0xcac] sm:$0xf0] }
 0x25c   : > { %v2559_v58 = vadd.f32 %v19421_v39, %v2546_v20  ;;  %v13217_v39 = vld [vmem:[#allocation4 + $0xaf8] sm:$0xf0]  ;;  %v17784_v20 = vld [vmem:[#allocation4 + $0xa8c] sm:$0xf] }
 0x25d   : > { %v17800_v35 = vld [vmem:[#allocation4 + $0xb0c] sm:$0xf]  ;;  %v13233_v36 = vld [vmem:[#allocation4 + $0xb18] sm:$0xf0] }
 0x25e   : > { %3529 = vmatpush.bf16.msra.mxu0 %v12932_v10  ;;  %3494 = vmatpush.bf16.msrb.mxu1 %v12992_v51  ;;  %v13103_v10 = vld [vmem:[#allocation4 + $0xa08] sm:$0xf]  ;;  %v17748_v51 = vld [vmem:[#allocation4 + $0x96c] sm:$0xf] }
 0x25f   : > { %3503 = vmatpush.bf16.msrb.mxu2 %v13184_v52  ;;  %v13025_v52 = vld [vmem:[#allocation4 + $0x978] sm:$0xf0]  ;;  %v13104_v53 = vor.u32 %v17770_v44, %v13103_v10  ;;  %v17810_v10 = vld [vmem:[#allocation4 + $0xb54] sm:$0xf0] }
 0x260   : > { %v13028_v55 = vor.u32 %v17748_v51, %v13025_v52  ;;  %v13121_v51 = vld [vmem:[#allocation4 + $0xa38] sm:$0xf0]  ;;  %v13248_v52 = vor.u32 %v17806_v48, %v13247_v47  ;;  %v13383_v47 = vld [vmem:[#allocation4 + $0xc40] sm:$0xf]  ;;  %v17841_v48 = vld [vmem:[#allocation4 + $0xc4c] sm:$0xf0] }
 0x262   : > { %3530 = vmatpush.bf16.msra.mxu0 %v12916_v16  ;;  %3495 = vmatpush.bf16.msrb.mxu1 %v12976_v57  ;;  %v17796_v16 = vld [vmem:[#allocation4 + $0xaec] sm:$0xf]  ;;  %v17826_v57 = vld [vmem:[#allocation4 + $0xbd4] sm:$0xf0] }
 0x263   : > { %3504 = vmatpush.bf16.msrb.mxu2 %v13168_v25  ;;  %v13220_v21 = vor.u32 %v17796_v16, %v13217_v39  ;;  %v17744_v25 = vld [vmem:[#allocation4 + $0x94c] sm:$0xf]  ;;  %v13328_v9 = vor.u32 %v17826_v57, %v13327_v22  ;;  %v17802_v39 = vld [vmem:[#allocation4 + $0xb14] sm:$0xf0] }
 0x264   : > { %v17824_v57 = vld [vmem:[#allocation4 + $0xbcc] sm:$0xf] }
 0x265   : > { %3457 = vmatmul.bf16.vlgmr.msra.gmra.mxu2 %v19423_v19  ;;  %3496 = vmatmul.bf16.vlgmr.msrb.gmra.mxu1 %v19413_v24 }
 0x266   : > { %3531 = vmatpush.bf16.msra.mxu0 %v12900_v3  ;;  %3540 = vmatpush.bf16.msra.mxu1 %v13092_v4  ;;  %v13009_v3 = vld [vmem:[#allocation4 + $0x958] sm:$0xf0] }
 0x267   : > { %3505 = vmatpush.bf16.msrb.mxu2 %v13152_v13  ;;  %v13201_v4 = vld [vmem:[#allocation4 + $0xad8] sm:$0xf0]  ;;  %v13012_v11 = vor.u32 %v17744_v25, %v13009_v3  ;;  %v17740_v13 = vld [vmem:[#allocation4 + $0x92c] sm:$0xf] }
 0x268   : > { %v13204_v5 = vor.u32 %v17792_v31, %v13201_v4  ;;  %v13329_v25 = vld [vmem:[#allocation4 + $0xbd8] sm:$0xf0]  ;;  %v17820_v31 = vld [vmem:[#allocation4 + $0xbac] sm:$0xf] }
 0x269   : > { %v13332_v3 = vor.u32 %v17824_v57, %v13329_v25  ;;  %v13313_v4 = vld [vmem:[#allocation4 + $0xbb8] sm:$0xf0] }
 0x26a   : > { %3532 = vmatpush.bf16.msra.mxu0 %v12884_v49  ;;  %3541 = vmatpush.bf16.msra.mxu1 %v13076_v42  ;;  %v12993_v49 = vld [vmem:[#allocation4 + $0x938] sm:$0xf0] }
 0x26b   : > { %3506 = vmatpush.bf16.msrb.mxu2 %v13136_v2  ;;  %v13185_v42 = vld [vmem:[#allocation4 + $0xab8] sm:$0xf0] }
 0x26c   : > { %v13188_v14 = vor.u32 %v17788_v23, %v13185_v42  ;;  %v13169_v2 = vld [vmem:[#allocation4 + $0xa98] sm:$0xf0] }
 0x26d   : > { %v2571_v38 = vpop.f32.mrf.mxu3  ;;  %v13265_v23 = vld [vmem:[#allocation4 + $0xb58] sm:$0xf0] }
 0x26e   : > { %v2572_v40 = vadd.f32 %v2571_v38, %v2559_v58  ;;  %3533 = vmatpush.bf16.msra.mxu0 %v12868_v26  ;;  %3542 = vmatpush.bf16.msra.mxu1 %v13060_v1  ;;  %v13296_v26 = vor.u32 %v17818_v18, %v13295_v15  ;;  %v13172_v1 = vor.u32 %v17784_v20, %v13169_v2  ;;  %v13153_v58 = vld [vmem:[#allocation4 + $0xa78] sm:$0xf0]  ;;  %v13263_v38 = vld [vmem:[#allocation4 + $0xb48] sm:$0xf]  ;;  %v17861_v15 = vld [vmem:[#allocation4 + $0xcec] sm:$0xf0] }
 0x26f   : > { %3507 = vmatpush.bf16.msrb.mxu2 %v13120_v56  ;;  %v13156_v37 = vor.u32 %v17780_v32, %v13153_v58  ;;  %v13137_v56 = vld [vmem:[#allocation4 + $0xa58] sm:$0xf0]  ;;  %v13236_v20 = vor.u32 %v17800_v35, %v13233_v36  ;;  %v13447_v2 = vld [vmem:[#allocation4 + $0xcc0] sm:$0xf]  ;;  %v17849_v58 = vld [vmem:[#allocation4 + $0xc8c] sm:$0xf0] }
 0x270   : > { %vm2578_vm13 = vcmp.gt.f32.partialorder %v2572_v40, 0.0  ;;  %v2582_v30 = vmul.f32 0.2, %v2572_v40  ;;  %v13415_v32 = vld [vmem:[#allocation4 + $0xc80] sm:$0xf] }
 0x272   : > { %v2586_v17 = vsel %vm2578_vm13, %v2572_v40, %v2582_v30  ;;  %3534 = vmatpush.bf16.msra.mxu0 %v12852_v43  ;;  %3543 = vmatpush.bf16.msra.mxu1 %v13044_v50  ;;  %v17776_v40 = vld [vmem:[#allocation4 + $0xa4c] sm:$0xf]  ;;  %v13264_v43 = vor.u32 %v17810_v10, %v13263_v38  ;;  %v13231_v30 = vld [vmem:[#allocation4 + $0xb08] sm:$0xf]  ;;  %v13399_v38 = vld [vmem:[#allocation4 + $0xc60] sm:$0xf] }
 0x273   : > { %v19434_v54 = vpack.c.bf16 %v2586_v17, %v2586_v17  ;;  %3508 = vmatpush.bf16.msrb.mxu2 %v13104_v53  ;;  %v13140_v44 = vor.u32 %v17776_v40, %v13137_v56  ;;  %v17772_v50 = vld [vmem:[#allocation4 + $0xa2c] sm:$0xf]  ;;  %v13105_v53 = vld [vmem:[#allocation4 + $0xa18] sm:$0xf0]  ;;  %v17845_v10 = vld [vmem:[#allocation4 + $0xc6c] sm:$0xf0] }
 0x274   : > { %v13124_v16 = vor.u32 %v17772_v50, %v13121_v51  ;;  %v17768_v17 = vld [vmem:[#allocation4 + $0xa0c] sm:$0xf]  ;;  %v13591_v40 = vld [vmem:[#allocation4 + $0xde0] sm:$0xf]  ;;  %v13400_v56 = vor.u32 %v17845_v10, %v13399_v38  ;;  %v17847_v38 = vld [vmem:[#allocation4 + $0xc84] sm:$0xf] }
 0x275   : > { %v2573_v8 = vpop.f32.mrf.mxu3  ;;  %3418 = vmatmul.bf16.vlgmr.msrb.gmra.mxu3 %v19434_v54  ;;  %3535 = vmatmul.bf16.vlgmr.msra.gmra.mxu0 %v19406_v34  ;;  %v12996_v34 = vor.u32 %v17740_v13, %v12993_v49  ;;  %v13284_v13 = vor.u32 %v17812_v62, %v13281_v12  ;;  %v17808_v49 = vld [vmem:[#allocation4 + $0xb4c] sm:$0xf]  ;;  %v13575_v50 = vld [vmem:[#allocation4 + $0xdc0] sm:$0xf]  ;;  %v17877_v62 = vld [vmem:[#allocation4 + $0xd6c] sm:$0xf0] }
 0x276   : > { %3514 = vmatpush.bf16.msrb.mxu3 %v13344_v61  ;;  %3544 = vmatpush.bf16.msra.mxu1 %v13028_v55  ;;  %v17828_v61 = vld [vmem:[#allocation4 + $0xbec] sm:$0xf]  ;;  %v13345_v55 = vld [vmem:[#allocation4 + $0xbf8] sm:$0xf0]  ;;  %v13316_v8 = vor.u32 %v17820_v31, %v13313_v4  ;;  %v13268_v42 = vor.u32 %v17808_v49, %v13265_v23  ;;  %v17881_v31 = vld [vmem:[#allocation4 + $0xd8c] sm:$0xf0] }
 0x277   : > { %3553 = vmatpush.bf16.msra.mxu2 %v13220_v21  ;;  %v13232_v21 = vor.u32 %v17802_v39, %v13231_v30  ;;  %v13348_v22 = vor.u32 %v17828_v61, %v13345_v55  ;;  %v13367_v30 = vld [vmem:[#allocation4 + $0xc20] sm:$0xf]  ;;  %v17837_v39 = vld [vmem:[#allocation4 + $0xc2c] sm:$0xf0]  ;;  %v17859_v4 = vld [vmem:[#allocation4 + $0xce4] sm:$0xf] }
 0x278   : > { %3509 = vmatmul.bf16.vlgmr.msrb.gmra.mxu2 %v19423_v19  ;;  %v17885_v61 = vld [vmem:[#allocation4 + $0xdac] sm:$0xf0]  ;;  %v13719_v12 = vld [vmem:[#allocation4 + $0xee0] sm:$0xf]  ;;  %v17855_v49 = vld [vmem:[#allocation4 + $0xcc4] sm:$0xf] }
 0x279   : > { %v13449_v23 = vld [vmem:[#allocation4 + $0xcd0] sm:$0xf0] }
 0x27a   : > { %3515 = vmatpush.bf16.msrb.mxu3 %v13328_v9  ;;  %3545 = vmatpush.bf16.msra.mxu1 %v13012_v11  ;;  %v17816_v9 = vld [vmem:[#allocation4 + $0xb8c] sm:$0xf]  ;;  %v13297_v11 = vld [vmem:[#allocation4 + $0xb98] sm:$0xf0]  ;;  %v13417_v10 = vld [vmem:[#allocation4 + $0xc90] sm:$0xf0] }
 0x27b   : > { %3554 = vmatpush.bf16.msra.mxu2 %v13204_v5  ;;  %v13300_v5 = vor.u32 %v17816_v9, %v13297_v11 }
 0x27e   : > { %3516 = vmatpush.bf16.msrb.mxu3 %v13312_v29  ;;  %3546 = vmatpush.bf16.msra.mxu1 %v12996_v34  ;;  %v17804_v29 = vld [vmem:[#allocation4 + $0xb2c] sm:$0xf]  ;;  %v13249_v34 = vld [vmem:[#allocation4 + $0xb38] sm:$0xf0] }
 0x27f   : > { %3555 = vmatpush.bf16.msra.mxu2 %v13188_v14  ;;  %v13463_v14 = vld [vmem:[#allocation4 + $0xce0] sm:$0xf] }
 0x280   : > { %v13464_v18 = vor.u32 %v17861_v15, %v13463_v14  ;;  %v13511_v14 = vld [vmem:[#allocation4 + $0xd40] sm:$0xf]  ;;  %v17873_v15 = vld [vmem:[#allocation4 + $0xd4c] sm:$0xf0] }
 0x281   : > { %v13512_v36 = vor.u32 %v17873_v15, %v13511_v14  ;;  %v13561_v14 = vld [vmem:[#allocation4 + $0xdb0] sm:$0xf0] }
 0x282   : > { %3517 = vmatpush.bf16.msrb.mxu3 %v13296_v26  ;;  %3547 = vmatpush.bf16.msra.mxu1 %v12980_v41  ;;  %v17857_v26 = vld [vmem:[#allocation4 + $0xccc] sm:$0xf0] }
 0x283   : > { %3556 = vmatpush.bf16.msra.mxu2 %v13172_v1  ;;  %4383 = vmatpush.bf16.msrb.mxu0 %v13464_v18  ;;  %v13448_v41 = vor.u32 %v17857_v26, %v13447_v2  ;;  %v13431_v1 = vld [vmem:[#allocation4 + $0xca0] sm:$0xf]  ;;  %v17851_v2 = vld [vmem:[#allocation4 + $0xca4] sm:$0xf]  ;;  %v13433_v26 = vld [vmem:[#allocation4 + $0xcb0] sm:$0xf0] }
 0x284   : > { %v13432_v28 = vor.u32 %v17853_v27, %v13431_v1  ;;  %v13436_v1 = vor.u32 %v17851_v2, %v13433_v26  ;;  %v13495_v27 = vld [vmem:[#allocation4 + $0xd20] sm:$0xf]  ;;  %v17879_v2 = vld [vmem:[#allocation4 + $0xd84] sm:$0xf] }
 0x285   : > { %3470 = vmatmul.bf16.vlgmr.msra.gmra.mxu3 %v19434_v54  ;;  %3548 = vmatmul.bf16.vlgmr.msra.gmra.mxu1 %v19413_v24  ;;  %v13108_v24 = vor.u32 %v17768_v17, %v13105_v53  ;;  %v13559_v17 = vld [vmem:[#allocation4 + $0xda0] sm:$0xf]  ;;  %v13368_v53 = vor.u32 %v17837_v39, %v13367_v30  ;;  %v17891_v39 = vld [vmem:[#allocation4 + $0xde4] sm:$0xf] }
 0x286   : > { %3518 = vmatpush.bf16.msrb.mxu3 %v13280_v33  ;;  %v13560_v55 = vor.u32 %v17885_v61, %v13559_v17  ;;  %v13593_v17 = vld [vmem:[#allocation4 + $0xdf0] sm:$0xf0] }
 0x287   : > { %3557 = vmatpush.bf16.msra.mxu2 %v13156_v37  ;;  %4384 = vmatpush.bf16.msrb.mxu0 %v13448_v41  ;;  %v13416_v37 = vor.u32 %v17849_v58, %v13415_v32  ;;  %v13687_v32 = vld [vmem:[#allocation4 + $0xea0] sm:$0xf]  ;;  %v13596_v61 = vor.u32 %v17891_v39, %v13593_v17  ;;  %v13513_v39 = vld [vmem:[#allocation4 + $0xd50] sm:$0xf0]  ;;  %v17919_v17 = vld [vmem:[#allocation4 + $0xec4] sm:$0xf] }
 0x28a   : > { %3519 = vmatpush.bf16.msrb.mxu3 %v13264_v43  ;;  %v17893_v43 = vld [vmem:[#allocation4 + $0xdec] sm:$0xf0] }
 0x28b   : > { %3558 = vmatpush.bf16.msra.mxu2 %v13140_v44  ;;  %4385 = vmatpush.bf16.msrb.mxu0 %v13432_v28  ;;  %v13592_v44 = vor.u32 %v17893_v43, %v13591_v40  ;;  %v17869_v28 = vld [vmem:[#allocation4 + $0xd2c] sm:$0xf0]  ;;  %v13479_v43 = vld [vmem:[#allocation4 + $0xd00] sm:$0xf] }
 0x28c   : > { %v13496_v58 = vor.u32 %v17869_v28, %v13495_v27  ;;  %v13607_v28 = vld [vmem:[#allocation4 + $0xe00] sm:$0xf] }
 0x28d   : > { %4396 = vmatpush.bf16.msrb.mxu1 %v13592_v44  ;;  %v17865_v44 = vld [vmem:[#allocation4 + $0xd0c] sm:$0xf0] }
 0x28e   : > { %3520 = vmatpush.bf16.msrb.mxu3 %v13248_v52  ;;  %v17889_v52 = vld [vmem:[#allocation4 + $0xdcc] sm:$0xf0] }
 0x28f   : > { %3559 = vmatpush.bf16.msra.mxu2 %v13124_v16  ;;  %4386 = vmatpush.bf16.msrb.mxu0 %v13416_v37  ;;  %v13576_v16 = vor.u32 %v17889_v52, %v13575_v50  ;;  %v17917_v37 = vld [vmem:[#allocation4 + $0xeac] sm:$0xf0] }
 0x290   : > { %v13688_v40 = vor.u32 %v17917_v37, %v13687_v32  ;;  %v17913_v50 = vld [vmem:[#allocation4 + $0xe8c] sm:$0xf0] }
 0x291   : > { %4397 = vmatpush.bf16.msrb.mxu1 %v13576_v16  ;;  %v17897_v32 = vld [vmem:[#allocation4 + $0xe0c] sm:$0xf0] }
 0x292   : > { %3521 = vmatpush.bf16.msrb.mxu3 %v13232_v21  ;;  %v13351_v21 = vld [vmem:[#allocation4 + $0xc00] sm:$0xf] }
 0x293   : > { %3560 = vmatpush.bf16.msra.mxu2 %v13108_v24  ;;  %4387 = vmatpush.bf16.msrb.mxu0 %v13400_v56  ;;  %v17833_v24 = vld [vmem:[#allocation4 + $0xc0c] sm:$0xf0]  ;;  %v13420_v56 = vor.u32 %v17847_v38, %v13417_v10  ;;  %v13608_v38 = vor.u32 %v17897_v32, %v13607_v28  ;;  %v17907_v32 = vld [vmem:[#allocation4 + $0xe64] sm:$0xf] }
 0x294   : > { %v17957_v10 = vld [vmem:[#allocation4 + $0xfec] sm:$0xf0] }
 0x295   : > { %3522 = vmatmul.bf16.vlgmr.msrb.gmra.mxu3 %v19434_v54  ;;  %4398 = vmatpush.bf16.msrb.mxu1 %v13560_v55  ;;  %v13655_v55 = vld [vmem:[#allocation4 + $0xe60] sm:$0xf] }
 0x296   : > { %3566 = vmatpush.bf16.msra.mxu3 %v13348_v22  ;;  %3561 = vmatmul.bf16.vlgmr.msra.gmra.mxu2 %v19423_v19  ;;  %v13252_v19 = vor.u32 %v17804_v29, %v13249_v34  ;;  %v13543_v22 = vld [vmem:[#allocation4 + $0xd80] sm:$0xf]  ;;  %v13452_v34 = vor.u32 %v17855_v49, %v13449_v23  ;;  %v17835_v49 = vld [vmem:[#allocation4 + $0xc24] sm:$0xf]  ;;  %v13369_v23 = vld [vmem:[#allocation4 + $0xc30] sm:$0xf0] }
 0x297   : > { %v13544_v9 = vor.u32 %v17881_v31, %v13543_v22  ;;  %v17839_v22 = vld [vmem:[#allocation4 + $0xc44] sm:$0xf] }
 0x298   : > { %v17887_v31 = vld [vmem:[#allocation4 + $0xdc4] sm:$0xf] }
 0x299   : > { %4399 = vmatpush.bf16.msrb.mxu1 %v13544_v9 }
 0x29a   : > { %3567 = vmatpush.bf16.msra.mxu3 %v13332_v3  ;;  %v13352_v3 = vor.u32 %v17833_v24, %v13351_v21  ;;  %v17909_v21 = vld [vmem:[#allocation4 + $0xe6c] sm:$0xf0] }
 0x29b   : > { %v13656_v24 = vor.u32 %v17909_v21, %v13655_v55  ;;  %v13705_v55 = vld [vmem:[#allocation4 + $0xed0] sm:$0xf0]  ;;  %v19458_v21 = vld [vmem:[#allocation10 + $0x2] ss:$8 sm:$0xf] }
 0x29e   : > { %3568 = vmatpush.bf16.msra.mxu3 %v13316_v8  ;;  %v13465_v8 = vld [vmem:[#allocation4 + $0xcf0] sm:$0xf0] }
 0x29f   : > { %v13468_v11 = vor.u32 %v17859_v4, %v13465_v8  ;;  %v13577_v8 = vld [vmem:[#allocation4 + $0xdd0] sm:$0xf0] }
 0x2a2   : > { %3569 = vmatpush.bf16.msra.mxu3 %v13300_v5  ;;  %v13527_v5 = vld [vmem:[#allocation4 + $0xd60] sm:$0xf] }
 0x2a6   : > { %3570 = vmatpush.bf16.msra.mxu3 %v13284_v13  ;;  %v17925_v13 = vld [vmem:[#allocation4 + $0xeec] sm:$0xf0] }
 0x2a7   : > { %v13720_v29 = vor.u32 %v17925_v13, %v13719_v12 }
 0x2a9   : > { %4409 = vmatpush.bf16.msrb.mxu2 %v13720_v29 }
 0x2aa   : > { %3571 = vmatpush.bf16.msra.mxu3 %v13268_v42  ;;  %v13528_v42 = vor.u32 %v17877_v62, %v13527_v5  ;;  %v13639_v5 = vld [vmem:[#allocation4 + $0xe40] sm:$0xf]  ;;  %v17905_v62 = vld [vmem:[#allocation4 + $0xe4c] sm:$0xf0] }
 0x2ab   : > { %v13640_v13 = vor.u32 %v17905_v62, %v13639_v5  ;;  %v13497_v5 = vld [vmem:[#allocation4 + $0xd30] sm:$0xf0]  ;;  %v17915_v62 = vld [vmem:[#allocation4 + $0xea4] sm:$0xf] }
 0x2ac   : > { %4400 = vmatpush.bf16.msrb.mxu1 %v13528_v42  ;;  %v17883_v42 = vld [vmem:[#allocation4 + $0xda4] sm:$0xf] }
 0x2ad   : > { %v13564_v15 = vor.u32 %v17883_v42, %v13561_v14  ;;  %v13799_v42 = vld [vmem:[#allocation4 + $0xf80] sm:$0xf]  ;;  %v17863_v14 = vld [vmem:[#allocation4 + $0xd04] sm:$0xf] }
 0x2ae   : > { %3572 = vmatpush.bf16.msra.mxu3 %v13252_v19  ;;  %v13703_v19 = vld [vmem:[#allocation4 + $0xec0] sm:$0xf] }
 0x2b0   : > { %4401 = vmatpush.bf16.msrb.mxu1 %v13512_v36  ;;  %v17831_v36 = vld [vmem:[#allocation4 + $0xc04] sm:$0xf] }
 0x2b2   : > { %3573 = vmatpush.bf16.msra.mxu3 %v13236_v20  ;;  %v19444_v33 = vpop.f32.mrf.mxu0  ;;  %v17921_v20 = vld [vmem:[#allocation4 + $0xecc] sm:$0xf0] }
 0x2b3   : > { %v13704_v41 = vor.u32 %v17921_v20, %v13703_v19  ;;  %v13623_v19 = vld [vmem:[#allocation4 + $0xe20] sm:$0xf]  ;;  %v13353_v20 = vld [vmem:[#allocation4 + $0xc10] sm:$0xf0] }
 0x2b4   : > { %4402 = vmatpush.bf16.msrb.mxu1 %v13496_v58  ;;  %v13356_v26 = vor.u32 %v17831_v36, %v13353_v20  ;;  %v13847_v58 = vld [vmem:[#allocation4 + $0xfe0] sm:$0xf]  ;;  %v13673_v36 = vld [vmem:[#allocation4 + $0xe90] sm:$0xf0] }
 0x2b5   : > { %3574 = vmatmul.bf16.vlgmr.msra.gmra.mxu3 %v19434_v54  ;;  %v13384_v54 = vor.u32 %v17841_v48, %v13383_v47  ;;  %4410 = vmatpush.bf16.msrb.mxu2 %v13704_v41  ;;  %v13671_v47 = vld [vmem:[#allocation4 + $0xe80] sm:$0xf]  ;;  %v13480_v48 = vor.u32 %v17865_v44, %v13479_v43  ;;  %v13545_v41 = vld [vmem:[#allocation4 + $0xd90] sm:$0xf0]  ;;  %v13848_v43 = vor.u32 %v17957_v10, %v13847_v58 }
 0x2b6   : > { %v13672_v16 = vor.u32 %v17913_v50, %v13671_v47  ;;  %v13548_v27 = vor.u32 %v17879_v2, %v13545_v41  ;;  %v17923_v47 = vld [vmem:[#allocation4 + $0xee4] sm:$0xf]  ;;  %v13783_v41 = vld [vmem:[#allocation4 + $0xf60] sm:$0xf]  ;;  %v13657_v58 = vld [vmem:[#allocation4 + $0xe70] sm:$0xf0] }
 0x2b7   : > { %4388 = vmatpush.bf16.msrb.mxu0 %v13384_v54  ;;  %v13401_v54 = vld [vmem:[#allocation4 + $0xc70] sm:$0xf0]  ;;  %4422 = vmatpush.bf16.msrb.mxu3 %v13848_v43  ;;  %v17937_v43 = vld [vmem:[#allocation4 + $0xf4c] sm:$0xf0] }
 0x2b8   : > { %4403 = vmatpush.bf16.msrb.mxu1 %v13480_v48  ;;  %v13721_v48 = vld [vmem:[#allocation4 + $0xef0] sm:$0xf0] }
 0x2b9   : > { %4411 = vmatpush.bf16.msrb.mxu2 %v13688_v40  ;;  %v17875_v40 = vld [vmem:[#allocation4 + $0xd64] sm:$0xf]  ;;  %v13724_v50 = vor.u32 %v17923_v47, %v13721_v48  ;;  %v13641_v48 = vld [vmem:[#allocation4 + $0xe50] sm:$0xf0] }
 0x2ba   : > { %v3382_v51 = vpop.f32.mrf.mxu0  ;;  %v17903_v47 = vld [vmem:[#allocation4 + $0xe44] sm:$0xf] }
 0x2bb   : > { %4389 = vmatpush.bf16.msrb.mxu0 %v13368_v53  ;;  %v17843_v51 = vld [vmem:[#allocation4 + $0xc64] sm:$0xf] }
 0x2bc   : > { %v13404_v30 = vor.u32 %v17843_v51, %v13401_v54  ;;  %4448 = vmatpush.bf16.msra.mxu1 %v13596_v61  ;;  %v13831_v51 = vld [vmem:[#allocation4 + $0xfc0] sm:$0xf]  ;;  %v17953_v54 = vld [vmem:[#allocation4 + $0xfcc] sm:$0xf0] }
 0x2bd   : > { %4412 = vmatpush.bf16.msrb.mxu2 %v13672_v16  ;;  %v13832_v16 = vor.u32 %v17953_v54, %v13831_v51  ;;  %v13644_v51 = vor.u32 %v17903_v47, %v13641_v48 }
 0x2bf   : > { %4390 = vmatpush.bf16.msrb.mxu0 %v13352_v3  ;;  %v13385_v3 = vld [vmem:[#allocation4 + $0xc50] sm:$0xf0]  ;;  %4423 = vmatpush.bf16.msrb.mxu3 %v13832_v16  ;;  %v13751_v16 = vld [vmem:[#allocation4 + $0xf20] sm:$0xf] }
 0x2c0   : > { %v13388_v4 = vor.u32 %v17839_v22, %v13385_v3  ;;  %v13708_v22 = vor.u32 %v17919_v17, %v13705_v55  ;;  %v13815_v3 = vld [vmem:[#allocation4 + $0xfa0] sm:$0xf]  ;;  %v17899_v17 = vld [vmem:[#allocation4 + $0xe24] sm:$0xf] }
 0x2c1   : > { %4413 = vmatpush.bf16.msrb.mxu2 %v13656_v24 }
 0x2c2   : > { %v19446_v57 = vpop.f32.mrf.mxu1  ;;  %v19448_v25 = vpop.f32.mrf.mxu0 }
 0x2c3   : > { %4435 = vmatpush.bf16.msra.mxu0 %v13468_v11  ;;  %v13580_v11 = vor.u32 %v17887_v31, %v13577_v8  ;;  %v17949_v31 = vld [vmem:[#allocation4 + $0xfac] sm:$0xf0] }
 0x2c4   : > { %v13816_v8 = vor.u32 %v17949_v31, %v13815_v3  ;;  %v17862_v3 = vld [vmem:[#allocation4 + $0xcf4] sm:$0xf0] }
 0x2c5   : > { %4449 = vmatpush.bf16.msra.mxu1 %v13580_v11  ;;  %4414 = vmatpush.bf16.msrb.mxu2 %v13640_v13  ;;  %v17867_v11 = vld [vmem:[#allocation4 + $0xd24] sm:$0xf]  ;;  %v13689_v13 = vld [vmem:[#allocation4 + $0xeb0] sm:$0xf0] }
 0x2c6   : > { %4424 = vmatpush.bf16.msrb.mxu3 %v13816_v8 }
 0x2c7   : > { %4436 = vmatpush.bf16.msra.mxu0 %v13452_v34  ;;  %v13372_v34 = vor.u32 %v17835_v49, %v13369_v23  ;;  %v2723_v49 = vperm.slane %v19458_v21, 0  ;;  %v13692_v23 = vor.u32 %v17915_v62, %v13689_v13  ;;  %v17929_v62 = vld [vmem:[#allocation4 + $0xf0c] sm:$0xf0] }
 0x2c9   : > { %4450 = vmatpush.bf16.msra.mxu1 %v13564_v15  ;;  %v13481_v15 = vld [vmem:[#allocation4 + $0xd10] sm:$0xf0]  ;;  %v3381_v20 = vadd.f32 %v19444_v33, %v2723_v49  ;;  %v17895_v49 = vld [vmem:[#allocation4 + $0xe04] sm:$0xf] }
 0x2ca   : > { %v3395_v18 = vpop.f32.mrf.mxu1  ;;  %v3434_v35 = vpop.f32.mrf.mxu0 }
 0x2cb   : > { %4437 = vmatpush.bf16.msra.mxu0 %v13436_v1  ;;  %v17901_v18 = vld [vmem:[#allocation4 + $0xe2c] sm:$0xf0] }
 0x2cc   : > { %v13624_v35 = vor.u32 %v17901_v18, %v13623_v19  ;;  %v17911_v19 = vld [vmem:[#allocation4 + $0xe84] sm:$0xf] }
 0x2cd   : > { %4451 = vmatpush.bf16.msra.mxu1 %v13548_v27  ;;  %v3394_v27 = vadd.f32 %v19446_v57, %v3381_v20 }
 0x2ce   : > { %4415 = vmatpush.bf16.msrb.mxu2 %v13624_v35  ;;  %v13484_v35 = vor.u32 %v17863_v14, %v13481_v15  ;;  %v13849_v15 = vld [vmem:[#allocation4 + $0xff0] sm:$0xf0] }
 0x2cf   : > { %4438 = vmatpush.bf16.msra.mxu0 %v13420_v56  ;;  %v13529_v56 = vld [vmem:[#allocation4 + $0xd70] sm:$0xf0] }
 0x2d0   : > { %v13532_v44 = vor.u32 %v17875_v40, %v13529_v56  ;;  %v13767_v56 = vld [vmem:[#allocation4 + $0xf40] sm:$0xf] }
 0x2d2   : > { %v19450_v52 = vpop.f32.mrf.mxu1  ;;  %4416 = vmatpush.bf16.msrb.mxu2 %v13608_v38  ;;  %4452 = vmatpush.bf16.msra.mxu1 %v13532_v44  ;;  %v13660_v38 = vor.u32 %v17907_v32, %v13657_v58  ;;  %v13768_v44 = vor.u32 %v17937_v43, %v13767_v56  ;;  %v17850_v56 = vld [vmem:[#allocation4 + $0xc94] sm:$0xf0]  ;;  %v17947_v43 = vld [vmem:[#allocation4 + $0xfa4] sm:$0xf] }
 0x2d3   : > { %4439 = vmatpush.bf16.msra.mxu0 %v13404_v30  ;;  %v17871_v30 = vld [vmem:[#allocation4 + $0xd44] sm:$0xf] }
 0x2d4   : > { %v19452_v53 = vpop.f32.mrf.mxu0  ;;  %v13516_v61 = vor.u32 %v17871_v30, %v13513_v39  ;;  %v17933_v30 = vld [vmem:[#allocation4 + $0xf2c] sm:$0xf0] }
 0x2d6   : > { %4461 = vmatpush.bf16.msra.mxu2 %v13724_v50  ;;  %4453 = vmatpush.bf16.msra.mxu1 %v13516_v61  ;;  %v13625_v61 = vld [vmem:[#allocation4 + $0xe30] sm:$0xf0] }
 0x2d7   : > { %4440 = vmatpush.bf16.msra.mxu0 %v13388_v4  ;;  %v13628_v31 = vor.u32 %v17899_v17, %v13625_v61  ;;  %v2725_v17 = vperm.slane %v19458_v21, 2 }
 0x2d8   : > { %v19454_v9 = vpop.f32.mrf.mxu2 }
 0x2d9   : > { %v3407_v10 = vadd.f32 %v19454_v9, %v3394_v27  ;;  %v13752_v9 = vor.u32 %v17933_v30, %v13751_v16  ;;  %v17951_v27 = vld [vmem:[#allocation4 + $0xfc4] sm:$0xf]  ;;  %v17894_v30 = vld [vmem:[#allocation4 + $0xdf4] sm:$0xf0] }
 0x2da   : > { %v3447_v12 = vpop.f32.mrf.mxu1  ;;  %4462 = vmatpush.bf16.msra.mxu2 %v13708_v22  ;;  %v13471_v22 = vld [vmem:[#allocation4 + $0xce8] sm:$0xf] }
 0x2db   : > { %4441 = vmatpush.bf16.msra.mxu0 %v13372_v34  ;;  %v13500_v12 = vor.u32 %v17867_v11, %v13497_v5  ;;  %v13735_v5 = vld [vmem:[#allocation4 + $0xf00] sm:$0xf] }
 0x2dc   : > { %v3486_v29 = vpop.f32.mrf.mxu0  ;;  %v13736_v13 = vor.u32 %v17929_v62, %v13735_v5  ;;  %v13583_v5 = vld [vmem:[#allocation4 + $0xdc8] sm:$0xf] }
 0x2dd   : > { %v17945_v29 = vld [vmem:[#allocation4 + $0xf8c] sm:$0xf0]  ;;  %4454 = vmatpush.bf16.msra.mxu1 %v13500_v12  ;;  %v13472_v12 = vor.u32 %v17862_v3, %v13471_v22 }
 0x2de   : > { %4463 = vmatpush.bf16.msra.mxu2 %v13692_v23  ;;  %v13800_v34 = vor.u32 %v17945_v29, %v13799_v42  ;;  %v13609_v23 = vld [vmem:[#allocation4 + $0xe10] sm:$0xf0]  ;;  %v17955_v42 = vld [vmem:[#allocation4 + $0xfe4] sm:$0xf]  ;;  %v13455_v29 = vld [vmem:[#allocation4 + $0xcc8] sm:$0xf] }
 0x2df   : > { %4442 = vmatpush.bf16.msra.mxu0 %v13356_v26  ;;  %v13676_v26 = vor.u32 %v17911_v19, %v13673_v36  ;;  %v13612_v14 = vor.u32 %v17895_v49, %v13609_v23  ;;  %v13852_v36 = vor.u32 %v17955_v42, %v13849_v15  ;;  %v3485_v49 = vadd.f32 %v19452_v53, %v2725_v17  ;;  %v17838_v15 = vld [vmem:[#allocation4 + $0xc34] sm:$0xf0]  ;;  %v13457_v17 = vld [vmem:[#allocation4 + $0xcd8] sm:$0xf0] }
 0x2e0   : > { %v3408_v1 = vpop.f32.mrf.mxu2  ;;  %4425 = vmatpush.bf16.msrb.mxu3 %v13800_v34  ;;  %v17858_v34 = vld [vmem:[#allocation4 + $0xcd4] sm:$0xf0] }
 0x2e1   : > { %v17941_v1 = vld [vmem:[#allocation4 + $0xf6c] sm:$0xf0]  ;;  %4455 = vmatpush.bf16.msra.mxu1 %v13484_v35 }
 0x2e2   : > { %v19456_v37 = vpop.f32.mrf.mxu1  ;;  %4464 = vmatpush.bf16.msra.mxu2 %v13676_v26  ;;  %v13784_v28 = vor.u32 %v17941_v1, %v13783_v41  ;;  %v13456_v26 = vor.u32 %v17858_v34, %v13455_v29  ;;  %v13439_v41 = vld [vmem:[#allocation4 + $0xca8] sm:$0xf]  ;;  %v17854_v1 = vld [vmem:[#allocation4 + $0xcb4] sm:$0xf0] }
 0x2e3   : > { %v3498_v42 = vadd.f32 %v19456_v37, %v3485_v49  ;;  %v17922_v49 = vld [vmem:[#allocation4 + $0xed4] sm:$0xf0] }
 0x2e4   : > { %4426 = vmatpush.bf16.msrb.mxu3 %v13784_v28  ;;  %v13833_v28 = vld [vmem:[#allocation4 + $0xfd0] sm:$0xf0] }
 0x2e6   : > { %4465 = vmatpush.bf16.msra.mxu2 %v13660_v38 }
 0x2e8   : > { %v19460_v24 = vpop.f32.mrf.mxu2  ;;  %4427 = vmatpush.bf16.msrb.mxu3 %v13768_v44 }
 0x2ea   : > { %v3499_v4 = vpop.f32.mrf.mxu1  ;;  %4466 = vmatpush.bf16.msra.mxu2 %v13644_v51  ;;  %v13407_v51 = vld [vmem:[#allocation4 + $0xc68] sm:$0xf] }
 0x2eb   : > { %v2724_v4 = vperm.slane %v19458_v21, 1 }
 0x2ec   : > { %4428 = vmatpush.bf16.msrb.mxu3 %v13752_v9  ;;  %v13801_v9 = vld [vmem:[#allocation4 + $0xf90] sm:$0xf0] }
 0x2ed   : > { %v3433_v19 = vadd.f32 %v19448_v25, %v2724_v4  ;;  %v13836_v25 = vor.u32 %v17951_v27, %v13833_v28  ;;  %v13391_v4 = vld [vmem:[#allocation4 + $0xc48] sm:$0xf] }
 0x2ee   : > { %4467 = vmatpush.bf16.msra.mxu2 %v13628_v31 }
 0x2f0   : > { %v3460_v2 = vpop.f32.mrf.mxu2  ;;  %4429 = vmatpush.bf16.msrb.mxu3 %v13736_v13  ;;  %v13785_v13 = vld [vmem:[#allocation4 + $0xf70] sm:$0xf0] }
 0x2f1   : > { %v3446_v2 = vadd.f32 %v19450_v52, %v3433_v19  ;;  %v13817_v52 = vld [vmem:[#allocation4 + $0xfb0] sm:$0xf0]  ;;  %v13567_v19 = vld [vmem:[#allocation4 + $0xda8] sm:$0xf] }
 0x2f2   : > { %v19463_v18 = vpop.f32.mrf.mxu0  ;;  %4468 = vmatpush.bf16.msra.mxu2 %v13612_v14  ;;  %v13820_v47 = vor.u32 %v17947_v43, %v13817_v52  ;;  %v13375_v14 = vld [vmem:[#allocation4 + $0xc28] sm:$0xf] }
 0x2f3   : > { %v3459_v32 = vadd.f32 %v19460_v24, %v3446_v2  ;;  %v13599_v24 = vld [vmem:[#allocation4 + $0xde8] sm:$0xf]  ;;  %v13769_v2 = vld [vmem:[#allocation4 + $0xf50] sm:$0xf0]  ;;  %v13376_v37 = vor.u32 %v17838_v15, %v13375_v14 }
 0x2f4   : > { %4474 = vmatpush.bf16.msra.mxu3 %v13852_v36  ;;  %v13600_v31 = vor.u32 %v17894_v30, %v13599_v24  ;;  %v17886_v36 = vld [vmem:[#allocation4 + $0xdb4] sm:$0xf0]  ;;  %v13727_v24 = vld [vmem:[#allocation4 + $0xee8] sm:$0xf]  ;;  %v13737_v30 = vld [vmem:[#allocation4 + $0xf10] sm:$0xf0] }
 0x2f5   : > { %v13503_v15 = vld [vmem:[#allocation4 + $0xd28] sm:$0xf] }
 0x2f8   : > { %v3419_v40 = vpop.f32.mrf.mxu3  ;;  %4475 = vmatpush.bf16.msra.mxu3 %v13836_v25  ;;  %v17834_v25 = vld [vmem:[#allocation4 + $0xc14] sm:$0xf0] }
 0x2f9   : > { %v3420_v33 = vadd.f32 %v3419_v40, %v3407_v10  ;;  %v13440_v10 = vor.u32 %v17854_v1, %v13439_v41  ;;  %v13423_v40 = vld [vmem:[#allocation4 + $0xc88] sm:$0xf] }
 0x2fa   : > { %v3538_v50 = vpop.f32.mrf.mxu0  ;;  %v13359_v1 = vld [vmem:[#allocation4 + $0xc08] sm:$0xf] }
 0x2fb   : > { %vm3579_vm14 = vcmp.gt.f32.partialorder %v3420_v33, 0.0  ;;  %v3583_v57 = vmul.f32 0.2, %v3420_v33  ;;  %v19468_v54 = vpop.f32.mrf.mxu2  ;;  %v13424_v50 = vor.u32 %v17850_v56, %v13423_v40  ;;  %v17931_v40 = vld [vmem:[#allocation4 + $0xf24] sm:$0xf] }
 0x2fc   : > { %4476 = vmatpush.bf16.msra.mxu3 %v13820_v47  ;;  %v3511_v53 = vadd.f32 %v19468_v54, %v3498_v42  ;;  %v13753_v56 = vld [vmem:[#allocation4 + $0xf30] sm:$0xf0]  ;;  %v13473_v54 = vld [vmem:[#allocation4 + $0xcf8] sm:$0xf0] }
 0x2fd   : > { %v3587_v39 = vsel %vm3579_vm14, %v3420_v33, %v3583_v57  ;;  %v17846_v57 = vld [vmem:[#allocation4 + $0xc74] sm:$0xf0]  ;;  %v13756_v52 = vor.u32 %v17931_v40, %v13753_v56  ;;  %v13441_v42 = vld [vmem:[#allocation4 + $0xcb8] sm:$0xf0]  ;;  %v17892_v40 = vld [vmem:[#allocation4 + $0xdec] sm:$0xf] }
 0x2fe   : > { %v3591_v55 = vadd.f32 %v3587_v39, %v19300_v63  ;;  %v17943_v39 = vld [vmem:[#allocation4 + $0xf84] sm:$0xf]  ;;  %v13408_v3 = vor.u32 %v17846_v57, %v13407_v51  ;;  %v13601_v56 = vld [vmem:[#allocation4 + $0xdf8] sm:$0xf0] }
 0x2ff   : > { %v13804_v61 = vor.u32 %v17943_v39, %v13801_v9  ;;  %v17926_v39 = vld [vmem:[#allocation4 + $0xef4] sm:$0xf0]  ;;  %v17856_v9 = vld [vmem:[#allocation4 + $0xccc] sm:$0xf] }
 0x300   : > { %v19472_v8 = vmul.f32 0.70710677, %v3591_v55  ;;  %v3421_v11 = vpop.f32.mrf.mxu3 }
 0x301   : > { %v17842_v11 = vld [vmem:[#allocation4 + $0xc54] sm:$0xf0]  ;;  %4477 = vmatpush.bf16.msra.mxu3 %v13804_v61 }
 0x302   : > { %v19476_v63 = vpack.c.bf16 %v19472_v8, %v19472_v8  ;;  %v19479_v35 = vpop.f32.mrf.mxu1  ;;  %v13392_v29 = vor.u32 %v17842_v11, %v13391_v4 }
 0x303   : > { %v3512_v20 = vpop.f32.mrf.mxu2 }
 0x304   : > { %4391 = vmatmul.bf16.vlgmr.msrb.gmra.mxu0 %v19476_v63  ;;  %v17935_v20 = vld [vmem:[#allocation4 + $0xf44] sm:$0xf] }
 0x305   : > { %4487 = vmatpush.bf16.msrb.mxu0 %v13472_v12  ;;  %v17939_v12 = vld [vmem:[#allocation4 + $0xf64] sm:$0xf] }
 0x306   : > { %v13788_v23 = vor.u32 %v17939_v12, %v13785_v13  ;;  %v17874_v12 = vld [vmem:[#allocation4 + $0xd54] sm:$0xf0]  ;;  %v13711_v13 = vld [vmem:[#allocation4 + $0xec8] sm:$0xf] }
 0x308   : > { %v3471_v58 = vpop.f32.mrf.mxu3  ;;  %4478 = vmatpush.bf16.msra.mxu3 %v13788_v23  ;;  %v17852_v23 = vld [vmem:[#allocation4 + $0xcac] sm:$0xf] }
 0x309   : > { %v3472_v38 = vadd.f32 %v3471_v58, %v3459_v32  ;;  %4488 = vmatpush.bf16.msrb.mxu0 %v13456_v26  ;;  %v13772_v26 = vor.u32 %v17935_v20, %v13769_v2  ;;  %v13568_v32 = vor.u32 %v17886_v36, %v13567_v19  ;;  %v13551_v58 = vld [vmem:[#allocation4 + $0xd88] sm:$0xf]  ;;  %v13444_v14 = vor.u32 %v17852_v23, %v13441_v42  ;;  %v17870_v19 = vld [vmem:[#allocation4 + $0xd34] sm:$0xf0]  ;;  %v17848_v2 = vld [vmem:[#allocation4 + $0xc8c] sm:$0xf] }
 0x30a   : > { %v3551_v44 = vpop.f32.mrf.mxu1  ;;  %v13695_v36 = vld [vmem:[#allocation4 + $0xea8] sm:$0xf]  ;;  %v17918_v20 = vld [vmem:[#allocation4 + $0xeb4] sm:$0xf0]  ;;  %v17832_v23 = vld [vmem:[#allocation4 + $0xc0c] sm:$0xf] }
 0x30b   : > { %vm3580_vm15 = vcmp.gt.f32.partialorder %v3472_v38, 0.0  ;;  %v3584_v33 = vmul.f32 0.2, %v3472_v38  ;;  %v13360_v44 = vor.u32 %v17834_v25, %v13359_v1  ;;  %v17914_v25 = vld [vmem:[#allocation4 + $0xe94] sm:$0xf0] }
 0x30c   : > { %4479 = vmatpush.bf16.msra.mxu3 %v13772_v26  ;;  %v13504_v26 = vor.u32 %v17870_v19, %v13503_v15  ;;  %v13361_v42 = vld [vmem:[#allocation4 + $0xc18] sm:$0xf0] }
 0x30d   : > { %v3588_v48 = vsel %vm3580_vm15, %v3472_v38, %v3584_v33  ;;  %4489 = vmatpush.bf16.msrb.mxu0 %v13440_v10  ;;  %v17882_v38 = vld [vmem:[#allocation4 + $0xd94] sm:$0xf0]  ;;  %v17860_v10 = vld [vmem:[#allocation4 + $0xcec] sm:$0xf]  ;;  %v13364_v19 = vor.u32 %v17832_v23, %v13361_v42  ;;  %v13665_v23 = vld [vmem:[#allocation4 + $0xe78] sm:$0xf0] }
 0x30e   : > { %v3592_v16 = vadd.f32 %v3588_v48, %v19302_v0  ;;  %v17890_v0 = vld [vmem:[#allocation4 + $0xdd4] sm:$0xf0]  ;;  %v13552_v47 = vor.u32 %v17882_v38, %v13551_v58  ;;  %v13535_v48 = vld [vmem:[#allocation4 + $0xd68] sm:$0xf]  ;;  %v13476_v57 = vor.u32 %v17860_v10, %v13473_v54  ;;  %v17844_v58 = vld [vmem:[#allocation4 + $0xc6c] sm:$0xf] }
 0x30f   : > { %v13584_v34 = vor.u32 %v17890_v0, %v13583_v5  ;;  %v13460_v5 = vor.u32 %v17856_v9, %v13457_v17  ;;  %v13519_v0 = vld [vmem:[#allocation4 + $0xd48] sm:$0xf]  ;;  %v13409_v38 = vld [vmem:[#allocation4 + $0xc78] sm:$0xf0]  ;;  %v2726_v10 = vperm.slane %v19458_v21, 3 }
 0x310   : > { %v19486_v55 = vmul.f32 0.70710677, %v3592_v16  ;;  %v3473_v22 = vpop.f32.mrf.mxu3  ;;  %4480 = vmatpush.bf16.msra.mxu3 %v13756_v52  ;;  %v17927_v16 = vld [vmem:[#allocation4 + $0xf04] sm:$0xf]  ;;  %v13412_v52 = vor.u32 %v17844_v58, %v13409_v38  ;;  %v17906_v17 = vld [vmem:[#allocation4 + $0xe54] sm:$0xf0] }
 0x311   : > { %4490 = vmatpush.bf16.msrb.mxu0 %v13424_v50  ;;  %v17878_v50 = vld [vmem:[#allocation4 + $0xd74] sm:$0xf0]  ;;  %v13740_v61 = vor.u32 %v17927_v16, %v13737_v30 }
 0x312   : > { %v19490_v62 = vpack.c.bf16 %v19486_v55, %v19486_v55  ;;  %v13536_v4 = vor.u32 %v17878_v50, %v13535_v48  ;;  %v17840_v48 = vld [vmem:[#allocation4 + $0xc4c] sm:$0xf]  ;;  %v13393_v50 = vld [vmem:[#allocation4 + $0xc58] sm:$0xf0] }
 0x313   : > { %v13396_v30 = vor.u32 %v17840_v48, %v13393_v50 }
 0x314   : > { %4404 = vmatmul.bf16.vlgmr.msrb.gmra.mxu1 %v19490_v62  ;;  %4443 = vmatmul.bf16.vlgmr.msra.gmra.mxu0 %v19476_v63 }
 0x315   : > { %4491 = vmatpush.bf16.msrb.mxu0 %v13408_v3  ;;  %4500 = vmatpush.bf16.msrb.mxu1 %v13600_v31 }
 0x316   : > { %4481 = vmatpush.bf16.msra.mxu3 %v13740_v61  ;;  %v17836_v61 = vld [vmem:[#allocation4 + $0xc2c] sm:$0xf] }
 0x318   : > { %v3523_v41 = vpop.f32.mrf.mxu3 }
 0x319   : > { %v3524_v27 = vadd.f32 %v3523_v41, %v3511_v53  ;;  %v19497_v28 = vpop.f32.mrf.mxu2  ;;  %4492 = vmatpush.bf16.msrb.mxu0 %v13392_v29  ;;  %4501 = vmatpush.bf16.msrb.mxu1 %v13584_v34  ;;  %v13520_v29 = vor.u32 %v17874_v12, %v13519_v0  ;;  %v13712_v34 = vor.u32 %v17922_v49, %v13711_v13  ;;  %v13425_v53 = vld [vmem:[#allocation4 + $0xc98] sm:$0xf0]  ;;  %v13631_v12 = vld [vmem:[#allocation4 + $0xe28] sm:$0xf]  ;;  %v17902_v13 = vld [vmem:[#allocation4 + $0xe34] sm:$0xf0] }
 0x31a   : > { %v13696_v41 = vor.u32 %v17918_v20, %v13695_v36  ;;  %v13428_v1 = vor.u32 %v17848_v2, %v13425_v53  ;;  %v13632_v15 = vor.u32 %v17902_v13, %v13631_v12  ;;  %v13615_v36 = vld [vmem:[#allocation4 + $0xe08] sm:$0xf]  ;;  %v17898_v20 = vld [vmem:[#allocation4 + $0xe14] sm:$0xf0] }
 0x31b   : > { %vm3581_vm0 = vcmp.gt.f32.partialorder %v3524_v27, 0.0  ;;  %v3585_v43 = vmul.f32 0.2, %v3524_v27  ;;  %v13616_v38 = vor.u32 %v17898_v20, %v13615_v36  ;;  %v13791_v12 = vld [vmem:[#allocation4 + $0xf68] sm:$0xf] }
 0x31c   : > { %v17942_v13 = vld [vmem:[#allocation4 + $0xf74] sm:$0xf0]  ;;  %v13759_v20 = vld [vmem:[#allocation4 + $0xf28] sm:$0xf] }
 0x31d   : > { %v3589_v33 = vsel %vm3581_vm0, %v3524_v27, %v3585_v43  ;;  %4493 = vmatpush.bf16.msrb.mxu0 %v13376_v37  ;;  %4502 = vmatpush.bf16.msrb.mxu1 %v13568_v32  ;;  %v13487_v27 = vld [vmem:[#allocation4 + $0xd08] sm:$0xf]  ;;  %v17866_v37 = vld [vmem:[#allocation4 + $0xd14] sm:$0xf0]  ;;  %v13792_v42 = vor.u32 %v17942_v13, %v13791_v12  ;;  %v17981_v12 = vld [vmem:[#allocation4 + $0x10ac] sm:$0xf0] }
 0x31e   : > { %v3593_v51 = vadd.f32 %v3589_v33, %v19304_v6  ;;  %v13728_v6 = vor.u32 %v17926_v39, %v13727_v24  ;;  %v13679_v32 = vld [vmem:[#allocation4 + $0xe88] sm:$0xf]  ;;  %v13488_v43 = vor.u32 %v17866_v37, %v13487_v27  ;;  %v13585_v24 = vld [vmem:[#allocation4 + $0xdd8] sm:$0xf0]  ;;  %v17924_v37 = vld [vmem:[#allocation4 + $0xeec] sm:$0xf] }
 0x31f   : > { %v13680_v54 = vor.u32 %v17914_v25, %v13679_v32  ;;  %v13663_v33 = vld [vmem:[#allocation4 + $0xe68] sm:$0xf]  ;;  %v13537_v27 = vld [vmem:[#allocation4 + $0xd78] sm:$0xf0] }
 0x320   : > { %v19500_v22 = vmul.f32 0.70710677, %v3593_v51  ;;  %v3525_v3 = vpop.f32.mrf.mxu3  ;;  %v3537_v51 = vadd.f32 %v19463_v18, %v2726_v10  ;;  %v13647_v39 = vld [vmem:[#allocation4 + $0xe48] sm:$0xf]  ;;  %v17884_v18 = vld [vmem:[#allocation4 + $0xdac] sm:$0xf] }
 0x321   : > { %v3564_v31 = vpop.f32.mrf.mxu2  ;;  %4494 = vmatpush.bf16.msrb.mxu0 %v13360_v44  ;;  %4503 = vmatpush.bf16.msrb.mxu1 %v13552_v47  ;;  %v13604_v44 = vor.u32 %v17892_v40, %v13601_v56  ;;  %v17910_v47 = vld [vmem:[#allocation4 + $0xe74] sm:$0xf0]  ;;  %v13377_v3 = vld [vmem:[#allocation4 + $0xc38] sm:$0xf0] }
 0x322   : > { %v19504_v11 = vpack.c.bf16 %v19500_v22, %v19500_v22  ;;  %v3550_v21 = vadd.f32 %v19479_v35, %v3537_v51  ;;  %v13664_v16 = vor.u32 %v17910_v47, %v13663_v33  ;;  %v13380_v0 = vor.u32 %v17836_v61, %v13377_v3  ;;  %v13729_v32 = vld [vmem:[#allocation4 + $0xef8] sm:$0xf0]  ;;  %v13807_v61 = vld [vmem:[#allocation4 + $0xf88] sm:$0xf]  ;;  %v17946_v3 = vld [vmem:[#allocation4 + $0xf94] sm:$0xf0] }
 0x323   : > { %v13732_v56 = vor.u32 %v17924_v37, %v13729_v32  ;;  %v13521_v33 = vld [vmem:[#allocation4 + $0xd58] sm:$0xf0]  ;;  %v17930_v37 = vld [vmem:[#allocation4 + $0xf14] sm:$0xf0]  ;;  %v17896_v32 = vld [vmem:[#allocation4 + $0xe0c] sm:$0xf] }
 0x324   : > { %4417 = vmatmul.bf16.vlgmr.msrb.gmra.mxu2 %v19504_v11  ;;  %4456 = vmatmul.bf16.vlgmr.msra.gmra.mxu1 %v19490_v62  ;;  %v3563_v31 = vadd.f32 %v19497_v28, %v3550_v21  ;;  %v13713_v47 = vld [vmem:[#allocation4 + $0xed8] sm:$0xf0]  ;;  %v17868_v21 = vld [vmem:[#allocation4 + $0xd2c] sm:$0xf] }
 0x325   : > { %4539 = vmatpush.bf16.msra.mxu0 %v13476_v57  ;;  %4504 = vmatpush.bf16.msrb.mxu1 %v13536_v4  ;;  %v17888_v57 = vld [vmem:[#allocation4 + $0xdcc] sm:$0xf]  ;;  %v13569_v4 = vld [vmem:[#allocation4 + $0xdb8] sm:$0xf0] }
 0x326   : > { %4495 = vmatmul.bf16.vlgmr.msrb.gmra.mxu0 %v19476_v63  ;;  %4513 = vmatpush.bf16.msrb.mxu2 %v13728_v6  ;;  %v13588_v9 = vor.u32 %v17888_v57, %v13585_v24  ;;  %v13572_v49 = vor.u32 %v17884_v18, %v13569_v4  ;;  %v13823_v57 = vld [vmem:[#allocation4 + $0xfa8] sm:$0xf]  ;;  %v17950_v24 = vld [vmem:[#allocation4 + $0xfb4] sm:$0xf0]  ;;  %v13489_v18 = vld [vmem:[#allocation4 + $0xd18] sm:$0xf0] }
 0x327   : > { %v17912_v4 = vld [vmem:[#allocation4 + $0xe8c] sm:$0xf] }
 0x329   : > { %4540 = vmatpush.bf16.msra.mxu0 %v13460_v5  ;;  %4505 = vmatpush.bf16.msrb.mxu1 %v13520_v29  ;;  %v13648_v5 = vor.u32 %v17906_v17, %v13647_v39  ;;  %v17880_v29 = vld [vmem:[#allocation4 + $0xd8c] sm:$0xf]  ;;  %v13697_v39 = vld [vmem:[#allocation4 + $0xeb8] sm:$0xf0] }
 0x32a   : > { %4514 = vmatpush.bf16.msrb.mxu2 %v13712_v34  ;;  %v13553_v34 = vld [vmem:[#allocation4 + $0xd98] sm:$0xf0] }
 0x32b   : > { %v13556_v53 = vor.u32 %v17880_v29, %v13553_v34  ;;  %v17938_v34 = vld [vmem:[#allocation4 + $0xf54] sm:$0xf0] }
 0x32d   : > { %4541 = vmatpush.bf16.msra.mxu0 %v13444_v14  ;;  %4506 = vmatpush.bf16.msrb.mxu1 %v13504_v26  ;;  %v13855_v26 = vld [vmem:[#allocation4 + $0xfe8] sm:$0xf] }
 0x32e   : > { %4515 = vmatpush.bf16.msrb.mxu2 %v13696_v41  ;;  %v17958_v41 = vld [vmem:[#allocation4 + $0xff4] sm:$0xf0] }
 0x32f   : > { %v13856_v10 = vor.u32 %v17958_v41, %v13855_v26  ;;  %v13633_v26 = vld [vmem:[#allocation4 + $0xe38] sm:$0xf0] }
 0x331   : > { %4542 = vmatpush.bf16.msra.mxu0 %v13428_v1  ;;  %4507 = vmatpush.bf16.msrb.mxu1 %v13488_v43  ;;  %v17876_v1 = vld [vmem:[#allocation4 + $0xd6c] sm:$0xf]  ;;  %v13839_v43 = vld [vmem:[#allocation4 + $0xfc8] sm:$0xf] }
 0x332   : > { %4516 = vmatpush.bf16.msrb.mxu2 %v13680_v54  ;;  %v17954_v54 = vld [vmem:[#allocation4 + $0xfd4] sm:$0xf0] }
 0x333   : > { %v13840_v48 = vor.u32 %v17954_v54, %v13839_v43  ;;  %v17952_v43 = vld [vmem:[#allocation4 + $0xfcc] sm:$0xf]  ;;  %v13841_v54 = vld [vmem:[#allocation4 + $0xfd8] sm:$0xf0] }
 0x334   : > { %4469 = vmatmul.bf16.vlgmr.msra.gmra.mxu2 %v19504_v11  ;;  %4508 = vmatmul.bf16.vlgmr.msrb.gmra.mxu1 %v19490_v62 }
 0x335   : > { %4543 = vmatpush.bf16.msra.mxu0 %v13412_v52  ;;  %4552 = vmatpush.bf16.msra.mxu1 %v13604_v44  ;;  %v17872_v52 = vld [vmem:[#allocation4 + $0xd4c] sm:$0xf] }
 0x336   : > { %4517 = vmatpush.bf16.msrb.mxu2 %v13664_v16  ;;  %v17920_v44 = vld [vmem:[#allocation4 + $0xecc] sm:$0xf]  ;;  %v13524_v50 = vor.u32 %v17872_v52, %v13521_v33  ;;  %v13505_v16 = vld [vmem:[#allocation4 + $0xd38] sm:$0xf0]  ;;  %v13844_v52 = vor.u32 %v17952_v43, %v13841_v54  ;;  %v18009_v54 = vld [vmem:[#allocation4 + $0x118c] sm:$0xf0] }
 0x337   : > { %v13716_v51 = vor.u32 %v17920_v44, %v13713_v47  ;;  %v17948_v33 = vld [vmem:[#allocation4 + $0xfac] sm:$0xf]  ;;  %v13825_v44 = vld [vmem:[#allocation4 + $0xfb8] sm:$0xf0] }
 0x338   : > { %v3575_v6 = vpop.f32.mrf.mxu3  ;;  %v13828_v47 = vor.u32 %v17948_v33, %v13825_v44  ;;  %v13977_v33 = vld [vmem:[#allocation4 + $0x10f0] sm:$0xf0] }
 0x339   : > { %v3576_v35 = vadd.f32 %v3575_v6, %v3563_v31  ;;  %4544 = vmatpush.bf16.msra.mxu0 %v13396_v30  ;;  %4553 = vmatpush.bf16.msra.mxu1 %v13588_v9  ;;  %v17916_v30 = vld [vmem:[#allocation4 + $0xeac] sm:$0xf]  ;;  %v13824_v9 = vor.u32 %v17950_v24, %v13823_v57  ;;  %v13681_v6 = vld [vmem:[#allocation4 + $0xe98] sm:$0xf0] }
 0x33a   : > { %4518 = vmatpush.bf16.msrb.mxu2 %v13648_v5  ;;  %v13700_v17 = vor.u32 %v17916_v30, %v13697_v39  ;;  %v17864_v31 = vld [vmem:[#allocation4 + $0xd0c] sm:$0xf]  ;;  %v13793_v24 = vld [vmem:[#allocation4 + $0xf78] sm:$0xf0] }
 0x33b   : > { %vm3582_vm1 = vcmp.gt.f32.partialorder %v3576_v35, 0.0  ;;  %v3586_v28 = vmul.f32 0.2, %v3576_v35  ;;  %v13492_v5 = vor.u32 %v17864_v31, %v13489_v18  ;;  %v17940_v57 = vld [vmem:[#allocation4 + $0xf6c] sm:$0xf] }
 0x33c   : > { %v13777_v30 = vld [vmem:[#allocation4 + $0xf58] sm:$0xf0]  ;;  %v17985_v31 = vld [vmem:[#allocation4 + $0x10cc] sm:$0xf0] }
 0x33d   : > { %v3590_v14 = vsel %vm3582_vm1, %v3576_v35, %v3586_v28  ;;  %4545 = vmatpush.bf16.msra.mxu0 %v13380_v0  ;;  %4554 = vmatpush.bf16.msra.mxu1 %v13572_v49  ;;  %v13808_v35 = vor.u32 %v17946_v3, %v13807_v61  ;;  %v13684_v0 = vor.u32 %v17912_v4, %v13681_v6  ;;  %v17908_v49 = vld [vmem:[#allocation4 + $0xe6c] sm:$0xf]  ;;  %v13775_v28 = vld [vmem:[#allocation4 + $0xf48] sm:$0xf]  ;;  %v17989_v61 = vld [vmem:[#allocation4 + $0x10ec] sm:$0xf0] }
 0x33e   : > { %v3594_v2 = vadd.f32 %v3590_v14, %v19306_v7  ;;  %4519 = vmatpush.bf16.msrb.mxu2 %v13632_v15  ;;  %v13540_v7 = vor.u32 %v17876_v1, %v13537_v27  ;;  %v13668_v29 = vor.u32 %v17908_v49, %v13665_v23  ;;  %v17904_v14 = vld [vmem:[#allocation4 + $0xe4c] sm:$0xf]  ;;  %v13649_v15 = vld [vmem:[#allocation4 + $0xe58] sm:$0xf0]  ;;  %v13743_v27 = vld [vmem:[#allocation4 + $0xf08] sm:$0xf] }
 0x33f   : > { %v13652_v36 = vor.u32 %v17904_v14, %v13649_v15  ;;  %v17928_v6 = vld [vmem:[#allocation4 + $0xf0c] sm:$0xf]  ;;  %v13927_v49 = vld [vmem:[#allocation4 + $0x1080] sm:$0xf]  ;;  %v17977_v23 = vld [vmem:[#allocation4 + $0x108c] sm:$0xf0] }
 0x340   : > { %v19516_v25 = vmul.f32 0.70710677, %v3594_v2  ;;  %v3577_v58 = vpop.f32.mrf.mxu3  ;;  %v17934_v2 = vld [vmem:[#allocation4 + $0xf34] sm:$0xf0] }
 0x341   : > { %4546 = vmatpush.bf16.msra.mxu0 %v13364_v19  ;;  %4555 = vmatpush.bf16.msra.mxu1 %v13556_v53  ;;  %v13776_v19 = vor.u32 %v17938_v34, %v13775_v28  ;;  %v17900_v53 = vld [vmem:[#allocation4 + $0xe2c] sm:$0xf]  ;;  %v13760_v41 = vor.u32 %v17934_v2, %v13759_v20  ;;  %v13617_v58 = vld [vmem:[#allocation4 + $0xe18] sm:$0xf0]  ;;  %v17973_v28 = vld [vmem:[#allocation4 + $0x106c] sm:$0xf0] }
 0x342   : > { %v19520_v40 = vpack.c.bf16 %v19516_v25, %v19516_v25  ;;  %4520 = vmatpush.bf16.msrb.mxu2 %v13616_v38  ;;  %v13636_v1 = vor.u32 %v17900_v53, %v13633_v26  ;;  %v17956_v38 = vld [vmem:[#allocation4 + $0xfec] sm:$0xf]  ;;  %v14103_v34 = vld [vmem:[#allocation4 + $0x11e0] sm:$0xf]  ;;  %v17969_v2 = vld [vmem:[#allocation4 + $0x104c] sm:$0xf0] }
 0x343   : > { %v13895_v20 = vld [vmem:[#allocation4 + $0x1040] sm:$0xf] }
 0x344   : > { %4430 = vmatmul.bf16.vlgmr.msrb.gmra.mxu3 %v19520_v40  ;;  %4547 = vmatmul.bf16.vlgmr.msra.gmra.mxu0 %v19476_v63  ;;  %v13508_v63 = vor.u32 %v17868_v21, %v13505_v16  ;;  %v13796_v21 = vor.u32 %v17940_v57, %v13793_v24  ;;  %v17936_v16 = vld [vmem:[#allocation4 + $0xf4c] sm:$0xf]  ;;  %v14087_v53 = vld [vmem:[#allocation4 + $0x11c0] sm:$0xf]  ;;  %v13896_v26 = vor.u32 %v17969_v2, %v13895_v20 }
 0x345   : > { %4526 = vmatpush.bf16.msrb.mxu3 %v13856_v10  ;;  %4556 = vmatpush.bf16.msra.mxu1 %v13540_v7  ;;  %v13857_v10 = vld [vmem:[#allocation4 + $0xff8] sm:$0xf0]  ;;  %v13744_v7 = vor.u32 %v17930_v37, %v13743_v27  ;;  %v13780_v39 = vor.u32 %v17936_v16, %v13777_v30  ;;  %v17965_v27 = vld [vmem:[#allocation4 + $0x102c] sm:$0xf0]  ;;  %v14071_v37 = vld [vmem:[#allocation4 + $0x11a0] sm:$0xf] }
 0x346   : > { %4565 = vmatpush.bf16.msra.mxu2 %v13732_v56  ;;  %v13860_v56 = vor.u32 %v17956_v38, %v13857_v10  ;;  %v18013_v38 = vld [vmem:[#allocation4 + $0x11ac] sm:$0xf0]  ;;  %v17983_v30 = vld [vmem:[#allocation4 + $0x10c4] sm:$0xf]  ;;  %v14183_v20 = vld [vmem:[#allocation4 + $0x1280] sm:$0xf] }
 0x347   : > { %4521 = vmatmul.bf16.vlgmr.msrb.gmra.mxu2 %v19504_v11  ;;  %v14072_v10 = vor.u32 %v18013_v38, %v14071_v37  ;;  %v18053_v16 = vld [vmem:[#allocation4 + $0x12ec] sm:$0xf0]  ;;  %v14105_v37 = vld [vmem:[#allocation4 + $0x11f0] sm:$0xf0] }
 0x348   : > { %v18037_v38 = vld [vmem:[#allocation4 + $0x126c] sm:$0xf0] }
 0x349   : > { %4527 = vmatpush.bf16.msrb.mxu3 %v13840_v48  ;;  %4557 = vmatpush.bf16.msra.mxu1 %v13524_v50  ;;  %v17944_v48 = vld [vmem:[#allocation4 + $0xf8c] sm:$0xf]  ;;  %v13809_v50 = vld [vmem:[#allocation4 + $0xf98] sm:$0xf0] }
 0x34a   : > { %4566 = vmatpush.bf16.msra.mxu2 %v13716_v51  ;;  %v13812_v51 = vor.u32 %v17944_v48, %v13809_v50  ;;  %v14039_v48 = vld [vmem:[#allocation4 + $0x1160] sm:$0xf]  ;;  %v18005_v50 = vld [vmem:[#allocation4 + $0x116c] sm:$0xf0] }
 0x34d   : > { %4528 = vmatpush.bf16.msrb.mxu3 %v13824_v9  ;;  %4558 = vmatpush.bf16.msra.mxu1 %v13508_v63  ;;  %v17932_v9 = vld [vmem:[#allocation4 + $0xf2c] sm:$0xf]  ;;  %v13761_v63 = vld [vmem:[#allocation4 + $0xf38] sm:$0xf0] }
 0x34e   : > { %4567 = vmatpush.bf16.msra.mxu2 %v13700_v17  ;;  %v13975_v17 = vld [vmem:[#allocation4 + $0x10e0] sm:$0xf]  ;;  %v13764_v18 = vor.u32 %v17932_v9, %v13761_v63 }
 0x34f   : > { %v13976_v3 = vor.u32 %v17989_v61, %v13975_v17  ;;  %v14023_v17 = vld [vmem:[#allocation4 + $0x1140] sm:$0xf]  ;;  %v18001_v61 = vld [vmem:[#allocation4 + $0x114c] sm:$0xf0] }
 0x351   : > { %4529 = vmatpush.bf16.msrb.mxu3 %v13808_v35  ;;  %4559 = vmatpush.bf16.msra.mxu1 %v13492_v5  ;;  %v13745_v35 = vld [vmem:[#allocation4 + $0xf18] sm:$0xf0] }
 0x352   : > { %4568 = vmatpush.bf16.msra.mxu2 %v13684_v0  ;;  %5387 = vmatpush.bf16.msrb.mxu0 %v13976_v3  ;;  %v13748_v5 = vor.u32 %v17928_v6, %v13745_v35  ;;  %v13943_v0 = vld [vmem:[#allocation4 + $0x10a0] sm:$0xf] }
 0x353   : > { %v13944_v13 = vor.u32 %v17981_v12, %v13943_v0  ;;  %v14215_v3 = vld [vmem:[#allocation4 + $0x12c0] sm:$0xf]  ;;  %v17997_v0 = vld [vmem:[#allocation4 + $0x112c] sm:$0xf0] }
 0x354   : > { %4482 = vmatmul.bf16.vlgmr.msra.gmra.mxu3 %v19520_v40  ;;  %4560 = vmatmul.bf16.vlgmr.msra.gmra.mxu1 %v19490_v62  ;;  %v13620_v62 = vor.u32 %v17896_v32, %v13617_v58  ;;  %v14199_v12 = vld [vmem:[#allocation4 + $0x12a0] sm:$0xf] }
 0x355   : > { %4530 = vmatpush.bf16.msrb.mxu3 %v13792_v42  ;;  %v13928_v42 = vor.u32 %v17977_v23, %v13927_v49 }
 0x356   : > { %4569 = vmatpush.bf16.msra.mxu2 %v13668_v29  ;;  %v13911_v29 = vld [vmem:[#allocation4 + $0x1060] sm:$0xf] }
 0x357   : > { %v13912_v15 = vor.u32 %v17973_v28, %v13911_v29  ;;  %v17975_v29 = vld [vmem:[#allocation4 + $0x1084] sm:$0xf]  ;;  %v13929_v28 = vld [vmem:[#allocation4 + $0x1090] sm:$0xf0] }
 0x359   : > { %4531 = vmatpush.bf16.msrb.mxu3 %v13776_v19  ;;  %v18021_v19 = vld [vmem:[#allocation4 + $0x11ec] sm:$0xf0] }
 0x35a   : > { %4570 = vmatpush.bf16.msra.mxu2 %v13652_v36  ;;  %v14104_v36 = vor.u32 %v18021_v19, %v14103_v34  ;;  %v13991_v19 = vld [vmem:[#allocation4 + $0x1100] sm:$0xf] }
 0x35c   : > { %5400 = vmatpush.bf16.msrb.mxu1 %v14104_v36  ;;  %v17993_v36 = vld [vmem:[#allocation4 + $0x110c] sm:$0xf0] }
 0x35d   : > { %4532 = vmatpush.bf16.msrb.mxu3 %v13760_v41  ;;  %v18017_v41 = vld [vmem:[#allocation4 + $0x11cc] sm:$0xf0]  ;;  %v13992_v2 = vor.u32 %v17993_v36, %v13991_v19  ;;  %v18051_v19 = vld [vmem:[#allocation4 + $0x12e4] sm:$0xf]  ;;  %v14233_v36 = vld [vmem:[#allocation4 + $0x12f0] sm:$0xf0] }
 0x35e   : > { %4571 = vmatpush.bf16.msra.mxu2 %v13636_v1  ;;  %v14088_v1 = vor.u32 %v18017_v41, %v14087_v53  ;;  %v18041_v53 = vld [vmem:[#allocation4 + $0x128c] sm:$0xf0]  ;;  %v13913_v41 = vld [vmem:[#allocation4 + $0x1070] sm:$0xf0] }
 0x360   : > { %5401 = vmatpush.bf16.msrb.mxu1 %v14088_v1  ;;  %v14184_v1 = vor.u32 %v18041_v53, %v14183_v20  ;;  %v14343_v53 = vld [vmem:[#allocation4 + $0x13c0] sm:$0xf] }
 0x361   : > { %4533 = vmatpush.bf16.msrb.mxu3 %v13744_v7  ;;  %v13863_v7 = vld [vmem:[#allocation4 + $0x1000] sm:$0xf] }
 0x362   : > { %4572 = vmatpush.bf16.msra.mxu2 %v13620_v62  ;;  %v17961_v62 = vld [vmem:[#allocation4 + $0x100c] sm:$0xf0] }
 0x363   : > { %v13864_v43 = vor.u32 %v17961_v62, %v13863_v7  ;;  %v13897_v62 = vld [vmem:[#allocation4 + $0x1050] sm:$0xf0] }
 0x364   : > { %4534 = vmatmul.bf16.vlgmr.msrb.gmra.mxu3 %v19520_v40  ;;  %5402 = vmatpush.bf16.msrb.mxu1 %v14072_v10  ;;  %v17967_v10 = vld [vmem:[#allocation4 + $0x1044] sm:$0xf] }
 0x365   : > { %4578 = vmatpush.bf16.msra.mxu3 %v13860_v56  ;;  %4573 = vmatmul.bf16.vlgmr.msra.gmra.mxu2 %v19504_v11  ;;  %v13959_v11 = vld [vmem:[#allocation4 + $0x10c0] sm:$0xf] }
 0x366   : > { %v13960_v4 = vor.u32 %v17985_v31, %v13959_v11  ;;  %v14055_v56 = vld [vmem:[#allocation4 + $0x1180] sm:$0xf]  ;;  %v18049_v11 = vld [vmem:[#allocation4 + $0x12cc] sm:$0xf0]  ;;  %v17979_v31 = vld [vmem:[#allocation4 + $0x10a4] sm:$0xf] }
 0x367   : > { %v14056_v44 = vor.u32 %v18009_v54, %v14055_v56  ;;  %v14216_v6 = vor.u32 %v18049_v11, %v14215_v3  ;;  %v18015_v56 = vld [vmem:[#allocation4 + $0x11c4] sm:$0xf] }
 0x368   : > { %5388 = vmatpush.bf16.msrb.mxu0 %v13960_v4  ;;  %v14024_v4 = vor.u32 %v18001_v61, %v14023_v17  ;;  %v14135_v17 = vld [vmem:[#allocation4 + $0x1220] sm:$0xf]  ;;  %v18029_v61 = vld [vmem:[#allocation4 + $0x122c] sm:$0xf0] }
 0x369   : > { %4579 = vmatpush.bf16.msra.mxu3 %v13844_v52  ;;  %v17987_v52 = vld [vmem:[#allocation4 + $0x10e4] sm:$0xf]  ;;  %5403 = vmatpush.bf16.msrb.mxu1 %v14056_v44  ;;  %v14136_v11 = vor.u32 %v18029_v61, %v14135_v17  ;;  %v13993_v17 = vld [vmem:[#allocation4 + $0x1110] sm:$0xf0] }
 0x36a   : > { %v18039_v61 = vld [vmem:[#allocation4 + $0x1284] sm:$0xf] }
 0x36c   : > { %5389 = vmatpush.bf16.msrb.mxu0 %v13944_v13 }
 0x36d   : > { %4580 = vmatpush.bf16.msra.mxu3 %v13828_v47  ;;  %v13980_v47 = vor.u32 %v17987_v52, %v13977_v33  ;;  %v13900_v52 = vor.u32 %v17967_v10, %v13897_v62  ;;  %v14327_v10 = vld [vmem:[#allocation4 + $0x13a0] sm:$0xf] }
 0x370   : > { %5390 = vmatpush.bf16.msrb.mxu0 %v13928_v42  ;;  %v18045_v42 = vld [vmem:[#allocation4 + $0x12ac] sm:$0xf0] }
 0x371   : > { %4581 = vmatpush.bf16.msra.mxu3 %v13812_v51  ;;  %v14231_v51 = vld [vmem:[#allocation4 + $0x12e0] sm:$0xf]  ;;  %v14200_v34 = vor.u32 %v18045_v42, %v14199_v12  ;;  %v18085_v42 = vld [vmem:[#allocation4 + $0x13ec] sm:$0xf0] }
 0x372   : > { %v14232_v9 = vor.u32 %v18053_v16, %v14231_v51  ;;  %v17963_v51 = vld [vmem:[#allocation4 + $0x1024] sm:$0xf]  ;;  %v14119_v12 = vld [vmem:[#allocation4 + $0x1200] sm:$0xf] }
 0x373   : > { %v18011_v16 = vld [vmem:[#allocation4 + $0x11a4] sm:$0xf] }
 0x374   : > { %5391 = vmatpush.bf16.msrb.mxu0 %v13912_v15  ;;  %5413 = vmatpush.bf16.msrb.mxu2 %v14232_v9  ;;  %v13932_v15 = vor.u32 %v17975_v29, %v13929_v28  ;;  %v18003_v29 = vld [vmem:[#allocation4 + $0x1164] sm:$0xf]  ;;  %v14041_v28 = vld [vmem:[#allocation4 + $0x1170] sm:$0xf0] }
 0x375   : > { %4582 = vmatpush.bf16.msra.mxu3 %v13796_v21  ;;  %v14040_v21 = vor.u32 %v18005_v50, %v14039_v48  ;;  %v18033_v48 = vld [vmem:[#allocation4 + $0x124c] sm:$0xf0] }
 0x377   : > { %5404 = vmatpush.bf16.msrb.mxu1 %v14040_v21  ;;  %v13881_v21 = vld [vmem:[#allocation4 + $0x1030] sm:$0xf0] }
 0x378   : > { %5392 = vmatpush.bf16.msrb.mxu0 %v13896_v26  ;;  %5414 = vmatpush.bf16.msrb.mxu2 %v14216_v6  ;;  %v17971_v26 = vld [vmem:[#allocation4 + $0x1064] sm:$0xf] }
 0x379   : > { %4583 = vmatpush.bf16.msra.mxu3 %v13780_v39  ;;  %v13961_v39 = vld [vmem:[#allocation4 + $0x10d0] sm:$0xf0] }
 0x37a   : > { %v13964_v63 = vor.u32 %v17983_v30, %v13961_v39  ;;  %v13884_v30 = vor.u32 %v17963_v51, %v13881_v21  ;;  %v14073_v39 = vld [vmem:[#allocation4 + $0x11b0] sm:$0xf0]  ;;  %v14311_v21 = vld [vmem:[#allocation4 + $0x1380] sm:$0xf] }
 0x37b   : > { %5405 = vmatpush.bf16.msrb.mxu1 %v14024_v4  ;;  %v18007_v4 = vld [vmem:[#allocation4 + $0x1184] sm:$0xf] }
 0x37c   : > { %5415 = vmatpush.bf16.msrb.mxu2 %v14200_v34 }
 0x37d   : > { %4584 = vmatpush.bf16.msra.mxu3 %v13764_v18  ;;  %v13945_v18 = vld [vmem:[#allocation4 + $0x10b0] sm:$0xf0] }
 0x37e   : > { %v13948_v35 = vor.u32 %v17979_v31, %v13945_v18  ;;  %v17959_v31 = vld [vmem:[#allocation4 + $0x1004] sm:$0xf]  ;;  %v13865_v18 = vld [vmem:[#allocation4 + $0x1010] sm:$0xf0] }
 0x380   : > { %5416 = vmatpush.bf16.msrb.mxu2 %v14184_v1 }
 0x381   : > { %4585 = vmatpush.bf16.msra.mxu3 %v13748_v5  ;;  %v19530_v14 = vpop.f32.mrf.mxu0  ;;  %v14007_v5 = vld [vmem:[#allocation4 + $0x1120] sm:$0xf] }
 0x382   : > { %v14008_v23 = vor.u32 %v17997_v0, %v14007_v5  ;;  %v14057_v5 = vld [vmem:[#allocation4 + $0x1190] sm:$0xf0] }
 0x383   : > { %v14060_v0 = vor.u32 %v18007_v4, %v14057_v5  ;;  %v14295_v4 = vld [vmem:[#allocation4 + $0x1360] sm:$0xf]  ;;  %v18035_v5 = vld [vmem:[#allocation4 + $0x1264] sm:$0xf] }
 0x384   : > { %4586 = vmatmul.bf16.vlgmr.msra.gmra.mxu3 %v19520_v40  ;;  %v13879_v40 = vld [vmem:[#allocation4 + $0x1020] sm:$0xf]  ;;  %5406 = vmatpush.bf16.msrb.mxu1 %v14008_v23 }
 0x385   : > { %v13880_v58 = vor.u32 %v17965_v27, %v13879_v40  ;;  %v13916_v40 = vor.u32 %v17971_v26, %v13913_v41  ;;  %v18019_v27 = vld [vmem:[#allocation4 + $0x11e4] sm:$0xf]  ;;  %v18081_v26 = vld [vmem:[#allocation4 + $0x13cc] sm:$0xf0] }
 0x386   : > { %v14344_v1 = vor.u32 %v18081_v26, %v14343_v53  ;;  %v14263_v53 = vld [vmem:[#allocation4 + $0x1320] sm:$0xf]  ;;  %v18061_v26 = vld [vmem:[#allocation4 + $0x132c] sm:$0xf0] }
 0x387   : > { %5393 = vmatpush.bf16.msrb.mxu0 %v13880_v58  ;;  %v14167_v58 = vld [vmem:[#allocation4 + $0x1260] sm:$0xf] }
 0x388   : > { %5407 = vmatpush.bf16.msrb.mxu1 %v13992_v2  ;;  %v14168_v7 = vor.u32 %v18037_v38, %v14167_v58  ;;  %v14236_v2 = vor.u32 %v18051_v19, %v14233_v36  ;;  %v14217_v58 = vld [vmem:[#allocation4 + $0x12d0] sm:$0xf0] }
 0x389   : > { %v4394_v32 = vpop.f32.mrf.mxu0  ;;  %v14153_v19 = vld [vmem:[#allocation4 + $0x1250] sm:$0xf0] }
 0x38a   : > { %v14108_v32 = vor.u32 %v18019_v27, %v14105_v37  ;;  %5417 = vmatpush.bf16.msrb.mxu2 %v14168_v7  ;;  %v14025_v27 = vld [vmem:[#allocation4 + $0x1150] sm:$0xf0]  ;;  %v18047_v37 = vld [vmem:[#allocation4 + $0x12c4] sm:$0xf]  ;;  %v18077_v7 = vld [vmem:[#allocation4 + $0x13ac] sm:$0xf0] }
 0x38b   : > { %5394 = vmatpush.bf16.msrb.mxu0 %v13864_v43  ;;  %v14089_v43 = vld [vmem:[#allocation4 + $0x11d0] sm:$0xf0]  ;;  %v14220_v38 = vor.u32 %v18047_v37, %v14217_v58  ;;  %v14328_v62 = vor.u32 %v18077_v7, %v14327_v10  ;;  %v17990_v58 = vld [vmem:[#allocation4 + $0x10f4] sm:$0xf0]  ;;  %v13967_v7 = vld [vmem:[#allocation4 + $0x10c8] sm:$0xf] }
 0x38c   : > { %5452 = vmatpush.bf16.msra.mxu1 %v14108_v32  ;;  %v14092_v33 = vor.u32 %v18015_v56, %v14089_v43  ;;  %v17995_v56 = vld [vmem:[#allocation4 + $0x1124] sm:$0xf]  ;;  %v14009_v43 = vld [vmem:[#allocation4 + $0x1130] sm:$0xf0] }
 0x38f   : > { %5439 = vmatpush.bf16.msra.mxu0 %v13980_v47  ;;  %v14151_v47 = vld [vmem:[#allocation4 + $0x1240] sm:$0xf] }
 0x390   : > { %5453 = vmatpush.bf16.msra.mxu1 %v14092_v33  ;;  %v14152_v50 = vor.u32 %v18033_v48, %v14151_v47  ;;  %v14012_v33 = vor.u32 %v17995_v56, %v14009_v43  ;;  %v14201_v47 = vld [vmem:[#allocation4 + $0x12b0] sm:$0xf0]  ;;  %v19544_v48 = vld [vmem:[#allocation10 + $0x3] ss:$8 sm:$0xf] }
 0x391   : > { %v19532_v57 = vpop.f32.mrf.mxu1  ;;  %v19534_v24 = vpop.f32.mrf.mxu0  ;;  %v18057_v43 = vld [vmem:[#allocation4 + $0x130c] sm:$0xf0] }
 0x392   : > { %5418 = vmatpush.bf16.msrb.mxu2 %v14152_v50 }
 0x393   : > { %5440 = vmatpush.bf16.msra.mxu0 %v13964_v63  ;;  %v14076_v63 = vor.u32 %v18011_v16, %v14073_v39  ;;  %v18073_v16 = vld [vmem:[#allocation4 + $0x138c] sm:$0xf0] }
 0x394   : > { %v14312_v39 = vor.u32 %v18073_v16, %v14311_v21 }
 0x395   : > { %5454 = vmatpush.bf16.msra.mxu1 %v14076_v63  ;;  %v17991_v63 = vld [vmem:[#allocation4 + $0x1104] sm:$0xf] }
 0x396   : > { %5419 = vmatpush.bf16.msrb.mxu2 %v14136_v11  ;;  %v14185_v11 = vld [vmem:[#allocation4 + $0x1290] sm:$0xf0] }
 0x397   : > { %5441 = vmatpush.bf16.msra.mxu0 %v13948_v35  ;;  %v13868_v35 = vor.u32 %v17959_v31, %v13865_v18  ;;  %v3735_v31 = vperm.slane %v19544_v48, 0  ;;  %v14188_v18 = vor.u32 %v18039_v61, %v14185_v11  ;;  %v13951_v11 = vld [vmem:[#allocation4 + $0x10a8] sm:$0xf] }
 0x399   : > { %v4407_v13 = vpop.f32.mrf.mxu1  ;;  %v4446_v49 = vpop.f32.mrf.mxu0  ;;  %5455 = vmatpush.bf16.msra.mxu1 %v14060_v0  ;;  %v14169_v0 = vld [vmem:[#allocation4 + $0x1270] sm:$0xf0] }
 0x39a   : > { %v18025_v13 = vld [vmem:[#allocation4 + $0x120c] sm:$0xf0]  ;;  %v14359_v49 = vld [vmem:[#allocation4 + $0x13e0] sm:$0xf] }
 0x39b   : > { %5442 = vmatpush.bf16.msra.mxu0 %v13932_v15  ;;  %v14120_v23 = vor.u32 %v18025_v13, %v14119_v12  ;;  %v14360_v34 = vor.u32 %v18085_v42, %v14359_v49  ;;  %v14044_v15 = vor.u32 %v18003_v29, %v14041_v28  ;;  %v14172_v13 = vor.u32 %v18035_v5, %v14169_v0  ;;  %v14279_v42 = vld [vmem:[#allocation4 + $0x1340] sm:$0xf]  ;;  %v18065_v29 = vld [vmem:[#allocation4 + $0x134c] sm:$0xf0] }
 0x39c   : > { %v4393_v49 = vadd.f32 %v19530_v14, %v3735_v31  ;;  %v14264_v14 = vor.u32 %v18061_v26, %v14263_v53  ;;  %v17982_v31 = vld [vmem:[#allocation4 + $0x10b4] sm:$0xf0]  ;;  %v14111_v53 = vld [vmem:[#allocation4 + $0x11e8] sm:$0xf] }
 0x39d   : > { %5420 = vmatpush.bf16.msrb.mxu2 %v14120_v23  ;;  %5426 = vmatpush.bf16.msrb.mxu3 %v14360_v34  ;;  %v14280_v34 = vor.u32 %v18065_v29, %v14279_v42  ;;  %v17978_v42 = vld [vmem:[#allocation4 + $0x1094] sm:$0xf0]  ;;  %v18075_v29 = vld [vmem:[#allocation4 + $0x13a4] sm:$0xf] }
 0x39e   : > { %5456 = vmatpush.bf16.msra.mxu1 %v14044_v15  ;;  %v4406_v28 = vadd.f32 %v19532_v57, %v4393_v49  ;;  %v18031_v15 = vld [vmem:[#allocation4 + $0x1244] sm:$0xf]  ;;  %v13952_v49 = vor.u32 %v17982_v31, %v13951_v11  ;;  %v18022_v26 = vld [vmem:[#allocation4 + $0x11f4] sm:$0xf0] }
 0x39f   : > { %5443 = vmatpush.bf16.msra.mxu0 %v13916_v40  ;;  %v17999_v40 = vld [vmem:[#allocation4 + $0x1144] sm:$0xf]  ;;  %v14156_v36 = vor.u32 %v18031_v15, %v14153_v19 }
 0x3a0   : > { %v14028_v32 = vor.u32 %v17999_v40, %v14025_v27  ;;  %v18027_v40 = vld [vmem:[#allocation4 + $0x1224] sm:$0xf]  ;;  %v14137_v27 = vld [vmem:[#allocation4 + $0x1230] sm:$0xf0] }
 0x3a1   : > { %v19536_v54 = vpop.f32.mrf.mxu1  ;;  %5465 = vmatpush.bf16.msra.mxu2 %v14236_v2  ;;  %5427 = vmatpush.bf16.msrb.mxu3 %v14344_v1  ;;  %v14140_v57 = vor.u32 %v18027_v40, %v14137_v27 }
 0x3a2   : > { %5457 = vmatpush.bf16.msra.mxu1 %v14028_v32  ;;  %v13983_v32 = vld [vmem:[#allocation4 + $0x10e8] sm:$0xf] }
 0x3a3   : > { %v19538_v44 = vpop.f32.mrf.mxu0  ;;  %5444 = vmatpush.bf16.msra.mxu0 %v13900_v52  ;;  %v18043_v52 = vld [vmem:[#allocation4 + $0x12a4] sm:$0xf]  ;;  %v13984_v56 = vor.u32 %v17990_v58, %v13983_v32  ;;  %v13903_v58 = vld [vmem:[#allocation4 + $0x1048] sm:$0xf] }
 0x3a4   : > { %v14204_v51 = vor.u32 %v18043_v52, %v14201_v47  ;;  %v18023_v52 = vld [vmem:[#allocation4 + $0x1204] sm:$0xf] }
 0x3a5   : > { %5466 = vmatpush.bf16.msra.mxu2 %v14220_v38  ;;  %5428 = vmatpush.bf16.msrb.mxu3 %v14328_v62 }
 0x3a6   : > { %5458 = vmatpush.bf16.msra.mxu1 %v14012_v33  ;;  %v14121_v33 = vld [vmem:[#allocation4 + $0x1210] sm:$0xf0] }
 0x3a7   : > { %v19540_v9 = vpop.f32.mrf.mxu2  ;;  %5445 = vmatpush.bf16.msra.mxu0 %v13884_v30  ;;  %v14124_v16 = vor.u32 %v18023_v52, %v14121_v33 }
 0x3a9   : > { %v4459_v3 = vpop.f32.mrf.mxu1  ;;  %5467 = vmatpush.bf16.msra.mxu2 %v14204_v51  ;;  %5429 = vmatpush.bf16.msrb.mxu3 %v14312_v39  ;;  %v17986_v51 = vld [vmem:[#allocation4 + $0x10d4] sm:$0xf0]  ;;  %v14361_v39 = vld [vmem:[#allocation4 + $0x13f0] sm:$0xf0] }
 0x3aa   : > { %v13996_v3 = vor.u32 %v17991_v63, %v13993_v17  ;;  %v3736_v63 = vperm.slane %v19544_v48, 1 }
 0x3ab   : > { %v4498_v6 = vpop.f32.mrf.mxu0  ;;  %5446 = vmatpush.bf16.msra.mxu0 %v13868_v35 }
 0x3ac   : > { %v18069_v6 = vld [vmem:[#allocation4 + $0x136c] sm:$0xf0]  ;;  %5459 = vmatpush.bf16.msra.mxu1 %v13996_v3  ;;  %v13968_v3 = vor.u32 %v17986_v51, %v13967_v7 }
 0x3ad   : > { %5468 = vmatpush.bf16.msra.mxu2 %v14188_v18  ;;  %v14296_v35 = vor.u32 %v18069_v6, %v14295_v4  ;;  %v18079_v18 = vld [vmem:[#allocation4 + $0x13c4] sm:$0xf]  ;;  %v14345_v4 = vld [vmem:[#allocation4 + $0x13d0] sm:$0xf0]  ;;  %v4445_v6 = vadd.f32 %v19534_v24, %v3736_v63  ;;  %v18014_v63 = vld [vmem:[#allocation4 + $0x11b4] sm:$0xf0] }
 0x3ae   : > { %v14348_v5 = vor.u32 %v18079_v18, %v14345_v4 }
 0x3af   : > { %v4420_v20 = vpop.f32.mrf.mxu2  ;;  %5430 = vmatpush.bf16.msrb.mxu3 %v14296_v35 }
 0x3b0   : > { %v4419_v20 = vadd.f32 %v19540_v9, %v4406_v28  ;;  %v14247_v9 = vld [vmem:[#allocation4 + $0x1300] sm:$0xf]  ;;  %v14329_v28 = vld [vmem:[#allocation4 + $0x13b0] sm:$0xf0] }
 0x3b1   : > { %v19542_v41 = vpop.f32.mrf.mxu1  ;;  %5469 = vmatpush.bf16.msra.mxu2 %v14172_v13  ;;  %v14248_v21 = vor.u32 %v18057_v43, %v14247_v9  ;;  %v4458_v13 = vadd.f32 %v19536_v54, %v4445_v6  ;;  %v14332_v15 = vor.u32 %v18075_v29, %v14329_v28  ;;  %v18071_v54 = vld [vmem:[#allocation4 + $0x1384] sm:$0xf]  ;;  %v18018_v9 = vld [vmem:[#allocation4 + $0x11d4] sm:$0xf0]  ;;  %v3737_v43 = vperm.slane %v19544_v48, 2 }
 0x3b2   : > { %v13871_v6 = vld [vmem:[#allocation4 + $0x1008] sm:$0xf]  ;;  %v17988_v29 = vld [vmem:[#allocation4 + $0x10ec] sm:$0xf]  ;;  %v13985_v28 = vld [vmem:[#allocation4 + $0x10f8] sm:$0xf0] }
 0x3b3   : > { %5431 = vmatpush.bf16.msrb.mxu3 %v14280_v34 }
 0x3b5   : > { %5470 = vmatpush.bf16.msra.mxu2 %v14156_v36 }
 0x3b7   : > { %v19546_v50 = vpop.f32.mrf.mxu2  ;;  %5432 = vmatpush.bf16.msrb.mxu3 %v14264_v14 }
 0x3b8   : > { %v4471_v34 = vadd.f32 %v19546_v50, %v4458_v13  ;;  %v14112_v50 = vor.u32 %v18022_v26, %v14111_v53  ;;  %v18010_v13 = vld [vmem:[#allocation4 + $0x1194] sm:$0xf0]  ;;  %v13988_v26 = vor.u32 %v17988_v29, %v13985_v28  ;;  %v14113_v29 = vld [vmem:[#allocation4 + $0x11f8] sm:$0xf0] }
 0x3b9   : > { %v4511_v30 = vpop.f32.mrf.mxu1  ;;  %5471 = vmatpush.bf16.msra.mxu2 %v14140_v57  ;;  %v17970_v57 = vld [vmem:[#allocation4 + $0x1054] sm:$0xf0] }
 0x3ba   : > { %v18083_v30 = vld [vmem:[#allocation4 + $0x13e4] sm:$0xf]  ;;  %v13904_v51 = vor.u32 %v17970_v57, %v13903_v58  ;;  %v18054_v53 = vld [vmem:[#allocation4 + $0x12f4] sm:$0xf0] }
 0x3bb   : > { %v14364_v17 = vor.u32 %v18083_v30, %v14361_v39  ;;  %5433 = vmatpush.bf16.msrb.mxu3 %v14248_v21  ;;  %v17966_v30 = vld [vmem:[#allocation4 + $0x1034] sm:$0xf0]  ;;  %v14079_v39 = vld [vmem:[#allocation4 + $0x11a8] sm:$0xf] }
 0x3bc   : > { %v14080_v4 = vor.u32 %v18014_v63, %v14079_v39  ;;  %v14015_v39 = vld [vmem:[#allocation4 + $0x1128] sm:$0xf]  ;;  %v17998_v63 = vld [vmem:[#allocation4 + $0x1134] sm:$0xf0] }
 0x3bd   : > { %5472 = vmatpush.bf16.msra.mxu2 %v14124_v16  ;;  %v13887_v16 = vld [vmem:[#allocation4 + $0x1028] sm:$0xf] }
 0x3be   : > { %v13888_v18 = vor.u32 %v17966_v30, %v13887_v16 }
 0x3bf   : > { %v4472_v23 = vpop.f32.mrf.mxu2  ;;  %5478 = vmatpush.bf16.msra.mxu3 %v14364_v17  ;;  %v18063_v17 = vld [vmem:[#allocation4 + $0x1344] sm:$0xf] }
 0x3c0   : > { %v13935_v23 = vld [vmem:[#allocation4 + $0x1088] sm:$0xf] }
 0x3c1   : > { %v19549_v12 = vpop.f32.mrf.mxu0  ;;  %v13936_v24 = vor.u32 %v17978_v42, %v13935_v23  ;;  %v14265_v23 = vld [vmem:[#allocation4 + $0x1330] sm:$0xf0] }
 0x3c3   : > { %5479 = vmatpush.bf16.msra.mxu3 %v14348_v5  ;;  %v17962_v5 = vld [vmem:[#allocation4 + $0x1014] sm:$0xf0] }
 0x3c7   : > { %v4431_v2 = vpop.f32.mrf.mxu3  ;;  %5480 = vmatpush.bf16.msra.mxu3 %v14332_v15  ;;  %v14047_v15 = vld [vmem:[#allocation4 + $0x1168] sm:$0xf] }
 0x3c8   : > { %v4432_v1 = vadd.f32 %v4431_v2, %v4419_v20  ;;  %v13919_v20 = vld [vmem:[#allocation4 + $0x1068] sm:$0xf]  ;;  %v17974_v2 = vld [vmem:[#allocation4 + $0x1074] sm:$0xf0] }
 0x3c9   : > { %v4550_v37 = vpop.f32.mrf.mxu0  ;;  %v13920_v32 = vor.u32 %v17974_v2, %v13919_v20  ;;  %v18006_v20 = vld [vmem:[#allocation4 + $0x1174] sm:$0xf0]  ;;  %v14239_v2 = vld [vmem:[#allocation4 + $0x12e8] sm:$0xf] }
 0x3ca   : > { %vm4591_vm2 = vcmp.gt.f32.partialorder %v4432_v1, 0.0  ;;  %v4595_v38 = vmul.f32 0.2, %v4432_v1  ;;  %v19554_v10 = vpop.f32.mrf.mxu2  ;;  %v14240_v58 = vor.u32 %v18054_v53, %v14239_v2  ;;  %v3738_v2 = vperm.slane %v19544_v48, 3  ;;  %v18016_v53 = vld [vmem:[#allocation4 + $0x11cc] sm:$0xf] }
 0x3cb   : > { %v18012_v48 = vld [vmem:[#allocation4 + $0x11ac] sm:$0xf] }
 0x3cc   : > { %v4599_v62 = vsel %vm4591_vm2, %v4432_v1, %v4595_v38  ;;  %v14313_v1 = vld [vmem:[#allocation4 + $0x1390] sm:$0xf0]  ;;  %v14095_v38 = vld [vmem:[#allocation4 + $0x11c8] sm:$0xf] }
 0x3cd   : > { %v19556_v47 = vpack.c.bf16 %v4599_v62, %v4599_v62  ;;  %v14316_v27 = vor.u32 %v18071_v54, %v14313_v1  ;;  %v18067_v62 = vld [vmem:[#allocation4 + $0x1364] sm:$0xf]  ;;  %v14096_v21 = vor.u32 %v18018_v9, %v14095_v38  ;;  %v17984_v54 = vld [vmem:[#allocation4 + $0x10cc] sm:$0xf]  ;;  %v14031_v38 = vld [vmem:[#allocation4 + $0x1148] sm:$0xf] }
 0x3ce   : > { %v18055_v1 = vld [vmem:[#allocation4 + $0x1304] sm:$0xf]  ;;  %v18002_v9 = vld [vmem:[#allocation4 + $0x1154] sm:$0xf0] }
 0x3cf   : > { %v4433_v61 = vpop.f32.mrf.mxu3  ;;  %5395 = vmatmul.bf16.vlgmr.msrb.gmra.mxu0 %v19556_v47  ;;  %5481 = vmatpush.bf16.msra.mxu3 %v14316_v27 }
 0x3d0   : > { %5491 = vmatpush.bf16.msrb.mxu0 %v13984_v56  ;;  %v14297_v56 = vld [vmem:[#allocation4 + $0x1370] sm:$0xf0] }
 0x3d1   : > { %v19561_v35 = vpop.f32.mrf.mxu1  ;;  %v14300_v52 = vor.u32 %v18067_v62, %v14297_v56  ;;  %v14281_v61 = vld [vmem:[#allocation4 + $0x1350] sm:$0xf0]  ;;  %v14223_v62 = vld [vmem:[#allocation4 + $0x12c8] sm:$0xf]  ;;  %v18050_v56 = vld [vmem:[#allocation4 + $0x12d4] sm:$0xf0] }
 0x3d2   : > { %v4524_v0 = vpop.f32.mrf.mxu2  ;;  %v14284_v11 = vor.u32 %v18063_v17, %v14281_v61  ;;  %v14224_v16 = vor.u32 %v18050_v56, %v14223_v62  ;;  %v14207_v17 = vld [vmem:[#allocation4 + $0x12a8] sm:$0xf]  ;;  %v18046_v61 = vld [vmem:[#allocation4 + $0x12b4] sm:$0xf0] }
 0x3d3   : > { %5482 = vmatpush.bf16.msra.mxu3 %v14300_v52  ;;  %v14063_v0 = vld [vmem:[#allocation4 + $0x1188] sm:$0xf]  ;;  %v13953_v52 = vld [vmem:[#allocation4 + $0x10b8] sm:$0xf0] }
 0x3d4   : > { %5492 = vmatpush.bf16.msrb.mxu0 %v13968_v3  ;;  %v4497_v3 = vadd.f32 %v19538_v44, %v3737_v43  ;;  %v17980_v43 = vld [vmem:[#allocation4 + $0x10ac] sm:$0xf]  ;;  %v14143_v62 = vld [vmem:[#allocation4 + $0x1228] sm:$0xf] }
 0x3d5   : > { %v13956_v30 = vor.u32 %v17980_v43, %v13953_v52  ;;  %v18030_v43 = vld [vmem:[#allocation4 + $0x1234] sm:$0xf0]  ;;  %v17960_v52 = vld [vmem:[#allocation4 + $0x100c] sm:$0xf] }
 0x3d6   : > { %v4510_v31 = vadd.f32 %v19542_v41, %v4497_v3  ;;  %v17976_v3 = vld [vmem:[#allocation4 + $0x108c] sm:$0xf] }
 0x3d7   : > { %v4483_v19 = vpop.f32.mrf.mxu3  ;;  %5483 = vmatpush.bf16.msra.mxu3 %v14284_v11  ;;  %v13937_v11 = vld [vmem:[#allocation4 + $0x1098] sm:$0xf0] }
 0x3d8   : > { %v4484_v36 = vadd.f32 %v4483_v19, %v4471_v34  ;;  %5493 = vmatpush.bf16.msrb.mxu0 %v13952_v49  ;;  %v18059_v49 = vld [vmem:[#allocation4 + $0x1324] sm:$0xf]  ;;  %v4523_v42 = vadd.f32 %v19554_v10, %v4510_v31  ;;  %v14249_v10 = vld [vmem:[#allocation4 + $0x1310] sm:$0xf0]  ;;  %v14016_v31 = vor.u32 %v17998_v63, %v14015_v39 }
 0x3d9   : > { %v4563_v40 = vpop.f32.mrf.mxu1  ;;  %v14268_v34 = vor.u32 %v18059_v49, %v14265_v23  ;;  %v14252_v27 = vor.u32 %v18055_v1, %v14249_v10  ;;  %v17972_v49 = vld [vmem:[#allocation4 + $0x106c] sm:$0xf]  ;;  %v13921_v23 = vld [vmem:[#allocation4 + $0x1078] sm:$0xf0]  ;;  %v14159_v10 = vld [vmem:[#allocation4 + $0x1248] sm:$0xf] }
 0x3da   : > { %vm4592_vm3 = vcmp.gt.f32.partialorder %v4484_v36, 0.0  ;;  %v4596_v14 = vmul.f32 0.2, %v4484_v36  ;;  %v13969_v40 = vld [vmem:[#allocation4 + $0x10d8] sm:$0xf0] }
 0x3db   : > { %5484 = vmatpush.bf16.msra.mxu3 %v14268_v34  ;;  %v13972_v57 = vor.u32 %v17984_v54, %v13969_v40  ;;  %v18034_v40 = vld [vmem:[#allocation4 + $0x1254] sm:$0xf0] }
 0x3dc   : > { %v4600_v37 = vsel %vm4592_vm3, %v4484_v36, %v4596_v14  ;;  %5494 = vmatpush.bf16.msrb.mxu0 %v13936_v24  ;;  %v13872_v36 = vor.u32 %v17962_v5, %v13871_v6  ;;  %v14064_v24 = vor.u32 %v18010_v13, %v14063_v0  ;;  %v13999_v6 = vld [vmem:[#allocation4 + $0x1108] sm:$0xf]  ;;  %v17994_v5 = vld [vmem:[#allocation4 + $0x1114] sm:$0xf0] }
 0x3dd   : > { %v19565_v7 = vpack.c.bf16 %v4600_v37, %v4600_v37  ;;  %v14191_v0 = vld [vmem:[#allocation4 + $0x1288] sm:$0xf]  ;;  %v18042_v13 = vld [vmem:[#allocation4 + $0x1294] sm:$0xf0]  ;;  %v14000_v28 = vor.u32 %v17994_v5, %v13999_v6 }
 0x3de   : > { %v14192_v34 = vor.u32 %v18042_v13, %v14191_v0 }
 0x3df   : > { %v4485_v33 = vpop.f32.mrf.mxu3  ;;  %5408 = vmatmul.bf16.vlgmr.msrb.gmra.mxu1 %v19565_v7  ;;  %5447 = vmatmul.bf16.vlgmr.msra.gmra.mxu0 %v19556_v47 }
 0x3e0   : > { %5495 = vmatpush.bf16.msrb.mxu0 %v13920_v32  ;;  %5504 = vmatpush.bf16.msrb.mxu1 %v14112_v50  ;;  %v14048_v32 = vor.u32 %v18006_v20, %v14047_v15  ;;  %v14175_v15 = vld [vmem:[#allocation4 + $0x1268] sm:$0xf]  ;;  %v13905_v20 = vld [vmem:[#allocation4 + $0x1058] sm:$0xf0] }
 0x3e1   : > { %5485 = vmatpush.bf16.msra.mxu3 %v14252_v27  ;;  %v17964_v27 = vld [vmem:[#allocation4 + $0x102c] sm:$0xf] }
 0x3e4   : > { %5496 = vmatpush.bf16.msrb.mxu0 %v13904_v51  ;;  %5505 = vmatpush.bf16.msrb.mxu1 %v14096_v21  ;;  %v14032_v21 = vor.u32 %v18002_v9, %v14031_v38  ;;  %v14160_v38 = vor.u32 %v18034_v40, %v14159_v10  ;;  %v18044_v10 = vld [vmem:[#allocation4 + $0x12ac] sm:$0xf] }
 0x3e7   : > { %v4535_v44 = vpop.f32.mrf.mxu3 }
 0x3e8   : > { %v4536_v19 = vadd.f32 %v4535_v44, %v4523_v42  ;;  %v19573_v41 = vpop.f32.mrf.mxu2  ;;  %5497 = vmatpush.bf16.msrb.mxu0 %v13888_v18  ;;  %5506 = vmatpush.bf16.msrb.mxu1 %v14080_v4  ;;  %v14208_v18 = vor.u32 %v18046_v61, %v14207_v17  ;;  %v13940_v4 = vor.u32 %v17976_v3, %v13937_v11  ;;  %v18020_v42 = vld [vmem:[#allocation4 + $0x11ec] sm:$0xf]  ;;  %v18026_v17 = vld [vmem:[#allocation4 + $0x1214] sm:$0xf0]  ;;  %v14367_v61 = vld [vmem:[#allocation4 + $0x13e8] sm:$0xf] }
 0x3e9   : > { %v13924_v44 = vor.u32 %v17972_v49, %v13921_v23  ;;  %v18086_v3 = vld [vmem:[#allocation4 + $0x13f4] sm:$0xf0] }
 0x3ea   : > { %vm4593_vm4 = vcmp.gt.f32.partialorder %v4536_v19, 0.0  ;;  %v4597_v14 = vmul.f32 0.2, %v4536_v19  ;;  %v14368_v13 = vor.u32 %v18086_v3, %v14367_v61  ;;  %v14271_v61 = vld [vmem:[#allocation4 + $0x1328] sm:$0xf] }
 0x3eb   : > { %v18062_v3 = vld [vmem:[#allocation4 + $0x1334] sm:$0xf0] }
 0x3ec   : > { %v4601_v37 = vsel %vm4593_vm4, %v4536_v19, %v4597_v14  ;;  %5498 = vmatpush.bf16.msrb.mxu0 %v13872_v36  ;;  %5507 = vmatpush.bf16.msrb.mxu1 %v14064_v24  ;;  %v14116_v19 = vor.u32 %v18020_v42, %v14113_v29  ;;  %v18038_v36 = vld [vmem:[#allocation4 + $0x1274] sm:$0xf0]  ;;  %v17968_v24 = vld [vmem:[#allocation4 + $0x104c] sm:$0xf]  ;;  %v14351_v29 = vld [vmem:[#allocation4 + $0x13c8] sm:$0xf] }
 0x3ed   : > { %v19575_v50 = vpack.c.bf16 %v4601_v37, %v4601_v37  ;;  %v14176_v54 = vor.u32 %v18038_v36, %v14175_v15  ;;  %v13908_v1 = vor.u32 %v17968_v24, %v13905_v20  ;;  %v13889_v37 = vld [vmem:[#allocation4 + $0x1038] sm:$0xf0]  ;;  %v18048_v15 = vld [vmem:[#allocation4 + $0x12cc] sm:$0xf] }
 0x3ee   : > { %v13892_v9 = vor.u32 %v17964_v27, %v13889_v37  ;;  %v14319_v37 = vld [vmem:[#allocation4 + $0x1388] sm:$0xf] }
 0x3ef   : > { %v4537_v33 = vpop.f32.mrf.mxu3  ;;  %5421 = vmatmul.bf16.vlgmr.msrb.gmra.mxu2 %v19575_v50  ;;  %5460 = vmatmul.bf16.vlgmr.msra.gmra.mxu1 %v19565_v7 }
 0x3f0   : > { %5543 = vmatpush.bf16.msra.mxu0 %v13988_v26  ;;  %v4576_v51 = vpop.f32.mrf.mxu2  ;;  %5508 = vmatpush.bf16.msrb.mxu1 %v14048_v32  ;;  %v14097_v26 = vld [vmem:[#allocation4 + $0x11d8] sm:$0xf0]  ;;  %v4549_v32 = vadd.f32 %v19549_v12, %v3738_v2 }
 0x3f1   : > { %5499 = vmatmul.bf16.vlgmr.msrb.gmra.mxu0 %v19556_v47  ;;  %5517 = vmatpush.bf16.msrb.mxu2 %v14240_v58  ;;  %v14100_v14 = vor.u32 %v18016_v53, %v14097_v26  ;;  %v14081_v58 = vld [vmem:[#allocation4 + $0x11b8] sm:$0xf0]  ;;  %v18008_v51 = vld [vmem:[#allocation4 + $0x118c] sm:$0xf]  ;;  %v14335_v53 = vld [vmem:[#allocation4 + $0x13a8] sm:$0xf] }
 0x3f2   : > { %v14084_v56 = vor.u32 %v18012_v48, %v14081_v58  ;;  %v13873_v33 = vld [vmem:[#allocation4 + $0x1018] sm:$0xf0]  ;;  %v18078_v26 = vld [vmem:[#allocation4 + $0x13b4] sm:$0xf0]  ;;  %v17992_v48 = vld [vmem:[#allocation4 + $0x110c] sm:$0xf] }
 0x3f3   : > { %v13876_v63 = vor.u32 %v17960_v52, %v13873_v33  ;;  %v14336_v40 = vor.u32 %v18078_v26, %v14335_v53  ;;  %v14001_v58 = vld [vmem:[#allocation4 + $0x1118] sm:$0xf0]  ;;  %v18070_v52 = vld [vmem:[#allocation4 + $0x1374] sm:$0xf0]  ;;  %v18036_v33 = vld [vmem:[#allocation4 + $0x126c] sm:$0xf] }
 0x3f4   : > { %5544 = vmatpush.bf16.msra.mxu0 %v13972_v57  ;;  %5509 = vmatpush.bf16.msrb.mxu1 %v14032_v21  ;;  %v4562_v57 = vadd.f32 %v19561_v35, %v4549_v32  ;;  %v14065_v21 = vld [vmem:[#allocation4 + $0x1198] sm:$0xf0]  ;;  %v14144_v35 = vor.u32 %v18030_v43, %v14143_v62  ;;  %v18074_v32 = vld [vmem:[#allocation4 + $0x1394] sm:$0xf0]  ;;  %v14004_v62 = vor.u32 %v17992_v48, %v14001_v58  ;;  %v14303_v43 = vld [vmem:[#allocation4 + $0x1368] sm:$0xf] }
 0x3f5   : > { %5518 = vmatpush.bf16.msrb.mxu2 %v14224_v16  ;;  %v14068_v11 = vor.u32 %v18008_v51, %v14065_v21  ;;  %v14304_v51 = vor.u32 %v18070_v52, %v14303_v43  ;;  %v18068_v53 = vld [vmem:[#allocation4 + $0x136c] sm:$0xf]  ;;  %v14305_v26 = vld [vmem:[#allocation4 + $0x1378] sm:$0xf0]  ;;  %v18113_v48 = vld [vmem:[#allocation4 + $0x14cc] sm:$0xf0] }
 0x3f6   : > { %v4575_v12 = vadd.f32 %v19573_v41, %v4562_v57  ;;  %v14241_v41 = vld [vmem:[#allocation4 + $0x12f8] sm:$0xf0]  ;;  %v18040_v57 = vld [vmem:[#allocation4 + $0x128c] sm:$0xf]  ;;  %v18109_v43 = vld [vmem:[#allocation4 + $0x14ac] sm:$0xf0] }
 0x3f8   : > { %5545 = vmatpush.bf16.msra.mxu0 %v13956_v30  ;;  %5510 = vmatpush.bf16.msrb.mxu1 %v14016_v31  ;;  %v14127_v30 = vld [vmem:[#allocation4 + $0x1208] sm:$0xf]  ;;  %v18004_v31 = vld [vmem:[#allocation4 + $0x116c] sm:$0xf] }
 0x3f9   : > { %5519 = vmatpush.bf16.msrb.mxu2 %v14208_v18  ;;  %v14049_v18 = vld [vmem:[#allocation4 + $0x1178] sm:$0xf0]  ;;  %v14128_v0 = vor.u32 %v18026_v17, %v14127_v30  ;;  %v18066_v30 = vld [vmem:[#allocation4 + $0x1354] sm:$0xf0] }
 0x3fa   : > { %v14052_v23 = vor.u32 %v18004_v31, %v14049_v18  ;;  %v14145_v31 = vld [vmem:[#allocation4 + $0x1238] sm:$0xf0]  ;;  %v14272_v18 = vor.u32 %v18062_v3, %v14271_v61  ;;  %v14407_v61 = vld [vmem:[#allocation4 + $0x1440] sm:$0xf]  ;;  %v18097_v3 = vld [vmem:[#allocation4 + $0x144c] sm:$0xf0] }
 0x3fc   : > { %5546 = vmatpush.bf16.msra.mxu0 %v13940_v4  ;;  %5511 = vmatpush.bf16.msrb.mxu1 %v14000_v28  ;;  %v18052_v4 = vld [vmem:[#allocation4 + $0x12ec] sm:$0xf]  ;;  %v18082_v28 = vld [vmem:[#allocation4 + $0x13d4] sm:$0xf0] }
 0x3fd   : > { %5520 = vmatpush.bf16.msrb.mxu2 %v14192_v34  ;;  %v14244_v42 = vor.u32 %v18052_v4, %v14241_v41  ;;  %v18000_v34 = vld [vmem:[#allocation4 + $0x114c] sm:$0xf]  ;;  %v14352_v24 = vor.u32 %v18082_v28, %v14351_v29  ;;  %v18058_v41 = vld [vmem:[#allocation4 + $0x1314] sm:$0xf0] }
 0x3fe   : > { %v18080_v28 = vld [vmem:[#allocation4 + $0x13cc] sm:$0xf] }
 0x3ff   : > { %5473 = vmatmul.bf16.vlgmr.msra.gmra.mxu2 %v19575_v50  ;;  %5512 = vmatmul.bf16.vlgmr.msrb.gmra.mxu1 %v19565_v7 }
 0x400   : > { %5547 = vmatpush.bf16.msra.mxu0 %v13924_v44  ;;  %5556 = vmatpush.bf16.msra.mxu1 %v14116_v19  ;;  %v14033_v44 = vld [vmem:[#allocation4 + $0x1158] sm:$0xf0] }
 0x401   : > { %5521 = vmatpush.bf16.msrb.mxu2 %v14176_v54  ;;  %v14225_v19 = vld [vmem:[#allocation4 + $0x12d8] sm:$0xf0]  ;;  %v14036_v20 = vor.u32 %v18000_v34, %v14033_v44  ;;  %v17996_v54 = vld [vmem:[#allocation4 + $0x112c] sm:$0xf] }
 0x402   : > { %v14228_v2 = vor.u32 %v18048_v15, %v14225_v19  ;;  %v14353_v34 = vld [vmem:[#allocation4 + $0x13d8] sm:$0xf0]  ;;  %v18076_v15 = vld [vmem:[#allocation4 + $0x13ac] sm:$0xf] }
 0x403   : > { %v14356_v44 = vor.u32 %v18080_v28, %v14353_v34  ;;  %v14337_v19 = vld [vmem:[#allocation4 + $0x13b8] sm:$0xf0]  ;;  %v18137_v34 = vld [vmem:[#allocation4 + $0x158c] sm:$0xf0] }
 0x404   : > { %5548 = vmatpush.bf16.msra.mxu0 %v13908_v1  ;;  %5557 = vmatpush.bf16.msra.mxu1 %v14100_v14  ;;  %v14017_v1 = vld [vmem:[#allocation4 + $0x1138] sm:$0xf0] }
 0x405   : > { %5522 = vmatpush.bf16.msrb.mxu2 %v14160_v38  ;;  %v14209_v14 = vld [vmem:[#allocation4 + $0x12b8] sm:$0xf0] }
 0x406   : > { %v14212_v27 = vor.u32 %v18044_v10, %v14209_v14  ;;  %v14193_v38 = vld [vmem:[#allocation4 + $0x1298] sm:$0xf0] }
 0x407   : > { %v4587_v16 = vpop.f32.mrf.mxu3  ;;  %v14289_v10 = vld [vmem:[#allocation4 + $0x1358] sm:$0xf0] }
 0x408   : > { %v4588_v39 = vadd.f32 %v4587_v16, %v4575_v12  ;;  %5549 = vmatpush.bf16.msra.mxu0 %v13892_v9  ;;  %5558 = vmatpush.bf16.msra.mxu1 %v14084_v56  ;;  %v14320_v9 = vor.u32 %v18074_v32, %v14319_v37  ;;  %v14196_v56 = vor.u32 %v18040_v57, %v14193_v38  ;;  %v14177_v12 = vld [vmem:[#allocation4 + $0x1278] sm:$0xf0]  ;;  %v14287_v16 = vld [vmem:[#allocation4 + $0x1348] sm:$0xf]  ;;  %v18117_v37 = vld [vmem:[#allocation4 + $0x14ec] sm:$0xf0] }
 0x409   : > { %5523 = vmatpush.bf16.msrb.mxu2 %v14144_v35  ;;  %v14180_v21 = vor.u32 %v18036_v33, %v14177_v12  ;;  %v14161_v35 = vld [vmem:[#allocation4 + $0x1258] sm:$0xf0]  ;;  %v18056_v38 = vld [vmem:[#allocation4 + $0x130c] sm:$0xf]  ;;  %v14439_v33 = vld [vmem:[#allocation4 + $0x1480] sm:$0xf] }
 0x40a   : > { %vm4594_vm5 = vcmp.gt.f32.partialorder %v4588_v39, 0.0  ;;  %v4598_v6 = vmul.f32 0.2, %v4588_v39  ;;  %v18105_v12 = vld [vmem:[#allocation4 + $0x148c] sm:$0xf0] }
 0x40c   : > { %v4602_v5 = vsel %vm4594_vm5, %v4588_v39, %v4598_v6  ;;  %5550 = vmatpush.bf16.msra.mxu0 %v13876_v63  ;;  %5559 = vmatpush.bf16.msra.mxu1 %v14068_v11  ;;  %v18032_v39 = vld [vmem:[#allocation4 + $0x124c] sm:$0xf]  ;;  %v14288_v63 = vor.u32 %v18066_v30, %v14287_v16  ;;  %v14255_v6 = vld [vmem:[#allocation4 + $0x1308] sm:$0xf]  ;;  %v18101_v16 = vld [vmem:[#allocation4 + $0x146c] sm:$0xf0] }
 0x40d   : > { %v19586_v49 = vpack.c.bf16 %v4602_v5, %v4602_v5  ;;  %5524 = vmatpush.bf16.msrb.mxu2 %v14128_v0  ;;  %v14164_v17 = vor.u32 %v18032_v39, %v14161_v35  ;;  %v18028_v11 = vld [vmem:[#allocation4 + $0x122c] sm:$0xf]  ;;  %v14129_v0 = vld [vmem:[#allocation4 + $0x1218] sm:$0xf0]  ;;  %v14615_v30 = vld [vmem:[#allocation4 + $0x15e0] sm:$0xf] }
 0x40e   : > { %v14148_v4 = vor.u32 %v18028_v11, %v14145_v31  ;;  %v18024_v5 = vld [vmem:[#allocation4 + $0x120c] sm:$0xf]  ;;  %v14599_v11 = vld [vmem:[#allocation4 + $0x15c0] sm:$0xf]  ;;  %v14408_v31 = vor.u32 %v18097_v3, %v14407_v61 }
 0x40f   : > { %v4589_v36 = vpop.f32.mrf.mxu3  ;;  %5434 = vmatmul.bf16.vlgmr.msrb.gmra.mxu3 %v19586_v49  ;;  %5551 = vmatmul.bf16.vlgmr.msra.gmra.mxu0 %v19556_v47  ;;  %v14020_v47 = vor.u32 %v17996_v54, %v14017_v1  ;;  %v14308_v54 = vor.u32 %v18068_v53, %v14305_v26  ;;  %v18064_v1 = vld [vmem:[#allocation4 + $0x134c] sm:$0xf]  ;;  %v14695_v61 = vld [vmem:[#allocation4 + $0x1680] sm:$0xf] }
 0x410   : > { %5530 = vmatpush.bf16.msrb.mxu3 %v14368_v13  ;;  %5560 = vmatpush.bf16.msra.mxu1 %v14052_v23  ;;  %v18084_v13 = vld [vmem:[#allocation4 + $0x13ec] sm:$0xf]  ;;  %v14369_v23 = vld [vmem:[#allocation4 + $0x13f8] sm:$0xf0]  ;;  %v14340_v36 = vor.u32 %v18076_v15, %v14337_v19  ;;  %v14292_v14 = vor.u32 %v18064_v1, %v14289_v10  ;;  %v14489_v15 = vld [vmem:[#allocation4 + $0x14f0] sm:$0xf0] }
 0x411   : > { %5569 = vmatpush.bf16.msra.mxu2 %v14244_v42  ;;  %v14256_v42 = vor.u32 %v18058_v41, %v14255_v6  ;;  %v14372_v29 = vor.u32 %v18084_v13, %v14369_v23  ;;  %v18093_v6 = vld [vmem:[#allocation4 + $0x142c] sm:$0xf0]  ;;  %v14583_v41 = vld [vmem:[#allocation4 + $0x15a0] sm:$0xf]  ;;  %v18111_v10 = vld [vmem:[#allocation4 + $0x14c4] sm:$0xf] }
 0x412   : > { %5525 = vmatmul.bf16.vlgmr.msrb.gmra.mxu2 %v19575_v50  ;;  %v18141_v13 = vld [vmem:[#allocation4 + $0x15ac] sm:$0xf0] }
 0x413   : > { %v14584_v23 = vor.u32 %v18141_v13, %v14583_v41  ;;  %v18181_v1 = vld [vmem:[#allocation4 + $0x16ec] sm:$0xf0]  ;;  %v14617_v41 = vld [vmem:[#allocation4 + $0x15f0] sm:$0xf0] }
 0x414   : > { %5531 = vmatpush.bf16.msrb.mxu3 %v14352_v24  ;;  %5561 = vmatpush.bf16.msra.mxu1 %v14036_v20  ;;  %v18072_v24 = vld [vmem:[#allocation4 + $0x138c] sm:$0xf]  ;;  %v14321_v20 = vld [vmem:[#allocation4 + $0x1398] sm:$0xf0]  ;;  %v18165_v13 = vld [vmem:[#allocation4 + $0x166c] sm:$0xf0] }
 0x415   : > { %5570 = vmatpush.bf16.msra.mxu2 %v14228_v2  ;;  %v14324_v2 = vor.u32 %v18072_v24, %v14321_v20  ;;  %v14551_v24 = vld [vmem:[#allocation4 + $0x1560] sm:$0xf]  ;;  %v18133_v20 = vld [vmem:[#allocation4 + $0x156c] sm:$0xf0] }
 0x418   : > { %5532 = vmatpush.bf16.msrb.mxu3 %v14336_v40  ;;  %5562 = vmatpush.bf16.msra.mxu1 %v14020_v47  ;;  %v18060_v40 = vld [vmem:[#allocation4 + $0x132c] sm:$0xf]  ;;  %v14273_v47 = vld [vmem:[#allocation4 + $0x1338] sm:$0xf0] }
 0x419   : > { %5571 = vmatpush.bf16.msra.mxu2 %v14212_v27  ;;  %v14487_v27 = vld [vmem:[#allocation4 + $0x14e0] sm:$0xf]  ;;  %v14276_v58 = vor.u32 %v18060_v40, %v14273_v47 }
 0x41a   : > { %v14488_v32 = vor.u32 %v18117_v37, %v14487_v27  ;;  %v14535_v27 = vld [vmem:[#allocation4 + $0x1540] sm:$0xf]  ;;  %v18129_v37 = vld [vmem:[#allocation4 + $0x154c] sm:$0xf0] }
 0x41c   : > { %5533 = vmatpush.bf16.msrb.mxu3 %v14320_v9  ;;  %5563 = vmatpush.bf16.msra.mxu1 %v14004_v62  ;;  %v14257_v9 = vld [vmem:[#allocation4 + $0x1318] sm:$0xf0] }
 0x41d   : > { %5572 = vmatpush.bf16.msra.mxu2 %v14196_v56  ;;  %6391 = vmatpush.bf16.msrb.mxu0 %v14488_v32  ;;  %v14260_v62 = vor.u32 %v18056_v38, %v14257_v9  ;;  %v14455_v56 = vld [vmem:[#allocation4 + $0x14a0] sm:$0xf] }
 0x41e   : > { %v14456_v52 = vor.u32 %v18109_v43, %v14455_v56  ;;  %v14727_v32 = vld [vmem:[#allocation4 + $0x16c0] sm:$0xf]  ;;  %v18125_v56 = vld [vmem:[#allocation4 + $0x152c] sm:$0xf0] }
 0x41f   : > { %5486 = vmatmul.bf16.vlgmr.msra.gmra.mxu3 %v19586_v49  ;;  %5564 = vmatmul.bf16.vlgmr.msra.gmra.mxu1 %v19565_v7  ;;  %v14132_v7 = vor.u32 %v18024_v5, %v14129_v0  ;;  %v14711_v43 = vld [vmem:[#allocation4 + $0x16a0] sm:$0xf] }
 0x420   : > { %5534 = vmatpush.bf16.msrb.mxu3 %v14304_v51  ;;  %v14440_v51 = vor.u32 %v18105_v12, %v14439_v33 }
 0x421   : > { %5573 = vmatpush.bf16.msra.mxu2 %v14180_v21  ;;  %v14423_v21 = vld [vmem:[#allocation4 + $0x1460] sm:$0xf] }
 0x422   : > { %v14424_v35 = vor.u32 %v18101_v16, %v14423_v21  ;;  %v18103_v21 = vld [vmem:[#allocation4 + $0x1484] sm:$0xf]  ;;  %v14441_v16 = vld [vmem:[#allocation4 + $0x1490] sm:$0xf0] }
 0x424   : > { %5535 = vmatpush.bf16.msrb.mxu3 %v14288_v63  ;;  %v18149_v63 = vld [vmem:[#allocation4 + $0x15ec] sm:$0xf0] }
 0x425   : > { %5574 = vmatpush.bf16.msra.mxu2 %v14164_v17  ;;  %v14616_v17 = vor.u32 %v18149_v63, %v14615_v30  ;;  %v14503_v63 = vld [vmem:[#allocation4 + $0x1500] sm:$0xf] }
 0x427   : > { %6404 = vmatpush.bf16.msrb.mxu1 %v14616_v17  ;;  %v18121_v17 = vld [vmem:[#allocation4 + $0x150c] sm:$0xf0] }
 0x428   : > { %5536 = vmatpush.bf16.msrb.mxu3 %v14272_v18  ;;  %v18145_v18 = vld [vmem:[#allocation4 + $0x15cc] sm:$0xf0]  ;;  %v14504_v3 = vor.u32 %v18121_v17, %v14503_v63  ;;  %v18179_v63 = vld [vmem:[#allocation4 + $0x16e4] sm:$0xf]  ;;  %v14745_v17 = vld [vmem:[#allocation4 + $0x16f0] sm:$0xf0] }
 0x429   : > { %5575 = vmatpush.bf16.msra.mxu2 %v14148_v4  ;;  %v14600_v4 = vor.u32 %v18145_v18, %v14599_v11  ;;  %v18169_v11 = vld [vmem:[#allocation4 + $0x168c] sm:$0xf0]  ;;  %v14425_v18 = vld [vmem:[#allocation4 + $0x1470] sm:$0xf0] }
 0x42b   : > { %6405 = vmatpush.bf16.msrb.mxu1 %v14600_v4  ;;  %v14696_v4 = vor.u32 %v18169_v11, %v14695_v61  ;;  %v14855_v11 = vld [vmem:[#allocation4 + $0x17c0] sm:$0xf] }
 0x42c   : > { %5537 = vmatpush.bf16.msrb.mxu3 %v14256_v42  ;;  %v14375_v42 = vld [vmem:[#allocation4 + $0x1400] sm:$0xf] }
 0x42d   : > { %5576 = vmatpush.bf16.msra.mxu2 %v14132_v7  ;;  %v18089_v7 = vld [vmem:[#allocation4 + $0x140c] sm:$0xf0] }
 0x42e   : > { %v14376_v28 = vor.u32 %v18089_v7, %v14375_v42  ;;  %v14409_v7 = vld [vmem:[#allocation4 + $0x1450] sm:$0xf0] }
 0x42f   : > { %5538 = vmatmul.bf16.vlgmr.msrb.gmra.mxu3 %v19586_v49  ;;  %6406 = vmatpush.bf16.msrb.mxu1 %v14584_v23  ;;  %v18095_v23 = vld [vmem:[#allocation4 + $0x1444] sm:$0xf] }
 0x430   : > { %5582 = vmatpush.bf16.msra.mxu3 %v14372_v29  ;;  %5577 = vmatmul.bf16.vlgmr.msra.gmra.mxu2 %v19575_v50  ;;  %v14471_v50 = vld [vmem:[#allocation4 + $0x14c0] sm:$0xf] }
 0x431   : > { %v14472_v57 = vor.u32 %v18113_v48, %v14471_v50  ;;  %v14567_v29 = vld [vmem:[#allocation4 + $0x1580] sm:$0xf]  ;;  %v18177_v50 = vld [vmem:[#allocation4 + $0x16cc] sm:$0xf0]  ;;  %v18107_v48 = vld [vmem:[#allocation4 + $0x14a4] sm:$0xf] }
 0x432   : > { %v14568_v19 = vor.u32 %v18137_v34, %v14567_v29  ;;  %v14728_v38 = vor.u32 %v18177_v50, %v14727_v32  ;;  %v18143_v29 = vld [vmem:[#allocation4 + $0x15c4] sm:$0xf] }
 0x433   : > { %6392 = vmatpush.bf16.msrb.mxu0 %v14472_v57  ;;  %v14536_v57 = vor.u32 %v18129_v37, %v14535_v27  ;;  %v14647_v27 = vld [vmem:[#allocation4 + $0x1620] sm:$0xf]  ;;  %v18157_v37 = vld [vmem:[#allocation4 + $0x162c] sm:$0xf0] }
 0x434   : > { %5583 = vmatpush.bf16.msra.mxu3 %v14356_v44  ;;  %v18115_v44 = vld [vmem:[#allocation4 + $0x14e4] sm:$0xf]  ;;  %6407 = vmatpush.bf16.msrb.mxu1 %v14568_v19  ;;  %v14648_v50 = vor.u32 %v18157_v37, %v14647_v27  ;;  %v14505_v27 = vld [vmem:[#allocation4 + $0x1510] sm:$0xf0] }
 0x435   : > { %v18167_v37 = vld [vmem:[#allocation4 + $0x1684] sm:$0xf] }
 0x437   : > { %6393 = vmatpush.bf16.msrb.mxu0 %v14456_v52 }
 0x438   : > { %5584 = vmatpush.bf16.msra.mxu3 %v14340_v36  ;;  %v14492_v36 = vor.u32 %v18115_v44, %v14489_v15  ;;  %v14412_v44 = vor.u32 %v18095_v23, %v14409_v7  ;;  %v14839_v23 = vld [vmem:[#allocation4 + $0x17a0] sm:$0xf] }
 0x43b   : > { %6394 = vmatpush.bf16.msrb.mxu0 %v14440_v51  ;;  %v18173_v51 = vld [vmem:[#allocation4 + $0x16ac] sm:$0xf0] }
 0x43c   : > { %5585 = vmatpush.bf16.msra.mxu3 %v14324_v2  ;;  %v14743_v2 = vld [vmem:[#allocation4 + $0x16e0] sm:$0xf]  ;;  %v14712_v30 = vor.u32 %v18173_v51, %v14711_v43  ;;  %v18213_v51 = vld [vmem:[#allocation4 + $0x17ec] sm:$0xf0] }
 0x43d   : > { %v14744_v40 = vor.u32 %v18181_v1, %v14743_v2  ;;  %v18091_v2 = vld [vmem:[#allocation4 + $0x1424] sm:$0xf]  ;;  %v14631_v43 = vld [vmem:[#allocation4 + $0x1600] sm:$0xf] }
 0x43e   : > { %v18139_v1 = vld [vmem:[#allocation4 + $0x15a4] sm:$0xf] }
 0x43f   : > { %6395 = vmatpush.bf16.msrb.mxu0 %v14424_v35  ;;  %6417 = vmatpush.bf16.msrb.mxu2 %v14744_v40  ;;  %v14444_v35 = vor.u32 %v18103_v21, %v14441_v16  ;;  %v18131_v21 = vld [vmem:[#allocation4 + $0x1564] sm:$0xf]  ;;  %v14553_v16 = vld [vmem:[#allocation4 + $0x1570] sm:$0xf0] }
 0x440   : > { %5586 = vmatpush.bf16.msra.mxu3 %v14308_v54  ;;  %v14552_v54 = vor.u32 %v18133_v20, %v14551_v24  ;;  %v18161_v24 = vld [vmem:[#allocation4 + $0x164c] sm:$0xf0] }
 0x442   : > { %6408 = vmatpush.bf16.msrb.mxu1 %v14552_v54  ;;  %v14393_v54 = vld [vmem:[#allocation4 + $0x1430] sm:$0xf0] }
 0x443   : > { %6396 = vmatpush.bf16.msrb.mxu0 %v14408_v31  ;;  %6418 = vmatpush.bf16.msrb.mxu2 %v14728_v38  ;;  %v18099_v31 = vld [vmem:[#allocation4 + $0x1464] sm:$0xf] }
 0x444   : > { %5587 = vmatpush.bf16.msra.mxu3 %v14292_v14  ;;  %v14473_v14 = vld [vmem:[#allocation4 + $0x14d0] sm:$0xf0] }
 0x445   : > { %v14476_v47 = vor.u32 %v18111_v10, %v14473_v14  ;;  %v14396_v10 = vor.u32 %v18091_v2, %v14393_v54  ;;  %v14585_v14 = vld [vmem:[#allocation4 + $0x15b0] sm:$0xf0]  ;;  %v14823_v54 = vld [vmem:[#allocation4 + $0x1780] sm:$0xf] }
 0x446   : > { %6409 = vmatpush.bf16.msrb.mxu1 %v14536_v57  ;;  %v18135_v57 = vld [vmem:[#allocation4 + $0x1584] sm:$0xf] }
 0x447   : > { %6419 = vmatpush.bf16.msrb.mxu2 %v14712_v30 }
 0x448   : > { %5588 = vmatpush.bf16.msra.mxu3 %v14276_v58  ;;  %v14457_v58 = vld [vmem:[#allocation4 + $0x14b0] sm:$0xf0] }
 0x449   : > { %v14460_v9 = vor.u32 %v18107_v48, %v14457_v58  ;;  %v18087_v48 = vld [vmem:[#allocation4 + $0x1404] sm:$0xf]  ;;  %v14377_v58 = vld [vmem:[#allocation4 + $0x1410] sm:$0xf0] }
 0x44b   : > { %6420 = vmatpush.bf16.msrb.mxu2 %v14696_v4 }
 0x44c   : > { %5589 = vmatpush.bf16.msra.mxu3 %v14260_v62  ;;  %v19596_v39 = vpop.f32.mrf.mxu0  ;;  %v14519_v62 = vld [vmem:[#allocation4 + $0x1520] sm:$0xf] }
 0x44d   : > { %v14520_v12 = vor.u32 %v18125_v56, %v14519_v62  ;;  %v14569_v62 = vld [vmem:[#allocation4 + $0x1590] sm:$0xf0] }
 0x44e   : > { %v14572_v56 = vor.u32 %v18135_v57, %v14569_v62  ;;  %v14807_v57 = vld [vmem:[#allocation4 + $0x1760] sm:$0xf]  ;;  %v18163_v62 = vld [vmem:[#allocation4 + $0x1664] sm:$0xf] }
 0x44f   : > { %5590 = vmatmul.bf16.vlgmr.msra.gmra.mxu3 %v19586_v49  ;;  %v14391_v49 = vld [vmem:[#allocation4 + $0x1420] sm:$0xf]  ;;  %6410 = vmatpush.bf16.msrb.mxu1 %v14520_v12 }
 0x450   : > { %v14392_v0 = vor.u32 %v18093_v6, %v14391_v49  ;;  %v14428_v49 = vor.u32 %v18099_v31, %v14425_v18  ;;  %v18147_v6 = vld [vmem:[#allocation4 + $0x15e4] sm:$0xf]  ;;  %v18209_v31 = vld [vmem:[#allocation4 + $0x17cc] sm:$0xf0] }
 0x451   : > { %v14856_v4 = vor.u32 %v18209_v31, %v14855_v11  ;;  %v14775_v11 = vld [vmem:[#allocation4 + $0x1720] sm:$0xf]  ;;  %v18189_v31 = vld [vmem:[#allocation4 + $0x172c] sm:$0xf0] }
 0x452   : > { %6397 = vmatpush.bf16.msrb.mxu0 %v14392_v0  ;;  %v14679_v0 = vld [vmem:[#allocation4 + $0x1660] sm:$0xf] }
 0x453   : > { %6411 = vmatpush.bf16.msrb.mxu1 %v14504_v3  ;;  %v14680_v42 = vor.u32 %v18165_v13, %v14679_v0  ;;  %v14748_v3 = vor.u32 %v18179_v63, %v14745_v17  ;;  %v14729_v0 = vld [vmem:[#allocation4 + $0x16d0] sm:$0xf0] }
 0x454   : > { %v5398_v5 = vpop.f32.mrf.mxu0  ;;  %v14665_v63 = vld [vmem:[#allocation4 + $0x1650] sm:$0xf0] }
 0x455   : > { %v14620_v5 = vor.u32 %v18147_v6, %v14617_v41  ;;  %6421 = vmatpush.bf16.msrb.mxu2 %v14680_v42  ;;  %v14537_v6 = vld [vmem:[#allocation4 + $0x1550] sm:$0xf0]  ;;  %v18175_v41 = vld [vmem:[#allocation4 + $0x16c4] sm:$0xf]  ;;  %v18205_v42 = vld [vmem:[#allocation4 + $0x17ac] sm:$0xf0] }
 0x456   : > { %6398 = vmatpush.bf16.msrb.mxu0 %v14376_v28  ;;  %v14601_v28 = vld [vmem:[#allocation4 + $0x15d0] sm:$0xf0]  ;;  %v14732_v13 = vor.u32 %v18175_v41, %v14729_v0  ;;  %v14840_v7 = vor.u32 %v18205_v42, %v14839_v23  ;;  %v18118_v0 = vld [vmem:[#allocation4 + $0x14f4] sm:$0xf0]  ;;  %v14479_v42 = vld [vmem:[#allocation4 + $0x14c8] sm:$0xf] }
 0x457   : > { %6456 = vmatpush.bf16.msra.mxu1 %v14620_v5  ;;  %v14604_v15 = vor.u32 %v18143_v29, %v14601_v28  ;;  %v18123_v29 = vld [vmem:[#allocation4 + $0x1524] sm:$0xf]  ;;  %v14521_v28 = vld [vmem:[#allocation4 + $0x1530] sm:$0xf0] }
 0x45a   : > { %6443 = vmatpush.bf16.msra.mxu0 %v14492_v36  ;;  %v14663_v36 = vld [vmem:[#allocation4 + $0x1640] sm:$0xf] }
 0x45b   : > { %6457 = vmatpush.bf16.msra.mxu1 %v14604_v15  ;;  %v14664_v20 = vor.u32 %v18161_v24, %v14663_v36  ;;  %v14524_v15 = vor.u32 %v18123_v29, %v14521_v28  ;;  %v14713_v36 = vld [vmem:[#allocation4 + $0x16b0] sm:$0xf0]  ;;  %v18185_v28 = vld [vmem:[#allocation4 + $0x170c] sm:$0xf0] }
 0x45c   : > { %v19598_v53 = vpop.f32.mrf.mxu1  ;;  %v19600_v26 = vpop.f32.mrf.mxu0  ;;  %v19610_v24 = vld [vmem:[#allocation10 + $0x4] ss:$8 sm:$0xf] }
 0x45d   : > { %6422 = vmatpush.bf16.msrb.mxu2 %v14664_v20 }
 0x45e   : > { %6444 = vmatpush.bf16.msra.mxu0 %v14476_v47  ;;  %v14588_v47 = vor.u32 %v18139_v1, %v14585_v14  ;;  %v18201_v1 = vld [vmem:[#allocation4 + $0x178c] sm:$0xf0] }
 0x45f   : > { %v14824_v14 = vor.u32 %v18201_v1, %v14823_v54 }
 0x460   : > { %6458 = vmatpush.bf16.msra.mxu1 %v14588_v47  ;;  %v18119_v47 = vld [vmem:[#allocation4 + $0x1504] sm:$0xf] }
 0x461   : > { %6423 = vmatpush.bf16.msrb.mxu2 %v14648_v50  ;;  %v14697_v50 = vld [vmem:[#allocation4 + $0x1690] sm:$0xf0] }
 0x462   : > { %6445 = vmatpush.bf16.msra.mxu0 %v14460_v9  ;;  %v14380_v9 = vor.u32 %v18087_v48, %v14377_v58  ;;  %v4739_v48 = vperm.slane %v19610_v24, 0  ;;  %v14700_v58 = vor.u32 %v18167_v37, %v14697_v50  ;;  %v14463_v50 = vld [vmem:[#allocation4 + $0x14a8] sm:$0xf] }
 0x464   : > { %v5411_v52 = vpop.f32.mrf.mxu1  ;;  %v5450_v33 = vpop.f32.mrf.mxu0  ;;  %6459 = vmatpush.bf16.msra.mxu1 %v14572_v56  ;;  %v14681_v56 = vld [vmem:[#allocation4 + $0x1670] sm:$0xf0] }
 0x465   : > { %v18153_v52 = vld [vmem:[#allocation4 + $0x160c] sm:$0xf0]  ;;  %v14871_v33 = vld [vmem:[#allocation4 + $0x17e0] sm:$0xf] }
 0x466   : > { %6446 = vmatpush.bf16.msra.mxu0 %v14444_v35  ;;  %v14632_v12 = vor.u32 %v18153_v52, %v14631_v43  ;;  %v14872_v30 = vor.u32 %v18213_v51, %v14871_v33  ;;  %v14556_v35 = vor.u32 %v18131_v21, %v14553_v16  ;;  %v14684_v52 = vor.u32 %v18163_v62, %v14681_v56  ;;  %v14791_v51 = vld [vmem:[#allocation4 + $0x1740] sm:$0xf]  ;;  %v18193_v21 = vld [vmem:[#allocation4 + $0x174c] sm:$0xf0] }
 0x467   : > { %v5397_v33 = vadd.f32 %v19596_v39, %v4739_v48  ;;  %v14776_v39 = vor.u32 %v18189_v31, %v14775_v11  ;;  %v18110_v48 = vld [vmem:[#allocation4 + $0x14b4] sm:$0xf0]  ;;  %v14623_v11 = vld [vmem:[#allocation4 + $0x15e8] sm:$0xf] }
 0x468   : > { %6424 = vmatpush.bf16.msrb.mxu2 %v14632_v12  ;;  %6430 = vmatpush.bf16.msrb.mxu3 %v14872_v30  ;;  %v14792_v30 = vor.u32 %v18193_v21, %v14791_v51  ;;  %v18106_v51 = vld [vmem:[#allocation4 + $0x1494] sm:$0xf0]  ;;  %v18203_v21 = vld [vmem:[#allocation4 + $0x17a4] sm:$0xf] }
 0x469   : > { %6460 = vmatpush.bf16.msra.mxu1 %v14556_v35  ;;  %v5410_v16 = vadd.f32 %v19598_v53, %v5397_v33  ;;  %v18159_v35 = vld [vmem:[#allocation4 + $0x1644] sm:$0xf]  ;;  %v14464_v33 = vor.u32 %v18110_v48, %v14463_v50  ;;  %v18150_v31 = vld [vmem:[#allocation4 + $0x15f4] sm:$0xf0] }
 0x46a   : > { %6447 = vmatpush.bf16.msra.mxu0 %v14428_v49  ;;  %v18127_v49 = vld [vmem:[#allocation4 + $0x1544] sm:$0xf]  ;;  %v14668_v17 = vor.u32 %v18159_v35, %v14665_v63 }
 0x46b   : > { %v14540_v5 = vor.u32 %v18127_v49, %v14537_v6  ;;  %v18155_v49 = vld [vmem:[#allocation4 + $0x1624] sm:$0xf]  ;;  %v14649_v6 = vld [vmem:[#allocation4 + $0x1630] sm:$0xf0] }
 0x46c   : > { %v19602_v34 = vpop.f32.mrf.mxu1  ;;  %6469 = vmatpush.bf16.msra.mxu2 %v14748_v3  ;;  %6431 = vmatpush.bf16.msrb.mxu3 %v14856_v4  ;;  %v14652_v53 = vor.u32 %v18155_v49, %v14649_v6 }
 0x46d   : > { %6461 = vmatpush.bf16.msra.mxu1 %v14540_v5  ;;  %v14495_v5 = vld [vmem:[#allocation4 + $0x14e8] sm:$0xf] }
 0x46e   : > { %v19604_v19 = vpop.f32.mrf.mxu0  ;;  %6448 = vmatpush.bf16.msra.mxu0 %v14412_v44  ;;  %v18171_v44 = vld [vmem:[#allocation4 + $0x16a4] sm:$0xf]  ;;  %v14496_v29 = vor.u32 %v18118_v0, %v14495_v5  ;;  %v14415_v0 = vld [vmem:[#allocation4 + $0x1448] sm:$0xf] }
 0x46f   : > { %v14716_v2 = vor.u32 %v18171_v44, %v14713_v36  ;;  %v18151_v44 = vld [vmem:[#allocation4 + $0x1604] sm:$0xf] }
 0x470   : > { %6470 = vmatpush.bf16.msra.mxu2 %v14732_v13  ;;  %6432 = vmatpush.bf16.msrb.mxu3 %v14840_v7 }
 0x471   : > { %6462 = vmatpush.bf16.msra.mxu1 %v14524_v15  ;;  %v14633_v15 = vld [vmem:[#allocation4 + $0x1610] sm:$0xf0] }
 0x472   : > { %v19606_v40 = vpop.f32.mrf.mxu2  ;;  %6449 = vmatpush.bf16.msra.mxu0 %v14396_v10  ;;  %v14636_v1 = vor.u32 %v18151_v44, %v14633_v15 }
 0x474   : > { %v5463_v32 = vpop.f32.mrf.mxu1  ;;  %6471 = vmatpush.bf16.msra.mxu2 %v14716_v2  ;;  %6433 = vmatpush.bf16.msrb.mxu3 %v14824_v14  ;;  %v18114_v2 = vld [vmem:[#allocation4 + $0x14d4] sm:$0xf0]  ;;  %v14873_v14 = vld [vmem:[#allocation4 + $0x17f0] sm:$0xf0] }
 0x475   : > { %v14508_v32 = vor.u32 %v18119_v47, %v14505_v27  ;;  %v4740_v47 = vperm.slane %v19610_v24, 1 }
 0x476   : > { %v5502_v38 = vpop.f32.mrf.mxu0  ;;  %6450 = vmatpush.bf16.msra.mxu0 %v14380_v9 }
 0x477   : > { %v18197_v38 = vld [vmem:[#allocation4 + $0x176c] sm:$0xf0]  ;;  %6463 = vmatpush.bf16.msra.mxu1 %v14508_v32  ;;  %v14480_v32 = vor.u32 %v18114_v2, %v14479_v42 }
 0x478   : > { %6472 = vmatpush.bf16.msra.mxu2 %v14700_v58  ;;  %v14808_v9 = vor.u32 %v18197_v38, %v14807_v57  ;;  %v18207_v58 = vld [vmem:[#allocation4 + $0x17c4] sm:$0xf]  ;;  %v14857_v57 = vld [vmem:[#allocation4 + $0x17d0] sm:$0xf0]  ;;  %v5449_v38 = vadd.f32 %v19600_v26, %v4740_v47  ;;  %v18142_v47 = vld [vmem:[#allocation4 + $0x15b4] sm:$0xf0] }
 0x479   : > { %v14860_v62 = vor.u32 %v18207_v58, %v14857_v57 }
 0x47a   : > { %v5424_v61 = vpop.f32.mrf.mxu2  ;;  %6434 = vmatpush.bf16.msrb.mxu3 %v14808_v9 }
 0x47b   : > { %v5423_v61 = vadd.f32 %v19606_v40, %v5410_v16  ;;  %v14759_v40 = vld [vmem:[#allocation4 + $0x1700] sm:$0xf]  ;;  %v14841_v16 = vld [vmem:[#allocation4 + $0x17b0] sm:$0xf0] }
 0x47c   : > { %v19608_v18 = vpop.f32.mrf.mxu1  ;;  %6473 = vmatpush.bf16.msra.mxu2 %v14684_v52  ;;  %v14760_v54 = vor.u32 %v18185_v28, %v14759_v40  ;;  %v5462_v52 = vadd.f32 %v19602_v34, %v5449_v38  ;;  %v14844_v35 = vor.u32 %v18203_v21, %v14841_v16  ;;  %v18199_v34 = vld [vmem:[#allocation4 + $0x1784] sm:$0xf]  ;;  %v18146_v40 = vld [vmem:[#allocation4 + $0x15d4] sm:$0xf0]  ;;  %v4741_v28 = vperm.slane %v19610_v24, 2 }
 0x47d   : > { %v14383_v38 = vld [vmem:[#allocation4 + $0x1408] sm:$0xf]  ;;  %v18116_v21 = vld [vmem:[#allocation4 + $0x14ec] sm:$0xf]  ;;  %v14497_v16 = vld [vmem:[#allocation4 + $0x14f8] sm:$0xf0] }
 0x47e   : > { %6435 = vmatpush.bf16.msrb.mxu3 %v14792_v30 }
 0x480   : > { %6474 = vmatpush.bf16.msra.mxu2 %v14668_v17 }
 0x482   : > { %v19612_v20 = vpop.f32.mrf.mxu2  ;;  %6436 = vmatpush.bf16.msrb.mxu3 %v14776_v39 }
 0x483   : > { %v5475_v30 = vadd.f32 %v19612_v20, %v5462_v52  ;;  %v14624_v20 = vor.u32 %v18150_v31, %v14623_v11  ;;  %v18138_v52 = vld [vmem:[#allocation4 + $0x1594] sm:$0xf0]  ;;  %v14500_v31 = vor.u32 %v18116_v21, %v14497_v16  ;;  %v14625_v21 = vld [vmem:[#allocation4 + $0x15f8] sm:$0xf0] }
 0x484   : > { %v5515_v10 = vpop.f32.mrf.mxu1  ;;  %6475 = vmatpush.bf16.msra.mxu2 %v14652_v53  ;;  %v18098_v53 = vld [vmem:[#allocation4 + $0x1454] sm:$0xf0] }
 0x485   : > { %v18211_v10 = vld [vmem:[#allocation4 + $0x17e4] sm:$0xf]  ;;  %v14416_v2 = vor.u32 %v18098_v53, %v14415_v0  ;;  %v18182_v11 = vld [vmem:[#allocation4 + $0x16f4] sm:$0xf0] }
 0x486   : > { %v14876_v27 = vor.u32 %v18211_v10, %v14873_v14  ;;  %6437 = vmatpush.bf16.msrb.mxu3 %v14760_v54  ;;  %v18094_v10 = vld [vmem:[#allocation4 + $0x1434] sm:$0xf0]  ;;  %v14591_v14 = vld [vmem:[#allocation4 + $0x15a8] sm:$0xf] }
 0x487   : > { %v14592_v57 = vor.u32 %v18142_v47, %v14591_v14  ;;  %v14527_v14 = vld [vmem:[#allocation4 + $0x1528] sm:$0xf]  ;;  %v18126_v47 = vld [vmem:[#allocation4 + $0x1534] sm:$0xf0] }
 0x488   : > { %6476 = vmatpush.bf16.msra.mxu2 %v14636_v1  ;;  %v14399_v1 = vld [vmem:[#allocation4 + $0x1428] sm:$0xf] }
 0x489   : > { %v14400_v58 = vor.u32 %v18094_v10, %v14399_v1 }
 0x48a   : > { %v5476_v12 = vpop.f32.mrf.mxu2  ;;  %6482 = vmatpush.bf16.msra.mxu3 %v14876_v27  ;;  %v18191_v27 = vld [vmem:[#allocation4 + $0x1744] sm:$0xf] }
 0x48b   : > { %v14447_v12 = vld [vmem:[#allocation4 + $0x1488] sm:$0xf] }
 0x48c   : > { %v19615_v43 = vpop.f32.mrf.mxu0  ;;  %v14448_v26 = vor.u32 %v18106_v51, %v14447_v12  ;;  %v14777_v12 = vld [vmem:[#allocation4 + $0x1730] sm:$0xf0] }
 0x48e   : > { %6483 = vmatpush.bf16.msra.mxu3 %v14860_v62  ;;  %v18090_v62 = vld [vmem:[#allocation4 + $0x1414] sm:$0xf0] }
 0x492   : > { %v5435_v3 = vpop.f32.mrf.mxu3  ;;  %6484 = vmatpush.bf16.msra.mxu3 %v14844_v35  ;;  %v14559_v35 = vld [vmem:[#allocation4 + $0x1568] sm:$0xf] }
 0x493   : > { %v5436_v4 = vadd.f32 %v5435_v3, %v5423_v61  ;;  %v14431_v61 = vld [vmem:[#allocation4 + $0x1468] sm:$0xf]  ;;  %v18102_v3 = vld [vmem:[#allocation4 + $0x1474] sm:$0xf0] }
 0x494   : > { %v5554_v41 = vpop.f32.mrf.mxu0  ;;  %v14432_v5 = vor.u32 %v18102_v3, %v14431_v61  ;;  %v18134_v61 = vld [vmem:[#allocation4 + $0x1574] sm:$0xf0]  ;;  %v14751_v3 = vld [vmem:[#allocation4 + $0x16e8] sm:$0xf] }
 0x495   : > { %vm5595_vm6 = vcmp.gt.f32.partialorder %v5436_v4, 0.0  ;;  %v5599_v13 = vmul.f32 0.2, %v5436_v4  ;;  %v19620_v23 = vpop.f32.mrf.mxu2  ;;  %v14752_v0 = vor.u32 %v18182_v11, %v14751_v3  ;;  %v4742_v3 = vperm.slane %v19610_v24, 3  ;;  %v18144_v11 = vld [vmem:[#allocation4 + $0x15cc] sm:$0xf] }
 0x496   : > { %v18140_v24 = vld [vmem:[#allocation4 + $0x15ac] sm:$0xf] }
 0x497   : > { %v5603_v7 = vsel %vm5595_vm6, %v5436_v4, %v5599_v13  ;;  %v14825_v4 = vld [vmem:[#allocation4 + $0x1790] sm:$0xf0]  ;;  %v14607_v13 = vld [vmem:[#allocation4 + $0x15c8] sm:$0xf] }
 0x498   : > { %v19622_v36 = vpack.c.bf16 %v5603_v7, %v5603_v7  ;;  %v14828_v6 = vor.u32 %v18199_v34, %v14825_v4  ;;  %v18195_v7 = vld [vmem:[#allocation4 + $0x1764] sm:$0xf]  ;;  %v14608_v54 = vor.u32 %v18146_v40, %v14607_v13  ;;  %v18112_v34 = vld [vmem:[#allocation4 + $0x14cc] sm:$0xf]  ;;  %v14543_v13 = vld [vmem:[#allocation4 + $0x1548] sm:$0xf] }
 0x499   : > { %v18183_v4 = vld [vmem:[#allocation4 + $0x1704] sm:$0xf]  ;;  %v18130_v40 = vld [vmem:[#allocation4 + $0x1554] sm:$0xf0] }
 0x49a   : > { %v5437_v37 = vpop.f32.mrf.mxu3  ;;  %6399 = vmatmul.bf16.vlgmr.msrb.gmra.mxu0 %v19622_v36  ;;  %6485 = vmatpush.bf16.msra.mxu3 %v14828_v6 }
 0x49b   : > { %6495 = vmatpush.bf16.msrb.mxu0 %v14496_v29  ;;  %v14809_v29 = vld [vmem:[#allocation4 + $0x1770] sm:$0xf0] }
 0x49c   : > { %v19627_v9 = vpop.f32.mrf.mxu1  ;;  %v14812_v44 = vor.u32 %v18195_v7, %v14809_v29  ;;  %v14793_v37 = vld [vmem:[#allocation4 + $0x1750] sm:$0xf0]  ;;  %v14735_v7 = vld [vmem:[#allocation4 + $0x16c8] sm:$0xf]  ;;  %v18178_v29 = vld [vmem:[#allocation4 + $0x16d4] sm:$0xf0] }
 0x49d   : > { %v5528_v56 = vpop.f32.mrf.mxu2  ;;  %v14796_v50 = vor.u32 %v18191_v27, %v14793_v37  ;;  %v14736_v1 = vor.u32 %v18178_v29, %v14735_v7  ;;  %v14719_v27 = vld [vmem:[#allocation4 + $0x16a8] sm:$0xf]  ;;  %v18174_v37 = vld [vmem:[#allocation4 + $0x16b4] sm:$0xf0] }
 0x49e   : > { %6486 = vmatpush.bf16.msra.mxu3 %v14812_v44  ;;  %v14575_v56 = vld [vmem:[#allocation4 + $0x1588] sm:$0xf]  ;;  %v14465_v44 = vld [vmem:[#allocation4 + $0x14b8] sm:$0xf0] }
 0x49f   : > { %6496 = vmatpush.bf16.msrb.mxu0 %v14480_v32  ;;  %v5501_v32 = vadd.f32 %v19604_v19, %v4741_v28  ;;  %v18108_v28 = vld [vmem:[#allocation4 + $0x14ac] sm:$0xf]  ;;  %v14655_v7 = vld [vmem:[#allocation4 + $0x1628] sm:$0xf] }
 0x4a0   : > { %v14468_v10 = vor.u32 %v18108_v28, %v14465_v44  ;;  %v18158_v28 = vld [vmem:[#allocation4 + $0x1634] sm:$0xf0]  ;;  %v18088_v44 = vld [vmem:[#allocation4 + $0x140c] sm:$0xf] }
 0x4a1   : > { %v5514_v48 = vadd.f32 %v19608_v18, %v5501_v32  ;;  %v18104_v32 = vld [vmem:[#allocation4 + $0x148c] sm:$0xf] }
 0x4a2   : > { %v5487_v63 = vpop.f32.mrf.mxu3  ;;  %6487 = vmatpush.bf16.msra.mxu3 %v14796_v50  ;;  %v14449_v50 = vld [vmem:[#allocation4 + $0x1498] sm:$0xf0] }
 0x4a3   : > { %v5488_v17 = vadd.f32 %v5487_v63, %v5475_v30  ;;  %6497 = vmatpush.bf16.msrb.mxu0 %v14464_v33  ;;  %v18187_v33 = vld [vmem:[#allocation4 + $0x1724] sm:$0xf]  ;;  %v5527_v51 = vadd.f32 %v19620_v23, %v5514_v48  ;;  %v14761_v23 = vld [vmem:[#allocation4 + $0x1710] sm:$0xf0]  ;;  %v14528_v48 = vor.u32 %v18126_v47, %v14527_v14 }
 0x4a4   : > { %v5567_v49 = vpop.f32.mrf.mxu1  ;;  %v14780_v30 = vor.u32 %v18187_v33, %v14777_v12  ;;  %v14764_v6 = vor.u32 %v18183_v4, %v14761_v23  ;;  %v18100_v33 = vld [vmem:[#allocation4 + $0x146c] sm:$0xf]  ;;  %v14433_v12 = vld [vmem:[#allocation4 + $0x1478] sm:$0xf0]  ;;  %v14671_v23 = vld [vmem:[#allocation4 + $0x1648] sm:$0xf] }
 0x4a5   : > { %vm5596_vm7 = vcmp.gt.f32.partialorder %v5488_v17, 0.0  ;;  %v5600_v39 = vmul.f32 0.2, %v5488_v17  ;;  %v14481_v49 = vld [vmem:[#allocation4 + $0x14d8] sm:$0xf0] }
 0x4a6   : > { %6488 = vmatpush.bf16.msra.mxu3 %v14780_v30  ;;  %v14484_v53 = vor.u32 %v18112_v34, %v14481_v49  ;;  %v18162_v49 = vld [vmem:[#allocation4 + $0x1654] sm:$0xf0] }
 0x4a7   : > { %v5604_v41 = vsel %vm5596_vm7, %v5488_v17, %v5600_v39  ;;  %6498 = vmatpush.bf16.msrb.mxu0 %v14448_v26  ;;  %v14384_v17 = vor.u32 %v18090_v62, %v14383_v38  ;;  %v14576_v26 = vor.u32 %v18138_v52, %v14575_v56  ;;  %v14511_v38 = vld [vmem:[#allocation4 + $0x1508] sm:$0xf]  ;;  %v18122_v62 = vld [vmem:[#allocation4 + $0x1514] sm:$0xf0] }
 0x4a8   : > { %v19631_v42 = vpack.c.bf16 %v5604_v41, %v5604_v41  ;;  %v14703_v56 = vld [vmem:[#allocation4 + $0x1688] sm:$0xf]  ;;  %v18170_v52 = vld [vmem:[#allocation4 + $0x1694] sm:$0xf0]  ;;  %v14512_v16 = vor.u32 %v18122_v62, %v14511_v38 }
 0x4a9   : > { %v14704_v30 = vor.u32 %v18170_v52, %v14703_v56 }
 0x4aa   : > { %v5489_v15 = vpop.f32.mrf.mxu3  ;;  %6412 = vmatmul.bf16.vlgmr.msrb.gmra.mxu1 %v19631_v42  ;;  %6451 = vmatmul.bf16.vlgmr.msra.gmra.mxu0 %v19622_v36 }
 0x4ab   : > { %6499 = vmatpush.bf16.msrb.mxu0 %v14432_v5  ;;  %6508 = vmatpush.bf16.msrb.mxu1 %v14624_v20  ;;  %v14560_v5 = vor.u32 %v18134_v61, %v14559_v35  ;;  %v14687_v35 = vld [vmem:[#allocation4 + $0x1668] sm:$0xf]  ;;  %v14417_v61 = vld [vmem:[#allocation4 + $0x1458] sm:$0xf0] }
 0x4ac   : > { %6489 = vmatpush.bf16.msra.mxu3 %v14764_v6  ;;  %v18092_v6 = vld [vmem:[#allocation4 + $0x142c] sm:$0xf] }
 0x4af   : > { %6500 = vmatpush.bf16.msrb.mxu0 %v14416_v2  ;;  %6509 = vmatpush.bf16.msrb.mxu1 %v14608_v54  ;;  %v14544_v54 = vor.u32 %v18130_v40, %v14543_v13  ;;  %v14672_v13 = vor.u32 %v18162_v49, %v14671_v23  ;;  %v18172_v23 = vld [vmem:[#allocation4 + $0x16ac] sm:$0xf] }
 0x4b2   : > { %v5539_v19 = vpop.f32.mrf.mxu3 }
 0x4b3   : > { %v5540_v63 = vadd.f32 %v5539_v19, %v5527_v51  ;;  %v19639_v18 = vpop.f32.mrf.mxu2  ;;  %6501 = vmatpush.bf16.msrb.mxu0 %v14400_v58  ;;  %6510 = vmatpush.bf16.msrb.mxu1 %v14592_v57  ;;  %v14720_v58 = vor.u32 %v18174_v37, %v14719_v27  ;;  %v14452_v57 = vor.u32 %v18104_v32, %v14449_v50  ;;  %v18148_v51 = vld [vmem:[#allocation4 + $0x15ec] sm:$0xf]  ;;  %v18154_v27 = vld [vmem:[#allocation4 + $0x1614] sm:$0xf0]  ;;  %v14879_v37 = vld [vmem:[#allocation4 + $0x17e8] sm:$0xf] }
 0x4b4   : > { %v14436_v19 = vor.u32 %v18100_v33, %v14433_v12  ;;  %v18214_v32 = vld [vmem:[#allocation4 + $0x17f4] sm:$0xf0] }
 0x4b5   : > { %vm5597_vm8 = vcmp.gt.f32.partialorder %v5540_v63, 0.0  ;;  %v5601_v39 = vmul.f32 0.2, %v5540_v63  ;;  %v14880_v52 = vor.u32 %v18214_v32, %v14879_v37  ;;  %v14783_v37 = vld [vmem:[#allocation4 + $0x1728] sm:$0xf] }
 0x4b6   : > { %v18190_v32 = vld [vmem:[#allocation4 + $0x1734] sm:$0xf0] }
 0x4b7   : > { %v5605_v41 = vsel %vm5597_vm8, %v5540_v63, %v5601_v39  ;;  %6502 = vmatpush.bf16.msrb.mxu0 %v14384_v17  ;;  %6511 = vmatpush.bf16.msrb.mxu1 %v14576_v26  ;;  %v14628_v63 = vor.u32 %v18148_v51, %v14625_v21  ;;  %v18166_v17 = vld [vmem:[#allocation4 + $0x1674] sm:$0xf0]  ;;  %v18096_v26 = vld [vmem:[#allocation4 + $0x144c] sm:$0xf]  ;;  %v14863_v21 = vld [vmem:[#allocation4 + $0x17c8] sm:$0xf] }
 0x4b8   : > { %v19641_v20 = vpack.c.bf16 %v5605_v41, %v5605_v41  ;;  %v14688_v34 = vor.u32 %v18166_v17, %v14687_v35  ;;  %v14420_v4 = vor.u32 %v18096_v26, %v14417_v61  ;;  %v14401_v41 = vld [vmem:[#allocation4 + $0x1438] sm:$0xf0]  ;;  %v18176_v35 = vld [vmem:[#allocation4 + $0x16cc] sm:$0xf] }
 0x4b9   : > { %v14404_v40 = vor.u32 %v18092_v6, %v14401_v41  ;;  %v14831_v41 = vld [vmem:[#allocation4 + $0x1788] sm:$0xf] }
 0x4ba   : > { %v5541_v15 = vpop.f32.mrf.mxu3  ;;  %6425 = vmatmul.bf16.vlgmr.msrb.gmra.mxu2 %v19641_v20  ;;  %6464 = vmatmul.bf16.vlgmr.msra.gmra.mxu1 %v19631_v42 }
 0x4bb   : > { %6547 = vmatpush.bf16.msra.mxu0 %v14500_v31  ;;  %v5580_v2 = vpop.f32.mrf.mxu2  ;;  %6512 = vmatpush.bf16.msrb.mxu1 %v14560_v5  ;;  %v14609_v31 = vld [vmem:[#allocation4 + $0x15d8] sm:$0xf0]  ;;  %v5553_v5 = vadd.f32 %v19615_v43, %v4742_v3 }
 0x4bc   : > { %6503 = vmatmul.bf16.vlgmr.msrb.gmra.mxu0 %v19622_v36  ;;  %6521 = vmatpush.bf16.msrb.mxu2 %v14752_v0  ;;  %v14612_v39 = vor.u32 %v18144_v11, %v14609_v31  ;;  %v14593_v0 = vld [vmem:[#allocation4 + $0x15b8] sm:$0xf0]  ;;  %v18136_v2 = vld [vmem:[#allocation4 + $0x158c] sm:$0xf]  ;;  %v14847_v11 = vld [vmem:[#allocation4 + $0x17a8] sm:$0xf] }
 0x4bd   : > { %v14596_v29 = vor.u32 %v18140_v24, %v14593_v0  ;;  %v14385_v15 = vld [vmem:[#allocation4 + $0x1418] sm:$0xf0]  ;;  %v18206_v31 = vld [vmem:[#allocation4 + $0x17b4] sm:$0xf0]  ;;  %v18120_v24 = vld [vmem:[#allocation4 + $0x150c] sm:$0xf] }
 0x4be   : > { %v14388_v47 = vor.u32 %v18088_v44, %v14385_v15  ;;  %v14848_v49 = vor.u32 %v18206_v31, %v14847_v11  ;;  %v14513_v0 = vld [vmem:[#allocation4 + $0x1518] sm:$0xf0]  ;;  %v18198_v44 = vld [vmem:[#allocation4 + $0x1774] sm:$0xf0]  ;;  %v18164_v15 = vld [vmem:[#allocation4 + $0x166c] sm:$0xf] }
 0x4bf   : > { %6548 = vmatpush.bf16.msra.mxu0 %v14484_v53  ;;  %6513 = vmatpush.bf16.msrb.mxu1 %v14544_v54  ;;  %v5566_v53 = vadd.f32 %v19627_v9, %v5553_v5  ;;  %v14577_v54 = vld [vmem:[#allocation4 + $0x1598] sm:$0xf0]  ;;  %v14656_v9 = vor.u32 %v18158_v28, %v14655_v7  ;;  %v18202_v5 = vld [vmem:[#allocation4 + $0x1794] sm:$0xf0]  ;;  %v14516_v7 = vor.u32 %v18120_v24, %v14513_v0  ;;  %v14815_v28 = vld [vmem:[#allocation4 + $0x1768] sm:$0xf] }
 0x4c0   : > { %6522 = vmatpush.bf16.msrb.mxu2 %v14736_v1  ;;  %v14580_v50 = vor.u32 %v18136_v2, %v14577_v54  ;;  %v14816_v2 = vor.u32 %v18198_v44, %v14815_v28  ;;  %v18196_v11 = vld [vmem:[#allocation4 + $0x176c] sm:$0xf]  ;;  %v14817_v31 = vld [vmem:[#allocation4 + $0x1778] sm:$0xf0]  ;;  %v18237_v28 = vld [vmem:[#allocation4 + $0x18ac] sm:$0xf0] }
 0x4c1   : > { %v5579_v43 = vadd.f32 %v19639_v18, %v5566_v53  ;;  %v14753_v18 = vld [vmem:[#allocation4 + $0x16f8] sm:$0xf0]  ;;  %v18168_v53 = vld [vmem:[#allocation4 + $0x168c] sm:$0xf] }
 0x4c2   : > { %v18184_v24 = vld [vmem:[#allocation4 + $0x170c] sm:$0xf]  ;;  %v14769_v0 = vld [vmem:[#allocation4 + $0x1718] sm:$0xf0] }
 0x4c3   : > { %6549 = vmatpush.bf16.msra.mxu0 %v14468_v10  ;;  %6514 = vmatpush.bf16.msrb.mxu1 %v14528_v48  ;;  %v14639_v10 = vld [vmem:[#allocation4 + $0x1608] sm:$0xf]  ;;  %v18132_v48 = vld [vmem:[#allocation4 + $0x156c] sm:$0xf] }
 0x4c4   : > { %6523 = vmatpush.bf16.msrb.mxu2 %v14720_v58  ;;  %v14561_v58 = vld [vmem:[#allocation4 + $0x1578] sm:$0xf0]  ;;  %v14640_v56 = vor.u32 %v18154_v27, %v14639_v10  ;;  %v18194_v10 = vld [vmem:[#allocation4 + $0x1754] sm:$0xf0] }
 0x4c5   : > { %v14564_v12 = vor.u32 %v18132_v48, %v14561_v58  ;;  %v14657_v48 = vld [vmem:[#allocation4 + $0x1638] sm:$0xf0]  ;;  %v14784_v58 = vor.u32 %v18190_v32, %v14783_v37  ;;  %v14919_v37 = vld [vmem:[#allocation4 + $0x1840] sm:$0xf]  ;;  %v18225_v32 = vld [vmem:[#allocation4 + $0x184c] sm:$0xf0] }
 0x4c7   : > { %6550 = vmatpush.bf16.msra.mxu0 %v14452_v57  ;;  %6515 = vmatpush.bf16.msrb.mxu1 %v14512_v16  ;;  %v18180_v57 = vld [vmem:[#allocation4 + $0x16ec] sm:$0xf]  ;;  %v18210_v16 = vld [vmem:[#allocation4 + $0x17d4] sm:$0xf0] }
 0x4c8   : > { %6524 = vmatpush.bf16.msrb.mxu2 %v14704_v30  ;;  %v14756_v51 = vor.u32 %v18180_v57, %v14753_v18  ;;  %v18128_v30 = vld [vmem:[#allocation4 + $0x154c] sm:$0xf]  ;;  %v14864_v26 = vor.u32 %v18210_v16, %v14863_v21  ;;  %v18186_v18 = vld [vmem:[#allocation4 + $0x1714] sm:$0xf0] }
 0x4c9   : > { %v18208_v16 = vld [vmem:[#allocation4 + $0x17cc] sm:$0xf] }
 0x4ca   : > { %6477 = vmatmul.bf16.vlgmr.msra.gmra.mxu2 %v19641_v20  ;;  %6516 = vmatmul.bf16.vlgmr.msrb.gmra.mxu1 %v19631_v42 }
 0x4cb   : > { %6551 = vmatpush.bf16.msra.mxu0 %v14436_v19  ;;  %6560 = vmatpush.bf16.msra.mxu1 %v14628_v63  ;;  %v14545_v19 = vld [vmem:[#allocation4 + $0x1558] sm:$0xf0] }
 0x4cc   : > { %6525 = vmatpush.bf16.msrb.mxu2 %v14688_v34  ;;  %v14737_v63 = vld [vmem:[#allocation4 + $0x16d8] sm:$0xf0]  ;;  %v14548_v61 = vor.u32 %v18128_v30, %v14545_v19  ;;  %v18124_v34 = vld [vmem:[#allocation4 + $0x152c] sm:$0xf] }
 0x4cd   : > { %v14740_v3 = vor.u32 %v18176_v35, %v14737_v63  ;;  %v14865_v30 = vld [vmem:[#allocation4 + $0x17d8] sm:$0xf0]  ;;  %v18204_v35 = vld [vmem:[#allocation4 + $0x17ac] sm:$0xf] }
 0x4ce   : > { %v14868_v19 = vor.u32 %v18208_v16, %v14865_v30  ;;  %v14849_v63 = vld [vmem:[#allocation4 + $0x17b8] sm:$0xf0] }
 0x4cf   : > { %6552 = vmatpush.bf16.msra.mxu0 %v14420_v4  ;;  %6561 = vmatpush.bf16.msra.mxu1 %v14612_v39  ;;  %v14529_v4 = vld [vmem:[#allocation4 + $0x1538] sm:$0xf0] }
 0x4d0   : > { %6526 = vmatpush.bf16.msrb.mxu2 %v14672_v13  ;;  %v14721_v39 = vld [vmem:[#allocation4 + $0x16b8] sm:$0xf0] }
 0x4d1   : > { %v14724_v6 = vor.u32 %v18172_v23, %v14721_v39  ;;  %v14705_v13 = vld [vmem:[#allocation4 + $0x1698] sm:$0xf0] }
 0x4d2   : > { %v5591_v1 = vpop.f32.mrf.mxu3  ;;  %v14801_v23 = vld [vmem:[#allocation4 + $0x1758] sm:$0xf0] }
 0x4d3   : > { %v5592_v14 = vadd.f32 %v5591_v1, %v5579_v43  ;;  %6553 = vmatpush.bf16.msra.mxu0 %v14404_v40  ;;  %6562 = vmatpush.bf16.msra.mxu1 %v14596_v29  ;;  %v14832_v40 = vor.u32 %v18202_v5, %v14831_v41  ;;  %v14708_v29 = vor.u32 %v18168_v53, %v14705_v13  ;;  %v14689_v43 = vld [vmem:[#allocation4 + $0x1678] sm:$0xf0]  ;;  %v14799_v1 = vld [vmem:[#allocation4 + $0x1748] sm:$0xf]  ;;  %v18245_v41 = vld [vmem:[#allocation4 + $0x18ec] sm:$0xf0] }
 0x4d4   : > { %6527 = vmatpush.bf16.msrb.mxu2 %v14656_v9  ;;  %v14692_v54 = vor.u32 %v18164_v15, %v14689_v43  ;;  %v14673_v9 = vld [vmem:[#allocation4 + $0x1658] sm:$0xf0]  ;;  %v14772_v53 = vor.u32 %v18184_v24, %v14769_v0  ;;  %v14983_v13 = vld [vmem:[#allocation4 + $0x18c0] sm:$0xf]  ;;  %v18233_v43 = vld [vmem:[#allocation4 + $0x188c] sm:$0xf0] }
 0x4d5   : > { %vm5598_vm9 = vcmp.gt.f32.partialorder %v5592_v14, 0.0  ;;  %v5602_v38 = vmul.f32 0.2, %v5592_v14  ;;  %v14951_v15 = vld [vmem:[#allocation4 + $0x1880] sm:$0xf] }
 0x4d7   : > { %v5606_v62 = vsel %vm5598_vm9, %v5592_v14, %v5602_v38  ;;  %6554 = vmatpush.bf16.msra.mxu0 %v14388_v47  ;;  %6563 = vmatpush.bf16.msra.mxu1 %v14580_v50  ;;  %v18160_v14 = vld [vmem:[#allocation4 + $0x164c] sm:$0xf]  ;;  %v14800_v47 = vor.u32 %v18194_v10, %v14799_v1  ;;  %v14767_v38 = vld [vmem:[#allocation4 + $0x1708] sm:$0xf]  ;;  %v14935_v1 = vld [vmem:[#allocation4 + $0x1860] sm:$0xf] }
 0x4d8   : > { %v19652_v33 = vpack.c.bf16 %v5606_v62, %v5606_v62  ;;  %6528 = vmatpush.bf16.msrb.mxu2 %v14640_v56  ;;  %v14676_v27 = vor.u32 %v18160_v14, %v14673_v9  ;;  %v18156_v50 = vld [vmem:[#allocation4 + $0x162c] sm:$0xf]  ;;  %v14641_v56 = vld [vmem:[#allocation4 + $0x1618] sm:$0xf0]  ;;  %v18229_v10 = vld [vmem:[#allocation4 + $0x186c] sm:$0xf0] }
 0x4d9   : > { %v14660_v57 = vor.u32 %v18156_v50, %v14657_v48  ;;  %v18152_v62 = vld [vmem:[#allocation4 + $0x160c] sm:$0xf]  ;;  %v15127_v14 = vld [vmem:[#allocation4 + $0x19e0] sm:$0xf]  ;;  %v14936_v9 = vor.u32 %v18229_v10, %v14935_v1  ;;  %v18231_v1 = vld [vmem:[#allocation4 + $0x1884] sm:$0xf] }
 0x4da   : > { %v5593_v17 = vpop.f32.mrf.mxu3  ;;  %6438 = vmatmul.bf16.vlgmr.msrb.gmra.mxu3 %v19652_v33  ;;  %6555 = vmatmul.bf16.vlgmr.msra.gmra.mxu0 %v19622_v36  ;;  %v14532_v36 = vor.u32 %v18124_v34, %v14529_v4  ;;  %v14820_v34 = vor.u32 %v18196_v11, %v14817_v31  ;;  %v18192_v4 = vld [vmem:[#allocation4 + $0x174c] sm:$0xf]  ;;  %v15111_v50 = vld [vmem:[#allocation4 + $0x19c0] sm:$0xf]  ;;  %v18261_v11 = vld [vmem:[#allocation4 + $0x196c] sm:$0xf0] }
 0x4db   : > { %6534 = vmatpush.bf16.msrb.mxu3 %v14880_v52  ;;  %6564 = vmatpush.bf16.msra.mxu1 %v14564_v12  ;;  %v18212_v52 = vld [vmem:[#allocation4 + $0x17ec] sm:$0xf]  ;;  %v14881_v12 = vld [vmem:[#allocation4 + $0x17f8] sm:$0xf0]  ;;  %v14852_v17 = vor.u32 %v18204_v35, %v14849_v63  ;;  %v14804_v39 = vor.u32 %v18192_v4, %v14801_v23  ;;  %v18265_v35 = vld [vmem:[#allocation4 + $0x198c] sm:$0xf0] }
 0x4dc   : > { %6573 = vmatpush.bf16.msra.mxu2 %v14756_v51  ;;  %v14768_v51 = vor.u32 %v18186_v18, %v14767_v38  ;;  %v14884_v21 = vor.u32 %v18212_v52, %v14881_v12  ;;  %v14903_v38 = vld [vmem:[#allocation4 + $0x1820] sm:$0xf]  ;;  %v18221_v18 = vld [vmem:[#allocation4 + $0x182c] sm:$0xf0]  ;;  %v18243_v63 = vld [vmem:[#allocation4 + $0x18e4] sm:$0xf] }
 0x4dd   : > { %6529 = vmatmul.bf16.vlgmr.msrb.gmra.mxu2 %v19641_v20  ;;  %v18269_v52 = vld [vmem:[#allocation4 + $0x19ac] sm:$0xf0]  ;;  %v15255_v31 = vld [vmem:[#allocation4 + $0x1ae0] sm:$0xf]  ;;  %v18239_v4 = vld [vmem:[#allocation4 + $0x18c4] sm:$0xf] }
 0x4de   : > { %v14985_v23 = vld [vmem:[#allocation4 + $0x18d0] sm:$0xf0] }
 0x4df   : > { %6535 = vmatpush.bf16.msrb.mxu3 %v14864_v26  ;;  %6565 = vmatpush.bf16.msra.mxu1 %v14548_v61  ;;  %v18200_v26 = vld [vmem:[#allocation4 + $0x178c] sm:$0xf]  ;;  %v14833_v61 = vld [vmem:[#allocation4 + $0x1798] sm:$0xf0]  ;;  %v14953_v10 = vld [vmem:[#allocation4 + $0x1890] sm:$0xf0] }
 0x4e0   : > { %6574 = vmatpush.bf16.msra.mxu2 %v14740_v3  ;;  %v14836_v3 = vor.u32 %v18200_v26, %v14833_v61 }
 0x4e3   : > { %6536 = vmatpush.bf16.msrb.mxu3 %v14848_v49  ;;  %6566 = vmatpush.bf16.msra.mxu1 %v14532_v36  ;;  %v18188_v49 = vld [vmem:[#allocation4 + $0x172c] sm:$0xf]  ;;  %v14785_v36 = vld [vmem:[#allocation4 + $0x1738] sm:$0xf0] }
 0x4e4   : > { %6575 = vmatpush.bf16.msra.mxu2 %v14724_v6  ;;  %v14999_v6 = vld [vmem:[#allocation4 + $0x18e0] sm:$0xf] }
 0x4e5   : > { %v15000_v5 = vor.u32 %v18245_v41, %v14999_v6  ;;  %v15047_v6 = vld [vmem:[#allocation4 + $0x1940] sm:$0xf]  ;;  %v18257_v41 = vld [vmem:[#allocation4 + $0x194c] sm:$0xf0] }
 0x4e6   : > { %v15048_v0 = vor.u32 %v18257_v41, %v15047_v6  ;;  %v15097_v6 = vld [vmem:[#allocation4 + $0x19b0] sm:$0xf0] }
 0x4e7   : > { %6537 = vmatpush.bf16.msrb.mxu3 %v14832_v40  ;;  %6567 = vmatpush.bf16.msra.mxu1 %v14516_v7  ;;  %v18241_v40 = vld [vmem:[#allocation4 + $0x18cc] sm:$0xf0] }
 0x4e8   : > { %6576 = vmatpush.bf16.msra.mxu2 %v14708_v29  ;;  %7403 = vmatpush.bf16.msrb.mxu0 %v15000_v5  ;;  %v14984_v7 = vor.u32 %v18241_v40, %v14983_v13  ;;  %v14967_v29 = vld [vmem:[#allocation4 + $0x18a0] sm:$0xf]  ;;  %v18235_v13 = vld [vmem:[#allocation4 + $0x18a4] sm:$0xf]  ;;  %v14969_v40 = vld [vmem:[#allocation4 + $0x18b0] sm:$0xf0] }
 0x4e9   : > { %v14968_v44 = vor.u32 %v18237_v28, %v14967_v29  ;;  %v14972_v29 = vor.u32 %v18235_v13, %v14969_v40  ;;  %v15031_v28 = vld [vmem:[#allocation4 + $0x1920] sm:$0xf]  ;;  %v18263_v13 = vld [vmem:[#allocation4 + $0x1984] sm:$0xf] }
 0x4ea   : > { %6490 = vmatmul.bf16.vlgmr.msra.gmra.mxu3 %v19652_v33  ;;  %6568 = vmatmul.bf16.vlgmr.msra.gmra.mxu1 %v19631_v42  ;;  %v14644_v42 = vor.u32 %v18152_v62, %v14641_v56  ;;  %v15095_v62 = vld [vmem:[#allocation4 + $0x19a0] sm:$0xf]  ;;  %v14904_v56 = vor.u32 %v18221_v18, %v14903_v38  ;;  %v18275_v18 = vld [vmem:[#allocation4 + $0x19e4] sm:$0xf] }
 0x4eb   : > { %6538 = vmatpush.bf16.msrb.mxu3 %v14816_v2  ;;  %v15096_v12 = vor.u32 %v18269_v52, %v15095_v62  ;;  %v15129_v62 = vld [vmem:[#allocation4 + $0x19f0] sm:$0xf0] }
 0x4ec   : > { %6577 = vmatpush.bf16.msra.mxu2 %v14692_v54  ;;  %7404 = vmatpush.bf16.msrb.mxu0 %v14984_v7  ;;  %v14952_v54 = vor.u32 %v18233_v43, %v14951_v15  ;;  %v15223_v15 = vld [vmem:[#allocation4 + $0x1aa0] sm:$0xf]  ;;  %v15132_v52 = vor.u32 %v18275_v18, %v15129_v62  ;;  %v15049_v18 = vld [vmem:[#allocation4 + $0x1950] sm:$0xf0]  ;;  %v18303_v62 = vld [vmem:[#allocation4 + $0x1ac4] sm:$0xf] }
 0x4ef   : > { %6539 = vmatpush.bf16.msrb.mxu3 %v14800_v47  ;;  %v18277_v47 = vld [vmem:[#allocation4 + $0x19ec] sm:$0xf0] }
 0x4f0   : > { %6578 = vmatpush.bf16.msra.mxu2 %v14676_v27  ;;  %7405 = vmatpush.bf16.msrb.mxu0 %v14968_v44  ;;  %v15128_v27 = vor.u32 %v18277_v47, %v15127_v14  ;;  %v18253_v44 = vld [vmem:[#allocation4 + $0x192c] sm:$0xf0]  ;;  %v15015_v47 = vld [vmem:[#allocation4 + $0x1900] sm:$0xf] }
 0x4f1   : > { %v15032_v43 = vor.u32 %v18253_v44, %v15031_v28  ;;  %v15143_v44 = vld [vmem:[#allocation4 + $0x1a00] sm:$0xf] }
 0x4f2   : > { %7416 = vmatpush.bf16.msrb.mxu1 %v15128_v27  ;;  %v18249_v27 = vld [vmem:[#allocation4 + $0x190c] sm:$0xf0] }
 0x4f3   : > { %6540 = vmatpush.bf16.msrb.mxu3 %v14784_v58  ;;  %v18273_v58 = vld [vmem:[#allocation4 + $0x19cc] sm:$0xf0] }
 0x4f4   : > { %6579 = vmatpush.bf16.msra.mxu2 %v14660_v57  ;;  %7406 = vmatpush.bf16.msrb.mxu0 %v14952_v54  ;;  %v15112_v57 = vor.u32 %v18273_v58, %v15111_v50  ;;  %v18301_v54 = vld [vmem:[#allocation4 + $0x1aac] sm:$0xf0] }
 0x4f5   : > { %v15224_v14 = vor.u32 %v18301_v54, %v15223_v15  ;;  %v18297_v50 = vld [vmem:[#allocation4 + $0x1a8c] sm:$0xf0] }
 0x4f6   : > { %7417 = vmatpush.bf16.msrb.mxu1 %v15112_v57  ;;  %v18281_v15 = vld [vmem:[#allocation4 + $0x1a0c] sm:$0xf0] }
 0x4f7   : > { %6541 = vmatpush.bf16.msrb.mxu3 %v14768_v51  ;;  %v14887_v51 = vld [vmem:[#allocation4 + $0x1800] sm:$0xf] }
 0x4f8   : > { %6580 = vmatpush.bf16.msra.mxu2 %v14644_v42  ;;  %7407 = vmatpush.bf16.msrb.mxu0 %v14936_v9  ;;  %v18217_v42 = vld [vmem:[#allocation4 + $0x180c] sm:$0xf0]  ;;  %v14956_v9 = vor.u32 %v18231_v1, %v14953_v10  ;;  %v15144_v1 = vor.u32 %v18281_v15, %v15143_v44  ;;  %v18291_v15 = vld [vmem:[#allocation4 + $0x1a64] sm:$0xf] }
 0x4f9   : > { %v18341_v10 = vld [vmem:[#allocation4 + $0x1bec] sm:$0xf0] }
 0x4fa   : > { %6542 = vmatmul.bf16.vlgmr.msrb.gmra.mxu3 %v19652_v33  ;;  %7418 = vmatpush.bf16.msrb.mxu1 %v15096_v12  ;;  %v15191_v12 = vld [vmem:[#allocation4 + $0x1a60] sm:$0xf] }
 0x4fb   : > { %6586 = vmatpush.bf16.msra.mxu3 %v14884_v21  ;;  %6581 = vmatmul.bf16.vlgmr.msra.gmra.mxu2 %v19641_v20  ;;  %v14788_v20 = vor.u32 %v18188_v49, %v14785_v36  ;;  %v15079_v21 = vld [vmem:[#allocation4 + $0x1980] sm:$0xf]  ;;  %v14988_v36 = vor.u32 %v18239_v4, %v14985_v23  ;;  %v18219_v4 = vld [vmem:[#allocation4 + $0x1824] sm:$0xf]  ;;  %v14905_v23 = vld [vmem:[#allocation4 + $0x1830] sm:$0xf0] }
 0x4fc   : > { %v15080_v26 = vor.u32 %v18265_v35, %v15079_v21  ;;  %v18223_v21 = vld [vmem:[#allocation4 + $0x1844] sm:$0xf] }
 0x4fd   : > { %v18271_v35 = vld [vmem:[#allocation4 + $0x19c4] sm:$0xf] }
 0x4fe   : > { %7419 = vmatpush.bf16.msrb.mxu1 %v15080_v26 }
 0x4ff   : > { %6587 = vmatpush.bf16.msra.mxu3 %v14868_v19  ;;  %v14888_v19 = vor.u32 %v18217_v42, %v14887_v51  ;;  %v18293_v51 = vld [vmem:[#allocation4 + $0x1a6c] sm:$0xf0] }
 0x500   : > { %v15192_v42 = vor.u32 %v18293_v51, %v15191_v12  ;;  %v15241_v12 = vld [vmem:[#allocation4 + $0x1ad0] sm:$0xf0] }
 0x501   : > { %v19676_v51 = vld [vmem:[#allocation10 + $0x5] ss:$8 sm:$0xf] }
 0x503   : > { %6588 = vmatpush.bf16.msra.mxu3 %v14852_v17  ;;  %v15001_v17 = vld [vmem:[#allocation4 + $0x18f0] sm:$0xf0] }
 0x504   : > { %v15004_v61 = vor.u32 %v18243_v63, %v15001_v17  ;;  %v15113_v17 = vld [vmem:[#allocation4 + $0x19d0] sm:$0xf0] }
 0x507   : > { %6589 = vmatpush.bf16.msra.mxu3 %v14836_v3  ;;  %v15063_v3 = vld [vmem:[#allocation4 + $0x1960] sm:$0xf] }
 0x50b   : > { %6590 = vmatpush.bf16.msra.mxu3 %v14820_v34  ;;  %v18309_v34 = vld [vmem:[#allocation4 + $0x1aec] sm:$0xf0] }
 0x50c   : > { %v15256_v49 = vor.u32 %v18309_v34, %v15255_v31 }
 0x50e   : > { %7429 = vmatpush.bf16.msrb.mxu2 %v15256_v49 }
 0x50f   : > { %6591 = vmatpush.bf16.msra.mxu3 %v14804_v39  ;;  %v15064_v39 = vor.u32 %v18261_v11, %v15063_v3  ;;  %v15175_v3 = vld [vmem:[#allocation4 + $0x1a40] sm:$0xf]  ;;  %v18289_v11 = vld [vmem:[#allocation4 + $0x1a4c] sm:$0xf0] }
 0x510   : > { %v15176_v34 = vor.u32 %v18289_v11, %v15175_v3  ;;  %v15033_v3 = vld [vmem:[#allocation4 + $0x1930] sm:$0xf0]  ;;  %v18299_v11 = vld [vmem:[#allocation4 + $0x1aa4] sm:$0xf] }
 0x511   : > { %7420 = vmatpush.bf16.msrb.mxu1 %v15064_v39  ;;  %v18267_v39 = vld [vmem:[#allocation4 + $0x19a4] sm:$0xf] }
 0x512   : > { %v15100_v41 = vor.u32 %v18267_v39, %v15097_v6  ;;  %v15335_v39 = vld [vmem:[#allocation4 + $0x1b80] sm:$0xf]  ;;  %v18247_v6 = vld [vmem:[#allocation4 + $0x1904] sm:$0xf] }
 0x513   : > { %6592 = vmatpush.bf16.msra.mxu3 %v14788_v20  ;;  %v15239_v20 = vld [vmem:[#allocation4 + $0x1ac0] sm:$0xf] }
 0x515   : > { %7421 = vmatpush.bf16.msrb.mxu1 %v15048_v0  ;;  %v18215_v0 = vld [vmem:[#allocation4 + $0x1804] sm:$0xf] }
 0x517   : > { %6593 = vmatpush.bf16.msra.mxu3 %v14772_v53  ;;  %v19662_v2 = vpop.f32.mrf.mxu0  ;;  %v18305_v53 = vld [vmem:[#allocation4 + $0x1acc] sm:$0xf0] }
 0x518   : > { %v15240_v7 = vor.u32 %v18305_v53, %v15239_v20  ;;  %v15159_v20 = vld [vmem:[#allocation4 + $0x1a20] sm:$0xf]  ;;  %v14889_v53 = vld [vmem:[#allocation4 + $0x1810] sm:$0xf0] }
 0x519   : > { %7422 = vmatpush.bf16.msrb.mxu1 %v15032_v43  ;;  %v14892_v40 = vor.u32 %v18215_v0, %v14889_v53  ;;  %v15383_v43 = vld [vmem:[#allocation4 + $0x1be0] sm:$0xf]  ;;  %v15209_v0 = vld [vmem:[#allocation4 + $0x1a90] sm:$0xf0] }
 0x51a   : > { %6594 = vmatmul.bf16.vlgmr.msra.gmra.mxu3 %v19652_v33  ;;  %v14920_v33 = vor.u32 %v18225_v32, %v14919_v37  ;;  %7430 = vmatpush.bf16.msrb.mxu2 %v15240_v7  ;;  %v15207_v37 = vld [vmem:[#allocation4 + $0x1a80] sm:$0xf]  ;;  %v15016_v32 = vor.u32 %v18249_v27, %v15015_v47  ;;  %v15081_v7 = vld [vmem:[#allocation4 + $0x1990] sm:$0xf0]  ;;  %v15384_v47 = vor.u32 %v18341_v10, %v15383_v43 }
 0x51b   : > { %v15208_v57 = vor.u32 %v18297_v50, %v15207_v37  ;;  %v15084_v28 = vor.u32 %v18263_v13, %v15081_v7  ;;  %v18307_v37 = vld [vmem:[#allocation4 + $0x1ae4] sm:$0xf]  ;;  %v15319_v7 = vld [vmem:[#allocation4 + $0x1b60] sm:$0xf]  ;;  %v15193_v43 = vld [vmem:[#allocation4 + $0x1a70] sm:$0xf0] }
 0x51c   : > { %7408 = vmatpush.bf16.msrb.mxu0 %v14920_v33  ;;  %v14937_v33 = vld [vmem:[#allocation4 + $0x1870] sm:$0xf0]  ;;  %7442 = vmatpush.bf16.msrb.mxu3 %v15384_v47  ;;  %v18321_v47 = vld [vmem:[#allocation4 + $0x1b4c] sm:$0xf0] }
 0x51d   : > { %7423 = vmatpush.bf16.msrb.mxu1 %v15016_v32  ;;  %v15257_v32 = vld [vmem:[#allocation4 + $0x1af0] sm:$0xf0] }
 0x51e   : > { %7431 = vmatpush.bf16.msrb.mxu2 %v15224_v14  ;;  %v18259_v14 = vld [vmem:[#allocation4 + $0x1964] sm:$0xf]  ;;  %v15260_v50 = vor.u32 %v18307_v37, %v15257_v32  ;;  %v15177_v32 = vld [vmem:[#allocation4 + $0x1a50] sm:$0xf0] }
 0x51f   : > { %v6402_v48 = vpop.f32.mrf.mxu0  ;;  %v18287_v37 = vld [vmem:[#allocation4 + $0x1a44] sm:$0xf] }
 0x520   : > { %7409 = vmatpush.bf16.msrb.mxu0 %v14904_v56  ;;  %v18227_v48 = vld [vmem:[#allocation4 + $0x1864] sm:$0xf] }
 0x521   : > { %v14940_v38 = vor.u32 %v18227_v48, %v14937_v33  ;;  %7468 = vmatpush.bf16.msra.mxu1 %v15132_v52  ;;  %v15367_v48 = vld [vmem:[#allocation4 + $0x1bc0] sm:$0xf]  ;;  %v18337_v33 = vld [vmem:[#allocation4 + $0x1bcc] sm:$0xf0] }
 0x522   : > { %7432 = vmatpush.bf16.msrb.mxu2 %v15208_v57  ;;  %v15368_v57 = vor.u32 %v18337_v33, %v15367_v48  ;;  %v15180_v48 = vor.u32 %v18287_v37, %v15177_v32 }
 0x524   : > { %7410 = vmatpush.bf16.msrb.mxu0 %v14888_v19  ;;  %v14921_v19 = vld [vmem:[#allocation4 + $0x1850] sm:$0xf0]  ;;  %7443 = vmatpush.bf16.msrb.mxu3 %v15368_v57  ;;  %v15287_v57 = vld [vmem:[#allocation4 + $0x1b20] sm:$0xf] }
 0x525   : > { %v14924_v63 = vor.u32 %v18223_v21, %v14921_v19  ;;  %v15244_v21 = vor.u32 %v18303_v62, %v15241_v12  ;;  %v15351_v19 = vld [vmem:[#allocation4 + $0x1ba0] sm:$0xf]  ;;  %v18283_v62 = vld [vmem:[#allocation4 + $0x1a24] sm:$0xf] }
 0x526   : > { %7433 = vmatpush.bf16.msrb.mxu2 %v15192_v42 }
 0x527   : > { %v19664_v16 = vpop.f32.mrf.mxu1  ;;  %v19666_v30 = vpop.f32.mrf.mxu0 }
 0x528   : > { %7455 = vmatpush.bf16.msra.mxu0 %v15004_v61  ;;  %v15116_v61 = vor.u32 %v18271_v35, %v15113_v17  ;;  %v18333_v35 = vld [vmem:[#allocation4 + $0x1bac] sm:$0xf0] }
 0x529   : > { %v15352_v17 = vor.u32 %v18333_v35, %v15351_v19  ;;  %v18246_v19 = vld [vmem:[#allocation4 + $0x18f4] sm:$0xf0] }
 0x52a   : > { %7469 = vmatpush.bf16.msra.mxu1 %v15116_v61  ;;  %7434 = vmatpush.bf16.msrb.mxu2 %v15176_v34  ;;  %v18251_v61 = vld [vmem:[#allocation4 + $0x1924] sm:$0xf]  ;;  %v15225_v34 = vld [vmem:[#allocation4 + $0x1ab0] sm:$0xf0] }
 0x52b   : > { %7444 = vmatpush.bf16.msrb.mxu3 %v15352_v17 }
 0x52c   : > { %7456 = vmatpush.bf16.msra.mxu0 %v14988_v36  ;;  %v14908_v36 = vor.u32 %v18219_v4, %v14905_v23  ;;  %v5743_v4 = vperm.slane %v19676_v51, 0  ;;  %v15228_v23 = vor.u32 %v18299_v11, %v15225_v34  ;;  %v18313_v11 = vld [vmem:[#allocation4 + $0x1b0c] sm:$0xf0] }
 0x52e   : > { %7470 = vmatpush.bf16.msra.mxu1 %v15100_v41  ;;  %v15017_v41 = vld [vmem:[#allocation4 + $0x1910] sm:$0xf0]  ;;  %v6401_v53 = vadd.f32 %v19662_v2, %v5743_v4  ;;  %v18279_v4 = vld [vmem:[#allocation4 + $0x1a04] sm:$0xf] }
 0x52f   : > { %v6415_v5 = vpop.f32.mrf.mxu1  ;;  %v6454_v24 = vpop.f32.mrf.mxu0 }
 0x530   : > { %7457 = vmatpush.bf16.msra.mxu0 %v14972_v29  ;;  %v18285_v5 = vld [vmem:[#allocation4 + $0x1a2c] sm:$0xf0] }
 0x531   : > { %v15160_v24 = vor.u32 %v18285_v5, %v15159_v20  ;;  %v18295_v20 = vld [vmem:[#allocation4 + $0x1a84] sm:$0xf] }
 0x532   : > { %7471 = vmatpush.bf16.msra.mxu1 %v15084_v28  ;;  %v6414_v28 = vadd.f32 %v19664_v16, %v6401_v53 }
 0x533   : > { %7435 = vmatpush.bf16.msrb.mxu2 %v15160_v24  ;;  %v15020_v24 = vor.u32 %v18247_v6, %v15017_v41  ;;  %v15385_v41 = vld [vmem:[#allocation4 + $0x1bf0] sm:$0xf0] }
 0x534   : > { %7458 = vmatpush.bf16.msra.mxu0 %v14956_v9  ;;  %v15065_v9 = vld [vmem:[#allocation4 + $0x1970] sm:$0xf0] }
 0x535   : > { %v15068_v27 = vor.u32 %v18259_v14, %v15065_v9  ;;  %v15303_v9 = vld [vmem:[#allocation4 + $0x1b40] sm:$0xf] }
 0x537   : > { %v19668_v58 = vpop.f32.mrf.mxu1  ;;  %7436 = vmatpush.bf16.msrb.mxu2 %v15144_v1  ;;  %7472 = vmatpush.bf16.msra.mxu1 %v15068_v27  ;;  %v15196_v1 = vor.u32 %v18291_v15, %v15193_v43  ;;  %v15304_v27 = vor.u32 %v18321_v47, %v15303_v9  ;;  %v18234_v9 = vld [vmem:[#allocation4 + $0x1894] sm:$0xf0]  ;;  %v18331_v47 = vld [vmem:[#allocation4 + $0x1ba4] sm:$0xf] }
 0x538   : > { %7459 = vmatpush.bf16.msra.mxu0 %v14940_v38  ;;  %v18255_v38 = vld [vmem:[#allocation4 + $0x1944] sm:$0xf] }
 0x539   : > { %v19670_v56 = vpop.f32.mrf.mxu0  ;;  %v15052_v52 = vor.u32 %v18255_v38, %v15049_v18  ;;  %v18317_v38 = vld [vmem:[#allocation4 + $0x1b2c] sm:$0xf0] }
 0x53b   : > { %7481 = vmatpush.bf16.msra.mxu2 %v15260_v50  ;;  %7473 = vmatpush.bf16.msra.mxu1 %v15052_v52  ;;  %v15161_v52 = vld [vmem:[#allocation4 + $0x1a30] sm:$0xf0] }
 0x53c   : > { %7460 = vmatpush.bf16.msra.mxu0 %v14924_v63  ;;  %v15164_v35 = vor.u32 %v18283_v62, %v15161_v52  ;;  %v5745_v62 = vperm.slane %v19676_v51, 2 }
 0x53d   : > { %v19672_v26 = vpop.f32.mrf.mxu2 }
 0x53e   : > { %v6427_v10 = vadd.f32 %v19672_v26, %v6414_v28  ;;  %v15288_v26 = vor.u32 %v18317_v38, %v15287_v57  ;;  %v18335_v28 = vld [vmem:[#allocation4 + $0x1bc4] sm:$0xf]  ;;  %v18278_v38 = vld [vmem:[#allocation4 + $0x19f4] sm:$0xf0] }
 0x53f   : > { %v6467_v31 = vpop.f32.mrf.mxu1  ;;  %7482 = vmatpush.bf16.msra.mxu2 %v15244_v21  ;;  %v15007_v21 = vld [vmem:[#allocation4 + $0x18e8] sm:$0xf] }
 0x540   : > { %7461 = vmatpush.bf16.msra.mxu0 %v14908_v36  ;;  %v15036_v31 = vor.u32 %v18251_v61, %v15033_v3  ;;  %v15271_v3 = vld [vmem:[#allocation4 + $0x1b00] sm:$0xf] }
 0x541   : > { %v6506_v49 = vpop.f32.mrf.mxu0  ;;  %v15272_v34 = vor.u32 %v18313_v11, %v15271_v3  ;;  %v15119_v3 = vld [vmem:[#allocation4 + $0x19c8] sm:$0xf] }
 0x542   : > { %v18329_v49 = vld [vmem:[#allocation4 + $0x1b8c] sm:$0xf0]  ;;  %7474 = vmatpush.bf16.msra.mxu1 %v15036_v31  ;;  %v15008_v31 = vor.u32 %v18246_v19, %v15007_v21 }
 0x543   : > { %7483 = vmatpush.bf16.msra.mxu2 %v15228_v23  ;;  %v15336_v36 = vor.u32 %v18329_v49, %v15335_v39  ;;  %v15145_v23 = vld [vmem:[#allocation4 + $0x1a10] sm:$0xf0]  ;;  %v18339_v39 = vld [vmem:[#allocation4 + $0x1be4] sm:$0xf]  ;;  %v14991_v49 = vld [vmem:[#allocation4 + $0x18c8] sm:$0xf] }
 0x544   : > { %7462 = vmatpush.bf16.msra.mxu0 %v14892_v40  ;;  %v15212_v40 = vor.u32 %v18295_v20, %v15209_v0  ;;  %v15148_v6 = vor.u32 %v18279_v4, %v15145_v23  ;;  %v15388_v0 = vor.u32 %v18339_v39, %v15385_v41  ;;  %v6505_v4 = vadd.f32 %v19670_v56, %v5745_v62  ;;  %v18222_v41 = vld [vmem:[#allocation4 + $0x1834] sm:$0xf0]  ;;  %v14993_v62 = vld [vmem:[#allocation4 + $0x18d8] sm:$0xf0] }
 0x545   : > { %v6428_v29 = vpop.f32.mrf.mxu2  ;;  %7445 = vmatpush.bf16.msrb.mxu3 %v15336_v36  ;;  %v18242_v36 = vld [vmem:[#allocation4 + $0x18d4] sm:$0xf0] }
 0x546   : > { %v18325_v29 = vld [vmem:[#allocation4 + $0x1b6c] sm:$0xf0]  ;;  %7475 = vmatpush.bf16.msra.mxu1 %v15020_v24 }
 0x547   : > { %v19674_v54 = vpop.f32.mrf.mxu1  ;;  %7484 = vmatpush.bf16.msra.mxu2 %v15212_v40  ;;  %v15320_v44 = vor.u32 %v18325_v29, %v15319_v7  ;;  %v14992_v40 = vor.u32 %v18242_v36, %v14991_v49  ;;  %v14975_v7 = vld [vmem:[#allocation4 + $0x18a8] sm:$0xf]  ;;  %v18238_v29 = vld [vmem:[#allocation4 + $0x18b4] sm:$0xf0] }
 0x548   : > { %v6518_v39 = vadd.f32 %v19674_v54, %v6505_v4  ;;  %v18306_v4 = vld [vmem:[#allocation4 + $0x1ad4] sm:$0xf0] }
 0x549   : > { %7446 = vmatpush.bf16.msrb.mxu3 %v15320_v44  ;;  %v15369_v44 = vld [vmem:[#allocation4 + $0x1bd0] sm:$0xf0] }
 0x54b   : > { %7485 = vmatpush.bf16.msra.mxu2 %v15196_v1 }
 0x54d   : > { %v19678_v42 = vpop.f32.mrf.mxu2  ;;  %7447 = vmatpush.bf16.msrb.mxu3 %v15304_v27 }
 0x54f   : > { %v6519_v63 = vpop.f32.mrf.mxu1  ;;  %7486 = vmatpush.bf16.msra.mxu2 %v15180_v48  ;;  %v14943_v48 = vld [vmem:[#allocation4 + $0x1868] sm:$0xf] }
 0x550   : > { %v5744_v63 = vperm.slane %v19676_v51, 1 }
 0x551   : > { %7448 = vmatpush.bf16.msrb.mxu3 %v15288_v26  ;;  %v15337_v26 = vld [vmem:[#allocation4 + $0x1b90] sm:$0xf0] }
 0x552   : > { %v6453_v20 = vadd.f32 %v19666_v30, %v5744_v63  ;;  %v15372_v30 = vor.u32 %v18335_v28, %v15369_v44  ;;  %v14927_v63 = vld [vmem:[#allocation4 + $0x1848] sm:$0xf] }
 0x553   : > { %7487 = vmatpush.bf16.msra.mxu2 %v15164_v35 }
 0x555   : > { %v6480_v13 = vpop.f32.mrf.mxu2  ;;  %7449 = vmatpush.bf16.msrb.mxu3 %v15272_v34  ;;  %v15321_v34 = vld [vmem:[#allocation4 + $0x1b70] sm:$0xf0] }
 0x556   : > { %v6466_v13 = vadd.f32 %v19668_v58, %v6453_v20  ;;  %v15353_v58 = vld [vmem:[#allocation4 + $0x1bb0] sm:$0xf0]  ;;  %v15103_v20 = vld [vmem:[#allocation4 + $0x19a8] sm:$0xf] }
 0x557   : > { %v19681_v5 = vpop.f32.mrf.mxu0  ;;  %7488 = vmatpush.bf16.msra.mxu2 %v15148_v6  ;;  %v15356_v37 = vor.u32 %v18331_v47, %v15353_v58  ;;  %v14911_v6 = vld [vmem:[#allocation4 + $0x1828] sm:$0xf] }
 0x558   : > { %v6479_v15 = vadd.f32 %v19678_v42, %v6466_v13  ;;  %v15135_v42 = vld [vmem:[#allocation4 + $0x19e8] sm:$0xf]  ;;  %v15305_v13 = vld [vmem:[#allocation4 + $0x1b50] sm:$0xf0]  ;;  %v14912_v54 = vor.u32 %v18222_v41, %v14911_v6 }
 0x559   : > { %7494 = vmatpush.bf16.msra.mxu3 %v15388_v0  ;;  %v15136_v35 = vor.u32 %v18278_v38, %v15135_v42  ;;  %v18270_v0 = vld [vmem:[#allocation4 + $0x19b4] sm:$0xf0]  ;;  %v15263_v42 = vld [vmem:[#allocation4 + $0x1ae8] sm:$0xf]  ;;  %v15273_v38 = vld [vmem:[#allocation4 + $0x1b10] sm:$0xf0] }
 0x55a   : > { %v15039_v41 = vld [vmem:[#allocation4 + $0x1928] sm:$0xf] }
 0x55d   : > { %v6439_v14 = vpop.f32.mrf.mxu3  ;;  %7495 = vmatpush.bf16.msra.mxu3 %v15372_v30  ;;  %v18218_v30 = vld [vmem:[#allocation4 + $0x1814] sm:$0xf0] }
 0x55e   : > { %v6440_v2 = vadd.f32 %v6439_v14, %v6427_v10  ;;  %v14976_v10 = vor.u32 %v18238_v29, %v14975_v7  ;;  %v14959_v14 = vld [vmem:[#allocation4 + $0x1888] sm:$0xf] }
 0x55f   : > { %v6558_v50 = vpop.f32.mrf.mxu0  ;;  %v14895_v29 = vld [vmem:[#allocation4 + $0x1808] sm:$0xf] }
 0x560   : > { %vm6599_vm10 = vcmp.gt.f32.partialorder %v6440_v2, 0.0  ;;  %v6603_v16 = vmul.f32 0.2, %v6440_v2  ;;  %v19686_v33 = vpop.f32.mrf.mxu2  ;;  %v14960_v50 = vor.u32 %v18234_v9, %v14959_v14  ;;  %v18315_v14 = vld [vmem:[#allocation4 + $0x1b24] sm:$0xf] }
 0x561   : > { %7496 = vmatpush.bf16.msra.mxu3 %v15356_v37  ;;  %v6531_v56 = vadd.f32 %v19686_v33, %v6518_v39  ;;  %v15289_v9 = vld [vmem:[#allocation4 + $0x1b30] sm:$0xf0]  ;;  %v15009_v33 = vld [vmem:[#allocation4 + $0x18f8] sm:$0xf0] }
 0x562   : > { %v6607_v18 = vsel %vm6599_vm10, %v6440_v2, %v6603_v16  ;;  %v18230_v16 = vld [vmem:[#allocation4 + $0x1874] sm:$0xf0]  ;;  %v15292_v58 = vor.u32 %v18315_v14, %v15289_v9  ;;  %v14977_v39 = vld [vmem:[#allocation4 + $0x18b8] sm:$0xf0]  ;;  %v18276_v14 = vld [vmem:[#allocation4 + $0x19ec] sm:$0xf] }
 0x563   : > { %v6611_v12 = vadd.f32 %v6607_v18, %v19472_v8  ;;  %v18327_v18 = vld [vmem:[#allocation4 + $0x1b84] sm:$0xf]  ;;  %v14944_v19 = vor.u32 %v18230_v16, %v14943_v48  ;;  %v15137_v9 = vld [vmem:[#allocation4 + $0x19f8] sm:$0xf0] }
 0x564   : > { %v15340_v52 = vor.u32 %v18327_v18, %v15337_v26  ;;  %v18310_v18 = vld [vmem:[#allocation4 + $0x1af4] sm:$0xf0]  ;;  %v18240_v26 = vld [vmem:[#allocation4 + $0x18cc] sm:$0xf] }
 0x565   : > { %v19690_v17 = vmul.f32 0.70710677, %v6611_v12  ;;  %v6441_v61 = vpop.f32.mrf.mxu3 }
 0x566   : > { %v18226_v61 = vld [vmem:[#allocation4 + $0x1854] sm:$0xf0]  ;;  %7497 = vmatpush.bf16.msra.mxu3 %v15340_v52 }
 0x567   : > { %v19694_v8 = vpack.c.bf16 %v19690_v17, %v19690_v17  ;;  %v19697_v24 = vpop.f32.mrf.mxu1  ;;  %v14928_v49 = vor.u32 %v18226_v61, %v14927_v63 }
 0x568   : > { %v6532_v53 = vpop.f32.mrf.mxu2 }
 0x569   : > { %7411 = vmatmul.bf16.vlgmr.msrb.gmra.mxu0 %v19694_v8  ;;  %v18319_v53 = vld [vmem:[#allocation4 + $0x1b44] sm:$0xf] }
 0x56a   : > { %7507 = vmatpush.bf16.msrb.mxu0 %v15008_v31  ;;  %v18323_v31 = vld [vmem:[#allocation4 + $0x1b64] sm:$0xf] }
 0x56b   : > { %v15324_v23 = vor.u32 %v18323_v31, %v15321_v34  ;;  %v18258_v31 = vld [vmem:[#allocation4 + $0x1954] sm:$0xf0]  ;;  %v15247_v34 = vld [vmem:[#allocation4 + $0x1ac8] sm:$0xf] }
 0x56d   : > { %v6491_v43 = vpop.f32.mrf.mxu3  ;;  %7498 = vmatpush.bf16.msra.mxu3 %v15324_v23  ;;  %v18236_v23 = vld [vmem:[#allocation4 + $0x18ac] sm:$0xf] }
 0x56e   : > { %v6492_v1 = vadd.f32 %v6491_v43, %v6479_v15  ;;  %7508 = vmatpush.bf16.msrb.mxu0 %v14992_v40  ;;  %v15308_v40 = vor.u32 %v18319_v53, %v15305_v13  ;;  %v15104_v15 = vor.u32 %v18270_v0, %v15103_v20  ;;  %v15087_v43 = vld [vmem:[#allocation4 + $0x1988] sm:$0xf]  ;;  %v14980_v6 = vor.u32 %v18236_v23, %v14977_v39  ;;  %v18254_v20 = vld [vmem:[#allocation4 + $0x1934] sm:$0xf0]  ;;  %v18232_v13 = vld [vmem:[#allocation4 + $0x188c] sm:$0xf] }
 0x56f   : > { %v6571_v27 = vpop.f32.mrf.mxu1  ;;  %v15231_v0 = vld [vmem:[#allocation4 + $0x1aa8] sm:$0xf]  ;;  %v18302_v53 = vld [vmem:[#allocation4 + $0x1ab4] sm:$0xf0]  ;;  %v18216_v23 = vld [vmem:[#allocation4 + $0x180c] sm:$0xf] }
 0x570   : > { %vm6600_vm11 = vcmp.gt.f32.partialorder %v6492_v1, 0.0  ;;  %v6604_v2 = vmul.f32 0.2, %v6492_v1  ;;  %v14896_v27 = vor.u32 %v18218_v30, %v14895_v29  ;;  %v18298_v30 = vld [vmem:[#allocation4 + $0x1a94] sm:$0xf0] }
 0x571   : > { %7499 = vmatpush.bf16.msra.mxu3 %v15308_v40  ;;  %v15040_v40 = vor.u32 %v18254_v20, %v15039_v41  ;;  %v14897_v39 = vld [vmem:[#allocation4 + $0x1818] sm:$0xf0] }
 0x572   : > { %v6608_v32 = vsel %vm6600_vm11, %v6492_v1, %v6604_v2  ;;  %7509 = vmatpush.bf16.msrb.mxu0 %v14976_v10  ;;  %v18266_v1 = vld [vmem:[#allocation4 + $0x1994] sm:$0xf0]  ;;  %v18244_v10 = vld [vmem:[#allocation4 + $0x18ec] sm:$0xf]  ;;  %v14900_v20 = vor.u32 %v18216_v23, %v14897_v39  ;;  %v15201_v23 = vld [vmem:[#allocation4 + $0x1a78] sm:$0xf0] }
 0x573   : > { %v6612_v57 = vadd.f32 %v6608_v32, %v19486_v55  ;;  %v18274_v55 = vld [vmem:[#allocation4 + $0x19d4] sm:$0xf0]  ;;  %v15088_v37 = vor.u32 %v18266_v1, %v15087_v43  ;;  %v15071_v32 = vld [vmem:[#allocation4 + $0x1968] sm:$0xf]  ;;  %v15012_v16 = vor.u32 %v18244_v10, %v15009_v33  ;;  %v18228_v43 = vld [vmem:[#allocation4 + $0x186c] sm:$0xf] }
 0x574   : > { %v15120_v36 = vor.u32 %v18274_v55, %v15119_v3  ;;  %v14996_v3 = vor.u32 %v18240_v26, %v14993_v62  ;;  %v15055_v55 = vld [vmem:[#allocation4 + $0x1948] sm:$0xf]  ;;  %v14945_v1 = vld [vmem:[#allocation4 + $0x1878] sm:$0xf0]  ;;  %v5746_v10 = vperm.slane %v19676_v51, 3 }
 0x575   : > { %v19704_v12 = vmul.f32 0.70710677, %v6612_v57  ;;  %v6493_v21 = vpop.f32.mrf.mxu3  ;;  %7500 = vmatpush.bf16.msra.mxu3 %v15292_v58  ;;  %v18311_v57 = vld [vmem:[#allocation4 + $0x1b04] sm:$0xf]  ;;  %v14948_v58 = vor.u32 %v18228_v43, %v14945_v1  ;;  %v18290_v62 = vld [vmem:[#allocation4 + $0x1a54] sm:$0xf0] }
 0x576   : > { %7510 = vmatpush.bf16.msrb.mxu0 %v14960_v50  ;;  %v18262_v50 = vld [vmem:[#allocation4 + $0x1974] sm:$0xf0]  ;;  %v15276_v52 = vor.u32 %v18311_v57, %v15273_v38 }
 0x577   : > { %v19708_v11 = vpack.c.bf16 %v19704_v12, %v19704_v12  ;;  %v15072_v63 = vor.u32 %v18262_v50, %v15071_v32  ;;  %v18224_v32 = vld [vmem:[#allocation4 + $0x184c] sm:$0xf]  ;;  %v14929_v50 = vld [vmem:[#allocation4 + $0x1858] sm:$0xf0] }
 0x578   : > { %v14932_v38 = vor.u32 %v18224_v32, %v14929_v50 }
 0x579   : > { %7424 = vmatmul.bf16.vlgmr.msrb.gmra.mxu1 %v19708_v11  ;;  %7463 = vmatmul.bf16.vlgmr.msra.gmra.mxu0 %v19694_v8 }
 0x57a   : > { %7511 = vmatpush.bf16.msrb.mxu0 %v14944_v19  ;;  %7520 = vmatpush.bf16.msrb.mxu1 %v15136_v35 }
 0x57b   : > { %7501 = vmatpush.bf16.msra.mxu3 %v15276_v52  ;;  %v18220_v52 = vld [vmem:[#allocation4 + $0x182c] sm:$0xf] }
 0x57d   : > { %v6543_v7 = vpop.f32.mrf.mxu3 }
 0x57e   : > { %v6544_v28 = vadd.f32 %v6543_v7, %v6531_v56  ;;  %v19715_v44 = vpop.f32.mrf.mxu2  ;;  %7512 = vmatpush.bf16.msrb.mxu0 %v14928_v49  ;;  %7521 = vmatpush.bf16.msrb.mxu1 %v15120_v36  ;;  %v15056_v49 = vor.u32 %v18258_v31, %v15055_v55  ;;  %v15248_v36 = vor.u32 %v18306_v4, %v15247_v34  ;;  %v14961_v56 = vld [vmem:[#allocation4 + $0x1898] sm:$0xf0]  ;;  %v15167_v31 = vld [vmem:[#allocation4 + $0x1a28] sm:$0xf]  ;;  %v18286_v34 = vld [vmem:[#allocation4 + $0x1a34] sm:$0xf0] }
 0x57f   : > { %v15232_v7 = vor.u32 %v18302_v53, %v15231_v0  ;;  %v14964_v29 = vor.u32 %v18232_v13, %v14961_v56  ;;  %v15168_v41 = vor.u32 %v18286_v34, %v15167_v31  ;;  %v15151_v0 = vld [vmem:[#allocation4 + $0x1a08] sm:$0xf]  ;;  %v18282_v53 = vld [vmem:[#allocation4 + $0x1a14] sm:$0xf0] }
 0x580   : > { %vm6601_vm12 = vcmp.gt.f32.partialorder %v6544_v28, 0.0  ;;  %v6605_v47 = vmul.f32 0.2, %v6544_v28  ;;  %v15152_v1 = vor.u32 %v18282_v53, %v15151_v0  ;;  %v15327_v31 = vld [vmem:[#allocation4 + $0x1b68] sm:$0xf] }
 0x581   : > { %v18326_v34 = vld [vmem:[#allocation4 + $0x1b74] sm:$0xf0]  ;;  %v15295_v53 = vld [vmem:[#allocation4 + $0x1b28] sm:$0xf] }
 0x582   : > { %v6609_v2 = vsel %vm6601_vm12, %v6544_v28, %v6605_v47  ;;  %7513 = vmatpush.bf16.msrb.mxu0 %v14912_v54  ;;  %7522 = vmatpush.bf16.msrb.mxu1 %v15104_v15  ;;  %v15023_v28 = vld [vmem:[#allocation4 + $0x1908] sm:$0xf]  ;;  %v18250_v54 = vld [vmem:[#allocation4 + $0x1914] sm:$0xf0]  ;;  %v15328_v39 = vor.u32 %v18326_v34, %v15327_v31  ;;  %v18365_v31 = vld [vmem:[#allocation4 + $0x1cac] sm:$0xf0] }
 0x583   : > { %v6613_v48 = vadd.f32 %v6609_v2, %v19500_v22  ;;  %v15264_v22 = vor.u32 %v18310_v18, %v15263_v42  ;;  %v15215_v15 = vld [vmem:[#allocation4 + $0x1a88] sm:$0xf]  ;;  %v15024_v47 = vor.u32 %v18250_v54, %v15023_v28  ;;  %v15121_v42 = vld [vmem:[#allocation4 + $0x19d8] sm:$0xf0]  ;;  %v18308_v54 = vld [vmem:[#allocation4 + $0x1aec] sm:$0xf] }
 0x584   : > { %v15216_v33 = vor.u32 %v18298_v30, %v15215_v15  ;;  %v15199_v2 = vld [vmem:[#allocation4 + $0x1a68] sm:$0xf]  ;;  %v15073_v28 = vld [vmem:[#allocation4 + $0x1978] sm:$0xf0] }
 0x585   : > { %v19718_v21 = vmul.f32 0.70710677, %v6613_v48  ;;  %v6545_v19 = vpop.f32.mrf.mxu3  ;;  %v6557_v48 = vadd.f32 %v19681_v5, %v5746_v10  ;;  %v15183_v18 = vld [vmem:[#allocation4 + $0x1a48] sm:$0xf]  ;;  %v18268_v5 = vld [vmem:[#allocation4 + $0x19ac] sm:$0xf] }
 0x586   : > { %v6584_v35 = vpop.f32.mrf.mxu2  ;;  %7514 = vmatpush.bf16.msrb.mxu0 %v14896_v27  ;;  %7523 = vmatpush.bf16.msrb.mxu1 %v15088_v37  ;;  %v15140_v27 = vor.u32 %v18276_v14, %v15137_v9  ;;  %v18294_v37 = vld [vmem:[#allocation4 + $0x1a74] sm:$0xf0]  ;;  %v14913_v19 = vld [vmem:[#allocation4 + $0x1838] sm:$0xf0] }
 0x587   : > { %v19722_v61 = vpack.c.bf16 %v19718_v21, %v19718_v21  ;;  %v6570_v51 = vadd.f32 %v19697_v24, %v6557_v48  ;;  %v15200_v57 = vor.u32 %v18294_v37, %v15199_v2  ;;  %v14916_v55 = vor.u32 %v18220_v52, %v14913_v19  ;;  %v15265_v15 = vld [vmem:[#allocation4 + $0x1af8] sm:$0xf0]  ;;  %v15343_v52 = vld [vmem:[#allocation4 + $0x1b88] sm:$0xf]  ;;  %v18330_v19 = vld [vmem:[#allocation4 + $0x1b94] sm:$0xf0] }
 0x588   : > { %v15268_v9 = vor.u32 %v18308_v54, %v15265_v15  ;;  %v15057_v2 = vld [vmem:[#allocation4 + $0x1958] sm:$0xf0]  ;;  %v18314_v54 = vld [vmem:[#allocation4 + $0x1b14] sm:$0xf0]  ;;  %v18280_v15 = vld [vmem:[#allocation4 + $0x1a0c] sm:$0xf] }
 0x589   : > { %7437 = vmatmul.bf16.vlgmr.msrb.gmra.mxu2 %v19722_v61  ;;  %7476 = vmatmul.bf16.vlgmr.msra.gmra.mxu1 %v19708_v11  ;;  %v6583_v35 = vadd.f32 %v19715_v44, %v6570_v51  ;;  %v15249_v37 = vld [vmem:[#allocation4 + $0x1ad8] sm:$0xf0]  ;;  %v18252_v51 = vld [vmem:[#allocation4 + $0x192c] sm:$0xf] }
 0x58a   : > { %7559 = vmatpush.bf16.msra.mxu0 %v15012_v16  ;;  %7524 = vmatpush.bf16.msrb.mxu1 %v15072_v63  ;;  %v18272_v16 = vld [vmem:[#allocation4 + $0x19cc] sm:$0xf]  ;;  %v15105_v63 = vld [vmem:[#allocation4 + $0x19b8] sm:$0xf0] }
 0x58b   : > { %7515 = vmatmul.bf16.vlgmr.msrb.gmra.mxu0 %v19694_v8  ;;  %7533 = vmatpush.bf16.msrb.mxu2 %v15264_v22  ;;  %v15124_v26 = vor.u32 %v18272_v16, %v15121_v42  ;;  %v15108_v4 = vor.u32 %v18268_v5, %v15105_v63  ;;  %v15359_v16 = vld [vmem:[#allocation4 + $0x1ba8] sm:$0xf]  ;;  %v18334_v42 = vld [vmem:[#allocation4 + $0x1bb4] sm:$0xf0]  ;;  %v15025_v5 = vld [vmem:[#allocation4 + $0x1918] sm:$0xf0] }
 0x58c   : > { %v18296_v63 = vld [vmem:[#allocation4 + $0x1a8c] sm:$0xf] }
 0x58e   : > { %7560 = vmatpush.bf16.msra.mxu0 %v14996_v3  ;;  %7525 = vmatpush.bf16.msrb.mxu1 %v15056_v49  ;;  %v15184_v3 = vor.u32 %v18290_v62, %v15183_v18  ;;  %v18264_v49 = vld [vmem:[#allocation4 + $0x198c] sm:$0xf]  ;;  %v15233_v18 = vld [vmem:[#allocation4 + $0x1ab8] sm:$0xf0] }
 0x58f   : > { %7534 = vmatpush.bf16.msrb.mxu2 %v15248_v36  ;;  %v15089_v36 = vld [vmem:[#allocation4 + $0x1998] sm:$0xf0] }
 0x590   : > { %v15092_v56 = vor.u32 %v18264_v49, %v15089_v36  ;;  %v18322_v36 = vld [vmem:[#allocation4 + $0x1b54] sm:$0xf0] }
 0x592   : > { %7561 = vmatpush.bf16.msra.mxu0 %v14980_v6  ;;  %7526 = vmatpush.bf16.msrb.mxu1 %v15040_v40  ;;  %v15391_v40 = vld [vmem:[#allocation4 + $0x1be8] sm:$0xf] }
 0x593   : > { %7535 = vmatpush.bf16.msrb.mxu2 %v15232_v7  ;;  %v18342_v7 = vld [vmem:[#allocation4 + $0x1bf4] sm:$0xf0] }
 0x594   : > { %v15392_v10 = vor.u32 %v18342_v7, %v15391_v40  ;;  %v15169_v40 = vld [vmem:[#allocation4 + $0x1a38] sm:$0xf0] }
 0x596   : > { %7562 = vmatpush.bf16.msra.mxu0 %v14964_v29  ;;  %7527 = vmatpush.bf16.msrb.mxu1 %v15024_v47  ;;  %v18260_v29 = vld [vmem:[#allocation4 + $0x196c] sm:$0xf]  ;;  %v15375_v47 = vld [vmem:[#allocation4 + $0x1bc8] sm:$0xf] }
 0x597   : > { %7536 = vmatpush.bf16.msrb.mxu2 %v15216_v33  ;;  %v18338_v33 = vld [vmem:[#allocation4 + $0x1bd4] sm:$0xf0] }
 0x598   : > { %v15376_v32 = vor.u32 %v18338_v33, %v15375_v47  ;;  %v18336_v47 = vld [vmem:[#allocation4 + $0x1bcc] sm:$0xf]  ;;  %v15377_v33 = vld [vmem:[#allocation4 + $0x1bd8] sm:$0xf0] }
 0x599   : > { %7489 = vmatmul.bf16.vlgmr.msra.gmra.mxu2 %v19722_v61  ;;  %7528 = vmatmul.bf16.vlgmr.msrb.gmra.mxu1 %v19708_v11 }
 0x59a   : > { %7563 = vmatpush.bf16.msra.mxu0 %v14948_v58  ;;  %7572 = vmatpush.bf16.msra.mxu1 %v15140_v27  ;;  %v18256_v58 = vld [vmem:[#allocation4 + $0x194c] sm:$0xf] }
 0x59b   : > { %7537 = vmatpush.bf16.msrb.mxu2 %v15200_v57  ;;  %v18304_v27 = vld [vmem:[#allocation4 + $0x1acc] sm:$0xf]  ;;  %v15060_v50 = vor.u32 %v18256_v58, %v15057_v2  ;;  %v15041_v57 = vld [vmem:[#allocation4 + $0x1938] sm:$0xf0]  ;;  %v15380_v58 = vor.u32 %v18336_v47, %v15377_v33  ;;  %v18393_v33 = vld [vmem:[#allocation4 + $0x1d8c] sm:$0xf0] }
 0x59c   : > { %v15252_v48 = vor.u32 %v18304_v27, %v15249_v37  ;;  %v18332_v2 = vld [vmem:[#allocation4 + $0x1bac] sm:$0xf]  ;;  %v15361_v27 = vld [vmem:[#allocation4 + $0x1bb8] sm:$0xf0] }
 0x59d   : > { %v6595_v22 = vpop.f32.mrf.mxu3  ;;  %v15364_v37 = vor.u32 %v18332_v2, %v15361_v27  ;;  %v15513_v2 = vld [vmem:[#allocation4 + $0x1cf0] sm:$0xf0] }
 0x59e   : > { %v6596_v24 = vadd.f32 %v6595_v22, %v6583_v35  ;;  %7564 = vmatpush.bf16.msra.mxu0 %v14932_v38  ;;  %7573 = vmatpush.bf16.msra.mxu1 %v15124_v26  ;;  %v18300_v38 = vld [vmem:[#allocation4 + $0x1aac] sm:$0xf]  ;;  %v15360_v26 = vor.u32 %v18334_v42, %v15359_v16  ;;  %v15217_v22 = vld [vmem:[#allocation4 + $0x1a98] sm:$0xf0] }
 0x59f   : > { %7538 = vmatpush.bf16.msrb.mxu2 %v15184_v3  ;;  %v15236_v62 = vor.u32 %v18300_v38, %v15233_v18  ;;  %v18248_v35 = vld [vmem:[#allocation4 + $0x190c] sm:$0xf]  ;;  %v15329_v42 = vld [vmem:[#allocation4 + $0x1b78] sm:$0xf0] }
 0x5a0   : > { %vm6602_vm13 = vcmp.gt.f32.partialorder %v6596_v24, 0.0  ;;  %v6606_v44 = vmul.f32 0.2, %v6596_v24  ;;  %v15028_v3 = vor.u32 %v18248_v35, %v15025_v5  ;;  %v18324_v16 = vld [vmem:[#allocation4 + $0x1b6c] sm:$0xf] }
 0x5a1   : > { %v15313_v38 = vld [vmem:[#allocation4 + $0x1b58] sm:$0xf0]  ;;  %v18369_v35 = vld [vmem:[#allocation4 + $0x1ccc] sm:$0xf0] }
 0x5a2   : > { %v6610_v6 = vsel %vm6602_vm13, %v6596_v24, %v6606_v44  ;;  %7565 = vmatpush.bf16.msra.mxu0 %v14916_v55  ;;  %7574 = vmatpush.bf16.msra.mxu1 %v15108_v4  ;;  %v15344_v24 = vor.u32 %v18330_v19, %v15343_v52  ;;  %v15220_v55 = vor.u32 %v18296_v63, %v15217_v22  ;;  %v18292_v4 = vld [vmem:[#allocation4 + $0x1a6c] sm:$0xf]  ;;  %v15311_v44 = vld [vmem:[#allocation4 + $0x1b48] sm:$0xf]  ;;  %v18373_v52 = vld [vmem:[#allocation4 + $0x1cec] sm:$0xf0] }
 0x5a3   : > { %v6614_v13 = vadd.f32 %v6610_v6, %v19516_v25  ;;  %7539 = vmatpush.bf16.msrb.mxu2 %v15168_v41  ;;  %v15076_v25 = vor.u32 %v18260_v29, %v15073_v28  ;;  %v15204_v49 = vor.u32 %v18292_v4, %v15201_v23  ;;  %v18288_v6 = vld [vmem:[#allocation4 + $0x1a4c] sm:$0xf]  ;;  %v15185_v41 = vld [vmem:[#allocation4 + $0x1a58] sm:$0xf0]  ;;  %v15279_v28 = vld [vmem:[#allocation4 + $0x1b08] sm:$0xf] }
 0x5a4   : > { %v15188_v0 = vor.u32 %v18288_v6, %v15185_v41  ;;  %v18312_v22 = vld [vmem:[#allocation4 + $0x1b0c] sm:$0xf]  ;;  %v15463_v4 = vld [vmem:[#allocation4 + $0x1c80] sm:$0xf]  ;;  %v18361_v23 = vld [vmem:[#allocation4 + $0x1c8c] sm:$0xf0] }
 0x5a5   : > { %v19734_v30 = vmul.f32 0.70710677, %v6614_v13  ;;  %v6597_v43 = vpop.f32.mrf.mxu3  ;;  %v18318_v13 = vld [vmem:[#allocation4 + $0x1b34] sm:$0xf0] }
 0x5a6   : > { %7566 = vmatpush.bf16.msra.mxu0 %v14900_v20  ;;  %7575 = vmatpush.bf16.msra.mxu1 %v15092_v56  ;;  %v15312_v20 = vor.u32 %v18322_v36, %v15311_v44  ;;  %v18284_v56 = vld [vmem:[#allocation4 + $0x1a2c] sm:$0xf]  ;;  %v15296_v7 = vor.u32 %v18318_v13, %v15295_v53  ;;  %v15153_v43 = vld [vmem:[#allocation4 + $0x1a18] sm:$0xf0]  ;;  %v18357_v44 = vld [vmem:[#allocation4 + $0x1c6c] sm:$0xf0] }
 0x5a7   : > { %v19738_v14 = vpack.c.bf16 %v19734_v30, %v19734_v30  ;;  %7540 = vmatpush.bf16.msrb.mxu2 %v15152_v1  ;;  %v15172_v29 = vor.u32 %v18284_v56, %v15169_v40  ;;  %v18340_v1 = vld [vmem:[#allocation4 + $0x1bec] sm:$0xf]  ;;  %v15639_v36 = vld [vmem:[#allocation4 + $0x1de0] sm:$0xf]  ;;  %v18353_v13 = vld [vmem:[#allocation4 + $0x1c4c] sm:$0xf0] }
 0x5a8   : > { %v15431_v53 = vld [vmem:[#allocation4 + $0x1c40] sm:$0xf] }
 0x5a9   : > { %7450 = vmatmul.bf16.vlgmr.msrb.gmra.mxu3 %v19738_v14  ;;  %7567 = vmatmul.bf16.vlgmr.msra.gmra.mxu0 %v19694_v8  ;;  %v15044_v8 = vor.u32 %v18252_v51, %v15041_v57  ;;  %v15332_v51 = vor.u32 %v18324_v16, %v15329_v42  ;;  %v18320_v57 = vld [vmem:[#allocation4 + $0x1b4c] sm:$0xf]  ;;  %v15623_v56 = vld [vmem:[#allocation4 + $0x1dc0] sm:$0xf]  ;;  %v15432_v40 = vor.u32 %v18353_v13, %v15431_v53 }
 0x5aa   : > { %7546 = vmatpush.bf16.msrb.mxu3 %v15392_v10  ;;  %7576 = vmatpush.bf16.msra.mxu1 %v15076_v25  ;;  %v15393_v10 = vld [vmem:[#allocation4 + $0x1bf8] sm:$0xf0]  ;;  %v15280_v25 = vor.u32 %v18314_v54, %v15279_v28  ;;  %v15316_v18 = vor.u32 %v18320_v57, %v15313_v38  ;;  %v18349_v28 = vld [vmem:[#allocation4 + $0x1c2c] sm:$0xf0]  ;;  %v15607_v54 = vld [vmem:[#allocation4 + $0x1da0] sm:$0xf] }
 0x5ab   : > { %7585 = vmatpush.bf16.msra.mxu2 %v15268_v9  ;;  %v15396_v9 = vor.u32 %v18340_v1, %v15393_v10  ;;  %v18397_v1 = vld [vmem:[#allocation4 + $0x1dac] sm:$0xf0]  ;;  %v18367_v38 = vld [vmem:[#allocation4 + $0x1cc4] sm:$0xf]  ;;  %v15719_v53 = vld [vmem:[#allocation4 + $0x1e80] sm:$0xf] }
 0x5ac   : > { %7541 = vmatmul.bf16.vlgmr.msrb.gmra.mxu2 %v19722_v61  ;;  %v15608_v10 = vor.u32 %v18397_v1, %v15607_v54  ;;  %v18437_v57 = vld [vmem:[#allocation4 + $0x1eec] sm:$0xf0]  ;;  %v15641_v54 = vld [vmem:[#allocation4 + $0x1df0] sm:$0xf0] }
 0x5ad   : > { %v18421_v1 = vld [vmem:[#allocation4 + $0x1e6c] sm:$0xf0] }
 0x5ae   : > { %7547 = vmatpush.bf16.msrb.mxu3 %v15376_v32  ;;  %7577 = vmatpush.bf16.msra.mxu1 %v15060_v50  ;;  %v18328_v32 = vld [vmem:[#allocation4 + $0x1b8c] sm:$0xf]  ;;  %v15345_v50 = vld [vmem:[#allocation4 + $0x1b98] sm:$0xf0] }
 0x5af   : > { %7586 = vmatpush.bf16.msra.mxu2 %v15252_v48  ;;  %v15348_v48 = vor.u32 %v18328_v32, %v15345_v50  ;;  %v15575_v32 = vld [vmem:[#allocation4 + $0x1d60] sm:$0xf]  ;;  %v18389_v50 = vld [vmem:[#allocation4 + $0x1d6c] sm:$0xf0] }
 0x5b2   : > { %7548 = vmatpush.bf16.msrb.mxu3 %v15360_v26  ;;  %7578 = vmatpush.bf16.msra.mxu1 %v15044_v8  ;;  %v18316_v26 = vld [vmem:[#allocation4 + $0x1b2c] sm:$0xf]  ;;  %v15297_v8 = vld [vmem:[#allocation4 + $0x1b38] sm:$0xf0] }
 0x5b3   : > { %7587 = vmatpush.bf16.msra.mxu2 %v15236_v62  ;;  %v15511_v62 = vld [vmem:[#allocation4 + $0x1ce0] sm:$0xf]  ;;  %v15300_v5 = vor.u32 %v18316_v26, %v15297_v8 }
 0x5b4   : > { %v15512_v19 = vor.u32 %v18373_v52, %v15511_v62  ;;  %v15559_v62 = vld [vmem:[#allocation4 + $0x1d40] sm:$0xf]  ;;  %v18385_v52 = vld [vmem:[#allocation4 + $0x1d4c] sm:$0xf0] }
 0x5b6   : > { %7549 = vmatpush.bf16.msrb.mxu3 %v15344_v24  ;;  %7579 = vmatpush.bf16.msra.mxu1 %v15028_v3  ;;  %v15281_v24 = vld [vmem:[#allocation4 + $0x1b18] sm:$0xf0] }
 0x5b7   : > { %7588 = vmatpush.bf16.msra.mxu2 %v15220_v55  ;;  %8407 = vmatpush.bf16.msrb.mxu0 %v15512_v19  ;;  %v15284_v3 = vor.u32 %v18312_v22, %v15281_v24  ;;  %v15479_v55 = vld [vmem:[#allocation4 + $0x1ca0] sm:$0xf] }
 0x5b8   : > { %v15480_v34 = vor.u32 %v18365_v31, %v15479_v55  ;;  %v15751_v19 = vld [vmem:[#allocation4 + $0x1ec0] sm:$0xf]  ;;  %v18381_v55 = vld [vmem:[#allocation4 + $0x1d2c] sm:$0xf0] }
 0x5b9   : > { %7502 = vmatmul.bf16.vlgmr.msra.gmra.mxu3 %v19738_v14  ;;  %7580 = vmatmul.bf16.vlgmr.msra.gmra.mxu1 %v19708_v11  ;;  %v15156_v11 = vor.u32 %v18280_v15, %v15153_v43  ;;  %v15735_v31 = vld [vmem:[#allocation4 + $0x1ea0] sm:$0xf] }
 0x5ba   : > { %7550 = vmatpush.bf16.msrb.mxu3 %v15328_v39  ;;  %v15464_v39 = vor.u32 %v18361_v23, %v15463_v4 }
 0x5bb   : > { %7589 = vmatpush.bf16.msra.mxu2 %v15204_v49  ;;  %v15447_v49 = vld [vmem:[#allocation4 + $0x1c60] sm:$0xf] }
 0x5bc   : > { %v15448_v41 = vor.u32 %v18357_v44, %v15447_v49  ;;  %v18359_v49 = vld [vmem:[#allocation4 + $0x1c84] sm:$0xf]  ;;  %v15465_v44 = vld [vmem:[#allocation4 + $0x1c90] sm:$0xf0] }
 0x5be   : > { %7551 = vmatpush.bf16.msrb.mxu3 %v15312_v20  ;;  %v18405_v20 = vld [vmem:[#allocation4 + $0x1dec] sm:$0xf0] }
 0x5bf   : > { %7590 = vmatpush.bf16.msra.mxu2 %v15188_v0  ;;  %v15640_v0 = vor.u32 %v18405_v20, %v15639_v36  ;;  %v15527_v20 = vld [vmem:[#allocation4 + $0x1d00] sm:$0xf] }
 0x5c1   : > { %8420 = vmatpush.bf16.msrb.mxu1 %v15640_v0  ;;  %v18377_v0 = vld [vmem:[#allocation4 + $0x1d0c] sm:$0xf0] }
 0x5c2   : > { %7552 = vmatpush.bf16.msrb.mxu3 %v15296_v7  ;;  %v18401_v7 = vld [vmem:[#allocation4 + $0x1dcc] sm:$0xf0]  ;;  %v15528_v13 = vor.u32 %v18377_v0, %v15527_v20  ;;  %v18435_v20 = vld [vmem:[#allocation4 + $0x1ee4] sm:$0xf]  ;;  %v15769_v0 = vld [vmem:[#allocation4 + $0x1ef0] sm:$0xf0] }
 0x5c3   : > { %7591 = vmatpush.bf16.msra.mxu2 %v15172_v29  ;;  %v15624_v29 = vor.u32 %v18401_v7, %v15623_v56  ;;  %v18425_v56 = vld [vmem:[#allocation4 + $0x1e8c] sm:$0xf0]  ;;  %v15449_v7 = vld [vmem:[#allocation4 + $0x1c70] sm:$0xf0] }
 0x5c5   : > { %8421 = vmatpush.bf16.msrb.mxu1 %v15624_v29  ;;  %v15720_v29 = vor.u32 %v18425_v56, %v15719_v53  ;;  %v15879_v56 = vld [vmem:[#allocation4 + $0x1fc0] sm:$0xf] }
 0x5c6   : > { %7553 = vmatpush.bf16.msrb.mxu3 %v15280_v25  ;;  %v15399_v25 = vld [vmem:[#allocation4 + $0x1c00] sm:$0xf] }
 0x5c7   : > { %7592 = vmatpush.bf16.msra.mxu2 %v15156_v11  ;;  %v18345_v11 = vld [vmem:[#allocation4 + $0x1c0c] sm:$0xf0] }
 0x5c8   : > { %v15400_v47 = vor.u32 %v18345_v11, %v15399_v25  ;;  %v15433_v11 = vld [vmem:[#allocation4 + $0x1c50] sm:$0xf0] }
 0x5c9   : > { %7554 = vmatmul.bf16.vlgmr.msrb.gmra.mxu3 %v19738_v14  ;;  %8422 = vmatpush.bf16.msrb.mxu1 %v15608_v10  ;;  %v18351_v10 = vld [vmem:[#allocation4 + $0x1c44] sm:$0xf] }
 0x5ca   : > { %7598 = vmatpush.bf16.msra.mxu3 %v15396_v9  ;;  %7593 = vmatmul.bf16.vlgmr.msra.gmra.mxu2 %v19722_v61  ;;  %v15495_v61 = vld [vmem:[#allocation4 + $0x1cc0] sm:$0xf] }
 0x5cb   : > { %v15496_v63 = vor.u32 %v18369_v35, %v15495_v61  ;;  %v15591_v9 = vld [vmem:[#allocation4 + $0x1d80] sm:$0xf]  ;;  %v18433_v61 = vld [vmem:[#allocation4 + $0x1ecc] sm:$0xf0]  ;;  %v18363_v35 = vld [vmem:[#allocation4 + $0x1ca4] sm:$0xf] }
 0x5cc   : > { %v15592_v27 = vor.u32 %v18393_v33, %v15591_v9  ;;  %v15752_v22 = vor.u32 %v18433_v61, %v15751_v19  ;;  %v18399_v9 = vld [vmem:[#allocation4 + $0x1dc4] sm:$0xf] }
 0x5cd   : > { %8408 = vmatpush.bf16.msrb.mxu0 %v15496_v63  ;;  %v15560_v63 = vor.u32 %v18385_v52, %v15559_v62  ;;  %v15671_v62 = vld [vmem:[#allocation4 + $0x1e20] sm:$0xf]  ;;  %v18413_v52 = vld [vmem:[#allocation4 + $0x1e2c] sm:$0xf0] }
 0x5ce   : > { %7599 = vmatpush.bf16.msra.mxu3 %v15380_v58  ;;  %v18371_v58 = vld [vmem:[#allocation4 + $0x1ce4] sm:$0xf]  ;;  %8423 = vmatpush.bf16.msrb.mxu1 %v15592_v27  ;;  %v15672_v61 = vor.u32 %v18413_v52, %v15671_v62  ;;  %v15529_v62 = vld [vmem:[#allocation4 + $0x1d10] sm:$0xf0] }
 0x5cf   : > { %v18423_v52 = vld [vmem:[#allocation4 + $0x1e84] sm:$0xf] }
 0x5d1   : > { %8409 = vmatpush.bf16.msrb.mxu0 %v15480_v34 }
 0x5d2   : > { %7600 = vmatpush.bf16.msra.mxu3 %v15364_v37  ;;  %v15516_v37 = vor.u32 %v18371_v58, %v15513_v2  ;;  %v15436_v58 = vor.u32 %v18351_v10, %v15433_v11  ;;  %v15863_v10 = vld [vmem:[#allocation4 + $0x1fa0] sm:$0xf] }
 0x5d5   : > { %8410 = vmatpush.bf16.msrb.mxu0 %v15464_v39  ;;  %v18429_v39 = vld [vmem:[#allocation4 + $0x1eac] sm:$0xf0] }
 0x5d6   : > { %7601 = vmatpush.bf16.msra.mxu3 %v15348_v48  ;;  %v15767_v48 = vld [vmem:[#allocation4 + $0x1ee0] sm:$0xf]  ;;  %v15736_v36 = vor.u32 %v18429_v39, %v15735_v31  ;;  %v18469_v39 = vld [vmem:[#allocation4 + $0x1fec] sm:$0xf0] }
 0x5d7   : > { %v15768_v26 = vor.u32 %v18437_v57, %v15767_v48  ;;  %v18347_v48 = vld [vmem:[#allocation4 + $0x1c24] sm:$0xf]  ;;  %v15655_v31 = vld [vmem:[#allocation4 + $0x1e00] sm:$0xf] }
 0x5d8   : > { %v18395_v57 = vld [vmem:[#allocation4 + $0x1da4] sm:$0xf] }
 0x5d9   : > { %8411 = vmatpush.bf16.msrb.mxu0 %v15448_v41  ;;  %8433 = vmatpush.bf16.msrb.mxu2 %v15768_v26  ;;  %v15468_v41 = vor.u32 %v18359_v49, %v15465_v44  ;;  %v18387_v49 = vld [vmem:[#allocation4 + $0x1d64] sm:$0xf]  ;;  %v15577_v44 = vld [vmem:[#allocation4 + $0x1d70] sm:$0xf0] }
 0x5da   : > { %7602 = vmatpush.bf16.msra.mxu3 %v15332_v51  ;;  %v15576_v51 = vor.u32 %v18389_v50, %v15575_v32  ;;  %v18417_v32 = vld [vmem:[#allocation4 + $0x1e4c] sm:$0xf0] }
 0x5dc   : > { %8424 = vmatpush.bf16.msrb.mxu1 %v15576_v51  ;;  %v15417_v51 = vld [vmem:[#allocation4 + $0x1c30] sm:$0xf0] }
 0x5dd   : > { %8412 = vmatpush.bf16.msrb.mxu0 %v15432_v40  ;;  %8434 = vmatpush.bf16.msrb.mxu2 %v15752_v22  ;;  %v18355_v40 = vld [vmem:[#allocation4 + $0x1c64] sm:$0xf] }
 0x5de   : > { %7603 = vmatpush.bf16.msra.mxu3 %v15316_v18  ;;  %v15497_v18 = vld [vmem:[#allocation4 + $0x1cd0] sm:$0xf0] }
 0x5df   : > { %v15500_v8 = vor.u32 %v18367_v38, %v15497_v18  ;;  %v15420_v38 = vor.u32 %v18347_v48, %v15417_v51  ;;  %v15609_v18 = vld [vmem:[#allocation4 + $0x1db0] sm:$0xf0]  ;;  %v15847_v51 = vld [vmem:[#allocation4 + $0x1f80] sm:$0xf] }
 0x5e0   : > { %8425 = vmatpush.bf16.msrb.mxu1 %v15560_v63  ;;  %v18391_v63 = vld [vmem:[#allocation4 + $0x1d84] sm:$0xf] }
 0x5e1   : > { %8435 = vmatpush.bf16.msrb.mxu2 %v15736_v36 }
 0x5e2   : > { %7604 = vmatpush.bf16.msra.mxu3 %v15300_v5  ;;  %v15481_v5 = vld [vmem:[#allocation4 + $0x1cb0] sm:$0xf0] }
 0x5e3   : > { %v15484_v24 = vor.u32 %v18363_v35, %v15481_v5  ;;  %v18343_v35 = vld [vmem:[#allocation4 + $0x1c04] sm:$0xf]  ;;  %v15401_v5 = vld [vmem:[#allocation4 + $0x1c10] sm:$0xf0] }
 0x5e5   : > { %8436 = vmatpush.bf16.msrb.mxu2 %v15720_v29 }
 0x5e6   : > { %7605 = vmatpush.bf16.msra.mxu3 %v15284_v3  ;;  %v19748_v6 = vpop.f32.mrf.mxu0  ;;  %v15543_v3 = vld [vmem:[#allocation4 + $0x1d20] sm:$0xf] }
 0x5e7   : > { %v15544_v23 = vor.u32 %v18381_v55, %v15543_v3  ;;  %v15593_v3 = vld [vmem:[#allocation4 + $0x1d90] sm:$0xf0] }
 0x5e8   : > { %v15596_v55 = vor.u32 %v18391_v63, %v15593_v3  ;;  %v15831_v63 = vld [vmem:[#allocation4 + $0x1f60] sm:$0xf]  ;;  %v18419_v3 = vld [vmem:[#allocation4 + $0x1e64] sm:$0xf] }
 0x5e9   : > { %7606 = vmatmul.bf16.vlgmr.msra.gmra.mxu3 %v19738_v14  ;;  %v15415_v14 = vld [vmem:[#allocation4 + $0x1c20] sm:$0xf]  ;;  %8426 = vmatpush.bf16.msrb.mxu1 %v15544_v23 }
 0x5ea   : > { %v15416_v43 = vor.u32 %v18349_v28, %v15415_v14  ;;  %v15452_v14 = vor.u32 %v18355_v40, %v15449_v7  ;;  %v18403_v28 = vld [vmem:[#allocation4 + $0x1de4] sm:$0xf]  ;;  %v18465_v40 = vld [vmem:[#allocation4 + $0x1fcc] sm:$0xf0] }
 0x5eb   : > { %v15880_v29 = vor.u32 %v18465_v40, %v15879_v56  ;;  %v15799_v56 = vld [vmem:[#allocation4 + $0x1f20] sm:$0xf]  ;;  %v18445_v40 = vld [vmem:[#allocation4 + $0x1f2c] sm:$0xf0] }
 0x5ec   : > { %8413 = vmatpush.bf16.msrb.mxu0 %v15416_v43  ;;  %v15703_v43 = vld [vmem:[#allocation4 + $0x1e60] sm:$0xf] }
 0x5ed   : > { %8427 = vmatpush.bf16.msrb.mxu1 %v15528_v13  ;;  %v15704_v25 = vor.u32 %v18421_v1, %v15703_v43  ;;  %v15772_v13 = vor.u32 %v18435_v20, %v15769_v0  ;;  %v15753_v43 = vld [vmem:[#allocation4 + $0x1ed0] sm:$0xf0] }
 0x5ee   : > { %v7414_v15 = vpop.f32.mrf.mxu0  ;;  %v15689_v20 = vld [vmem:[#allocation4 + $0x1e50] sm:$0xf0] }
 0x5ef   : > { %v15644_v15 = vor.u32 %v18403_v28, %v15641_v54  ;;  %8437 = vmatpush.bf16.msrb.mxu2 %v15704_v25  ;;  %v15561_v28 = vld [vmem:[#allocation4 + $0x1d50] sm:$0xf0]  ;;  %v18431_v54 = vld [vmem:[#allocation4 + $0x1ec4] sm:$0xf]  ;;  %v18461_v25 = vld [vmem:[#allocation4 + $0x1fac] sm:$0xf0] }
 0x5f0   : > { %8414 = vmatpush.bf16.msrb.mxu0 %v15400_v47  ;;  %v15625_v47 = vld [vmem:[#allocation4 + $0x1dd0] sm:$0xf0]  ;;  %v15756_v1 = vor.u32 %v18431_v54, %v15753_v43  ;;  %v15864_v11 = vor.u32 %v18461_v25, %v15863_v10  ;;  %v18374_v43 = vld [vmem:[#allocation4 + $0x1cf4] sm:$0xf0]  ;;  %v15503_v25 = vld [vmem:[#allocation4 + $0x1cc8] sm:$0xf] }
 0x5f1   : > { %8472 = vmatpush.bf16.msra.mxu1 %v15644_v15  ;;  %v15628_v2 = vor.u32 %v18399_v9, %v15625_v47  ;;  %v18379_v9 = vld [vmem:[#allocation4 + $0x1d24] sm:$0xf]  ;;  %v15545_v47 = vld [vmem:[#allocation4 + $0x1d30] sm:$0xf0] }
 0x5f4   : > { %8459 = vmatpush.bf16.msra.mxu0 %v15516_v37  ;;  %v15687_v37 = vld [vmem:[#allocation4 + $0x1e40] sm:$0xf] }
 0x5f5   : > { %8473 = vmatpush.bf16.msra.mxu1 %v15628_v2  ;;  %v15688_v50 = vor.u32 %v18417_v32, %v15687_v37  ;;  %v15548_v2 = vor.u32 %v18379_v9, %v15545_v47  ;;  %v15737_v37 = vld [vmem:[#allocation4 + $0x1eb0] sm:$0xf0]  ;;  %v18441_v47 = vld [vmem:[#allocation4 + $0x1f0c] sm:$0xf0] }
 0x5f6   : > { %v19750_v16 = vpop.f32.mrf.mxu1  ;;  %v19752_v42 = vpop.f32.mrf.mxu0  ;;  %v19762_v32 = vld [vmem:[#allocation10 + $0x6] ss:$8 sm:$0xf] }
 0x5f7   : > { %8438 = vmatpush.bf16.msrb.mxu2 %v15688_v50 }
 0x5f8   : > { %8460 = vmatpush.bf16.msra.mxu0 %v15500_v8  ;;  %v15612_v8 = vor.u32 %v18395_v57, %v15609_v18  ;;  %v18457_v57 = vld [vmem:[#allocation4 + $0x1f8c] sm:$0xf0] }
 0x5f9   : > { %v15848_v18 = vor.u32 %v18457_v57, %v15847_v51 }
 0x5fa   : > { %8474 = vmatpush.bf16.msra.mxu1 %v15612_v8  ;;  %v18375_v8 = vld [vmem:[#allocation4 + $0x1d04] sm:$0xf] }
 0x5fb   : > { %8439 = vmatpush.bf16.msrb.mxu2 %v15672_v61  ;;  %v15721_v61 = vld [vmem:[#allocation4 + $0x1e90] sm:$0xf0] }
 0x5fc   : > { %8461 = vmatpush.bf16.msra.mxu0 %v15484_v24  ;;  %v15404_v24 = vor.u32 %v18343_v35, %v15401_v5  ;;  %v6755_v35 = vperm.slane %v19762_v32, 0  ;;  %v15724_v5 = vor.u32 %v18423_v52, %v15721_v61  ;;  %v15487_v61 = vld [vmem:[#allocation4 + $0x1ca8] sm:$0xf] }
 0x5fe   : > { %v7427_v34 = vpop.f32.mrf.mxu1  ;;  %v7466_v4 = vpop.f32.mrf.mxu0  ;;  %8475 = vmatpush.bf16.msra.mxu1 %v15596_v55  ;;  %v15705_v55 = vld [vmem:[#allocation4 + $0x1e70] sm:$0xf0] }
 0x5ff   : > { %v18409_v34 = vld [vmem:[#allocation4 + $0x1e0c] sm:$0xf0]  ;;  %v15895_v4 = vld [vmem:[#allocation4 + $0x1fe0] sm:$0xf] }
 0x600   : > { %8462 = vmatpush.bf16.msra.mxu0 %v15468_v41  ;;  %v15656_v23 = vor.u32 %v18409_v34, %v15655_v31  ;;  %v15896_v36 = vor.u32 %v18469_v39, %v15895_v4  ;;  %v15580_v41 = vor.u32 %v18387_v49, %v15577_v44  ;;  %v15708_v34 = vor.u32 %v18419_v3, %v15705_v55  ;;  %v15815_v39 = vld [vmem:[#allocation4 + $0x1f40] sm:$0xf]  ;;  %v18449_v49 = vld [vmem:[#allocation4 + $0x1f4c] sm:$0xf0] }
 0x601   : > { %v7413_v4 = vadd.f32 %v19748_v6, %v6755_v35  ;;  %v15800_v6 = vor.u32 %v18445_v40, %v15799_v56  ;;  %v18366_v35 = vld [vmem:[#allocation4 + $0x1cb4] sm:$0xf0]  ;;  %v15647_v56 = vld [vmem:[#allocation4 + $0x1de8] sm:$0xf] }
 0x602   : > { %8440 = vmatpush.bf16.msrb.mxu2 %v15656_v23  ;;  %8446 = vmatpush.bf16.msrb.mxu3 %v15896_v36  ;;  %v15816_v36 = vor.u32 %v18449_v49, %v15815_v39  ;;  %v18362_v39 = vld [vmem:[#allocation4 + $0x1c94] sm:$0xf0]  ;;  %v18459_v49 = vld [vmem:[#allocation4 + $0x1fa4] sm:$0xf] }
 0x603   : > { %8476 = vmatpush.bf16.msra.mxu1 %v15580_v41  ;;  %v7426_v44 = vadd.f32 %v19750_v16, %v7413_v4  ;;  %v18415_v41 = vld [vmem:[#allocation4 + $0x1e44] sm:$0xf]  ;;  %v15488_v4 = vor.u32 %v18366_v35, %v15487_v61  ;;  %v18406_v40 = vld [vmem:[#allocation4 + $0x1df4] sm:$0xf0] }
 0x604   : > { %8463 = vmatpush.bf16.msra.mxu0 %v15452_v14  ;;  %v18383_v14 = vld [vmem:[#allocation4 + $0x1d44] sm:$0xf]  ;;  %v15692_v0 = vor.u32 %v18415_v41, %v15689_v20 }
 0x605   : > { %v15564_v15 = vor.u32 %v18383_v14, %v15561_v28  ;;  %v18411_v14 = vld [vmem:[#allocation4 + $0x1e24] sm:$0xf]  ;;  %v15673_v28 = vld [vmem:[#allocation4 + $0x1e30] sm:$0xf0] }
 0x606   : > { %v19754_v33 = vpop.f32.mrf.mxu1  ;;  %8485 = vmatpush.bf16.msra.mxu2 %v15772_v13  ;;  %8447 = vmatpush.bf16.msrb.mxu3 %v15880_v29  ;;  %v15676_v16 = vor.u32 %v18411_v14, %v15673_v28 }
 0x607   : > { %8477 = vmatpush.bf16.msra.mxu1 %v15564_v15  ;;  %v15519_v15 = vld [vmem:[#allocation4 + $0x1ce8] sm:$0xf] }
 0x608   : > { %v19756_v27 = vpop.f32.mrf.mxu0  ;;  %8464 = vmatpush.bf16.msra.mxu0 %v15436_v58  ;;  %v18427_v58 = vld [vmem:[#allocation4 + $0x1ea4] sm:$0xf]  ;;  %v15520_v9 = vor.u32 %v18374_v43, %v15519_v15  ;;  %v15439_v43 = vld [vmem:[#allocation4 + $0x1c48] sm:$0xf] }
 0x609   : > { %v15740_v48 = vor.u32 %v18427_v58, %v15737_v37  ;;  %v18407_v58 = vld [vmem:[#allocation4 + $0x1e04] sm:$0xf] }
 0x60a   : > { %8486 = vmatpush.bf16.msra.mxu2 %v15756_v1  ;;  %8448 = vmatpush.bf16.msrb.mxu3 %v15864_v11 }
 0x60b   : > { %8478 = vmatpush.bf16.msra.mxu1 %v15548_v2  ;;  %v15657_v2 = vld [vmem:[#allocation4 + $0x1e10] sm:$0xf0] }
 0x60c   : > { %v19758_v26 = vpop.f32.mrf.mxu2  ;;  %8465 = vmatpush.bf16.msra.mxu0 %v15420_v38  ;;  %v15660_v57 = vor.u32 %v18407_v58, %v15657_v2 }
 0x60e   : > { %v7479_v19 = vpop.f32.mrf.mxu1  ;;  %8487 = vmatpush.bf16.msra.mxu2 %v15740_v48  ;;  %8449 = vmatpush.bf16.msrb.mxu3 %v15848_v18  ;;  %v18370_v48 = vld [vmem:[#allocation4 + $0x1cd4] sm:$0xf0]  ;;  %v15897_v18 = vld [vmem:[#allocation4 + $0x1ff0] sm:$0xf0] }
 0x60f   : > { %v15532_v19 = vor.u32 %v18375_v8, %v15529_v62  ;;  %v6756_v8 = vperm.slane %v19762_v32, 1 }
 0x610   : > { %v7518_v22 = vpop.f32.mrf.mxu0  ;;  %8466 = vmatpush.bf16.msra.mxu0 %v15404_v24 }
 0x611   : > { %v18453_v22 = vld [vmem:[#allocation4 + $0x1f6c] sm:$0xf0]  ;;  %8479 = vmatpush.bf16.msra.mxu1 %v15532_v19  ;;  %v15504_v19 = vor.u32 %v18370_v48, %v15503_v25 }
 0x612   : > { %8488 = vmatpush.bf16.msra.mxu2 %v15724_v5  ;;  %v15832_v24 = vor.u32 %v18453_v22, %v15831_v63  ;;  %v18463_v5 = vld [vmem:[#allocation4 + $0x1fc4] sm:$0xf]  ;;  %v15881_v63 = vld [vmem:[#allocation4 + $0x1fd0] sm:$0xf0]  ;;  %v7465_v22 = vadd.f32 %v19752_v42, %v6756_v8  ;;  %v18398_v8 = vld [vmem:[#allocation4 + $0x1db4] sm:$0xf0] }
 0x613   : > { %v15884_v3 = vor.u32 %v18463_v5, %v15881_v63 }
 0x614   : > { %v7440_v53 = vpop.f32.mrf.mxu2  ;;  %8450 = vmatpush.bf16.msrb.mxu3 %v15832_v24 }
 0x615   : > { %v7439_v53 = vadd.f32 %v19758_v26, %v7426_v44  ;;  %v15783_v26 = vld [vmem:[#allocation4 + $0x1f00] sm:$0xf]  ;;  %v15865_v44 = vld [vmem:[#allocation4 + $0x1fb0] sm:$0xf0] }
 0x616   : > { %v19760_v7 = vpop.f32.mrf.mxu1  ;;  %8489 = vmatpush.bf16.msra.mxu2 %v15708_v34  ;;  %v15784_v51 = vor.u32 %v18441_v47, %v15783_v26  ;;  %v7478_v34 = vadd.f32 %v19754_v33, %v7465_v22  ;;  %v15868_v41 = vor.u32 %v18459_v49, %v15865_v44  ;;  %v18455_v33 = vld [vmem:[#allocation4 + $0x1f84] sm:$0xf]  ;;  %v18402_v26 = vld [vmem:[#allocation4 + $0x1dd4] sm:$0xf0]  ;;  %v6757_v47 = vperm.slane %v19762_v32, 2 }
 0x617   : > { %v15407_v22 = vld [vmem:[#allocation4 + $0x1c08] sm:$0xf]  ;;  %v18372_v49 = vld [vmem:[#allocation4 + $0x1cec] sm:$0xf]  ;;  %v15521_v44 = vld [vmem:[#allocation4 + $0x1cf8] sm:$0xf0] }
 0x618   : > { %8451 = vmatpush.bf16.msrb.mxu3 %v15816_v36 }
 0x61a   : > { %8490 = vmatpush.bf16.msra.mxu2 %v15692_v0 }
 0x61c   : > { %v19764_v50 = vpop.f32.mrf.mxu2  ;;  %8452 = vmatpush.bf16.msrb.mxu3 %v15800_v6 }
 0x61d   : > { %v7491_v36 = vadd.f32 %v19764_v50, %v7478_v34  ;;  %v15648_v50 = vor.u32 %v18406_v40, %v15647_v56  ;;  %v18394_v34 = vld [vmem:[#allocation4 + $0x1d94] sm:$0xf0]  ;;  %v15524_v40 = vor.u32 %v18372_v49, %v15521_v44  ;;  %v15649_v49 = vld [vmem:[#allocation4 + $0x1df8] sm:$0xf0] }
 0x61e   : > { %v7531_v38 = vpop.f32.mrf.mxu1  ;;  %8491 = vmatpush.bf16.msra.mxu2 %v15676_v16  ;;  %v18354_v16 = vld [vmem:[#allocation4 + $0x1c54] sm:$0xf0] }
 0x61f   : > { %v18467_v38 = vld [vmem:[#allocation4 + $0x1fe4] sm:$0xf]  ;;  %v15440_v48 = vor.u32 %v18354_v16, %v15439_v43  ;;  %v18438_v56 = vld [vmem:[#allocation4 + $0x1ef4] sm:$0xf0] }
 0x620   : > { %v15900_v62 = vor.u32 %v18467_v38, %v15897_v18  ;;  %8453 = vmatpush.bf16.msrb.mxu3 %v15784_v51  ;;  %v18350_v38 = vld [vmem:[#allocation4 + $0x1c34] sm:$0xf0]  ;;  %v15615_v18 = vld [vmem:[#allocation4 + $0x1da8] sm:$0xf] }
 0x621   : > { %v15616_v63 = vor.u32 %v18398_v8, %v15615_v18  ;;  %v15551_v18 = vld [vmem:[#allocation4 + $0x1d28] sm:$0xf]  ;;  %v18382_v8 = vld [vmem:[#allocation4 + $0x1d34] sm:$0xf0] }
 0x622   : > { %8492 = vmatpush.bf16.msra.mxu2 %v15660_v57  ;;  %v15423_v57 = vld [vmem:[#allocation4 + $0x1c28] sm:$0xf] }
 0x623   : > { %v15424_v5 = vor.u32 %v18350_v38, %v15423_v57 }
 0x624   : > { %v7492_v23 = vpop.f32.mrf.mxu2  ;;  %8498 = vmatpush.bf16.msra.mxu3 %v15900_v62  ;;  %v18447_v62 = vld [vmem:[#allocation4 + $0x1f44] sm:$0xf] }
 0x625   : > { %v15471_v23 = vld [vmem:[#allocation4 + $0x1c88] sm:$0xf] }
 0x626   : > { %v19767_v31 = vpop.f32.mrf.mxu0  ;;  %v15472_v42 = vor.u32 %v18362_v39, %v15471_v23  ;;  %v15801_v23 = vld [vmem:[#allocation4 + $0x1f30] sm:$0xf0] }
 0x628   : > { %8499 = vmatpush.bf16.msra.mxu3 %v15884_v3  ;;  %v18346_v3 = vld [vmem:[#allocation4 + $0x1c14] sm:$0xf0] }
 0x62c   : > { %v7451_v13 = vpop.f32.mrf.mxu3  ;;  %8500 = vmatpush.bf16.msra.mxu3 %v15868_v41  ;;  %v15583_v41 = vld [vmem:[#allocation4 + $0x1d68] sm:$0xf] }
 0x62d   : > { %v7452_v29 = vadd.f32 %v7451_v13, %v7439_v53  ;;  %v15455_v53 = vld [vmem:[#allocation4 + $0x1c68] sm:$0xf]  ;;  %v18358_v13 = vld [vmem:[#allocation4 + $0x1c74] sm:$0xf0] }
 0x62e   : > { %v7570_v54 = vpop.f32.mrf.mxu0  ;;  %v15456_v15 = vor.u32 %v18358_v13, %v15455_v53  ;;  %v18390_v53 = vld [vmem:[#allocation4 + $0x1d74] sm:$0xf0]  ;;  %v15775_v13 = vld [vmem:[#allocation4 + $0x1ee8] sm:$0xf] }
 0x62f   : > { %vm7611_vm14 = vcmp.gt.f32.partialorder %v7452_v29, 0.0  ;;  %v7615_v1 = vmul.f32 0.2, %v7452_v29  ;;  %v19772_v10 = vpop.f32.mrf.mxu2  ;;  %v15776_v43 = vor.u32 %v18438_v56, %v15775_v13  ;;  %v6758_v13 = vperm.slane %v19762_v32, 3  ;;  %v18400_v56 = vld [vmem:[#allocation4 + $0x1dcc] sm:$0xf] }
 0x630   : > { %v18396_v32 = vld [vmem:[#allocation4 + $0x1dac] sm:$0xf] }
 0x631   : > { %v7619_v11 = vsel %vm7611_vm14, %v7452_v29, %v7615_v1  ;;  %v15849_v29 = vld [vmem:[#allocation4 + $0x1f90] sm:$0xf0]  ;;  %v15631_v1 = vld [vmem:[#allocation4 + $0x1dc8] sm:$0xf] }
 0x632   : > { %v19774_v37 = vpack.c.bf16 %v7619_v11, %v7619_v11  ;;  %v15852_v28 = vor.u32 %v18455_v33, %v15849_v29  ;;  %v18451_v11 = vld [vmem:[#allocation4 + $0x1f64] sm:$0xf]  ;;  %v15632_v51 = vor.u32 %v18402_v26, %v15631_v1  ;;  %v18368_v33 = vld [vmem:[#allocation4 + $0x1ccc] sm:$0xf]  ;;  %v15567_v1 = vld [vmem:[#allocation4 + $0x1d48] sm:$0xf] }
 0x633   : > { %v18439_v29 = vld [vmem:[#allocation4 + $0x1f04] sm:$0xf]  ;;  %v18386_v26 = vld [vmem:[#allocation4 + $0x1d54] sm:$0xf0] }
 0x634   : > { %v7453_v52 = vpop.f32.mrf.mxu3  ;;  %8415 = vmatmul.bf16.vlgmr.msrb.gmra.mxu0 %v19774_v37  ;;  %8501 = vmatpush.bf16.msra.mxu3 %v15852_v28 }
 0x635   : > { %8511 = vmatpush.bf16.msrb.mxu0 %v15520_v9  ;;  %v15833_v9 = vld [vmem:[#allocation4 + $0x1f70] sm:$0xf0] }
 0x636   : > { %v19779_v24 = vpop.f32.mrf.mxu1  ;;  %v15836_v58 = vor.u32 %v18451_v11, %v15833_v9  ;;  %v15817_v52 = vld [vmem:[#allocation4 + $0x1f50] sm:$0xf0]  ;;  %v15759_v11 = vld [vmem:[#allocation4 + $0x1ec8] sm:$0xf]  ;;  %v18434_v9 = vld [vmem:[#allocation4 + $0x1ed4] sm:$0xf0] }
 0x637   : > { %v7544_v55 = vpop.f32.mrf.mxu2  ;;  %v15820_v61 = vor.u32 %v18447_v62, %v15817_v52  ;;  %v15760_v57 = vor.u32 %v18434_v9, %v15759_v11  ;;  %v15743_v62 = vld [vmem:[#allocation4 + $0x1ea8] sm:$0xf]  ;;  %v18430_v52 = vld [vmem:[#allocation4 + $0x1eb4] sm:$0xf0] }
 0x638   : > { %8502 = vmatpush.bf16.msra.mxu3 %v15836_v58  ;;  %v15599_v55 = vld [vmem:[#allocation4 + $0x1d88] sm:$0xf]  ;;  %v15489_v58 = vld [vmem:[#allocation4 + $0x1cb8] sm:$0xf0] }
 0x639   : > { %8512 = vmatpush.bf16.msrb.mxu0 %v15504_v19  ;;  %v7517_v19 = vadd.f32 %v19756_v27, %v6757_v47  ;;  %v18364_v47 = vld [vmem:[#allocation4 + $0x1cac] sm:$0xf]  ;;  %v15679_v11 = vld [vmem:[#allocation4 + $0x1e28] sm:$0xf] }
 0x63a   : > { %v15492_v38 = vor.u32 %v18364_v47, %v15489_v58  ;;  %v18414_v47 = vld [vmem:[#allocation4 + $0x1e34] sm:$0xf0]  ;;  %v18344_v58 = vld [vmem:[#allocation4 + $0x1c0c] sm:$0xf] }
 0x63b   : > { %v7530_v35 = vadd.f32 %v19760_v7, %v7517_v19  ;;  %v18360_v19 = vld [vmem:[#allocation4 + $0x1c8c] sm:$0xf] }
 0x63c   : > { %v7503_v20 = vpop.f32.mrf.mxu3  ;;  %8503 = vmatpush.bf16.msra.mxu3 %v15820_v61  ;;  %v15473_v61 = vld [vmem:[#allocation4 + $0x1c98] sm:$0xf0] }
 0x63d   : > { %v7504_v0 = vadd.f32 %v7503_v20, %v7491_v36  ;;  %8513 = vmatpush.bf16.msrb.mxu0 %v15488_v4  ;;  %v18443_v4 = vld [vmem:[#allocation4 + $0x1f24] sm:$0xf]  ;;  %v7543_v39 = vadd.f32 %v19772_v10, %v7530_v35  ;;  %v15785_v10 = vld [vmem:[#allocation4 + $0x1f10] sm:$0xf0]  ;;  %v15552_v35 = vor.u32 %v18382_v8, %v15551_v18 }
 0x63e   : > { %v7583_v14 = vpop.f32.mrf.mxu1  ;;  %v15804_v36 = vor.u32 %v18443_v4, %v15801_v23  ;;  %v15788_v28 = vor.u32 %v18439_v29, %v15785_v10  ;;  %v18356_v4 = vld [vmem:[#allocation4 + $0x1c6c] sm:$0xf]  ;;  %v15457_v23 = vld [vmem:[#allocation4 + $0x1c78] sm:$0xf0]  ;;  %v15695_v10 = vld [vmem:[#allocation4 + $0x1e48] sm:$0xf] }
 0x63f   : > { %vm7612_vm15 = vcmp.gt.f32.partialorder %v7504_v0, 0.0  ;;  %v7616_v6 = vmul.f32 0.2, %v7504_v0  ;;  %v15505_v14 = vld [vmem:[#allocation4 + $0x1cd8] sm:$0xf0] }
 0x640   : > { %8504 = vmatpush.bf16.msra.mxu3 %v15804_v36  ;;  %v15508_v16 = vor.u32 %v18368_v33, %v15505_v14  ;;  %v18418_v14 = vld [vmem:[#allocation4 + $0x1e54] sm:$0xf0] }
 0x641   : > { %v7620_v54 = vsel %vm7612_vm15, %v7504_v0, %v7616_v6  ;;  %8514 = vmatpush.bf16.msrb.mxu0 %v15472_v42  ;;  %v15408_v0 = vor.u32 %v18346_v3, %v15407_v22  ;;  %v15600_v42 = vor.u32 %v18394_v34, %v15599_v55  ;;  %v15535_v22 = vld [vmem:[#allocation4 + $0x1d08] sm:$0xf]  ;;  %v18378_v3 = vld [vmem:[#allocation4 + $0x1d14] sm:$0xf0] }
 0x642   : > { %v19783_v25 = vpack.c.bf16 %v7620_v54, %v7620_v54  ;;  %v15727_v55 = vld [vmem:[#allocation4 + $0x1e88] sm:$0xf]  ;;  %v18426_v34 = vld [vmem:[#allocation4 + $0x1e94] sm:$0xf0]  ;;  %v15536_v44 = vor.u32 %v18378_v3, %v15535_v22 }
 0x643   : > { %v15728_v36 = vor.u32 %v18426_v34, %v15727_v55 }
 0x644   : > { %v7505_v2 = vpop.f32.mrf.mxu3  ;;  %8428 = vmatmul.bf16.vlgmr.msrb.gmra.mxu1 %v19783_v25  ;;  %8467 = vmatmul.bf16.vlgmr.msra.gmra.mxu0 %v19774_v37 }
 0x645   : > { %8515 = vmatpush.bf16.msrb.mxu0 %v15456_v15  ;;  %8524 = vmatpush.bf16.msrb.mxu1 %v15648_v50  ;;  %v15584_v15 = vor.u32 %v18390_v53, %v15583_v41  ;;  %v15711_v41 = vld [vmem:[#allocation4 + $0x1e68] sm:$0xf]  ;;  %v15441_v53 = vld [vmem:[#allocation4 + $0x1c58] sm:$0xf0] }
 0x646   : > { %8505 = vmatpush.bf16.msra.mxu3 %v15788_v28  ;;  %v18348_v28 = vld [vmem:[#allocation4 + $0x1c2c] sm:$0xf] }
 0x649   : > { %8516 = vmatpush.bf16.msrb.mxu0 %v15440_v48  ;;  %8525 = vmatpush.bf16.msrb.mxu1 %v15632_v51  ;;  %v15568_v51 = vor.u32 %v18386_v26, %v15567_v1  ;;  %v15696_v1 = vor.u32 %v18418_v14, %v15695_v10  ;;  %v18428_v10 = vld [vmem:[#allocation4 + $0x1eac] sm:$0xf] }
 0x64c   : > { %v7555_v27 = vpop.f32.mrf.mxu3 }
 0x64d   : > { %v7556_v20 = vadd.f32 %v7555_v27, %v7543_v39  ;;  %v19791_v7 = vpop.f32.mrf.mxu2  ;;  %8517 = vmatpush.bf16.msrb.mxu0 %v15424_v5  ;;  %8526 = vmatpush.bf16.msrb.mxu1 %v15616_v63  ;;  %v15744_v5 = vor.u32 %v18430_v52, %v15743_v62  ;;  %v15476_v63 = vor.u32 %v18360_v19, %v15473_v61  ;;  %v18404_v39 = vld [vmem:[#allocation4 + $0x1dec] sm:$0xf]  ;;  %v18410_v62 = vld [vmem:[#allocation4 + $0x1e14] sm:$0xf0]  ;;  %v15903_v52 = vld [vmem:[#allocation4 + $0x1fe8] sm:$0xf] }
 0x64e   : > { %v15460_v27 = vor.u32 %v18356_v4, %v15457_v23  ;;  %v18470_v19 = vld [vmem:[#allocation4 + $0x1ff4] sm:$0xf0] }
 0x64f   : > { %vm7613_vm0 = vcmp.gt.f32.partialorder %v7556_v20, 0.0  ;;  %v7617_v6 = vmul.f32 0.2, %v7556_v20  ;;  %v15904_v34 = vor.u32 %v18470_v19, %v15903_v52  ;;  %v15807_v52 = vld [vmem:[#allocation4 + $0x1f28] sm:$0xf] }
 0x650   : > { %v18446_v19 = vld [vmem:[#allocation4 + $0x1f34] sm:$0xf0] }
 0x651   : > { %v7621_v54 = vsel %vm7613_vm0, %v7556_v20, %v7617_v6  ;;  %8518 = vmatpush.bf16.msrb.mxu0 %v15408_v0  ;;  %8527 = vmatpush.bf16.msrb.mxu1 %v15600_v42  ;;  %v15652_v20 = vor.u32 %v18404_v39, %v15649_v49  ;;  %v18422_v0 = vld [vmem:[#allocation4 + $0x1e74] sm:$0xf0]  ;;  %v18352_v42 = vld [vmem:[#allocation4 + $0x1c4c] sm:$0xf]  ;;  %v15887_v49 = vld [vmem:[#allocation4 + $0x1fc8] sm:$0xf] }
 0x652   : > { %v19793_v50 = vpack.c.bf16 %v7621_v54, %v7621_v54  ;;  %v15712_v33 = vor.u32 %v18422_v0, %v15711_v41  ;;  %v15444_v29 = vor.u32 %v18352_v42, %v15441_v53  ;;  %v15425_v54 = vld [vmem:[#allocation4 + $0x1c38] sm:$0xf0]  ;;  %v18432_v41 = vld [vmem:[#allocation4 + $0x1ecc] sm:$0xf] }
 0x653   : > { %v15428_v26 = vor.u32 %v18348_v28, %v15425_v54  ;;  %v15855_v54 = vld [vmem:[#allocation4 + $0x1f88] sm:$0xf] }
 0x654   : > { %v7557_v2 = vpop.f32.mrf.mxu3  ;;  %8441 = vmatmul.bf16.vlgmr.msrb.gmra.mxu2 %v19793_v50  ;;  %8480 = vmatmul.bf16.vlgmr.msra.gmra.mxu1 %v19783_v25 }
 0x655   : > { %8563 = vmatpush.bf16.msra.mxu0 %v15524_v40  ;;  %v7596_v48 = vpop.f32.mrf.mxu2  ;;  %8528 = vmatpush.bf16.msrb.mxu1 %v15584_v15  ;;  %v15633_v40 = vld [vmem:[#allocation4 + $0x1dd8] sm:$0xf0]  ;;  %v7569_v15 = vadd.f32 %v19767_v31, %v6758_v13 }
 0x656   : > { %8519 = vmatmul.bf16.vlgmr.msrb.gmra.mxu0 %v19774_v37  ;;  %8537 = vmatpush.bf16.msrb.mxu2 %v15776_v43  ;;  %v15636_v6 = vor.u32 %v18400_v56, %v15633_v40  ;;  %v15617_v43 = vld [vmem:[#allocation4 + $0x1db8] sm:$0xf0]  ;;  %v18392_v48 = vld [vmem:[#allocation4 + $0x1d8c] sm:$0xf]  ;;  %v15871_v56 = vld [vmem:[#allocation4 + $0x1fa8] sm:$0xf] }
 0x657   : > { %v15620_v9 = vor.u32 %v18396_v32, %v15617_v43  ;;  %v15409_v2 = vld [vmem:[#allocation4 + $0x1c18] sm:$0xf0]  ;;  %v18462_v40 = vld [vmem:[#allocation4 + $0x1fb4] sm:$0xf0]  ;;  %v18376_v32 = vld [vmem:[#allocation4 + $0x1d0c] sm:$0xf] }
 0x658   : > { %v15412_v8 = vor.u32 %v18344_v58, %v15409_v2  ;;  %v15872_v14 = vor.u32 %v18462_v40, %v15871_v56  ;;  %v15537_v43 = vld [vmem:[#allocation4 + $0x1d18] sm:$0xf0]  ;;  %v18454_v58 = vld [vmem:[#allocation4 + $0x1f74] sm:$0xf0]  ;;  %v18420_v2 = vld [vmem:[#allocation4 + $0x1e6c] sm:$0xf] }
 0x659   : > { %8564 = vmatpush.bf16.msra.mxu0 %v15508_v16  ;;  %8529 = vmatpush.bf16.msrb.mxu1 %v15568_v51  ;;  %v7582_v16 = vadd.f32 %v19779_v24, %v7569_v15  ;;  %v15601_v51 = vld [vmem:[#allocation4 + $0x1d98] sm:$0xf0]  ;;  %v15680_v24 = vor.u32 %v18414_v47, %v15679_v11  ;;  %v18458_v15 = vld [vmem:[#allocation4 + $0x1f94] sm:$0xf0]  ;;  %v15540_v11 = vor.u32 %v18376_v32, %v15537_v43  ;;  %v15839_v47 = vld [vmem:[#allocation4 + $0x1f68] sm:$0xf] }
 0x65a   : > { %8538 = vmatpush.bf16.msrb.mxu2 %v15760_v57  ;;  %v15604_v61 = vor.u32 %v18392_v48, %v15601_v51  ;;  %v15840_v48 = vor.u32 %v18454_v58, %v15839_v47  ;;  %v18452_v56 = vld [vmem:[#allocation4 + $0x1f6c] sm:$0xf]  ;;  %v15841_v40 = vld [vmem:[#allocation4 + $0x1f78] sm:$0xf0]  ;;  %v18497_v32 = vld [vmem:[#allocation4 + $0x20cc] sm:$0xf0] }
 0x65b   : > { %v7595_v31 = vadd.f32 %v19791_v7, %v7582_v16  ;;  %v15777_v7 = vld [vmem:[#allocation4 + $0x1ef8] sm:$0xf0]  ;;  %v18424_v16 = vld [vmem:[#allocation4 + $0x1e8c] sm:$0xf]  ;;  %v18493_v47 = vld [vmem:[#allocation4 + $0x20ac] sm:$0xf0] }
 0x65d   : > { %8565 = vmatpush.bf16.msra.mxu0 %v15492_v38  ;;  %8530 = vmatpush.bf16.msrb.mxu1 %v15552_v35  ;;  %v15663_v38 = vld [vmem:[#allocation4 + $0x1e08] sm:$0xf]  ;;  %v18388_v35 = vld [vmem:[#allocation4 + $0x1d6c] sm:$0xf] }
 0x65e   : > { %8539 = vmatpush.bf16.msrb.mxu2 %v15744_v5  ;;  %v15585_v5 = vld [vmem:[#allocation4 + $0x1d78] sm:$0xf0]  ;;  %v15664_v55 = vor.u32 %v18410_v62, %v15663_v38  ;;  %v18450_v38 = vld [vmem:[#allocation4 + $0x1f54] sm:$0xf0] }
 0x65f   : > { %v15588_v23 = vor.u32 %v18388_v35, %v15585_v5  ;;  %v15681_v35 = vld [vmem:[#allocation4 + $0x1e38] sm:$0xf0]  ;;  %v15808_v5 = vor.u32 %v18446_v19, %v15807_v52  ;;  %v15943_v52 = vld [vmem:[#allocation4 + $0x2040] sm:$0xf]  ;;  %v18481_v19 = vld [vmem:[#allocation4 + $0x204c] sm:$0xf0] }
 0x661   : > { %8566 = vmatpush.bf16.msra.mxu0 %v15476_v63  ;;  %8531 = vmatpush.bf16.msrb.mxu1 %v15536_v44  ;;  %v18436_v63 = vld [vmem:[#allocation4 + $0x1eec] sm:$0xf]  ;;  %v18466_v44 = vld [vmem:[#allocation4 + $0x1fd4] sm:$0xf0] }
 0x662   : > { %8540 = vmatpush.bf16.msrb.mxu2 %v15728_v36  ;;  %v15780_v39 = vor.u32 %v18436_v63, %v15777_v7  ;;  %v18384_v36 = vld [vmem:[#allocation4 + $0x1d4c] sm:$0xf]  ;;  %v15888_v42 = vor.u32 %v18466_v44, %v15887_v49  ;;  %v18442_v7 = vld [vmem:[#allocation4 + $0x1f14] sm:$0xf0] }
 0x663   : > { %v18464_v44 = vld [vmem:[#allocation4 + $0x1fcc] sm:$0xf] }
 0x664   : > { %8493 = vmatmul.bf16.vlgmr.msra.gmra.mxu2 %v19793_v50  ;;  %8532 = vmatmul.bf16.vlgmr.msrb.gmra.mxu1 %v19783_v25 }
 0x665   : > { %8567 = vmatpush.bf16.msra.mxu0 %v15460_v27  ;;  %8576 = vmatpush.bf16.msra.mxu1 %v15652_v20  ;;  %v15569_v27 = vld [vmem:[#allocation4 + $0x1d58] sm:$0xf0] }
 0x666   : > { %8541 = vmatpush.bf16.msrb.mxu2 %v15712_v33  ;;  %v15761_v20 = vld [vmem:[#allocation4 + $0x1ed8] sm:$0xf0]  ;;  %v15572_v53 = vor.u32 %v18384_v36, %v15569_v27  ;;  %v18380_v33 = vld [vmem:[#allocation4 + $0x1d2c] sm:$0xf] }
 0x667   : > { %v15764_v13 = vor.u32 %v18432_v41, %v15761_v20  ;;  %v15889_v36 = vld [vmem:[#allocation4 + $0x1fd8] sm:$0xf0]  ;;  %v18460_v41 = vld [vmem:[#allocation4 + $0x1fac] sm:$0xf] }
 0x668   : > { %v15892_v27 = vor.u32 %v18464_v44, %v15889_v36  ;;  %v15873_v20 = vld [vmem:[#allocation4 + $0x1fb8] sm:$0xf0]  ;;  %v18521_v36 = vld [vmem:[#allocation4 + $0x218c] sm:$0xf0] }
 0x669   : > { %8568 = vmatpush.bf16.msra.mxu0 %v15444_v29  ;;  %8577 = vmatpush.bf16.msra.mxu1 %v15636_v6  ;;  %v15553_v29 = vld [vmem:[#allocation4 + $0x1d38] sm:$0xf0] }
 0x66a   : > { %8542 = vmatpush.bf16.msrb.mxu2 %v15696_v1  ;;  %v15745_v6 = vld [vmem:[#allocation4 + $0x1eb8] sm:$0xf0] }
 0x66b   : > { %v15748_v28 = vor.u32 %v18428_v10, %v15745_v6  ;;  %v15729_v1 = vld [vmem:[#allocation4 + $0x1e98] sm:$0xf0] }
 0x66c   : > { %v7607_v57 = vpop.f32.mrf.mxu3  ;;  %v15825_v10 = vld [vmem:[#allocation4 + $0x1f58] sm:$0xf0] }
 0x66d   : > { %v7608_v18 = vadd.f32 %v7607_v57, %v7595_v31  ;;  %8569 = vmatpush.bf16.msra.mxu0 %v15428_v26  ;;  %8578 = vmatpush.bf16.msra.mxu1 %v15620_v9  ;;  %v15856_v26 = vor.u32 %v18458_v15, %v15855_v54  ;;  %v15732_v9 = vor.u32 %v18424_v16, %v15729_v1  ;;  %v15713_v31 = vld [vmem:[#allocation4 + $0x1e78] sm:$0xf0]  ;;  %v15823_v57 = vld [vmem:[#allocation4 + $0x1f48] sm:$0xf]  ;;  %v18501_v54 = vld [vmem:[#allocation4 + $0x20ec] sm:$0xf0] }
 0x66e   : > { %8543 = vmatpush.bf16.msrb.mxu2 %v15680_v24  ;;  %v15716_v51 = vor.u32 %v18420_v2, %v15713_v31  ;;  %v15697_v24 = vld [vmem:[#allocation4 + $0x1e58] sm:$0xf0]  ;;  %v18440_v1 = vld [vmem:[#allocation4 + $0x1f0c] sm:$0xf]  ;;  %v15975_v2 = vld [vmem:[#allocation4 + $0x2080] sm:$0xf] }
 0x66f   : > { %vm7614_vm1 = vcmp.gt.f32.partialorder %v7608_v18, 0.0  ;;  %v7618_v22 = vmul.f32 0.2, %v7608_v18  ;;  %v18489_v31 = vld [vmem:[#allocation4 + $0x208c] sm:$0xf0] }
 0x671   : > { %v7622_v3 = vsel %vm7614_vm1, %v7608_v18, %v7618_v22  ;;  %8570 = vmatpush.bf16.msra.mxu0 %v15412_v8  ;;  %8579 = vmatpush.bf16.msra.mxu1 %v15604_v61  ;;  %v18416_v18 = vld [vmem:[#allocation4 + $0x1e4c] sm:$0xf]  ;;  %v15824_v8 = vor.u32 %v18450_v38, %v15823_v57  ;;  %v15791_v22 = vld [vmem:[#allocation4 + $0x1f08] sm:$0xf]  ;;  %v18485_v57 = vld [vmem:[#allocation4 + $0x206c] sm:$0xf0] }
 0x672   : > { %v19804_v4 = vpack.c.bf16 %v7622_v3, %v7622_v3  ;;  %8544 = vmatpush.bf16.msrb.mxu2 %v15664_v55  ;;  %v15700_v62 = vor.u32 %v18416_v18, %v15697_v24  ;;  %v18412_v61 = vld [vmem:[#allocation4 + $0x1e2c] sm:$0xf]  ;;  %v15665_v55 = vld [vmem:[#allocation4 + $0x1e18] sm:$0xf0]  ;;  %v16151_v38 = vld [vmem:[#allocation4 + $0x21e0] sm:$0xf] }
 0x673   : > { %v15684_v63 = vor.u32 %v18412_v61, %v15681_v35  ;;  %v18408_v3 = vld [vmem:[#allocation4 + $0x1e0c] sm:$0xf]  ;;  %v16135_v61 = vld [vmem:[#allocation4 + $0x21c0] sm:$0xf]  ;;  %v15944_v35 = vor.u32 %v18481_v19, %v15943_v52 }
 0x674   : > { %v7609_v0 = vpop.f32.mrf.mxu3  ;;  %8454 = vmatmul.bf16.vlgmr.msrb.gmra.mxu3 %v19804_v4  ;;  %8571 = vmatmul.bf16.vlgmr.msra.gmra.mxu0 %v19774_v37  ;;  %v15556_v37 = vor.u32 %v18380_v33, %v15553_v29  ;;  %v15844_v33 = vor.u32 %v18452_v56, %v15841_v40  ;;  %v18448_v29 = vld [vmem:[#allocation4 + $0x1f4c] sm:$0xf]  ;;  %v16231_v52 = vld [vmem:[#allocation4 + $0x2280] sm:$0xf] }
 0x675   : > { %8550 = vmatpush.bf16.msrb.mxu3 %v15904_v34  ;;  %8580 = vmatpush.bf16.msra.mxu1 %v15588_v23  ;;  %v18468_v34 = vld [vmem:[#allocation4 + $0x1fec] sm:$0xf]  ;;  %v15905_v23 = vld [vmem:[#allocation4 + $0x1ff8] sm:$0xf0]  ;;  %v15876_v0 = vor.u32 %v18460_v41, %v15873_v20  ;;  %v15828_v6 = vor.u32 %v18448_v29, %v15825_v10  ;;  %v16025_v41 = vld [vmem:[#allocation4 + $0x20f0] sm:$0xf0] }
 0x676   : > { %8589 = vmatpush.bf16.msra.mxu2 %v15780_v39  ;;  %v15792_v39 = vor.u32 %v18442_v7, %v15791_v22  ;;  %v15908_v49 = vor.u32 %v18468_v34, %v15905_v23  ;;  %v18477_v22 = vld [vmem:[#allocation4 + $0x202c] sm:$0xf0]  ;;  %v16119_v7 = vld [vmem:[#allocation4 + $0x21a0] sm:$0xf]  ;;  %v18495_v10 = vld [vmem:[#allocation4 + $0x20c4] sm:$0xf] }
 0x677   : > { %8545 = vmatmul.bf16.vlgmr.msrb.gmra.mxu2 %v19793_v50  ;;  %v18525_v34 = vld [vmem:[#allocation4 + $0x21ac] sm:$0xf0] }
 0x678   : > { %v16120_v23 = vor.u32 %v18525_v34, %v16119_v7  ;;  %v18565_v29 = vld [vmem:[#allocation4 + $0x22ec] sm:$0xf0]  ;;  %v16153_v7 = vld [vmem:[#allocation4 + $0x21f0] sm:$0xf0] }
 0x679   : > { %8551 = vmatpush.bf16.msrb.mxu3 %v15888_v42  ;;  %8581 = vmatpush.bf16.msra.mxu1 %v15572_v53  ;;  %v18456_v42 = vld [vmem:[#allocation4 + $0x1f8c] sm:$0xf]  ;;  %v15857_v53 = vld [vmem:[#allocation4 + $0x1f98] sm:$0xf0]  ;;  %v18549_v34 = vld [vmem:[#allocation4 + $0x226c] sm:$0xf0] }
 0x67a   : > { %8590 = vmatpush.bf16.msra.mxu2 %v15764_v13  ;;  %v15860_v13 = vor.u32 %v18456_v42, %v15857_v53  ;;  %v16087_v42 = vld [vmem:[#allocation4 + $0x2160] sm:$0xf]  ;;  %v18517_v53 = vld [vmem:[#allocation4 + $0x216c] sm:$0xf0] }
 0x67d   : > { %8552 = vmatpush.bf16.msrb.mxu3 %v15872_v14  ;;  %8582 = vmatpush.bf16.msra.mxu1 %v15556_v37  ;;  %v18444_v14 = vld [vmem:[#allocation4 + $0x1f2c] sm:$0xf]  ;;  %v15809_v37 = vld [vmem:[#allocation4 + $0x1f38] sm:$0xf0] }
 0x67e   : > { %8591 = vmatpush.bf16.msra.mxu2 %v15748_v28  ;;  %v16023_v28 = vld [vmem:[#allocation4 + $0x20e0] sm:$0xf]  ;;  %v15812_v43 = vor.u32 %v18444_v14, %v15809_v37 }
 0x67f   : > { %v16024_v15 = vor.u32 %v18501_v54, %v16023_v28  ;;  %v16071_v28 = vld [vmem:[#allocation4 + $0x2140] sm:$0xf]  ;;  %v18513_v54 = vld [vmem:[#allocation4 + $0x214c] sm:$0xf0] }
 0x681   : > { %8553 = vmatpush.bf16.msrb.mxu3 %v15856_v26  ;;  %8583 = vmatpush.bf16.msra.mxu1 %v15540_v11  ;;  %v15793_v26 = vld [vmem:[#allocation4 + $0x1f18] sm:$0xf0] }
 0x682   : > { %8592 = vmatpush.bf16.msra.mxu2 %v15732_v9  ;;  %9411 = vmatpush.bf16.msrb.mxu0 %v16024_v15  ;;  %v15796_v11 = vor.u32 %v18440_v1, %v15793_v26  ;;  %v15991_v9 = vld [vmem:[#allocation4 + $0x20a0] sm:$0xf] }
 0x683   : > { %v15992_v58 = vor.u32 %v18493_v47, %v15991_v9  ;;  %v16263_v15 = vld [vmem:[#allocation4 + $0x22c0] sm:$0xf]  ;;  %v18509_v9 = vld [vmem:[#allocation4 + $0x212c] sm:$0xf0] }
 0x684   : > { %8506 = vmatmul.bf16.vlgmr.msra.gmra.mxu3 %v19804_v4  ;;  %8584 = vmatmul.bf16.vlgmr.msra.gmra.mxu1 %v19783_v25  ;;  %v15668_v25 = vor.u32 %v18408_v3, %v15665_v55  ;;  %v16247_v47 = vld [vmem:[#allocation4 + $0x22a0] sm:$0xf] }
 0x685   : > { %8554 = vmatpush.bf16.msrb.mxu3 %v15840_v48  ;;  %v15976_v48 = vor.u32 %v18489_v31, %v15975_v2 }
 0x686   : > { %8593 = vmatpush.bf16.msra.mxu2 %v15716_v51  ;;  %v15959_v51 = vld [vmem:[#allocation4 + $0x2060] sm:$0xf] }
 0x687   : > { %v15960_v24 = vor.u32 %v18485_v57, %v15959_v51  ;;  %v18487_v51 = vld [vmem:[#allocation4 + $0x2084] sm:$0xf]  ;;  %v15977_v57 = vld [vmem:[#allocation4 + $0x2090] sm:$0xf0] }
 0x689   : > { %8555 = vmatpush.bf16.msrb.mxu3 %v15824_v8  ;;  %v18533_v8 = vld [vmem:[#allocation4 + $0x21ec] sm:$0xf0] }
 0x68a   : > { %8594 = vmatpush.bf16.msra.mxu2 %v15700_v62  ;;  %v16152_v62 = vor.u32 %v18533_v8, %v16151_v38  ;;  %v16039_v8 = vld [vmem:[#allocation4 + $0x2100] sm:$0xf] }
 0x68c   : > { %9424 = vmatpush.bf16.msrb.mxu1 %v16152_v62  ;;  %v18505_v62 = vld [vmem:[#allocation4 + $0x210c] sm:$0xf0] }
 0x68d   : > { %8556 = vmatpush.bf16.msrb.mxu3 %v15808_v5  ;;  %v18529_v5 = vld [vmem:[#allocation4 + $0x21cc] sm:$0xf0]  ;;  %v16040_v19 = vor.u32 %v18505_v62, %v16039_v8  ;;  %v18563_v8 = vld [vmem:[#allocation4 + $0x22e4] sm:$0xf]  ;;  %v16281_v62 = vld [vmem:[#allocation4 + $0x22f0] sm:$0xf0] }
 0x68e   : > { %8595 = vmatpush.bf16.msra.mxu2 %v15684_v63  ;;  %v16136_v63 = vor.u32 %v18529_v5, %v16135_v61  ;;  %v18553_v61 = vld [vmem:[#allocation4 + $0x228c] sm:$0xf0]  ;;  %v15961_v5 = vld [vmem:[#allocation4 + $0x2070] sm:$0xf0] }
 0x690   : > { %9425 = vmatpush.bf16.msrb.mxu1 %v16136_v63  ;;  %v16232_v63 = vor.u32 %v18553_v61, %v16231_v52  ;;  %v16391_v61 = vld [vmem:[#allocation4 + $0x23c0] sm:$0xf] }
 0x691   : > { %8557 = vmatpush.bf16.msrb.mxu3 %v15792_v39  ;;  %v15911_v39 = vld [vmem:[#allocation4 + $0x2000] sm:$0xf] }
 0x692   : > { %8596 = vmatpush.bf16.msra.mxu2 %v15668_v25  ;;  %v18473_v25 = vld [vmem:[#allocation4 + $0x200c] sm:$0xf0] }
 0x693   : > { %v15912_v44 = vor.u32 %v18473_v25, %v15911_v39  ;;  %v15945_v25 = vld [vmem:[#allocation4 + $0x2050] sm:$0xf0] }
 0x694   : > { %8558 = vmatmul.bf16.vlgmr.msrb.gmra.mxu3 %v19804_v4  ;;  %9426 = vmatpush.bf16.msrb.mxu1 %v16120_v23  ;;  %v18479_v23 = vld [vmem:[#allocation4 + $0x2044] sm:$0xf] }
 0x695   : > { %8602 = vmatpush.bf16.msra.mxu3 %v15908_v49  ;;  %8597 = vmatmul.bf16.vlgmr.msra.gmra.mxu2 %v19793_v50  ;;  %v16007_v50 = vld [vmem:[#allocation4 + $0x20c0] sm:$0xf] }
 0x696   : > { %v16008_v16 = vor.u32 %v18497_v32, %v16007_v50  ;;  %v16103_v49 = vld [vmem:[#allocation4 + $0x2180] sm:$0xf]  ;;  %v18561_v50 = vld [vmem:[#allocation4 + $0x22cc] sm:$0xf0]  ;;  %v18491_v32 = vld [vmem:[#allocation4 + $0x20a4] sm:$0xf] }
 0x697   : > { %v16104_v20 = vor.u32 %v18521_v36, %v16103_v49  ;;  %v16264_v1 = vor.u32 %v18561_v50, %v16263_v15  ;;  %v18527_v49 = vld [vmem:[#allocation4 + $0x21c4] sm:$0xf] }
 0x698   : > { %9412 = vmatpush.bf16.msrb.mxu0 %v16008_v16  ;;  %v16072_v16 = vor.u32 %v18513_v54, %v16071_v28  ;;  %v16183_v28 = vld [vmem:[#allocation4 + $0x2220] sm:$0xf]  ;;  %v18541_v54 = vld [vmem:[#allocation4 + $0x222c] sm:$0xf0] }
 0x699   : > { %8603 = vmatpush.bf16.msra.mxu3 %v15892_v27  ;;  %v18499_v27 = vld [vmem:[#allocation4 + $0x20e4] sm:$0xf]  ;;  %9427 = vmatpush.bf16.msrb.mxu1 %v16104_v20  ;;  %v16184_v50 = vor.u32 %v18541_v54, %v16183_v28  ;;  %v16041_v28 = vld [vmem:[#allocation4 + $0x2110] sm:$0xf0] }
 0x69a   : > { %v18551_v54 = vld [vmem:[#allocation4 + $0x2284] sm:$0xf] }
 0x69c   : > { %9413 = vmatpush.bf16.msrb.mxu0 %v15992_v58 }
 0x69d   : > { %8604 = vmatpush.bf16.msra.mxu3 %v15876_v0  ;;  %v16028_v0 = vor.u32 %v18499_v27, %v16025_v41  ;;  %v15948_v27 = vor.u32 %v18479_v23, %v15945_v25  ;;  %v16375_v23 = vld [vmem:[#allocation4 + $0x23a0] sm:$0xf] }
 0x6a0   : > { %9414 = vmatpush.bf16.msrb.mxu0 %v15976_v48  ;;  %v18557_v48 = vld [vmem:[#allocation4 + $0x22ac] sm:$0xf0] }
 0x6a1   : > { %8605 = vmatpush.bf16.msra.mxu3 %v15860_v13  ;;  %v16279_v13 = vld [vmem:[#allocation4 + $0x22e0] sm:$0xf]  ;;  %v16248_v38 = vor.u32 %v18557_v48, %v16247_v47  ;;  %v18597_v48 = vld [vmem:[#allocation4 + $0x23ec] sm:$0xf0] }
 0x6a2   : > { %v16280_v14 = vor.u32 %v18565_v29, %v16279_v13  ;;  %v18475_v13 = vld [vmem:[#allocation4 + $0x2024] sm:$0xf]  ;;  %v16167_v47 = vld [vmem:[#allocation4 + $0x2200] sm:$0xf] }
 0x6a3   : > { %v18523_v29 = vld [vmem:[#allocation4 + $0x21a4] sm:$0xf] }
 0x6a4   : > { %9415 = vmatpush.bf16.msrb.mxu0 %v15960_v24  ;;  %9437 = vmatpush.bf16.msrb.mxu2 %v16280_v14  ;;  %v15980_v24 = vor.u32 %v18487_v51, %v15977_v57  ;;  %v18515_v51 = vld [vmem:[#allocation4 + $0x2164] sm:$0xf]  ;;  %v16089_v57 = vld [vmem:[#allocation4 + $0x2170] sm:$0xf0] }
 0x6a5   : > { %8606 = vmatpush.bf16.msra.mxu3 %v15844_v33  ;;  %v16088_v33 = vor.u32 %v18517_v53, %v16087_v42  ;;  %v18545_v42 = vld [vmem:[#allocation4 + $0x224c] sm:$0xf0] }
 0x6a7   : > { %9428 = vmatpush.bf16.msrb.mxu1 %v16088_v33  ;;  %v15929_v33 = vld [vmem:[#allocation4 + $0x2030] sm:$0xf0] }
 0x6a8   : > { %9416 = vmatpush.bf16.msrb.mxu0 %v15944_v35  ;;  %9438 = vmatpush.bf16.msrb.mxu2 %v16264_v1  ;;  %v18483_v35 = vld [vmem:[#allocation4 + $0x2064] sm:$0xf] }
 0x6a9   : > { %8607 = vmatpush.bf16.msra.mxu3 %v15828_v6  ;;  %v16009_v6 = vld [vmem:[#allocation4 + $0x20d0] sm:$0xf0] }
 0x6aa   : > { %v16012_v37 = vor.u32 %v18495_v10, %v16009_v6  ;;  %v15932_v10 = vor.u32 %v18475_v13, %v15929_v33  ;;  %v16121_v6 = vld [vmem:[#allocation4 + $0x21b0] sm:$0xf0]  ;;  %v16359_v33 = vld [vmem:[#allocation4 + $0x2380] sm:$0xf] }
 0x6ab   : > { %9429 = vmatpush.bf16.msrb.mxu1 %v16072_v16  ;;  %v18519_v16 = vld [vmem:[#allocation4 + $0x2184] sm:$0xf] }
 0x6ac   : > { %9439 = vmatpush.bf16.msrb.mxu2 %v16248_v38 }
 0x6ad   : > { %8608 = vmatpush.bf16.msra.mxu3 %v15812_v43  ;;  %v15993_v43 = vld [vmem:[#allocation4 + $0x20b0] sm:$0xf0] }
 0x6ae   : > { %v15996_v26 = vor.u32 %v18491_v32, %v15993_v43  ;;  %v18471_v32 = vld [vmem:[#allocation4 + $0x2004] sm:$0xf]  ;;  %v15913_v43 = vld [vmem:[#allocation4 + $0x2010] sm:$0xf0] }
 0x6b0   : > { %9440 = vmatpush.bf16.msrb.mxu2 %v16232_v63 }
 0x6b1   : > { %8609 = vmatpush.bf16.msra.mxu3 %v15796_v11  ;;  %v19814_v18 = vpop.f32.mrf.mxu0  ;;  %v16055_v11 = vld [vmem:[#allocation4 + $0x2120] sm:$0xf] }
 0x6b2   : > { %v16056_v31 = vor.u32 %v18509_v9, %v16055_v11  ;;  %v16105_v11 = vld [vmem:[#allocation4 + $0x2190] sm:$0xf0] }
 0x6b3   : > { %v16108_v9 = vor.u32 %v18519_v16, %v16105_v11  ;;  %v16343_v16 = vld [vmem:[#allocation4 + $0x2360] sm:$0xf]  ;;  %v18547_v11 = vld [vmem:[#allocation4 + $0x2264] sm:$0xf] }
 0x6b4   : > { %8610 = vmatmul.bf16.vlgmr.msra.gmra.mxu3 %v19804_v4  ;;  %v15927_v4 = vld [vmem:[#allocation4 + $0x2020] sm:$0xf]  ;;  %9430 = vmatpush.bf16.msrb.mxu1 %v16056_v31 }
 0x6b5   : > { %v15928_v55 = vor.u32 %v18477_v22, %v15927_v4  ;;  %v15964_v4 = vor.u32 %v18483_v35, %v15961_v5  ;;  %v18531_v22 = vld [vmem:[#allocation4 + $0x21e4] sm:$0xf]  ;;  %v18593_v35 = vld [vmem:[#allocation4 + $0x23cc] sm:$0xf0] }
 0x6b6   : > { %v16392_v63 = vor.u32 %v18593_v35, %v16391_v61  ;;  %v16311_v61 = vld [vmem:[#allocation4 + $0x2320] sm:$0xf]  ;;  %v18573_v35 = vld [vmem:[#allocation4 + $0x232c] sm:$0xf0] }
 0x6b7   : > { %9417 = vmatpush.bf16.msrb.mxu0 %v15928_v55  ;;  %v16215_v55 = vld [vmem:[#allocation4 + $0x2260] sm:$0xf] }
 0x6b8   : > { %9431 = vmatpush.bf16.msrb.mxu1 %v16040_v19  ;;  %v16216_v39 = vor.u32 %v18549_v34, %v16215_v55  ;;  %v16284_v19 = vor.u32 %v18563_v8, %v16281_v62  ;;  %v16265_v55 = vld [vmem:[#allocation4 + $0x22d0] sm:$0xf0] }
 0x6b9   : > { %v8418_v3 = vpop.f32.mrf.mxu0  ;;  %v16201_v8 = vld [vmem:[#allocation4 + $0x2250] sm:$0xf0] }
 0x6ba   : > { %v16156_v3 = vor.u32 %v18531_v22, %v16153_v7  ;;  %9441 = vmatpush.bf16.msrb.mxu2 %v16216_v39  ;;  %v16073_v22 = vld [vmem:[#allocation4 + $0x2150] sm:$0xf0]  ;;  %v18559_v7 = vld [vmem:[#allocation4 + $0x22c4] sm:$0xf]  ;;  %v18589_v39 = vld [vmem:[#allocation4 + $0x23ac] sm:$0xf0] }
 0x6bb   : > { %9418 = vmatpush.bf16.msrb.mxu0 %v15912_v44  ;;  %v16137_v44 = vld [vmem:[#allocation4 + $0x21d0] sm:$0xf0]  ;;  %v16268_v34 = vor.u32 %v18559_v7, %v16265_v55  ;;  %v16376_v25 = vor.u32 %v18589_v39, %v16375_v23  ;;  %v18502_v55 = vld [vmem:[#allocation4 + $0x20f4] sm:$0xf0]  ;;  %v16015_v39 = vld [vmem:[#allocation4 + $0x20c8] sm:$0xf] }
 0x6bc   : > { %9476 = vmatpush.bf16.msra.mxu1 %v16156_v3  ;;  %v16140_v41 = vor.u32 %v18527_v49, %v16137_v44  ;;  %v18507_v49 = vld [vmem:[#allocation4 + $0x2124] sm:$0xf]  ;;  %v16057_v44 = vld [vmem:[#allocation4 + $0x2130] sm:$0xf0] }
 0x6bf   : > { %9463 = vmatpush.bf16.msra.mxu0 %v16028_v0  ;;  %v16199_v0 = vld [vmem:[#allocation4 + $0x2240] sm:$0xf] }
 0x6c0   : > { %9477 = vmatpush.bf16.msra.mxu1 %v16140_v41  ;;  %v16200_v53 = vor.u32 %v18545_v42, %v16199_v0  ;;  %v16060_v41 = vor.u32 %v18507_v49, %v16057_v44  ;;  %v16249_v0 = vld [vmem:[#allocation4 + $0x22b0] sm:$0xf0]  ;;  %v18569_v44 = vld [vmem:[#allocation4 + $0x230c] sm:$0xf0] }
 0x6c1   : > { %v19816_v56 = vpop.f32.mrf.mxu1  ;;  %v19818_v40 = vpop.f32.mrf.mxu0  ;;  %v19828_v42 = vld [vmem:[#allocation10 + $0x7] ss:$8 sm:$0xf] }
 0x6c2   : > { %9442 = vmatpush.bf16.msrb.mxu2 %v16200_v53 }
 0x6c3   : > { %9464 = vmatpush.bf16.msra.mxu0 %v16012_v37  ;;  %v16124_v37 = vor.u32 %v18523_v29, %v16121_v6  ;;  %v18585_v29 = vld [vmem:[#allocation4 + $0x238c] sm:$0xf0] }
 0x6c4   : > { %v16360_v6 = vor.u32 %v18585_v29, %v16359_v33 }
 0x6c5   : > { %9478 = vmatpush.bf16.msra.mxu1 %v16124_v37  ;;  %v18503_v37 = vld [vmem:[#allocation4 + $0x2104] sm:$0xf] }
 0x6c6   : > { %9443 = vmatpush.bf16.msrb.mxu2 %v16184_v50  ;;  %v16233_v50 = vld [vmem:[#allocation4 + $0x2290] sm:$0xf0] }
 0x6c7   : > { %9465 = vmatpush.bf16.msra.mxu0 %v15996_v26  ;;  %v15916_v26 = vor.u32 %v18471_v32, %v15913_v43  ;;  %v7759_v32 = vperm.slane %v19828_v42, 0  ;;  %v16236_v43 = vor.u32 %v18551_v54, %v16233_v50  ;;  %v15999_v50 = vld [vmem:[#allocation4 + $0x20a8] sm:$0xf] }
 0x6c9   : > { %v8431_v58 = vpop.f32.mrf.mxu1  ;;  %v8470_v2 = vpop.f32.mrf.mxu0  ;;  %9479 = vmatpush.bf16.msra.mxu1 %v16108_v9  ;;  %v16217_v9 = vld [vmem:[#allocation4 + $0x2270] sm:$0xf0] }
 0x6ca   : > { %v18537_v58 = vld [vmem:[#allocation4 + $0x220c] sm:$0xf0]  ;;  %v16407_v2 = vld [vmem:[#allocation4 + $0x23e0] sm:$0xf] }
 0x6cb   : > { %9466 = vmatpush.bf16.msra.mxu0 %v15980_v24  ;;  %v16168_v31 = vor.u32 %v18537_v58, %v16167_v47  ;;  %v16408_v38 = vor.u32 %v18597_v48, %v16407_v2  ;;  %v16092_v24 = vor.u32 %v18515_v51, %v16089_v57  ;;  %v16220_v58 = vor.u32 %v18547_v11, %v16217_v9  ;;  %v16327_v48 = vld [vmem:[#allocation4 + $0x2340] sm:$0xf]  ;;  %v18577_v51 = vld [vmem:[#allocation4 + $0x234c] sm:$0xf0] }
 0x6cc   : > { %v8417_v2 = vadd.f32 %v19814_v18, %v7759_v32  ;;  %v16312_v18 = vor.u32 %v18573_v35, %v16311_v61  ;;  %v18494_v32 = vld [vmem:[#allocation4 + $0x20b4] sm:$0xf0]  ;;  %v16159_v61 = vld [vmem:[#allocation4 + $0x21e8] sm:$0xf] }
 0x6cd   : > { %9444 = vmatpush.bf16.msrb.mxu2 %v16168_v31  ;;  %9450 = vmatpush.bf16.msrb.mxu3 %v16408_v38  ;;  %v16328_v38 = vor.u32 %v18577_v51, %v16327_v48  ;;  %v18490_v48 = vld [vmem:[#allocation4 + $0x2094] sm:$0xf0]  ;;  %v18587_v51 = vld [vmem:[#allocation4 + $0x23a4] sm:$0xf] }
 0x6ce   : > { %9480 = vmatpush.bf16.msra.mxu1 %v16092_v24  ;;  %v8430_v57 = vadd.f32 %v19816_v56, %v8417_v2  ;;  %v18543_v24 = vld [vmem:[#allocation4 + $0x2244] sm:$0xf]  ;;  %v16000_v2 = vor.u32 %v18494_v32, %v15999_v50  ;;  %v18534_v35 = vld [vmem:[#allocation4 + $0x21f4] sm:$0xf0] }
 0x6cf   : > { %9467 = vmatpush.bf16.msra.mxu0 %v15964_v4  ;;  %v18511_v4 = vld [vmem:[#allocation4 + $0x2144] sm:$0xf]  ;;  %v16204_v62 = vor.u32 %v18543_v24, %v16201_v8 }
 0x6d0   : > { %v16076_v3 = vor.u32 %v18511_v4, %v16073_v22  ;;  %v18539_v4 = vld [vmem:[#allocation4 + $0x2224] sm:$0xf]  ;;  %v16185_v22 = vld [vmem:[#allocation4 + $0x2230] sm:$0xf0] }
 0x6d1   : > { %v19820_v36 = vpop.f32.mrf.mxu1  ;;  %9489 = vmatpush.bf16.msra.mxu2 %v16284_v19  ;;  %9451 = vmatpush.bf16.msrb.mxu3 %v16392_v63  ;;  %v16188_v56 = vor.u32 %v18539_v4, %v16185_v22 }
 0x6d2   : > { %9481 = vmatpush.bf16.msra.mxu1 %v16076_v3  ;;  %v16031_v3 = vld [vmem:[#allocation4 + $0x20e8] sm:$0xf] }
 0x6d3   : > { %v19822_v20 = vpop.f32.mrf.mxu0  ;;  %9468 = vmatpush.bf16.msra.mxu0 %v15948_v27  ;;  %v18555_v27 = vld [vmem:[#allocation4 + $0x22a4] sm:$0xf]  ;;  %v16032_v49 = vor.u32 %v18502_v55, %v16031_v3  ;;  %v15951_v55 = vld [vmem:[#allocation4 + $0x2048] sm:$0xf] }
 0x6d4   : > { %v16252_v13 = vor.u32 %v18555_v27, %v16249_v0  ;;  %v18535_v27 = vld [vmem:[#allocation4 + $0x2204] sm:$0xf] }
 0x6d5   : > { %9490 = vmatpush.bf16.msra.mxu2 %v16268_v34  ;;  %9452 = vmatpush.bf16.msrb.mxu3 %v16376_v25 }
 0x6d6   : > { %9482 = vmatpush.bf16.msra.mxu1 %v16060_v41  ;;  %v16169_v41 = vld [vmem:[#allocation4 + $0x2210] sm:$0xf0] }
 0x6d7   : > { %v19824_v14 = vpop.f32.mrf.mxu2  ;;  %9469 = vmatpush.bf16.msra.mxu0 %v15932_v10  ;;  %v16172_v29 = vor.u32 %v18535_v27, %v16169_v41 }
 0x6d9   : > { %v8483_v15 = vpop.f32.mrf.mxu1  ;;  %9491 = vmatpush.bf16.msra.mxu2 %v16252_v13  ;;  %9453 = vmatpush.bf16.msrb.mxu3 %v16360_v6  ;;  %v18498_v13 = vld [vmem:[#allocation4 + $0x20d4] sm:$0xf0]  ;;  %v16409_v6 = vld [vmem:[#allocation4 + $0x23f0] sm:$0xf0] }
 0x6da   : > { %v16044_v15 = vor.u32 %v18503_v37, %v16041_v28  ;;  %v7760_v37 = vperm.slane %v19828_v42, 1 }
 0x6db   : > { %v8522_v1 = vpop.f32.mrf.mxu0  ;;  %9470 = vmatpush.bf16.msra.mxu0 %v15916_v26 }
 0x6dc   : > { %v18581_v1 = vld [vmem:[#allocation4 + $0x236c] sm:$0xf0]  ;;  %9483 = vmatpush.bf16.msra.mxu1 %v16044_v15  ;;  %v16016_v15 = vor.u32 %v18498_v13, %v16015_v39 }
 0x6dd   : > { %9492 = vmatpush.bf16.msra.mxu2 %v16236_v43  ;;  %v16344_v26 = vor.u32 %v18581_v1, %v16343_v16  ;;  %v18591_v43 = vld [vmem:[#allocation4 + $0x23c4] sm:$0xf]  ;;  %v16393_v16 = vld [vmem:[#allocation4 + $0x23d0] sm:$0xf0]  ;;  %v8469_v1 = vadd.f32 %v19818_v40, %v7760_v37  ;;  %v18526_v37 = vld [vmem:[#allocation4 + $0x21b4] sm:$0xf0] }
 0x6de   : > { %v16396_v11 = vor.u32 %v18591_v43, %v16393_v16 }
 0x6df   : > { %v8444_v52 = vpop.f32.mrf.mxu2  ;;  %9454 = vmatpush.bf16.msrb.mxu3 %v16344_v26 }
 0x6e0   : > { %v8443_v52 = vadd.f32 %v19824_v14, %v8430_v57  ;;  %v16295_v14 = vld [vmem:[#allocation4 + $0x2300] sm:$0xf]  ;;  %v16377_v57 = vld [vmem:[#allocation4 + $0x23b0] sm:$0xf0] }
 0x6e1   : > { %v19826_v5 = vpop.f32.mrf.mxu1  ;;  %9493 = vmatpush.bf16.msra.mxu2 %v16220_v58  ;;  %v16296_v33 = vor.u32 %v18569_v44, %v16295_v14  ;;  %v8482_v58 = vadd.f32 %v19820_v36, %v8469_v1  ;;  %v16380_v24 = vor.u32 %v18587_v51, %v16377_v57  ;;  %v18583_v36 = vld [vmem:[#allocation4 + $0x2384] sm:$0xf]  ;;  %v18530_v14 = vld [vmem:[#allocation4 + $0x21d4] sm:$0xf0]  ;;  %v7761_v44 = vperm.slane %v19828_v42, 2 }
 0x6e2   : > { %v15919_v1 = vld [vmem:[#allocation4 + $0x2008] sm:$0xf]  ;;  %v18500_v51 = vld [vmem:[#allocation4 + $0x20ec] sm:$0xf]  ;;  %v16033_v57 = vld [vmem:[#allocation4 + $0x20f8] sm:$0xf0] }
 0x6e3   : > { %9455 = vmatpush.bf16.msrb.mxu3 %v16328_v38 }
 0x6e5   : > { %9494 = vmatpush.bf16.msra.mxu2 %v16204_v62 }
 0x6e7   : > { %v19830_v53 = vpop.f32.mrf.mxu2  ;;  %9456 = vmatpush.bf16.msrb.mxu3 %v16312_v18 }
 0x6e8   : > { %v8495_v38 = vadd.f32 %v19830_v53, %v8482_v58  ;;  %v16160_v53 = vor.u32 %v18534_v35, %v16159_v61  ;;  %v18522_v58 = vld [vmem:[#allocation4 + $0x2194] sm:$0xf0]  ;;  %v16036_v35 = vor.u32 %v18500_v51, %v16033_v57  ;;  %v16161_v51 = vld [vmem:[#allocation4 + $0x21f8] sm:$0xf0] }
 0x6e9   : > { %v8535_v10 = vpop.f32.mrf.mxu1  ;;  %9495 = vmatpush.bf16.msra.mxu2 %v16188_v56  ;;  %v18482_v56 = vld [vmem:[#allocation4 + $0x2054] sm:$0xf0] }
 0x6ea   : > { %v18595_v10 = vld [vmem:[#allocation4 + $0x23e4] sm:$0xf]  ;;  %v15952_v13 = vor.u32 %v18482_v56, %v15951_v55  ;;  %v18566_v61 = vld [vmem:[#allocation4 + $0x22f4] sm:$0xf0] }
 0x6eb   : > { %v16412_v28 = vor.u32 %v18595_v10, %v16409_v6  ;;  %9457 = vmatpush.bf16.msrb.mxu3 %v16296_v33  ;;  %v18478_v10 = vld [vmem:[#allocation4 + $0x2034] sm:$0xf0]  ;;  %v16127_v6 = vld [vmem:[#allocation4 + $0x21a8] sm:$0xf] }
 0x6ec   : > { %v16128_v16 = vor.u32 %v18526_v37, %v16127_v6  ;;  %v16063_v6 = vld [vmem:[#allocation4 + $0x2128] sm:$0xf]  ;;  %v18510_v37 = vld [vmem:[#allocation4 + $0x2134] sm:$0xf0] }
 0x6ed   : > { %9496 = vmatpush.bf16.msra.mxu2 %v16172_v29  ;;  %v15935_v29 = vld [vmem:[#allocation4 + $0x2028] sm:$0xf] }
 0x6ee   : > { %v15936_v43 = vor.u32 %v18478_v10, %v15935_v29 }
 0x6ef   : > { %v8496_v31 = vpop.f32.mrf.mxu2  ;;  %9502 = vmatpush.bf16.msra.mxu3 %v16412_v28  ;;  %v18575_v28 = vld [vmem:[#allocation4 + $0x2344] sm:$0xf] }
 0x6f0   : > { %v15983_v31 = vld [vmem:[#allocation4 + $0x2088] sm:$0xf] }
 0x6f1   : > { %v19833_v47 = vpop.f32.mrf.mxu0  ;;  %v15984_v40 = vor.u32 %v18490_v48, %v15983_v31  ;;  %v16313_v31 = vld [vmem:[#allocation4 + $0x2330] sm:$0xf0] }
 0x6f3   : > { %9503 = vmatpush.bf16.msra.mxu3 %v16396_v11  ;;  %v18474_v11 = vld [vmem:[#allocation4 + $0x2014] sm:$0xf0] }
 0x6f7   : > { %v8455_v19 = vpop.f32.mrf.mxu3  ;;  %9504 = vmatpush.bf16.msra.mxu3 %v16380_v24  ;;  %v16095_v24 = vld [vmem:[#allocation4 + $0x2168] sm:$0xf] }
 0x6f8   : > { %v8456_v63 = vadd.f32 %v8455_v19, %v8443_v52  ;;  %v15967_v52 = vld [vmem:[#allocation4 + $0x2068] sm:$0xf]  ;;  %v18486_v19 = vld [vmem:[#allocation4 + $0x2074] sm:$0xf0] }
 0x6f9   : > { %v8574_v7 = vpop.f32.mrf.mxu0  ;;  %v15968_v3 = vor.u32 %v18486_v19, %v15967_v52  ;;  %v18518_v52 = vld [vmem:[#allocation4 + $0x2174] sm:$0xf0]  ;;  %v16287_v19 = vld [vmem:[#allocation4 + $0x22e8] sm:$0xf] }
 0x6fa   : > { %vm8615_vm2 = vcmp.gt.f32.partialorder %v8456_v63, 0.0  ;;  %v8619_v34 = vmul.f32 0.2, %v8456_v63  ;;  %v19838_v23 = vpop.f32.mrf.mxu2  ;;  %v16288_v55 = vor.u32 %v18566_v61, %v16287_v19  ;;  %v7762_v19 = vperm.slane %v19828_v42, 3  ;;  %v18528_v61 = vld [vmem:[#allocation4 + $0x21cc] sm:$0xf] }
 0x6fb   : > { %v18524_v42 = vld [vmem:[#allocation4 + $0x21ac] sm:$0xf] }
 0x6fc   : > { %v8623_v25 = vsel %vm8615_vm2, %v8456_v63, %v8619_v34  ;;  %v16361_v63 = vld [vmem:[#allocation4 + $0x2390] sm:$0xf0]  ;;  %v16143_v34 = vld [vmem:[#allocation4 + $0x21c8] sm:$0xf]  ;;  %vm11662_vm2 = vcmask 7168  }
 0x6fd   : > { %v19840_v0 = vpack.c.bf16 %v8623_v25, %v8623_v25  ;;  %v16364_v22 = vor.u32 %v18583_v36, %v16361_v63  ;;  %v18579_v25 = vld [vmem:[#allocation4 + $0x2364] sm:$0xf]  ;;  %v16144_v33 = vor.u32 %v18530_v14, %v16143_v34  ;;  %v18496_v36 = vld [vmem:[#allocation4 + $0x20cc] sm:$0xf]  ;;  %v16079_v34 = vld [vmem:[#allocation4 + $0x2148] sm:$0xf] }
 0x6fe   : > { %v18567_v63 = vld [vmem:[#allocation4 + $0x2304] sm:$0xf]  ;;  %v18514_v14 = vld [vmem:[#allocation4 + $0x2154] sm:$0xf0] }
 0x6ff   : > { %v8457_v54 = vpop.f32.mrf.mxu3  ;;  %9419 = vmatmul.bf16.vlgmr.msrb.gmra.mxu0 %v19840_v0  ;;  %9505 = vmatpush.bf16.msra.mxu3 %v16364_v22 }
 0x700   : > { %9515 = vmatpush.bf16.msrb.mxu0 %v16032_v49  ;;  %v16345_v49 = vld [vmem:[#allocation4 + $0x2370] sm:$0xf0] }
 0x701   : > { %v19845_v26 = vpop.f32.mrf.mxu1  ;;  %v16348_v27 = vor.u32 %v18579_v25, %v16345_v49  ;;  %v16329_v54 = vld [vmem:[#allocation4 + $0x2350] sm:$0xf0]  ;;  %v16271_v25 = vld [vmem:[#allocation4 + $0x22c8] sm:$0xf]  ;;  %v18562_v49 = vld [vmem:[#allocation4 + $0x22d4] sm:$0xf0] }
 0x702   : > { %v8548_v9 = vpop.f32.mrf.mxu2  ;;  %v16332_v50 = vor.u32 %v18575_v28, %v16329_v54  ;;  %v16272_v29 = vor.u32 %v18562_v49, %v16271_v25  ;;  %v16255_v28 = vld [vmem:[#allocation4 + $0x22a8] sm:$0xf]  ;;  %v18558_v54 = vld [vmem:[#allocation4 + $0x22b4] sm:$0xf0] }
 0x703   : > { %9506 = vmatpush.bf16.msra.mxu3 %v16348_v27  ;;  %v16111_v9 = vld [vmem:[#allocation4 + $0x2188] sm:$0xf]  ;;  %v16001_v27 = vld [vmem:[#allocation4 + $0x20b8] sm:$0xf0]  ;;  %v18542_v49 = vld [vmem:[#allocation4 + $0x2234] sm:$0xf0] }
 0x704   : > { %9516 = vmatpush.bf16.msrb.mxu0 %v16016_v15  ;;  %v8521_v15 = vadd.f32 %v19822_v20, %v7761_v44  ;;  %v18492_v44 = vld [vmem:[#allocation4 + $0x20ac] sm:$0xf]  ;;  %v16191_v25 = vld [vmem:[#allocation4 + $0x2228] sm:$0xf] }
 0x705   : > { %v16004_v10 = vor.u32 %v18492_v44, %v16001_v27  ;;  %v18472_v27 = vld [vmem:[#allocation4 + $0x200c] sm:$0xf] }
 0x706   : > { %v8534_v32 = vadd.f32 %v19826_v5, %v8521_v15  ;;  %v18488_v15 = vld [vmem:[#allocation4 + $0x208c] sm:$0xf] }
 0x707   : > { %v8507_v8 = vpop.f32.mrf.mxu3  ;;  %9507 = vmatpush.bf16.msra.mxu3 %v16332_v50  ;;  %v15985_v50 = vld [vmem:[#allocation4 + $0x2098] sm:$0xf0] }
 0x708   : > { %v8508_v62 = vadd.f32 %v8507_v8, %v8495_v38  ;;  %9517 = vmatpush.bf16.msrb.mxu0 %v16000_v2  ;;  %v18571_v2 = vld [vmem:[#allocation4 + $0x2324] sm:$0xf]  ;;  %v8547_v48 = vadd.f32 %v19838_v23, %v8534_v32  ;;  %v16297_v23 = vld [vmem:[#allocation4 + $0x2310] sm:$0xf0]  ;;  %v16064_v32 = vor.u32 %v18510_v37, %v16063_v6  ;;  %v16175_v37 = vld [vmem:[#allocation4 + $0x2208] sm:$0xf] }
 0x709   : > { %v8587_v4 = vpop.f32.mrf.mxu1  ;;  %v16316_v38 = vor.u32 %v18571_v2, %v16313_v31  ;;  %v16300_v22 = vor.u32 %v18567_v63, %v16297_v23  ;;  %v18484_v2 = vld [vmem:[#allocation4 + $0x206c] sm:$0xf]  ;;  %v15969_v31 = vld [vmem:[#allocation4 + $0x2078] sm:$0xf0]  ;;  %v16207_v23 = vld [vmem:[#allocation4 + $0x2248] sm:$0xf] }
 0x70a   : > { %vm8616_vm3 = vcmp.gt.f32.partialorder %v8508_v62, 0.0  ;;  %v8620_v18 = vmul.f32 0.2, %v8508_v62  ;;  %v16017_v4 = vld [vmem:[#allocation4 + $0x20d8] sm:$0xf0] }
 0x70b   : > { %9508 = vmatpush.bf16.msra.mxu3 %v16316_v38  ;;  %v16020_v56 = vor.u32 %v18496_v36, %v16017_v4  ;;  %v18546_v4 = vld [vmem:[#allocation4 + $0x2254] sm:$0xf0] }
 0x70c   : > { %v8624_v7 = vsel %vm8616_vm3, %v8508_v62, %v8620_v18  ;;  %9518 = vmatpush.bf16.msrb.mxu0 %v15984_v40  ;;  %v15920_v62 = vor.u32 %v18474_v11, %v15919_v1  ;;  %v16112_v40 = vor.u32 %v18522_v58, %v16111_v9  ;;  %v16047_v1 = vld [vmem:[#allocation4 + $0x2108] sm:$0xf]  ;;  %v18506_v11 = vld [vmem:[#allocation4 + $0x2114] sm:$0xf0] }
 0x70d   : > { %v19849_v39 = vpack.c.bf16 %v8624_v7, %v8624_v7  ;;  %v16239_v9 = vld [vmem:[#allocation4 + $0x2288] sm:$0xf]  ;;  %v18554_v58 = vld [vmem:[#allocation4 + $0x2294] sm:$0xf0]  ;;  %v16048_v57 = vor.u32 %v18506_v11, %v16047_v1  ;;  %v18516_v1 = vld [vmem:[#allocation4 + $0x216c] sm:$0xf] }
 0x70e   : > { %v16240_v38 = vor.u32 %v18554_v58, %v16239_v9  ;;  %v16097_v11 = vld [vmem:[#allocation4 + $0x2178] sm:$0xf0]  ;;  %v18564_v9 = vld [vmem:[#allocation4 + $0x22ec] sm:$0xf] }
 0x70f   : > { %v8509_v41 = vpop.f32.mrf.mxu3  ;;  %9432 = vmatmul.bf16.vlgmr.msrb.gmra.mxu1 %v19849_v39  ;;  %9471 = vmatmul.bf16.vlgmr.msra.gmra.mxu0 %v19840_v0  ;;  %v16289_v58 = vld [vmem:[#allocation4 + $0x22f8] sm:$0xf0] }
 0x710   : > { %9519 = vmatpush.bf16.msrb.mxu0 %v15968_v3  ;;  %9528 = vmatpush.bf16.msrb.mxu1 %v16160_v53  ;;  %v16096_v3 = vor.u32 %v18518_v52, %v16095_v24  ;;  %v16223_v24 = vld [vmem:[#allocation4 + $0x2268] sm:$0xf]  ;;  %v15953_v52 = vld [vmem:[#allocation4 + $0x2058] sm:$0xf0] }
 0x711   : > { %9509 = vmatpush.bf16.msra.mxu3 %v16300_v22  ;;  %v18476_v22 = vld [vmem:[#allocation4 + $0x202c] sm:$0xf] }
 0x714   : > { %9520 = vmatpush.bf16.msrb.mxu0 %v15952_v13  ;;  %9529 = vmatpush.bf16.msrb.mxu1 %v16144_v33  ;;  %v16080_v33 = vor.u32 %v18514_v14, %v16079_v34  ;;  %v16208_v34 = vor.u32 %v18546_v4, %v16207_v23  ;;  %v18749_v23 = vld [vmem:[#allocation9 + $0xac] sm:$0xf0] }
 0x717   : > { %v8559_v20 = vpop.f32.mrf.mxu3 }
 0x718   : > { %v8560_v8 = vadd.f32 %v8559_v20, %v8547_v48  ;;  %v19857_v5 = vpop.f32.mrf.mxu2  ;;  %9521 = vmatpush.bf16.msrb.mxu0 %v15936_v43  ;;  %9530 = vmatpush.bf16.msrb.mxu1 %v16128_v16  ;;  %v16256_v43 = vor.u32 %v18558_v54, %v16255_v28  ;;  %v15988_v16 = vor.u32 %v18488_v15, %v15985_v50  ;;  %v18532_v48 = vld [vmem:[#allocation4 + $0x21ec] sm:$0xf]  ;;  %v18538_v15 = vld [vmem:[#allocation4 + $0x2214] sm:$0xf0]  ;;  %v16415_v50 = vld [vmem:[#allocation4 + $0x23e8] sm:$0xf] }
 0x719   : > { %v15972_v20 = vor.u32 %v18484_v2, %v15969_v31  ;;  %v16519_v2 = vld [vmem:[#allocation9 + $0xc0] sm:$0xf]  ;;  %v18753_v31 = vld [vmem:[#allocation9 + $0xcc] sm:$0xf0] }
 0x71a   : > { %vm8617_vm4 = vcmp.gt.f32.partialorder %v8560_v8, 0.0  ;;  %v8621_v18 = vmul.f32 0.2, %v8560_v8 }
 0x71c   : > { %v8625_v7 = vsel %vm8617_vm4, %v8560_v8, %v8621_v18  ;;  %9522 = vmatpush.bf16.msrb.mxu0 %v15920_v62  ;;  %9531 = vmatpush.bf16.msrb.mxu1 %v16112_v40  ;;  %v16164_v8 = vor.u32 %v18532_v48, %v16161_v51  ;;  %v18550_v62 = vld [vmem:[#allocation4 + $0x2274] sm:$0xf0]  ;;  %v18480_v40 = vld [vmem:[#allocation4 + $0x204c] sm:$0xf]  ;;  %v16176_v51 = vor.u32 %v18538_v15, %v16175_v37  ;;  %v16241_v37 = vld [vmem:[#allocation4 + $0x2298] sm:$0xf0] }
 0x71d   : > { %v19859_v53 = vpack.c.bf16 %v8625_v7, %v8625_v7  ;;  %v16224_v36 = vor.u32 %v18550_v62, %v16223_v24  ;;  %v15956_v63 = vor.u32 %v18480_v40, %v15953_v52  ;;  %v15937_v7 = vld [vmem:[#allocation4 + $0x2038] sm:$0xf0]  ;;  %v16292_v24 = vor.u32 %v18564_v9, %v16289_v58  ;;  %v18594_v62 = vld [vmem:[#allocation4 + $0x23d4] sm:$0xf0]  ;;  %v18512_v40 = vld [vmem:[#allocation4 + $0x214c] sm:$0xf] }
 0x71e   : > { %v15940_v14 = vor.u32 %v18476_v22, %v15937_v7  ;;  %v16520_v52 = vor.u32 %v18753_v31, %v16519_v2  ;;  %v16383_v7 = vld [vmem:[#allocation4 + $0x23a8] sm:$0xf]  ;;  %v18789_v15 = vld [vmem:[#allocation9 + $0x1ec] sm:$0xf0]  ;;  %v18548_v58 = vld [vmem:[#allocation4 + $0x226c] sm:$0xf] }
 0x71f   : > { %v8561_v41 = vpop.f32.mrf.mxu3  ;;  %9445 = vmatmul.bf16.vlgmr.msrb.gmra.mxu2 %v19859_v53  ;;  %9484 = vmatmul.bf16.vlgmr.msra.gmra.mxu1 %v19849_v39  ;;  %v16225_v2 = vld [vmem:[#allocation4 + $0x2278] sm:$0xf0]  ;;  %v16455_v31 = vld [vmem:[#allocation9 + $0x40] sm:$0xf] }
 0x720   : > { %9567 = vmatpush.bf16.msra.mxu0 %v16036_v35  ;;  %v8600_v13 = vpop.f32.mrf.mxu2  ;;  %9532 = vmatpush.bf16.msrb.mxu1 %v16096_v3  ;;  %v16145_v35 = vld [vmem:[#allocation4 + $0x21d8] sm:$0xf0]  ;;  %v8573_v3 = vadd.f32 %v19833_v47, %v7762_v19 }
 0x721   : > { %9523 = vmatmul.bf16.vlgmr.msrb.gmra.mxu0 %v19840_v0  ;;  %9541 = vmatpush.bf16.msrb.mxu2 %v16288_v55  ;;  %v16148_v18 = vor.u32 %v18528_v61, %v16145_v35  ;;  %v16129_v55 = vld [vmem:[#allocation4 + $0x21b8] sm:$0xf0]  ;;  %v18520_v13 = vld [vmem:[#allocation4 + $0x218c] sm:$0xf] }
 0x722   : > { %v16132_v44 = vor.u32 %v18524_v42, %v16129_v55  ;;  %v15921_v41 = vld [vmem:[#allocation4 + $0x2018] sm:$0xf0]  ;;  %v18560_v61 = vld [vmem:[#allocation4 + $0x22cc] sm:$0xf] }
 0x723   : > { %v15924_v54 = vor.u32 %v18472_v27, %v15921_v41  ;;  %v16081_v19 = vld [vmem:[#allocation4 + $0x2158] sm:$0xf0]  ;;  %v18508_v42 = vld [vmem:[#allocation4 + $0x212c] sm:$0xf]  ;;  %v16367_v27 = vld [vmem:[#allocation4 + $0x2388] sm:$0xf] }
 0x724   : > { %9568 = vmatpush.bf16.msra.mxu0 %v16020_v56  ;;  %9533 = vmatpush.bf16.msrb.mxu1 %v16080_v33  ;;  %v8586_v56 = vadd.f32 %v19845_v26, %v8573_v3  ;;  %v16113_v33 = vld [vmem:[#allocation4 + $0x2198] sm:$0xf0]  ;;  %v16192_v26 = vor.u32 %v18542_v49, %v16191_v25  ;;  %v16084_v4 = vor.u32 %v18512_v40, %v16081_v19  ;;  %v18590_v3 = vld [vmem:[#allocation4 + $0x23b4] sm:$0xf0]  ;;  %v18745_v25 = vld [vmem:[#allocation9 + $0x8c] sm:$0xf0] }
 0x725   : > { %9542 = vmatpush.bf16.msrb.mxu2 %v16272_v29  ;;  %v16535_v29 = vld [vmem:[#allocation9 + $0xe0] sm:$0xf]  ;;  %v16273_v35 = vld [vmem:[#allocation4 + $0x22d8] sm:$0xf0]  ;;  %v18578_v40 = vld [vmem:[#allocation4 + $0x2354] sm:$0xf0] }
 0x726   : > { %v8599_v47 = vadd.f32 %v19857_v5, %v8586_v56  ;;  %v16276_v22 = vor.u32 %v18560_v61, %v16273_v35  ;;  %v16065_v56 = vld [vmem:[#allocation4 + $0x2138] sm:$0xf0]  ;;  %v19875_v49 = vld [vmem:[#allocation10 + $0x23] ss:$8 sm:$0xf] }
 0x727   : > { %v16068_v41 = vor.u32 %v18508_v42, %v16065_v56  ;;  %v18544_v61 = vld [vmem:[#allocation4 + $0x224c] sm:$0xf]  ;;  %v16209_v35 = vld [vmem:[#allocation4 + $0x2258] sm:$0xf0] }
 0x728   : > { %9569 = vmatpush.bf16.msra.mxu0 %v16004_v10  ;;  %9534 = vmatpush.bf16.msrb.mxu1 %v16064_v32  ;;  %v18757_v10 = vld [vmem:[#allocation9 + $0xec] sm:$0xf0]  ;;  %v18598_v32 = vld [vmem:[#allocation4 + $0x23f4] sm:$0xf0]  ;;  %v16193_v56 = vld [vmem:[#allocation4 + $0x2238] sm:$0xf0] }
 0x729   : > { %9543 = vmatpush.bf16.msrb.mxu2 %v16256_v43  ;;  %v16116_v43 = vor.u32 %v18520_v13, %v16113_v33  ;;  %v18504_v33 = vld [vmem:[#allocation4 + $0x210c] sm:$0xf] }
 0x72c   : > { %9570 = vmatpush.bf16.msra.mxu0 %v15988_v16  ;;  %9535 = vmatpush.bf16.msrb.mxu1 %v16048_v57  ;;  %v16536_v16 = vor.u32 %v18757_v10, %v16535_v29  ;;  %v16416_v57 = vor.u32 %v18598_v32, %v16415_v50  ;;  %v16049_v29 = vld [vmem:[#allocation4 + $0x2118] sm:$0xf0]  ;;  %v447_v32 = vperm.slane %v19875_v49, 0 }
 0x72d   : > { %9544 = vmatpush.bf16.msrb.mxu2 %v16240_v38 }
 0x72f   : > { %9497 = vmatmul.bf16.vlgmr.msra.gmra.mxu2 %v19859_v53  ;;  %9536 = vmatmul.bf16.vlgmr.msrb.gmra.mxu1 %v19849_v39 }
 0x730   : > { %9571 = vmatpush.bf16.msra.mxu0 %v15972_v20  ;;  %9580 = vmatpush.bf16.msra.mxu1 %v16164_v8  ;;  %v16100_v20 = vor.u32 %v18516_v1, %v16097_v11  ;;  %v16399_v8 = vld [vmem:[#allocation4 + $0x23c8] sm:$0xf]  ;;  %v18582_v11 = vld [vmem:[#allocation4 + $0x2374] sm:$0xf0] }
 0x731   : > { %9545 = vmatpush.bf16.msrb.mxu2 %v16224_v36  ;;  %v16351_v1 = vld [vmem:[#allocation4 + $0x2368] sm:$0xf] }
 0x734   : > { %9572 = vmatpush.bf16.msra.mxu0 %v15956_v63  ;;  %9581 = vmatpush.bf16.msra.mxu1 %v16148_v18  ;;  %v16503_v63 = vld [vmem:[#allocation9 + $0xa0] sm:$0xf]  ;;  %v16400_v18 = vor.u32 %v18594_v62, %v16399_v8  ;;  %v16228_v8 = vor.u32 %v18548_v58, %v16225_v2  ;;  %v16335_v62 = vld [vmem:[#allocation4 + $0x2348] sm:$0xf]  ;;  %v448_v2 = vperm.slane %v19875_v49, 1 }
 0x735   : > { %9546 = vmatpush.bf16.msrb.mxu2 %v16208_v34  ;;  %v16504_v55 = vor.u32 %v18749_v23, %v16503_v63  ;;  %v18556_v34 = vld [vmem:[#allocation4 + $0x22ac] sm:$0xf]  ;;  %v18733_v63 = vld [vmem:[#allocation9 + $0x2c] sm:$0xf0]  ;;  %v16631_v23 = vld [vmem:[#allocation9 + $0x1a0] sm:$0xf] }
 0x737   : > { %v8611_v6 = vpop.f32.mrf.mxu3 }
 0x738   : > { %v8612_v28 = vadd.f32 %v8611_v6, %v8599_v47  ;;  %9573 = vmatpush.bf16.msra.mxu0 %v15940_v14  ;;  %9582 = vmatpush.bf16.msra.mxu1 %v16132_v44  ;;  %v16257_v14 = vld [vmem:[#allocation4 + $0x22b8] sm:$0xf0]  ;;  %v16384_v44 = vor.u32 %v18590_v3, %v16383_v7  ;;  %v18586_v47 = vld [vmem:[#allocation4 + $0x2394] sm:$0xf0]  ;;  %v18552_v6 = vld [vmem:[#allocation4 + $0x228c] sm:$0xf] }
 0x739   : > { %9547 = vmatpush.bf16.msrb.mxu2 %v16192_v26  ;;  %v16260_v13 = vor.u32 %v18556_v34, %v16257_v14  ;;  %v18741_v26 = vld [vmem:[#allocation9 + $0x6c] sm:$0xf0]  ;;  %v16368_v50 = vor.u32 %v18586_v47, %v16367_v27  ;;  %v18574_v7 = vld [vmem:[#allocation4 + $0x2334] sm:$0xf0]  ;;  %v16423_v34 = vld [vmem:[#allocation9] sm:$0xf] }
 0x73a   : > { %vm8618_vm5 = vcmp.gt.f32.partialorder %v8612_v28, 0.0  ;;  %v8622_v5 = vmul.f32 0.2, %v8612_v28  ;;  %v18729_v14 = vld [vmem:[#allocation9 + $0xc] sm:$0xf0] }
 0x73b   : > { %v16303_v47 = vld [vmem:[#allocation4 + $0x2308] sm:$0xf] }
 0x73c   : > { %v8626_v48 = vsel %vm8618_vm5, %v8612_v28, %v8622_v5  ;;  %9574 = vmatpush.bf16.msra.mxu0 %v15924_v54  ;;  %9583 = vmatpush.bf16.msra.mxu1 %v16116_v43  ;;  %v16471_v28 = vld [vmem:[#allocation9 + $0x60] sm:$0xf]  ;;  %v16052_v43 = vor.u32 %v18504_v33, %v16049_v29  ;;  %v18570_v33 = vld [vmem:[#allocation4 + $0x2314] sm:$0xf0]  ;;  %v18536_v29 = vld [vmem:[#allocation4 + $0x220c] sm:$0xf] }
 0x73d   : > { %v19870_v38 = vpack.c.bf16 %v8626_v48, %v8626_v48  ;;  %9548 = vmatpush.bf16.msrb.mxu2 %v16176_v51  ;;  %v16663_v54 = vld [vmem:[#allocation9 + $0x1e0] sm:$0xf]  ;;  %v16472_v9 = vor.u32 %v18741_v26, %v16471_v28  ;;  %v18737_v48 = vld [vmem:[#allocation9 + $0x4c] sm:$0xf0]  ;;  %v18596_v28 = vld [vmem:[#allocation4 + $0x23ec] sm:$0xf] }
 0x73e   : > { %v16664_v5 = vor.u32 %v18789_v15, %v16663_v54  ;;  %v16647_v51 = vld [vmem:[#allocation9 + $0x1c0] sm:$0xf]  ;;  %v16417_v26 = vld [vmem:[#allocation4 + $0x23f8] sm:$0xf0] }
 0x73f   : > { %v8613_v36 = vpop.f32.mrf.mxu3  ;;  %9458 = vmatmul.bf16.vlgmr.msrb.gmra.mxu3 %v19870_v38  ;;  %9575 = vmatmul.bf16.vlgmr.msra.gmra.mxu0 %v19840_v0  ;;  %v16487_v0 = vld [vmem:[#allocation9 + $0x80] sm:$0xf]  ;;  %v16420_v58 = vor.u32 %v18596_v28, %v16417_v26  ;;  %v18580_v28 = vld [vmem:[#allocation4 + $0x236c] sm:$0xf]  ;;  %v16353_v26 = vld [vmem:[#allocation4 + $0x2378] sm:$0xf0] }
 0x740   : > { %10543 = vmatpush.bf16.msrb.mxu0 %v16536_v16  ;;  %9554 = vmatpush.bf16.msrb.mxu3 %v16416_v57  ;;  %v16488_v10 = vor.u32 %v18745_v25, %v16487_v0  ;;  %v16244_v16 = vor.u32 %v18552_v6, %v16241_v37  ;;  %v18785_v57 = vld [vmem:[#allocation9 + $0x1cc] sm:$0xf0]  ;;  %v16439_v36 = vld [vmem:[#allocation9 + $0x20] sm:$0xf]  ;;  %v16177_v37 = vld [vmem:[#allocation4 + $0x2218] sm:$0xf0] }
 0x741   : > { %9584 = vmatpush.bf16.msra.mxu1 %v16100_v20  ;;  %9593 = vmatpush.bf16.msra.mxu2 %v16292_v24  ;;  %v16352_v20 = vor.u32 %v18582_v11, %v16351_v1  ;;  %v491_v24 = vadd.f32 %v19340_v45, %v447_v32  ;;  %v16648_v19 = vor.u32 %v18785_v57, %v16647_v51  ;;  %v16615_v0 = vld [vmem:[#allocation9 + $0x180] sm:$0xf]  ;;  %v18777_v25 = vld [vmem:[#allocation9 + $0x18c] sm:$0xf0]  ;;  %v18751_v1 = vld [vmem:[#allocation9 + $0xc4] sm:$0xf] }
 0x742   : > { %9549 = vmatmul.bf16.vlgmr.msrb.gmra.mxu2 %v19859_v53  ;;  %v16336_v45 = vor.u32 %v18578_v40, %v16335_v62  ;;  %v16440_v3 = vor.u32 %v18733_v63, %v16439_v36  ;;  %v16616_v6 = vor.u32 %v18777_v25, %v16615_v0  ;;  %v16599_v15 = vld [vmem:[#allocation9 + $0x160] sm:$0xf]  ;;  %v16521_v11 = vld [vmem:[#allocation9 + $0xd0] sm:$0xf0]  ;;  %v16401_v51 = vld [vmem:[#allocation4 + $0x23d8] sm:$0xf0]  ;;  %v504_v36 = vadd.f32 %v19342_v46, %v448_v2 }
 0x743   : > { %vm533_vm6 = vcmp.gt.f32.partialorder %v491_v24, 0.0  ;;  %v16791_v32 = vld [vmem:[#allocation9 + $0x2e0] sm:$0xf]  ;;  %v18769_v62 = vld [vmem:[#allocation9 + $0x14c] sm:$0xf0] }
 0x744   : > { %10544 = vmatpush.bf16.msrb.mxu0 %v16520_v52  ;;  %9555 = vmatpush.bf16.msrb.mxu3 %v16400_v18  ;;  %v16456_v52 = vor.u32 %v18737_v48, %v16455_v31  ;;  %v18781_v18 = vld [vmem:[#allocation9 + $0x1ac] sm:$0xf0]  ;;  %v18592_v48 = vld [vmem:[#allocation4 + $0x23cc] sm:$0xf]  ;;  %v16775_v40 = vld [vmem:[#allocation9 + $0x2c0] sm:$0xf] }
 0x745   : > { %9585 = vmatpush.bf16.msra.mxu1 %v16084_v4  ;;  %9594 = vmatpush.bf16.msra.mxu2 %v16276_v22  ;;  %v16212_v4 = vor.u32 %v18544_v61, %v16209_v35  ;;  %v16319_v22 = vld [vmem:[#allocation4 + $0x2328] sm:$0xf]  ;;  %v16632_v42 = vor.u32 %v18781_v18, %v16631_v23  ;;  %v16505_v61 = vld [vmem:[#allocation9 + $0xb0] sm:$0xf0]  ;;  %v16404_v35 = vor.u32 %v18592_v48, %v16401_v51  ;;  %v18588_v23 = vld [vmem:[#allocation4 + $0x23ac] sm:$0xf] }
 0x746   : > { %v16320_v27 = vor.u32 %v18574_v7, %v16319_v22  ;;  %v16385_v18 = vld [vmem:[#allocation4 + $0x23b8] sm:$0xf0]  ;;  %v16567_v22 = vld [vmem:[#allocation9 + $0x120] sm:$0xf]  ;;  %v18765_v7 = vld [vmem:[#allocation9 + $0x12c] sm:$0xf0] }
 0x747   : > { %v16489_v46 = vld [vmem:[#allocation9 + $0x90] sm:$0xf0]  ;;  %v18584_v0 = vld [vmem:[#allocation4 + $0x238c] sm:$0xf]  ;;  %v16369_v25 = vld [vmem:[#allocation4 + $0x2398] sm:$0xf0] }
 0x748   : > { %10545 = vmatpush.bf16.msrb.mxu0 %v16504_v55  ;;  %9556 = vmatpush.bf16.msrb.mxu3 %v16384_v44  ;;  %v18540_v55 = vld [vmem:[#allocation4 + $0x222c] sm:$0xf]  ;;  %v537_v44 = vmul.f32 0.2, %v491_v24  ;;  %vm534_vm7 = vcmp.gt.f32.partialorder %v504_v36, 0.0  ;;  %v449_v51 = vperm.slane %v19875_v49, 2 }
 0x749   : > { %9586 = vmatpush.bf16.msra.mxu1 %v16068_v41  ;;  %9595 = vmatpush.bf16.msra.mxu2 %v16260_v13  ;;  %v16537_v41 = vld [vmem:[#allocation9 + $0xf0] sm:$0xf0]  ;;  %v16196_v13 = vor.u32 %v18540_v55, %v16193_v56  ;;  %v18743_v55 = vld [vmem:[#allocation9 + $0x84] sm:$0xf]  ;;  %v16388_v56 = vor.u32 %v18588_v23, %v16385_v18  ;;  %v18576_v2 = vld [vmem:[#allocation4 + $0x234c] sm:$0xf] }
 0x74a   : > { %v16321_v23 = vld [vmem:[#allocation4 + $0x2338] sm:$0xf0]  ;;  %v517_v18 = vadd.f32 %v19344_v59, %v449_v51  ;;  %v16777_v51 = vld [vmem:[#allocation9 + $0x2d0] sm:$0xf0] }
 0x74c   : > { %10546 = vmatpush.bf16.msrb.mxu0 %v16488_v10  ;;  %9557 = vmatpush.bf16.msrb.mxu3 %v16368_v50  ;;  %v16424_v10 = vor.u32 %v18729_v14, %v16423_v34  ;;  %v18773_v50 = vld [vmem:[#allocation9 + $0x16c] sm:$0xf0]  ;;  %v538_v34 = vmul.f32 0.2, %v504_v36  ;;  %v16568_v14 = vor.u32 %v18765_v7, %v16567_v22  ;;  %v16695_v22 = vld [vmem:[#allocation9 + $0x220] sm:$0xf] }
 0x74d   : > { %9587 = vmatpush.bf16.msra.mxu1 %v16052_v43  ;;  %9596 = vmatpush.bf16.msra.mxu2 %v16244_v16  ;;  %v16304_v43 = vor.u32 %v18570_v33, %v16303_v47  ;;  %v18821_v16 = vld [vmem:[#allocation9 + $0x2ec] sm:$0xf0]  ;;  %v16600_v31 = vor.u32 %v18773_v50, %v16599_v15  ;;  %v18739_v33 = vld [vmem:[#allocation9 + $0x64] sm:$0xf]  ;;  %v16727_v50 = vld [vmem:[#allocation9 + $0x260] sm:$0xf] }
 0x74e   : > { %v16792_v57 = vor.u32 %v18821_v16, %v16791_v32  ;;  %v18809_v47 = vld [vmem:[#allocation9 + $0x28c] sm:$0xf0]  ;;  %v542_v32 = vsel %vm534_vm7, %v504_v36, %v538_v34  ;;  %v16633_v36 = vld [vmem:[#allocation9 + $0x1b0] sm:$0xf0]  ;;  %vm535_vm8 = vcmp.gt.f32.partialorder %v517_v18, 0.0 }
 0x74f   : > { %9510 = vmatmul.bf16.vlgmr.msra.gmra.mxu3 %v19870_v38  ;;  %v18805_v16 = vld [vmem:[#allocation9 + $0x26c] sm:$0xf0]  ;;  %v19889_v48 = vpack.c.bf16 %v542_v32, %v542_v32  ;;  %v16617_v34 = vld [vmem:[#allocation9 + $0x190] sm:$0xf0] }
 0x750   : > { %10547 = vmatpush.bf16.msrb.mxu0 %v16472_v9  ;;  %9558 = vmatpush.bf16.msrb.mxu3 %v16352_v20  ;;  %v541_v9 = vsel %vm533_vm6, %v491_v24, %v537_v44  ;;  %v16524_v20 = vor.u32 %v18751_v1, %v16521_v11  ;;  %v18817_v24 = vld [vmem:[#allocation9 + $0x2cc] sm:$0xf0]  ;;  %v18735_v1 = vld [vmem:[#allocation9 + $0x44] sm:$0xf]  ;;  %v16457_v11 = vld [vmem:[#allocation9 + $0x50] sm:$0xf0] }
 0x751   : > { %10556 = vmatpush.bf16.msrb.mxu1 %v16664_v5  ;;  %9597 = vmatpush.bf16.msra.mxu2 %v16228_v8  ;;  %v16180_v5 = vor.u32 %v18536_v29, %v16177_v37  ;;  %v16583_v8 = vld [vmem:[#allocation9 + $0x140] sm:$0xf]  ;;  %v16372_v29 = vor.u32 %v18584_v0, %v16369_v25  ;;  %v18797_v7 = vld [vmem:[#allocation9 + $0x22c] sm:$0xf0]  ;;  %v18758_v0 = vld [vmem:[#allocation9 + $0xf4] sm:$0xf0] }
 0x752   : > { %9588 = vmatmul.bf16.vlgmr.msra.gmra.mxu1 %v19849_v39  ;;  %v18755_v39 = vld [vmem:[#allocation9 + $0xe4] sm:$0xf]  ;;  %v16584_v63 = vor.u32 %v18769_v62, %v16583_v8  ;;  %v16711_v8 = vld [vmem:[#allocation9 + $0x240] sm:$0xf]  ;;  %v18568_v25 = vld [vmem:[#allocation4 + $0x230c] sm:$0xf]  ;;  %v16696_v59 = vor.u32 %v18797_v7, %v16695_v22 }
 0x753   : > { %v16540_v54 = vor.u32 %v18755_v39, %v16537_v41  ;;  %v16551_v39 = vld [vmem:[#allocation9 + $0x100] sm:$0xf]  ;;  %v18761_v41 = vld [vmem:[#allocation9 + $0x10c] sm:$0xf0]  ;;  %v18746_v22 = vld [vmem:[#allocation9 + $0x94] sm:$0xf0] }
 0x754   : > { %10548 = vmatpush.bf16.msrb.mxu0 %v16456_v52  ;;  %9559 = vmatpush.bf16.msrb.mxu3 %v16336_v45  ;;  %v19883_v52 = vpack.c.bf16 %v541_v9, %v541_v9  ;;  %v16776_v45 = vor.u32 %v18817_v24, %v16775_v40  ;;  %v16552_v37 = vor.u32 %v18761_v41, %v16551_v39  ;;  %v18801_v40 = vld [vmem:[#allocation9 + $0x24c] sm:$0xf0]  ;;  %v18731_v24 = vld [vmem:[#allocation9 + $0x24] sm:$0xf]  ;;  %v16919_v41 = vld [vmem:[#allocation9 + $0x3e0] sm:$0xf] }
 0x755   : > { %10557 = vmatpush.bf16.msrb.mxu1 %v16648_v19  ;;  %9598 = vmatpush.bf16.msra.mxu2 %v16212_v4  ;;  %v18747_v19 = vld [vmem:[#allocation9 + $0xa4] sm:$0xf]  ;;  %v16356_v9 = vor.u32 %v18580_v28, %v16353_v26  ;;  %v16793_v26 = vld [vmem:[#allocation9 + $0x2f0] sm:$0xf0] }
 0x756   : > { %v16508_v4 = vor.u32 %v18747_v19, %v16505_v61  ;;  %v16441_v19 = vld [vmem:[#allocation9 + $0x30] sm:$0xf0]  ;;  %v18819_v28 = vld [vmem:[#allocation9 + $0x2e4] sm:$0xf] }
 0x758   : > { %10549 = vmatpush.bf16.msrb.mxu0 %v16440_v3  ;;  %9560 = vmatpush.bf16.msrb.mxu3 %v16320_v27  ;;  %v16759_v3 = vld [vmem:[#allocation9 + $0x2a0] sm:$0xf]  ;;  %v16492_v27 = vor.u32 %v18743_v55, %v16489_v46  ;;  %v16425_v55 = vld [vmem:[#allocation9 + $0x10] sm:$0xf0]  ;;  %v18775_v46 = vld [vmem:[#allocation9 + $0x184] sm:$0xf] }
 0x759   : > { %10558 = vmatpush.bf16.msrb.mxu1 %v16632_v42  ;;  %9599 = vmatpush.bf16.msra.mxu2 %v16196_v13  ;;  %v18813_v42 = vld [vmem:[#allocation9 + $0x2ac] sm:$0xf0]  ;;  %v16743_v13 = vld [vmem:[#allocation9 + $0x280] sm:$0xf] }
 0x75a   : > { %v16760_v44 = vor.u32 %v18813_v42, %v16759_v3  ;;  %v18727_v42 = vld [vmem:[#allocation9 + $0x4] sm:$0xf] }
 0x75b   : > { %v16428_v39 = vor.u32 %v18727_v42, %v16425_v55  ;;  %v18841_v42 = vld [vmem:[#allocation9 + $0x38c] sm:$0xf0] }
 0x75c   : > { %10550 = vmatpush.bf16.msrb.mxu0 %v16424_v10  ;;  %9561 = vmatpush.bf16.msrb.mxu3 %v16304_v43  ;;  %v18787_v10 = vld [vmem:[#allocation9 + $0x1e4] sm:$0xf] }
 0x75d   : > { %10559 = vmatpush.bf16.msrb.mxu1 %v16616_v6  ;;  %9600 = vmatpush.bf16.msra.mxu2 %v16180_v5  ;;  %v16665_v6 = vld [vmem:[#allocation9 + $0x1f0] sm:$0xf0]  ;;  %v18783_v5 = vld [vmem:[#allocation9 + $0x1c4] sm:$0xf] }
 0x75e   : > { %v16668_v43 = vor.u32 %v18787_v10, %v16665_v6  ;;  %v18771_v10 = vld [vmem:[#allocation9 + $0x164] sm:$0xf] }
 0x75f   : > { %10551 = vmatmul.bf16.vlgmr.msrb.gmra.mxu0 %v19883_v52  ;;  %9562 = vmatmul.bf16.vlgmr.msrb.gmra.mxu3 %v19870_v38 }
 0x760   : > { %10595 = vmatpush.bf16.msra.mxu0 %v16540_v54  ;;  %9606 = vmatpush.bf16.msra.mxu3 %v16420_v58  ;;  %v16744_v54 = vor.u32 %v18809_v47, %v16743_v13  ;;  %v16649_v58 = vld [vmem:[#allocation9 + $0x1d0] sm:$0xf0]  ;;  %v18853_v13 = vld [vmem:[#allocation9 + $0x3ec] sm:$0xf0]  ;;  %v16620_v47 = vor.u32 %v18775_v46, %v16617_v34 }
 0x761   : > { %10560 = vmatpush.bf16.msrb.mxu1 %v16600_v31  ;;  %10569 = vmatpush.bf16.msrb.mxu2 %v16792_v57  ;;  %v16337_v31 = vld [vmem:[#allocation4 + $0x2358] sm:$0xf0]  ;;  %v16728_v57 = vor.u32 %v18805_v16, %v16727_v50  ;;  %v16652_v62 = vor.u32 %v18783_v5, %v16649_v58  ;;  %v18754_v50 = vld [vmem:[#allocation9 + $0xd4] sm:$0xf0]  ;;  %v18849_v16 = vld [vmem:[#allocation9 + $0x3cc] sm:$0xf0] }
 0x762   : > { %9601 = vmatmul.bf16.vlgmr.msra.gmra.mxu2 %v19859_v53  ;;  %v16473_v53 = vld [vmem:[#allocation9 + $0x70] sm:$0xf0]  ;;  %v16340_v61 = vor.u32 %v18576_v2, %v16337_v31  ;;  %v18815_v31 = vld [vmem:[#allocation9 + $0x2c4] sm:$0xf] }
 0x763   : > { %v16476_v15 = vor.u32 %v18739_v33, %v16473_v53  ;;  %v16679_v53 = vld [vmem:[#allocation9 + $0x200] sm:$0xf]  ;;  %v16585_v2 = vld [vmem:[#allocation9 + $0x150] sm:$0xf0] }
 0x764   : > { %10596 = vmatpush.bf16.msra.mxu0 %v16524_v20  ;;  %9607 = vmatpush.bf16.msra.mxu3 %v16404_v35  ;;  %v16460_v20 = vor.u32 %v18735_v1, %v16457_v11  ;;  %v18779_v35 = vld [vmem:[#allocation9 + $0x1a4] sm:$0xf]  ;;  %v16796_v11 = vor.u32 %v18819_v28, %v16793_v26  ;;  %v16463_v28 = vld [vmem:[#allocation9 + $0x48] sm:$0xf] }
 0x765   : > { %10561 = vmatpush.bf16.msrb.mxu1 %v16584_v63  ;;  %10570 = vmatpush.bf16.msrb.mxu2 %v16776_v45  ;;  %v18572_v63 = vld [vmem:[#allocation4 + $0x232c] sm:$0xf]  ;;  %v16712_v45 = vor.u32 %v18801_v40, %v16711_v8  ;;  %v16636_v3 = vor.u32 %v18779_v35, %v16633_v36  ;;  %v18750_v8 = vld [vmem:[#allocation9 + $0xb4] sm:$0xf0]  ;;  %v18845_v40 = vld [vmem:[#allocation9 + $0x3ac] sm:$0xf0] }
 0x766   : > { %v18763_v35 = vld [vmem:[#allocation9 + $0x124] sm:$0xf] }
 0x768   : > { %10597 = vmatpush.bf16.msra.mxu0 %v16508_v4  ;;  %9608 = vmatpush.bf16.msra.mxu3 %v16388_v56  ;;  %v16444_v4 = vor.u32 %v18731_v24, %v16441_v19  ;;  %v16324_v56 = vor.u32 %v18572_v63, %v16321_v23  ;;  %v16569_v63 = vld [vmem:[#allocation9 + $0x130] sm:$0xf0]  ;;  %v18811_v23 = vld [vmem:[#allocation9 + $0x2a4] sm:$0xf] }
 0x769   : > { %10562 = vmatpush.bf16.msrb.mxu1 %v16568_v14  ;;  %10571 = vmatpush.bf16.msrb.mxu2 %v16760_v44  ;;  %v16543_v14 = vld [vmem:[#allocation9 + $0xe8] sm:$0xf]  ;;  %v16305_v44 = vld [vmem:[#allocation4 + $0x2318] sm:$0xf0]  ;;  %v16572_v55 = vor.u32 %v18763_v35, %v16569_v63  ;;  %v16697_v35 = vld [vmem:[#allocation9 + $0x230] sm:$0xf0] }
 0x76a   : > { %v16544_v33 = vor.u32 %v18758_v0, %v16543_v14  ;;  %v16308_v6 = vor.u32 %v18568_v25, %v16305_v44  ;;  %v18807_v14 = vld [vmem:[#allocation9 + $0x284] sm:$0xf]  ;;  %v16745_v0 = vld [vmem:[#allocation9 + $0x290] sm:$0xf0]  ;;  %v16479_v25 = vld [vmem:[#allocation9 + $0x68] sm:$0xf] }
 0x76b   : > { %v18730_v63 = vld [vmem:[#allocation9 + $0x14] sm:$0xf0] }
 0x76c   : > { %10598 = vmatpush.bf16.msra.mxu0 %v16492_v27  ;;  %9609 = vmatpush.bf16.msra.mxu3 %v16372_v29  ;;  %v539_v27 = vmul.f32 0.2, %v517_v18  ;;  %v18793_v29 = vld [vmem:[#allocation9 + $0x20c] sm:$0xf0] }
 0x76d   : > { %10563 = vmatpush.bf16.msrb.mxu1 %v16552_v37  ;;  %10572 = vmatpush.bf16.msrb.mxu2 %v16744_v54  ;;  %v16601_v37 = vld [vmem:[#allocation9 + $0x170] sm:$0xf0]  ;;  %v16920_v54 = vor.u32 %v18853_v13, %v16919_v41  ;;  %v16680_v32 = vor.u32 %v18793_v29, %v16679_v53  ;;  %v16855_v41 = vld [vmem:[#allocation9 + $0x360] sm:$0xf]  ;;  %v18837_v13 = vld [vmem:[#allocation9 + $0x36c] sm:$0xf0]  ;;  %v16748_v53 = vor.u32 %v18807_v14, %v16745_v0 }
 0x76e   : > { %v16604_v1 = vor.u32 %v18771_v10, %v16601_v37  ;;  %v543_v5 = vsel %vm535_vm8, %v517_v18, %v539_v27  ;;  %v16761_v18 = vld [vmem:[#allocation9 + $0x2b0] sm:$0xf0]  ;;  %v18742_v27 = vld [vmem:[#allocation9 + $0x74] sm:$0xf0]  ;;  %v16856_v26 = vor.u32 %v18837_v13, %v16855_v41 }
 0x76f   : > { %v19895_v24 = vpack.c.bf16 %v543_v5, %v543_v5  ;;  %v16764_v46 = vor.u32 %v18811_v23, %v16761_v18  ;;  %v16480_v29 = vor.u32 %v18742_v27, %v16479_v25  ;;  %v16729_v37 = vld [vmem:[#allocation9 + $0x270] sm:$0xf0]  ;;  %v18799_v5 = vld [vmem:[#allocation9 + $0x244] sm:$0xf]  ;;  %v16623_v18 = vld [vmem:[#allocation9 + $0x188] sm:$0xf] }
 0x770   : > { %10599 = vmatpush.bf16.msra.mxu0 %v16476_v15  ;;  %9610 = vmatpush.bf16.msra.mxu3 %v16356_v9  ;;  %v16527_v15 = vld [vmem:[#allocation9 + $0xc8] sm:$0xf]  ;;  %v18767_v9 = vld [vmem:[#allocation9 + $0x144] sm:$0xf]  ;;  %v16921_v14 = vld [vmem:[#allocation9 + $0x3f0] sm:$0xf0] }
 0x771   : > { %10608 = vmatpush.bf16.msra.mxu1 %v16668_v43  ;;  %10573 = vmatpush.bf16.msrb.mxu2 %v16728_v57  ;;  %v16903_v43 = vld [vmem:[#allocation9 + $0x3c0] sm:$0xf]  ;;  %v16528_v58 = vor.u32 %v18754_v50, %v16527_v15  ;;  %v16588_v19 = vor.u32 %v18767_v9, %v16585_v2  ;;  %v16655_v15 = vld [vmem:[#allocation9 + $0x1c8] sm:$0xf]  ;;  %v18786_v50 = vld [vmem:[#allocation9 + $0x1d4] sm:$0xf0] }
 0x772   : > { %10564 = vmatmul.bf16.vlgmr.msrb.gmra.mxu1 %v19889_v48  ;;  %v16904_v57 = vor.u32 %v18849_v16, %v16903_v43  ;;  %v16839_v43 = vld [vmem:[#allocation9 + $0x340] sm:$0xf]  ;;  %v18833_v16 = vld [vmem:[#allocation9 + $0x34c] sm:$0xf0]  ;;  %v16656_v9 = vor.u32 %v18786_v50, %v16655_v15  ;;  %v16447_v2 = vld [vmem:[#allocation9 + $0x28] sm:$0xf] }
 0x773   : > { %v16681_v27 = vld [vmem:[#allocation9 + $0x210] sm:$0xf0]  ;;  %v18774_v13 = vld [vmem:[#allocation9 + $0x174] sm:$0xf0]  ;;  %v16591_v50 = vld [vmem:[#allocation9 + $0x148] sm:$0xf] }
 0x774   : > { %10600 = vmatpush.bf16.msra.mxu0 %v16460_v20  ;;  %9611 = vmatpush.bf16.msra.mxu3 %v16340_v61  ;;  %v16511_v20 = vld [vmem:[#allocation9 + $0xa8] sm:$0xf]  ;;  %v16780_v61 = vor.u32 %v18815_v31, %v16777_v51  ;;  %v16840_v31 = vor.u32 %v18833_v16, %v16839_v43  ;;  %v18734_v51 = vld [vmem:[#allocation9 + $0x34] sm:$0xf0] }
 0x775   : > { %10609 = vmatpush.bf16.msra.mxu1 %v16652_v62  ;;  %10574 = vmatpush.bf16.msrb.mxu2 %v16712_v45  ;;  %v16887_v62 = vld [vmem:[#allocation9 + $0x3a0] sm:$0xf]  ;;  %v16512_v36 = vor.u32 %v18750_v8, %v16511_v20  ;;  %v18782_v20 = vld [vmem:[#allocation9 + $0x1b4] sm:$0xf0]  ;;  %v16783_v16 = vld [vmem:[#allocation9 + $0x2c8] sm:$0xf] }
 0x776   : > { %v16888_v45 = vor.u32 %v18845_v40, %v16887_v62  ;;  %v16823_v8 = vld [vmem:[#allocation9 + $0x320] sm:$0xf]  ;;  %v18795_v40 = vld [vmem:[#allocation9 + $0x224] sm:$0xf]  ;;  %v18770_v43 = vld [vmem:[#allocation9 + $0x154] sm:$0xf0] }
 0x778   : > { %10601 = vmatpush.bf16.msra.mxu0 %v16444_v4  ;;  %9612 = vmatpush.bf16.msra.mxu3 %v16324_v56  ;;  %v16495_v4 = vld [vmem:[#allocation9 + $0x88] sm:$0xf]  ;;  %v16553_v56 = vld [vmem:[#allocation9 + $0x110] sm:$0xf0] }
 0x779   : > { %10610 = vmatpush.bf16.msra.mxu1 %v16636_v3  ;;  %10575 = vmatpush.bf16.msrb.mxu2 %v16696_v59  ;;  %v16871_v3 = vld [vmem:[#allocation9 + $0x380] sm:$0xf]  ;;  %v16496_v34 = vor.u32 %v18746_v22, %v16495_v4  ;;  %v16671_v59 = vld [vmem:[#allocation9 + $0x1e8] sm:$0xf]  ;;  %v18756_v4 = vld [vmem:[#allocation9 + $0xec] sm:$0xf] }
 0x77a   : > { %v16872_v44 = vor.u32 %v18841_v42, %v16871_v3  ;;  %v16545_v42 = vld [vmem:[#allocation9 + $0xf8] sm:$0xf0] }
 0x77c   : > { %10602 = vmatpush.bf16.msra.mxu0 %v16428_v39  ;;  %9613 = vmatpush.bf16.msra.mxu3 %v16308_v6  ;;  %v19899_v7 = vpop.f32.mrf.mxu0  ;;  %v18790_v39 = vld [vmem:[#allocation9 + $0x1f4] sm:$0xf0]  ;;  %v18803_v6 = vld [vmem:[#allocation9 + $0x264] sm:$0xf] }
 0x77d   : > { %10611 = vmatpush.bf16.msra.mxu1 %v16620_v47  ;;  %10576 = vmatpush.bf16.msrb.mxu2 %v16680_v32  ;;  %v450_v47 = vperm.slane %v19875_v49, 3  ;;  %v16672_v10 = vor.u32 %v18790_v39, %v16671_v59  ;;  %v16607_v59 = vld [vmem:[#allocation9 + $0x168] sm:$0xf]  ;;  %v16548_v39 = vor.u32 %v18756_v4, %v16545_v42  ;;  %v18762_v42 = vld [vmem:[#allocation9 + $0x114] sm:$0xf0] }
 0x77e   : > { %v16559_v4 = vld [vmem:[#allocation9 + $0x108] sm:$0xf] }
 0x77f   : > { %10603 = vmatmul.bf16.vlgmr.msra.gmra.mxu0 %v19883_v52  ;;  %9614 = vmatmul.bf16.vlgmr.msra.gmra.mxu3 %v19870_v38  ;;  %v18759_v38 = vld [vmem:[#allocation9 + $0x104] sm:$0xf]  ;;  %v19903_v49 = vadd.f32 %v19346_v60, %v450_v47  ;;  %v18829_v60 = vld [vmem:[#allocation9 + $0x32c] sm:$0xf0]  ;;  %v16799_v47 = vld [vmem:[#allocation9 + $0x2e8] sm:$0xf] }
 0x780   : > { %10647 = vmatpush.bf16.msrb.mxu0 %v16544_v33  ;;  %10582 = vmatpush.bf16.msrb.mxu3 %v16920_v54  ;;  %v16556_v33 = vor.u32 %v18759_v38, %v16553_v56  ;;  %v18738_v54 = vld [vmem:[#allocation9 + $0x54] sm:$0xf0]  ;;  %v16824_v23 = vor.u32 %v18829_v60, %v16823_v8  ;;  %v16700_v56 = vor.u32 %v18795_v40, %v16697_v35  ;;  %v16575_v8 = vld [vmem:[#allocation9 + $0x128] sm:$0xf]  ;;  %v18744_v35 = vld [vmem:[#allocation9 + $0x8c] sm:$0xf] }
 0x781   : > { %10612 = vmatpush.bf16.msra.mxu1 %v16604_v1  ;;  %10621 = vmatpush.bf16.msra.mxu2 %v16796_v11  ;;  %v16732_v1 = vor.u32 %v18803_v6, %v16729_v37  ;;  %v16464_v11 = vor.u32 %v18738_v54, %v16463_v28  ;;  %vm536_vm9 = vcmp.gt.f32.partialorder %v19903_v49, 0.0  ;;  %v540_v38 = vmul.f32 0.2, %v19903_v49  ;;  %v18847_v37 = vld [vmem:[#allocation9 + $0x3c4] sm:$0xf] }
 0x782   : > { %10577 = vmatmul.bf16.vlgmr.msrb.gmra.mxu2 %v19895_v24  ;;  %v16905_v28 = vld [vmem:[#allocation9 + $0x3d0] sm:$0xf0]  ;;  %v16608_v54 = vor.u32 %v18774_v13, %v16607_v59  ;;  %v16767_v40 = vld [vmem:[#allocation9 + $0x2a8] sm:$0xf]  ;;  %v18835_v59 = vld [vmem:[#allocation9 + $0x364] sm:$0xf] }
 0x784   : > { %10648 = vmatpush.bf16.msrb.mxu0 %v16528_v58  ;;  %10583 = vmatpush.bf16.msrb.mxu3 %v16904_v57  ;;  %v9422_v32 = vpop.f32.mrf.mxu0  ;;  %v16713_v58 = vld [vmem:[#allocation9 + $0x250] sm:$0xf0]  ;;  %v16639_v57 = vld [vmem:[#allocation9 + $0x1a8] sm:$0xf] }
 0x785   : > { %10613 = vmatpush.bf16.msra.mxu1 %v16588_v19  ;;  %10622 = vmatpush.bf16.msra.mxu2 %v16780_v61  ;;  %v16716_v62 = vor.u32 %v18799_v5, %v16713_v58  ;;  %v16448_v19 = vor.u32 %v18734_v51, %v16447_v2  ;;  %v16640_v61 = vor.u32 %v18782_v20, %v16639_v57  ;;  %v18748_v58 = vld [vmem:[#allocation9 + $0xac] sm:$0xf]  ;;  %v16513_v2 = vld [vmem:[#allocation9 + $0xb8] sm:$0xf0]  ;;  %v16889_v51 = vld [vmem:[#allocation9 + $0x3b0] sm:$0xf0] }
 0x786   : > { %v16908_v5 = vor.u32 %v18847_v37, %v16905_v28  ;;  %v16592_v57 = vor.u32 %v18770_v43, %v16591_v50  ;;  %v16516_v60 = vor.u32 %v18748_v58, %v16513_v2  ;;  %v16465_v37 = vld [vmem:[#allocation9 + $0x58] sm:$0xf0]  ;;  %v18784_v28 = vld [vmem:[#allocation9 + $0x1cc] sm:$0xf] }
 0x787   : > { %v16449_v2 = vld [vmem:[#allocation9 + $0x38] sm:$0xf0] }
 0x788   : > { %10649 = vmatpush.bf16.msrb.mxu0 %v16512_v36  ;;  %10584 = vmatpush.bf16.msrb.mxu3 %v16888_v45  ;;  %v16431_v36 = vld [vmem:[#allocation9 + $0x8] sm:$0xf]  ;;  %v18778_v45 = vld [vmem:[#allocation9 + $0x194] sm:$0xf0] }
 0x789   : > { %10614 = vmatpush.bf16.msra.mxu1 %v16572_v55  ;;  %10623 = vmatpush.bf16.msra.mxu2 %v16764_v46  ;;  %v16807_v55 = vld [vmem:[#allocation9 + $0x300] sm:$0xf]  ;;  %v18825_v46 = vld [vmem:[#allocation9 + $0x30c] sm:$0xf0]  ;;  %v16432_v0 = vor.u32 %v18730_v63, %v16431_v36  ;;  %v16624_v25 = vor.u32 %v18778_v45, %v16623_v18  ;;  %v16497_v36 = vld [vmem:[#allocation9 + $0x98] sm:$0xf0] }
 0x78a   : > { %v16808_v41 = vor.u32 %v18825_v46, %v16807_v55  ;;  %v18839_v63 = vld [vmem:[#allocation9 + $0x384] sm:$0xf]  ;;  %v16500_v55 = vor.u32 %v18744_v35, %v16497_v36  ;;  %v16751_v46 = vld [vmem:[#allocation9 + $0x288] sm:$0xf]  ;;  %v18728_v35 = vld [vmem:[#allocation9 + $0xc] sm:$0xf] }
 0x78b   : > { %v16433_v36 = vld [vmem:[#allocation9 + $0x18] sm:$0xf0] }
 0x78c   : > { %10650 = vmatpush.bf16.msrb.mxu0 %v16496_v34  ;;  %10585 = vmatpush.bf16.msrb.mxu3 %v16872_v44  ;;  %v19907_v22 = vpop.f32.mrf.mxu1  ;;  %v19909_v3 = vpop.f32.mrf.mxu0  ;;  %v18851_v34 = vld [vmem:[#allocation9 + $0x3e4] sm:$0xf] }
 0x78d   : > { %10615 = vmatpush.bf16.msra.mxu1 %v16556_v33  ;;  %10624 = vmatpush.bf16.msra.mxu2 %v16748_v53  ;;  %v18791_v44 = vld [vmem:[#allocation9 + $0x204] sm:$0xf]  ;;  %v18822_v33 = vld [vmem:[#allocation9 + $0x2f4] sm:$0xf0]  ;;  %v16924_v53 = vor.u32 %v18851_v34, %v16921_v14 }
 0x78e   : > { %v16684_v6 = vor.u32 %v18791_v44, %v16681_v27  ;;  %v16800_v15 = vor.u32 %v18822_v33, %v16799_v47  ;;  %v16673_v44 = vld [vmem:[#allocation9 + $0x1f8] sm:$0xf0] }
 0x790   : > { %10651 = vmatpush.bf16.msrb.mxu0 %v16480_v29  ;;  %10586 = vmatpush.bf16.msrb.mxu3 %v16856_v26  ;;  %v18752_v29 = vld [vmem:[#allocation9 + $0xcc] sm:$0xf]  ;;  %v544_v26 = vsel %vm536_vm9, %v19903_v49, %v540_v38  ;;  %v18843_v49 = vld [vmem:[#allocation9 + $0x3a4] sm:$0xf]  ;;  %v18810_v38 = vld [vmem:[#allocation9 + $0x294] sm:$0xf0] }
 0x791   : > { %10660 = vmatpush.bf16.msrb.mxu1 %v16672_v10  ;;  %10625 = vmatpush.bf16.msra.mxu2 %v16732_v1  ;;  %v16529_v10 = vld [vmem:[#allocation9 + $0xd8] sm:$0xf0]  ;;  %v18818_v1 = vld [vmem:[#allocation9 + $0x2d4] sm:$0xf0]  ;;  %v16752_v13 = vor.u32 %v18810_v38, %v16751_v46 }
 0x792   : > { %10616 = vmatmul.bf16.vlgmr.msra.gmra.mxu1 %v19889_v48  ;;  %v16532_v32 = vor.u32 %v18752_v29, %v16529_v10  ;;  %v16784_v20 = vor.u32 %v18818_v1, %v16783_v16  ;;  %v18806_v29 = vld [vmem:[#allocation9 + $0x274] sm:$0xf0]  ;;  %v18736_v10 = vld [vmem:[#allocation9 + $0x4c] sm:$0xf]  ;;  %v16719_v1 = vld [vmem:[#allocation9 + $0x248] sm:$0xf] }
 0x793   : > { %v16468_v43 = vor.u32 %v18736_v10, %v16465_v37  ;;  %v18625_v37 = vld [vmem:[#allocation7 + $0xcc] sm:$0xf0] }
 0x794   : > { %10652 = vmatpush.bf16.msrb.mxu0 %v16464_v11  ;;  %10587 = vmatpush.bf16.msrb.mxu3 %v16840_v31  ;;  %v9435_v11 = vpop.f32.mrf.mxu1  ;;  %v19915_v31 = vpack.c.bf16 %v544_v26, %v544_v26  ;;  %v16657_v26 = vld [vmem:[#allocation9 + $0x1d8] sm:$0xf0] }
 0x795   : > { %10661 = vmatpush.bf16.msrb.mxu1 %v16656_v9  ;;  %10626 = vmatpush.bf16.msra.mxu2 %v16716_v62  ;;  %v9474_v9 = vpop.f32.mrf.mxu0  ;;  %v18766_v62 = vld [vmem:[#allocation9 + $0x134] sm:$0xf0]  ;;  %v16660_v16 = vor.u32 %v18784_v28, %v16657_v26  ;;  %v16911_v26 = vld [vmem:[#allocation9 + $0x3c8] sm:$0xf] }
 0x796   : > { %v16576_v18 = vor.u32 %v18766_v62, %v16575_v8  ;;  %v18802_v11 = vld [vmem:[#allocation9 + $0x254] sm:$0xf0]  ;;  %v18732_v9 = vld [vmem:[#allocation9 + $0x2c] sm:$0xf]  ;;  %v16825_v8 = vld [vmem:[#allocation9 + $0x330] sm:$0xf0] }
 0x797   : > { %v16703_v62 = vld [vmem:[#allocation9 + $0x228] sm:$0xf] }
 0x798   : > { %10653 = vmatpush.bf16.msrb.mxu0 %v16448_v19  ;;  %10588 = vmatpush.bf16.msrb.mxu3 %v16824_v23  ;;  %v18814_v19 = vld [vmem:[#allocation9 + $0x2b4] sm:$0xf0]  ;;  %v16873_v23 = vld [vmem:[#allocation9 + $0x390] sm:$0xf0] }
 0x799   : > { %10662 = vmatpush.bf16.msrb.mxu1 %v16640_v61  ;;  %10627 = vmatpush.bf16.msra.mxu2 %v16700_v56  ;;  %v16892_v61 = vor.u32 %v18843_v49, %v16889_v51  ;;  %v16768_v45 = vor.u32 %v18814_v19, %v16767_v40  ;;  %v18740_v56 = vld [vmem:[#allocation9 + $0x6c] sm:$0xf]  ;;  %v16876_v14 = vor.u32 %v18839_v63, %v16873_v23  ;;  %v16641_v51 = vld [vmem:[#allocation9 + $0x1b8] sm:$0xf0] }
 0x79a   : > { %v18780_v49 = vld [vmem:[#allocation9 + $0x1ac] sm:$0xf]  ;;  %v16452_v40 = vor.u32 %v18732_v9, %v16449_v2  ;;  %v16785_v9 = vld [vmem:[#allocation9 + $0x2d8] sm:$0xf0]  ;;  %v18621_v2 = vld [vmem:[#allocation7 + $0xac] sm:$0xf0] }
 0x79b   : > { %v16644_v19 = vor.u32 %v18780_v49, %v16641_v51  ;;  %v18776_v23 = vld [vmem:[#allocation9 + $0x18c] sm:$0xf]  ;;  %v16895_v51 = vld [vmem:[#allocation9 + $0x3a8] sm:$0xf] }
 0x79c   : > { %10654 = vmatpush.bf16.msrb.mxu0 %v16432_v0  ;;  %10589 = vmatpush.bf16.msrb.mxu3 %v16808_v41  ;;  %v19920_v34 = vpop.f32.mrf.mxu1  ;;  %v16481_v0 = vld [vmem:[#allocation9 + $0x78] sm:$0xf0]  ;;  %v16560_v41 = vor.u32 %v18762_v42, %v16559_v4  ;;  %v18629_v4 = vld [vmem:[#allocation7 + $0xec] sm:$0xf0]  ;;  %v18823_v42 = vld [vmem:[#allocation9 + $0x304] sm:$0xf] }
 0x79d   : > { %10663 = vmatpush.bf16.msrb.mxu1 %v16624_v25  ;;  %10628 = vmatpush.bf16.msra.mxu2 %v16684_v6  ;;  %v18788_v25 = vld [vmem:[#allocation9 + $0x1ec] sm:$0xf]  ;;  %v16484_v47 = vor.u32 %v18740_v56, %v16481_v0  ;;  %v16927_v56 = vld [vmem:[#allocation9 + $0x3e8] sm:$0xf]  ;;  %v16436_v0 = vor.u32 %v18728_v35, %v16433_v36  ;;  %v16769_v36 = vld [vmem:[#allocation9 + $0x2b8] sm:$0xf0] }
 0x79e   : > { %v19922_v27 = vpop.f32.mrf.mxu0  ;;  %v16676_v33 = vor.u32 %v18788_v25, %v16673_v44  ;;  %v16687_v44 = vld [vmem:[#allocation9 + $0x208] sm:$0xf]  ;;  %v18812_v35 = vld [vmem:[#allocation9 + $0x2ac] sm:$0xf] }
 0x79f   : > { %10655 = vmatmul.bf16.vlgmr.msrb.gmra.mxu0 %v19883_v52  ;;  %10590 = vmatmul.bf16.vlgmr.msrb.gmra.mxu3 %v19915_v31 }
 0x7a0   : > { %10699 = vmatpush.bf16.msra.mxu0 %v16548_v39  ;;  %10634 = vmatpush.bf16.msra.mxu3 %v16924_v53  ;;  %v16857_v39 = vld [vmem:[#allocation9 + $0x370] sm:$0xf0]  ;;  %v16735_v53 = vld [vmem:[#allocation9 + $0x268] sm:$0xf] }
 0x7a1   : > { %10664 = vmatpush.bf16.msrb.mxu1 %v16608_v54  ;;  %10673 = vmatpush.bf16.msrb.mxu2 %v16800_v15  ;;  %v16860_v6 = vor.u32 %v18835_v59, %v16857_v39  ;;  %v18831_v54 = vld [vmem:[#allocation9 + $0x344] sm:$0xf]  ;;  %v16841_v15 = vld [vmem:[#allocation9 + $0x350] sm:$0xf0]  ;;  %v18794_v59 = vld [vmem:[#allocation9 + $0x214] sm:$0xf0] }
 0x7a2   : > { %10629 = vmatmul.bf16.vlgmr.msra.gmra.mxu2 %v19895_v24  ;;  %v19924_v50 = vpop.f32.mrf.mxu2  ;;  %v16844_v58 = vor.u32 %v18831_v54, %v16841_v15  ;;  %v18772_v39 = vld [vmem:[#allocation9 + $0x16c] sm:$0xf]  ;;  %v16688_v28 = vor.u32 %v18794_v59, %v16687_v44  ;;  %v18850_v54 = vld [vmem:[#allocation9 + $0x3d4] sm:$0xf0] }
 0x7a4   : > { %10700 = vmatpush.bf16.msra.mxu0 %v16532_v32  ;;  %10635 = vmatpush.bf16.msra.mxu3 %v16908_v5  ;;  %v16736_v32 = vor.u32 %v18806_v29, %v16735_v53  ;;  %v9487_v5 = vpop.f32.mrf.mxu1  ;;  %v18820_v53 = vld [vmem:[#allocation9 + $0x2ec] sm:$0xf]  ;;  %v16801_v29 = vld [vmem:[#allocation9 + $0x2f8] sm:$0xf0] }
 0x7a5   : > { %10665 = vmatpush.bf16.msrb.mxu1 %v16592_v57  ;;  %10674 = vmatpush.bf16.msrb.mxu2 %v16784_v20  ;;  %v18827_v20 = vld [vmem:[#allocation9 + $0x324] sm:$0xf]  ;;  %v16912_v5 = vor.u32 %v18850_v54, %v16911_v26 }
 0x7a6   : > { %v9526_v57 = vpop.f32.mrf.mxu0  ;;  %v16828_v63 = vor.u32 %v18827_v20, %v16825_v8  ;;  %v19932_v20 = vld [vmem:[#allocation10 + $0x20] ss:$8 sm:$0xf] }
 0x7a7   : > { %v18846_v57 = vld [vmem:[#allocation9 + $0x3b4] sm:$0xf0] }
 0x7a8   : > { %10701 = vmatpush.bf16.msra.mxu0 %v16516_v60  ;;  %10636 = vmatpush.bf16.msra.mxu3 %v16892_v61  ;;  %v16720_v60 = vor.u32 %v18802_v11, %v16719_v1  ;;  %v18798_v61 = vld [vmem:[#allocation9 + $0x234] sm:$0xf0]  ;;  %v16593_v1 = vld [vmem:[#allocation9 + $0x158] sm:$0xf0]  ;;  %v18816_v11 = vld [vmem:[#allocation9 + $0x2cc] sm:$0xf] }
 0x7a9   : > { %10666 = vmatpush.bf16.msrb.mxu1 %v16576_v18  ;;  %10675 = vmatpush.bf16.msrb.mxu2 %v16768_v45  ;;  %v16625_v18 = vld [vmem:[#allocation9 + $0x198] sm:$0xf0]  ;;  %v17047_v45 = vld [vmem:[#allocation7 + $0xe0] sm:$0xf]  ;;  %v16704_v38 = vor.u32 %v18798_v61, %v16703_v62  ;;  %v18764_v62 = vld [vmem:[#allocation9 + $0x12c] sm:$0xf] }
 0x7aa   : > { %v9448_v46 = vpop.f32.mrf.mxu2  ;;  %v16628_v25 = vor.u32 %v18776_v23, %v16625_v18  ;;  %v16577_v61 = vld [vmem:[#allocation9 + $0x138] sm:$0xf0]  ;;  %v18617_v23 = vld [vmem:[#allocation7 + $0x8c] sm:$0xf0]  ;;  %v8763_v18 = vperm.slane %v19932_v20, 0 }
 0x7ab   : > { %v18760_v46 = vld [vmem:[#allocation9 + $0x10c] sm:$0xf] }
 0x7ac   : > { %10702 = vmatpush.bf16.msra.mxu0 %v16500_v55  ;;  %10637 = vmatpush.bf16.msra.mxu3 %v16876_v14  ;;  %v16809_v55 = vld [vmem:[#allocation9 + $0x310] sm:$0xf0]  ;;  %v18854_v14 = vld [vmem:[#allocation9 + $0x3f4] sm:$0xf0] }
 0x7ad   : > { %10667 = vmatpush.bf16.msrb.mxu1 %v16560_v41  ;;  %10676 = vmatpush.bf16.msrb.mxu2 %v16752_v13  ;;  %v19927_v41 = vpop.f32.mrf.mxu1  ;;  %v17048_v13 = vor.u32 %v18629_v4, %v17047_v45  ;;  %v16928_v10 = vor.u32 %v18854_v14, %v16927_v56  ;;  %v16879_v45 = vld [vmem:[#allocation9 + $0x388] sm:$0xf]  ;;  %v18842_v4 = vld [vmem:[#allocation9 + $0x394] sm:$0xf0]  ;;  %v18808_v14 = vld [vmem:[#allocation9 + $0x28c] sm:$0xf] }
 0x7ae   : > { %v16880_v59 = vor.u32 %v18842_v4, %v16879_v45 }
 0x7b0   : > { %10703 = vmatpush.bf16.msra.mxu0 %v16484_v47  ;;  %10638 = vmatpush.bf16.msra.mxu3 %v16860_v6  ;;  %v16812_v47 = vor.u32 %v18823_v42, %v16809_v55  ;;  %v17031_v6 = vld [vmem:[#allocation7 + $0xc0] sm:$0xf]  ;;  %v16580_v42 = vor.u32 %v18764_v62, %v16577_v61  ;;  %v16772_v55 = vor.u32 %v18812_v35, %v16769_v36  ;;  %v16721_v62 = vld [vmem:[#allocation9 + $0x258] sm:$0xf0] }
 0x7b1   : > { %10712 = vmatpush.bf16.msra.mxu1 %v16676_v33  ;;  %10677 = vmatpush.bf16.msrb.mxu2 %v16736_v32  ;;  %v16609_v33 = vld [vmem:[#allocation9 + $0x178] sm:$0xf0]  ;;  %v16804_v32 = vor.u32 %v18820_v53, %v16801_v29  ;;  %v16863_v29 = vld [vmem:[#allocation9 + $0x368] sm:$0xf]  ;;  %v17143_v36 = vld [vmem:[#allocation7 + $0x1a0] sm:$0xf] }
 0x7b2   : > { %10668 = vmatmul.bf16.vlgmr.msrb.gmra.mxu1 %v19889_v48  ;;  %v16612_v15 = vor.u32 %v18772_v39, %v16609_v33  ;;  %v19930_v49 = vpop.f32.mrf.mxu2  ;;  %v18613_v39 = vld [vmem:[#allocation7 + $0x6c] sm:$0xf0]  ;;  %v9421_v33 = vadd.f32 %v19899_v7, %v8763_v18  ;;  %v8764_v18 = vperm.slane %v19932_v20, 1 }
 0x7b3   : > { %v18657_v7 = vld [vmem:[#allocation7 + $0x1cc] sm:$0xf0] }
 0x7b4   : > { %10704 = vmatpush.bf16.msra.mxu0 %v16468_v43  ;;  %10639 = vmatpush.bf16.msra.mxu3 %v16844_v58  ;;  %v18768_v43 = vld [vmem:[#allocation9 + $0x14c] sm:$0xf]  ;;  %v17015_v58 = vld [vmem:[#allocation7 + $0xa0] sm:$0xf] }
 0x7b5   : > { %10713 = vmatpush.bf16.msra.mxu1 %v16660_v16  ;;  %10678 = vmatpush.bf16.msrb.mxu2 %v16720_v60  ;;  %v17032_v16 = vor.u32 %v18625_v37, %v17031_v6  ;;  %v16596_v8 = vor.u32 %v18768_v43, %v16593_v1  ;;  %v16788_v60 = vor.u32 %v18816_v11, %v16785_v9  ;;  %v16967_v43 = vld [vmem:[#allocation7 + $0x40] sm:$0xf]  ;;  %v18609_v1 = vld [vmem:[#allocation7 + $0x4c] sm:$0xf0] }
 0x7b6   : > { %v17159_v11 = vld [vmem:[#allocation7 + $0x1c0] sm:$0xf] }
 0x7b8   : > { %10705 = vmatpush.bf16.msra.mxu0 %v16452_v40  ;;  %10640 = vmatpush.bf16.msra.mxu3 %v16828_v63  ;;  %v9539_v40 = vpop.f32.mrf.mxu1  ;;  %v16999_v63 = vld [vmem:[#allocation7 + $0x80] sm:$0xf] }
 0x7b9   : > { %10714 = vmatpush.bf16.msra.mxu1 %v16644_v19  ;;  %10679 = vmatpush.bf16.msrb.mxu2 %v16704_v38  ;;  %v17016_v19 = vor.u32 %v18621_v2, %v17015_v58  ;;  %v16561_v38 = vld [vmem:[#allocation9 + $0x118] sm:$0xf0]  ;;  %v17000_v56 = vor.u32 %v18617_v23, %v16999_v63  ;;  %v18834_v58 = vld [vmem:[#allocation9 + $0x354] sm:$0xf0]  ;;  %v16951_v40 = vld [vmem:[#allocation7 + $0x20] sm:$0xf] }
 0x7ba   : > { %v9500_v53 = vpop.f32.mrf.mxu2  ;;  %v16564_v6 = vor.u32 %v18760_v46, %v16561_v38  ;;  %v18830_v23 = vld [vmem:[#allocation9 + $0x334] sm:$0xf0] }
 0x7bb   : > { %v18826_v53 = vld [vmem:[#allocation9 + $0x314] sm:$0xf0] }
 0x7bc   : > { %10706 = vmatpush.bf16.msra.mxu0 %v16436_v0  ;;  %10641 = vmatpush.bf16.msra.mxu3 %v16812_v47  ;;  %v16753_v0 = vld [vmem:[#allocation9 + $0x298] sm:$0xf0]  ;;  %v19937_v44 = vpop.f32.mrf.mxu0  ;;  %v18661_v47 = vld [vmem:[#allocation7 + $0x1ec] sm:$0xf0] }
 0x7bd   : > { %10715 = vmatpush.bf16.msra.mxu1 %v16628_v25  ;;  %10680 = vmatpush.bf16.msrb.mxu2 %v16688_v28  ;;  %v16983_v25 = vld [vmem:[#allocation7 + $0x60] sm:$0xf]  ;;  %v16756_v37 = vor.u32 %v18808_v14, %v16753_v0  ;;  %v9434_v28 = vadd.f32 %v19907_v22, %v9421_v33  ;;  %v18800_v22 = vld [vmem:[#allocation9 + $0x24c] sm:$0xf]  ;;  %v18601_v0 = vld [vmem:[#allocation7 + $0xc] sm:$0xf0] }
 0x7be   : > { %v16984_v26 = vor.u32 %v18613_v39, %v16983_v25  ;;  %v16724_v4 = vor.u32 %v18800_v22, %v16721_v62  ;;  %v16935_v14 = vld [vmem:[#allocation7] sm:$0xf]  ;;  %v18649_v39 = vld [vmem:[#allocation7 + $0x18c] sm:$0xf0]  ;;  %v16815_v33 = vld [vmem:[#allocation9 + $0x308] sm:$0xf] }
 0x7bf   : > { %10707 = vmatmul.bf16.vlgmr.msra.gmra.mxu0 %v19883_v52  ;;  %10642 = vmatmul.bf16.vlgmr.msra.gmra.mxu3 %v19915_v31  ;;  %v16896_v52 = vor.u32 %v18846_v57, %v16895_v51  ;;  %v9447_v9 = vadd.f32 %v19924_v50, %v9434_v28  ;;  %v18653_v50 = vld [vmem:[#allocation7 + $0x1ac] sm:$0xf0]  ;;  %v16929_v28 = vld [vmem:[#allocation9 + $0x3f8] sm:$0xf0] }
 0x7c0   : > { %11391 = vmatpush.bf16.msrb.mxu0 %v17048_v13  ;;  %10686 = vmatpush.bf16.msrb.mxu3 %v16928_v10  ;;  %v17175_v13 = vld [vmem:[#allocation7 + $0x1e0] sm:$0xf]  ;;  %v18838_v10 = vld [vmem:[#allocation9 + $0x374] sm:$0xf0]  ;;  %v17144_v38 = vor.u32 %v18653_v50, %v17143_v36  ;;  %v18641_v36 = vld [vmem:[#allocation7 + $0x14c] sm:$0xf0] }
 0x7c1   : > { %10716 = vmatpush.bf16.msra.mxu1 %v16612_v15  ;;  %10725 = vmatpush.bf16.msra.mxu2 %v16804_v32  ;;  %v17176_v54 = vor.u32 %v18661_v47, %v17175_v13  ;;  %v18804_v15 = vld [vmem:[#allocation9 + $0x26c] sm:$0xf]  ;;  %v16737_v32 = vld [vmem:[#allocation9 + $0x278] sm:$0xf0]  ;;  %v18627_v13 = vld [vmem:[#allocation7 + $0xe4] sm:$0xf] }
 0x7c2   : > { %10681 = vmatmul.bf16.vlgmr.msrb.gmra.mxu2 %v19895_v24  ;;  %v9459_v2 = vpop.f32.mrf.mxu3  ;;  %v16740_v51 = vor.u32 %v18804_v15, %v16737_v32  ;;  %v17049_v47 = vld [vmem:[#allocation7 + $0xf0] sm:$0xf0]  ;;  %v16689_v15 = vld [vmem:[#allocation9 + $0x218] sm:$0xf0]  ;;  %v18645_v32 = vld [vmem:[#allocation7 + $0x16c] sm:$0xf0] }
 0x7c3   : > { %v9460_v57 = vadd.f32 %v9459_v2, %v9447_v9  ;;  %v9473_v9 = vadd.f32 %v19909_v3, %v8764_v18  ;;  %v18623_v2 = vld [vmem:[#allocation7 + $0xc4] sm:$0xf]  ;;  %v17287_v50 = vld [vmem:[#allocation7 + $0x2c0] sm:$0xf] }
 0x7c4   : > { %11392 = vmatpush.bf16.msrb.mxu0 %v17032_v16  ;;  %10687 = vmatpush.bf16.msrb.mxu3 %v16912_v5  ;;  %v16864_v16 = vor.u32 %v18838_v10, %v16863_v29  ;;  %v16847_v5 = vld [vmem:[#allocation9 + $0x348] sm:$0xf]  ;;  %v9578_v61 = vpop.f32.mrf.mxu0  ;;  %v18619_v18 = vld [vmem:[#allocation7 + $0xa4] sm:$0xf] }
 0x7c5   : > { %10717 = vmatpush.bf16.msra.mxu1 %v16596_v8  ;;  %10726 = vmatpush.bf16.msra.mxu2 %v16788_v60  ;;  %v16968_v8 = vor.u32 %v18609_v1, %v16967_v43  ;;  %v17160_v60 = vor.u32 %v18657_v7, %v17159_v11  ;;  %v16848_v35 = vor.u32 %v18834_v58, %v16847_v5  ;;  %vm9619_vm10 = vcmp.gt.f32.partialorder %v9460_v57, 0.0  ;;  %v19944_v45 = vpop.f32.mrf.mxu2  ;;  %v17303_v11 = vld [vmem:[#allocation7 + $0x2e0] sm:$0xf]  ;;  %v18693_v7 = vld [vmem:[#allocation7 + $0x2ec] sm:$0xf0] }
 0x7c6   : > { %v9623_v63 = vmul.f32 0.2, %v9460_v57  ;;  %v16816_v1 = vor.u32 %v18826_v53, %v16815_v33  ;;  %v9486_v62 = vadd.f32 %v19920_v34, %v9473_v9  ;;  %v17095_v61 = vld [vmem:[#allocation7 + $0x140] sm:$0xf]  ;;  %v17001_v33 = vld [vmem:[#allocation7 + $0x90] sm:$0xf0] }
 0x7c7   : > { %v18840_v53 = vld [vmem:[#allocation9 + $0x38c] sm:$0xf] }
 0x7c8   : > { %11393 = vmatpush.bf16.msrb.mxu0 %v17016_v19  ;;  %10688 = vmatpush.bf16.msrb.mxu3 %v16896_v52  ;;  %v18605_v19 = vld [vmem:[#allocation7 + $0x2c] sm:$0xf0]  ;;  %v16831_v52 = vld [vmem:[#allocation9 + $0x328] sm:$0xf] }
 0x7c9   : > { %10718 = vmatpush.bf16.msra.mxu1 %v16580_v42  ;;  %10727 = vmatpush.bf16.msra.mxu2 %v16772_v55  ;;  %v18796_v42 = vld [vmem:[#allocation9 + $0x22c] sm:$0xf]  ;;  %v9627_v55 = vsel %vm9619_vm10, %v9460_v57, %v9623_v63  ;;  %v16952_v46 = vor.u32 %v18605_v19, %v16951_v40  ;;  %v17304_v19 = vor.u32 %v18693_v7, %v17303_v11  ;;  %v18659_v11 = vld [vmem:[#allocation7 + $0x1e4] sm:$0xf]  ;;  %v17177_v7 = vld [vmem:[#allocation7 + $0x1f0] sm:$0xf0] }
 0x7ca   : > { %v9631_v25 = vadd.f32 %v9627_v55, %v19690_v17  ;;  %v9461_v29 = vpop.f32.mrf.mxu3  ;;  %v17111_v17 = vld [vmem:[#allocation7 + $0x160] sm:$0xf]  ;;  %v9499_v63 = vadd.f32 %v19930_v49, %v9486_v62  ;;  %v16897_v55 = vld [vmem:[#allocation9 + $0x3b8] sm:$0xf0]  ;;  %v17180_v62 = vor.u32 %v18659_v11, %v17177_v7  ;;  %v18725_v11 = vld [vmem:[#allocation7 + $0x3ec] sm:$0xf0] }
 0x7cb   : > { %v17112_v40 = vor.u32 %v18645_v32, %v17111_v17  ;;  %v16881_v29 = vld [vmem:[#allocation9 + $0x398] sm:$0xf0]  ;;  %v18681_v32 = vld [vmem:[#allocation7 + $0x28c] sm:$0xf0] }
 0x7cc   : > { %11394 = vmatpush.bf16.msrb.mxu0 %v17000_v56  ;;  %10689 = vmatpush.bf16.msrb.mxu3 %v16880_v59  ;;  %v16705_v56 = vld [vmem:[#allocation9 + $0x238] sm:$0xf0]  ;;  %v17127_v59 = vld [vmem:[#allocation7 + $0x180] sm:$0xf]  ;;  %v9635_v43 = vmul.f32 0.70710677, %v9631_v25 }
 0x7cd   : > { %10719 = vmatpush.bf16.msra.mxu1 %v16564_v6  ;;  %10728 = vmatpush.bf16.msra.mxu2 %v16756_v37  ;;  %v16708_v10 = vor.u32 %v18796_v42, %v16705_v56  ;;  %v18792_v6 = vld [vmem:[#allocation9 + $0x20c] sm:$0xf]  ;;  %v9552_v22 = vpop.f32.mrf.mxu2  ;;  %v17271_v25 = vld [vmem:[#allocation7 + $0x2a0] sm:$0xf] }
 0x7ce   : > { %v18852_v37 = vld [vmem:[#allocation9 + $0x3ec] sm:$0xf]  ;;  %v16692_v57 = vor.u32 %v18792_v6, %v16689_v15 }
 0x7cf   : > { %v19948_v5 = vpop.f32.mrf.mxu1  ;;  %v16932_v58 = vor.u32 %v18852_v37, %v16929_v28  ;;  %v18844_v42 = vld [vmem:[#allocation9 + $0x3ac] sm:$0xf] }
 0x7d0   : > { %11395 = vmatpush.bf16.msrb.mxu0 %v16984_v26  ;;  %10690 = vmatpush.bf16.msrb.mxu3 %v16864_v16  ;;  %v16936_v26 = vor.u32 %v18601_v0, %v16935_v14  ;;  %v17052_v16 = vor.u32 %v18627_v13, %v17049_v47  ;;  %v17079_v14 = vld [vmem:[#allocation7 + $0x120] sm:$0xf]  ;;  %v18637_v0 = vld [vmem:[#allocation7 + $0x12c] sm:$0xf0]  ;;  %v16900_v47 = vor.u32 %v18844_v42, %v16897_v55 }
 0x7d1   : > { %11404 = vmatpush.bf16.msrb.mxu1 %v17176_v54  ;;  %10729 = vmatpush.bf16.msra.mxu2 %v16740_v51  ;;  %v17128_v54 = vor.u32 %v18649_v39, %v17127_v59  ;;  %v17033_v51 = vld [vmem:[#allocation7 + $0xd0] sm:$0xf0]  ;;  %v18615_v59 = vld [vmem:[#allocation7 + $0x84] sm:$0xf]  ;;  %v17080_v37 = vor.u32 %v18637_v0, %v17079_v14 }
 0x7d2   : > { %10720 = vmatmul.bf16.vlgmr.msra.gmra.mxu1 %v19889_v48  ;;  %v16832_v48 = vor.u32 %v18830_v23, %v16831_v52  ;;  %v17036_v3 = vor.u32 %v18623_v2, %v17033_v51  ;;  %v18689_v52 = vld [vmem:[#allocation7 + $0x2cc] sm:$0xf0]  ;;  %v9511_v34 = vpop.f32.mrf.mxu3  ;;  %v17004_v17 = vor.u32 %v18615_v59, %v17001_v33  ;;  %v16865_v2 = vld [vmem:[#allocation9 + $0x378] sm:$0xf0]  ;;  %v16953_v14 = vld [vmem:[#allocation7 + $0x30] sm:$0xf0] }
 0x7d3   : > { %v17288_v56 = vor.u32 %v18689_v52, %v17287_v50  ;;  %v18655_v50 = vld [vmem:[#allocation7 + $0x1c4] sm:$0xf]  ;;  %v17161_v52 = vld [vmem:[#allocation7 + $0x1d0] sm:$0xf0]  ;;  %v18669_v33 = vld [vmem:[#allocation7 + $0x22c] sm:$0xf0] }
 0x7d4   : > { %11396 = vmatpush.bf16.msrb.mxu0 %v16968_v8  ;;  %10691 = vmatpush.bf16.msrb.mxu3 %v16848_v35  ;;  %v18848_v8 = vld [vmem:[#allocation9 + $0x3cc] sm:$0xf]  ;;  %v19951_v35 = vpack.c.bf16 %v9635_v43, %v9635_v43  ;;  %v18611_v43 = vld [vmem:[#allocation7 + $0x64] sm:$0xf]  ;;  %v17164_v55 = vor.u32 %v18655_v50, %v17161_v52  ;;  %v18626_v50 = vld [vmem:[#allocation7 + $0xd4] sm:$0xf0] }
 0x7d5   : > { %11405 = vmatpush.bf16.msrb.mxu1 %v17160_v60  ;;  %10730 = vmatpush.bf16.msra.mxu2 %v16724_v4  ;;  %v16913_v60 = vld [vmem:[#allocation9 + $0x3d8] sm:$0xf0]  ;;  %v17017_v4 = vld [vmem:[#allocation7 + $0xb0] sm:$0xf0]  ;;  %v18651_v0 = vld [vmem:[#allocation7 + $0x1a4] sm:$0xf] }
 0x7d6   : > { %v16916_v23 = vor.u32 %v18848_v8, %v16913_v60  ;;  %v17020_v49 = vor.u32 %v18619_v18, %v17017_v4 }
 0x7d7   : > { %v9591_v13 = vpop.f32.mrf.mxu1 }
 0x7d8   : > { %11397 = vmatpush.bf16.msrb.mxu0 %v16952_v46  ;;  %10692 = vmatpush.bf16.msrb.mxu3 %v16832_v48  ;;  %v9512_v46 = vadd.f32 %v9511_v34, %v9499_v63  ;;  %v18685_v48 = vld [vmem:[#allocation7 + $0x2ac] sm:$0xf0]  ;;  %v18832_v63 = vld [vmem:[#allocation9 + $0x34c] sm:$0xf] }
 0x7d9   : > { %11406 = vmatpush.bf16.msrb.mxu1 %v17144_v38  ;;  %10731 = vmatpush.bf16.msra.mxu2 %v16708_v10  ;;  %v17096_v38 = vor.u32 %v18641_v36, %v17095_v61  ;;  %v8765_v10 = vperm.slane %v19932_v20, 2  ;;  %v17272_v28 = vor.u32 %v18685_v48, %v17271_v25  ;;  %v16969_v36 = vld [vmem:[#allocation7 + $0x50] sm:$0xf0]  ;;  %v16833_v48 = vld [vmem:[#allocation9 + $0x338] sm:$0xf0] }
 0x7da   : > { %vm9620_vm11 = vcmp.gt.f32.partialorder %v9512_v46, 0.0  ;;  %v9624_v39 = vmul.f32 0.2, %v9512_v46  ;;  %v9513_v9 = vpop.f32.mrf.mxu3 }
 0x7db   : > { %v9525_v61 = vadd.f32 %v19922_v27, %v8765_v10  ;;  %v18673_v27 = vld [vmem:[#allocation7 + $0x24c] sm:$0xf0] }
 0x7dc   : > { %11398 = vmatpush.bf16.msrb.mxu0 %v16936_v26  ;;  %10693 = vmatpush.bf16.msrb.mxu3 %v16816_v1  ;;  %v9628_v6 = vsel %vm9620_vm11, %v9512_v46, %v9624_v39  ;;  %v17063_v26 = vld [vmem:[#allocation7 + $0x100] sm:$0xf]  ;;  %v16985_v1 = vld [vmem:[#allocation7 + $0x70] sm:$0xf0]  ;;  %v19959_v51 = vpop.f32.mrf.mxu0 }
 0x7dd   : > { %11407 = vmatpush.bf16.msrb.mxu1 %v17128_v54  ;;  %10732 = vmatpush.bf16.msra.mxu2 %v16692_v57  ;;  %v18633_v54 = vld [vmem:[#allocation7 + $0x10c] sm:$0xf0]  ;;  %v9632_v15 = vadd.f32 %v9628_v6, %v19704_v12  ;;  %v17239_v12 = vld [vmem:[#allocation7 + $0x260] sm:$0xf]  ;;  %v16988_v60 = vor.u32 %v18611_v43, %v16985_v1  ;;  %v9538_v18 = vadd.f32 %v19927_v41, %v9525_v61  ;;  %v18828_v41 = vld [vmem:[#allocation9 + $0x32c] sm:$0xf] }
 0x7de   : > { %v17064_v22 = vor.u32 %v18633_v54, %v17063_v26  ;;  %v17223_v46 = vld [vmem:[#allocation7 + $0x240] sm:$0xf]  ;;  %v17129_v26 = vld [vmem:[#allocation7 + $0x190] sm:$0xf0]  ;;  %v16836_v54 = vor.u32 %v18828_v41, %v16833_v48  ;;  %v16817_v43 = vld [vmem:[#allocation9 + $0x318] sm:$0xf0] }
 0x7df   : > { %11399 = vmatmul.bf16.vlgmr.msrb.gmra.mxu0 %v19951_v35  ;;  %10694 = vmatmul.bf16.vlgmr.msrb.gmra.mxu3 %v19915_v31  ;;  %v9636_v8 = vmul.f32 0.70710677, %v9632_v15  ;;  %v9551_v25 = vadd.f32 %v19944_v45, %v9538_v18  ;;  %v17224_v13 = vor.u32 %v18673_v27, %v17223_v46  ;;  %v18647_v45 = vld [vmem:[#allocation7 + $0x184] sm:$0xf]  ;;  %v17055_v15 = vld [vmem:[#allocation7 + $0xe8] sm:$0xf] }
 0x7e0   : > { %11443 = vmatpush.bf16.msra.mxu0 %v17052_v16  ;;  %10738 = vmatpush.bf16.msra.mxu3 %v16932_v58  ;;  %v16884_v16 = vor.u32 %v18840_v53, %v16881_v29  ;;  %v18836_v58 = vld [vmem:[#allocation9 + $0x36c] sm:$0xf]  ;;  %v18599_v53 = vld [vmem:[#allocation7 + $0x4] sm:$0xf]  ;;  %v17431_v1 = vld [vmem:[#allocation7 + $0x3e0] sm:$0xf] }
 0x7e1   : > { %11408 = vmatpush.bf16.msrb.mxu1 %v17112_v40  ;;  %11417 = vmatpush.bf16.msrb.mxu2 %v17304_v19  ;;  %v18677_v40 = vld [vmem:[#allocation7 + $0x26c] sm:$0xf0]  ;;  %v18607_v19 = vld [vmem:[#allocation7 + $0x44] sm:$0xf]  ;;  %v19963_v34 = vpack.c.bf16 %v9636_v8, %v9636_v8  ;;  %v17415_v18 = vld [vmem:[#allocation7 + $0x3c0] sm:$0xf] }
 0x7e2   : > { %10733 = vmatmul.bf16.vlgmr.msra.gmra.mxu2 %v19895_v24  ;;  %v17255_v24 = vld [vmem:[#allocation7 + $0x280] sm:$0xf]  ;;  %v17240_v4 = vor.u32 %v18677_v40, %v17239_v12  ;;  %v16972_v42 = vor.u32 %v18607_v19, %v16969_v36  ;;  %v9563_v39 = vpop.f32.mrf.mxu3  ;;  %v18691_v40 = vld [vmem:[#allocation7 + $0x2e4] sm:$0xf]  ;;  %v17305_v19 = vld [vmem:[#allocation7 + $0x2f0] sm:$0xf0] }
 0x7e3   : > { %v17256_v57 = vor.u32 %v18681_v32, %v17255_v24  ;;  %v9564_v29 = vadd.f32 %v9563_v39, %v9551_v25  ;;  %v18824_v24 = vld [vmem:[#allocation9 + $0x30c] sm:$0xf]  ;;  %v17039_v36 = vld [vmem:[#allocation7 + $0xc8] sm:$0xf]  ;;  %v17308_v46 = vor.u32 %v18691_v40, %v17305_v19  ;;  %v18639_v27 = vld [vmem:[#allocation7 + $0x144] sm:$0xf] }
 0x7e4   : > { %11444 = vmatpush.bf16.msra.mxu0 %v17036_v3  ;;  %10739 = vmatpush.bf16.msra.mxu3 %v16916_v23  ;;  %v16868_v3 = vor.u32 %v18836_v58, %v16865_v2  ;;  %v16849_v23 = vld [vmem:[#allocation9 + $0x358] sm:$0xf0]  ;;  %v10554_v59 = vpop.f32.mrf.mxu0  ;;  %v17132_v58 = vor.u32 %v18647_v45, %v17129_v26  ;;  %v17191_v2 = vld [vmem:[#allocation7 + $0x200] sm:$0xf]  ;;  %v18622_v25 = vld [vmem:[#allocation7 + $0xb4] sm:$0xf0] }
 0x7e5   : > { %11409 = vmatpush.bf16.msrb.mxu1 %v17096_v38  ;;  %11418 = vmatpush.bf16.msrb.mxu2 %v17288_v56  ;;  %v18603_v38 = vld [vmem:[#allocation7 + $0x24] sm:$0xf]  ;;  %v16852_v56 = vor.u32 %v18832_v63, %v16849_v23  ;;  %v19967_v10 = vpop.f32.mrf.mxu2  ;;  %vm9621_vm12 = vcmp.gt.f32.partialorder %v9564_v29, 0.0  ;;  %v9625_v32 = vmul.f32 0.2, %v9564_v29 }
 0x7e6   : > { %v16956_v6 = vor.u32 %v18603_v38, %v16953_v14  ;;  %v17040_v38 = vor.u32 %v18626_v50, %v17039_v36  ;;  %v18687_v14 = vld [vmem:[#allocation7 + $0x2c4] sm:$0xf]  ;;  %v17399_v41 = vld [vmem:[#allocation7 + $0x3a0] sm:$0xf]  ;;  %v18717_v48 = vld [vmem:[#allocation7 + $0x3ac] sm:$0xf0] }
 0x7e7   : > { %v9629_v7 = vsel %vm9621_vm12, %v9564_v29, %v9625_v32  ;;  %v18683_v29 = vld [vmem:[#allocation7 + $0x2a4] sm:$0xf]  ;;  %v17007_v45 = vld [vmem:[#allocation7 + $0x88] sm:$0xf]  ;;  %v18618_v26 = vld [vmem:[#allocation7 + $0x94] sm:$0xf0] }
 0x7e8   : > { %11445 = vmatpush.bf16.msra.mxu0 %v17020_v49  ;;  %10740 = vmatpush.bf16.msra.mxu3 %v16900_v47  ;;  %v17145_v49 = vld [vmem:[#allocation7 + $0x1b0] sm:$0xf0]  ;;  %v17207_v47 = vld [vmem:[#allocation7 + $0x220] sm:$0xf]  ;;  %v9633_v12 = vadd.f32 %v9629_v7, %v19718_v21  ;;  %v18631_v32 = vld [vmem:[#allocation7 + $0x104] sm:$0xf] }
 0x7e9   : > { %11410 = vmatpush.bf16.msrb.mxu1 %v17080_v37  ;;  %11419 = vmatpush.bf16.msrb.mxu2 %v17272_v28  ;;  %v17148_v37 = vor.u32 %v18651_v0, %v17145_v49  ;;  %v16937_v28 = vld [vmem:[#allocation7 + $0x10] sm:$0xf0]  ;;  %v17023_v49 = vld [vmem:[#allocation7 + $0xa8] sm:$0xf] }
 0x7ea   : > { %v16940_v9 = vor.u32 %v18599_v53, %v16937_v28  ;;  %v9565_v63 = vpop.f32.mrf.mxu3  ;;  %v17289_v0 = vld [vmem:[#allocation7 + $0x2d0] sm:$0xf0]  ;;  %v17400_v28 = vor.u32 %v18717_v48, %v17399_v41  ;;  %v16975_v36 = vld [vmem:[#allocation7 + $0x48] sm:$0xf]  ;;  %v17335_v48 = vld [vmem:[#allocation7 + $0x320] sm:$0xf] }
 0x7eb   : > { %v17081_v53 = vld [vmem:[#allocation7 + $0x130] sm:$0xf0]  ;;  %v18610_v63 = vld [vmem:[#allocation7 + $0x54] sm:$0xf0] }
 0x7ec   : > { %11446 = vmatpush.bf16.msra.mxu0 %v17004_v17  ;;  %10741 = vmatpush.bf16.msra.mxu3 %v16884_v16  ;;  %v18630_v17 = vld [vmem:[#allocation7 + $0xf4] sm:$0xf0]  ;;  %v17208_v16 = vor.u32 %v18669_v33, %v17207_v47  ;;  %v18635_v47 = vld [vmem:[#allocation7 + $0x124] sm:$0xf]  ;;  %v17024_v33 = vor.u32 %v18622_v25, %v17023_v49  ;;  %v17151_v49 = vld [vmem:[#allocation7 + $0x1a8] sm:$0xf] }
 0x7ed   : > { %11411 = vmatpush.bf16.msrb.mxu1 %v17064_v22  ;;  %11420 = vmatpush.bf16.msrb.mxu2 %v17256_v57  ;;  %v18665_v22 = vld [vmem:[#allocation7 + $0x20c] sm:$0xf0]  ;;  %v18643_v57 = vld [vmem:[#allocation7 + $0x164] sm:$0xf]  ;;  %v17056_v8 = vor.u32 %v18630_v17, %v17055_v15  ;;  %v9604_v21 = vpop.f32.mrf.mxu2  ;;  %v17084_v17 = vor.u32 %v18635_v47, %v17081_v53  ;;  %v18654_v25 = vld [vmem:[#allocation7 + $0x1b4] sm:$0xf0] }
 0x7ee   : > { %v17192_v23 = vor.u32 %v18665_v22, %v17191_v2  ;;  %v18713_v15 = vld [vmem:[#allocation7 + $0x38c] sm:$0xf0]  ;;  %v18662_v2 = vld [vmem:[#allocation7 + $0x1f4] sm:$0xf0]  ;;  %v8766_v22 = vperm.slane %v19932_v20, 3 }
 0x7ef   : > { %v10565_v61 = vpop.f32.mrf.mxu1  ;;  %v18667_v47 = vld [vmem:[#allocation7 + $0x224] sm:$0xf]  ;;  %v16943_v53 = vld [vmem:[#allocation7 + $0x8] sm:$0xf] }
 0x7f0   : > { %11447 = vmatpush.bf16.msra.mxu0 %v16988_v60  ;;  %10742 = vmatpush.bf16.msra.mxu3 %v16868_v3  ;;  %v16820_v60 = vor.u32 %v18824_v24, %v16817_v43  ;;  %v17432_v3 = vor.u32 %v18725_v11, %v17431_v1  ;;  %v19971_v52 = vadd.f32 %v10565_v61, %v19959_v51  ;;  %v17257_v1 = vld [vmem:[#allocation7 + $0x290] sm:$0xf0]  ;;  %v16991_v11 = vld [vmem:[#allocation7 + $0x68] sm:$0xf]  ;;  %v18675_v61 = vld [vmem:[#allocation7 + $0x264] sm:$0xf] }
 0x7f1   : > { %11456 = vmatpush.bf16.msra.mxu1 %v17180_v62  ;;  %11421 = vmatpush.bf16.msrb.mxu2 %v17240_v4  ;;  %v17113_v62 = vld [vmem:[#allocation7 + $0x170] sm:$0xf0]  ;;  %v18721_v4 = vld [vmem:[#allocation7 + $0x3cc] sm:$0xf0]  ;;  %v17008_v43 = vor.u32 %v18618_v26, %v17007_v45  ;;  %v9577_v20 = vadd.f32 %v19937_v44, %v8766_v22  ;;  %v18602_v45 = vld [vmem:[#allocation7 + $0x14] sm:$0xf0] }
 0x7f2   : > { %11412 = vmatmul.bf16.vlgmr.msrb.gmra.mxu1 %v19963_v34  ;;  %v17416_v51 = vor.u32 %v18721_v4, %v17415_v18  ;;  %v18658_v18 = vld [vmem:[#allocation7 + $0x1d4] sm:$0xf0]  ;;  %v17351_v4 = vld [vmem:[#allocation7 + $0x340] sm:$0xf]  ;;  %v17135_v26 = vld [vmem:[#allocation7 + $0x188] sm:$0xf] }
 0x7f3   : > { %v17119_v22 = vld [vmem:[#allocation7 + $0x168] sm:$0xf] }
 0x7f4   : > { %11448 = vmatpush.bf16.msra.mxu0 %v16972_v42  ;;  %10743 = vmatpush.bf16.msra.mxu3 %v16852_v56  ;;  %v9637_v42 = vmul.f32 0.70710677, %v9633_v12  ;;  %v17097_v56 = vld [vmem:[#allocation7 + $0x150] sm:$0xf0]  ;;  %v17367_v12 = vld [vmem:[#allocation7 + $0x360] sm:$0xf] }
 0x7f5   : > { %11457 = vmatpush.bf16.msra.mxu1 %v17164_v55  ;;  %11422 = vmatpush.bf16.msrb.mxu2 %v17224_v13  ;;  %v17116_v55 = vor.u32 %v18643_v57, %v17113_v62  ;;  %v17100_v39 = vor.u32 %v18639_v27, %v17097_v56  ;;  %v17292_v13 = vor.u32 %v18687_v14, %v17289_v0  ;;  %v17225_v56 = vld [vmem:[#allocation7 + $0x250] sm:$0xf0]  ;;  %v16959_v14 = vld [vmem:[#allocation7 + $0x28] sm:$0xf] }
 0x7f6   : > { %v19974_v59 = vpack.c.bf16 %v9637_v42, %v9637_v42  ;;  %v18705_v42 = vld [vmem:[#allocation7 + $0x34c] sm:$0xf0] }
 0x7f7   : > { %v17352_v0 = vor.u32 %v18705_v42, %v17351_v4  ;;  %v17417_v4 = vld [vmem:[#allocation7 + $0x3d0] sm:$0xf0] }
 0x7f8   : > { %11449 = vmatpush.bf16.msra.mxu0 %v16956_v6  ;;  %10744 = vmatpush.bf16.msra.mxu3 %v16836_v54  ;;  %v17273_v6 = vld [vmem:[#allocation7 + $0x2b0] sm:$0xf0]  ;;  %v17383_v54 = vld [vmem:[#allocation7 + $0x380] sm:$0xf] }
 0x7f9   : > { %11458 = vmatpush.bf16.msra.mxu1 %v17148_v37  ;;  %11423 = vmatpush.bf16.msrb.mxu2 %v17208_v16  ;;  %v10567_v37 = vpop.f32.mrf.mxu1  ;;  %v17276_v24 = vor.u32 %v18683_v29, %v17273_v6  ;;  %v18679_v16 = vld [vmem:[#allocation7 + $0x284] sm:$0xf]  ;;  %v17384_v7 = vor.u32 %v18713_v15, %v17383_v54 }
 0x7fa   : > { %v17260_v62 = vor.u32 %v18679_v16, %v17257_v1  ;;  %v18723_v1 = vld [vmem:[#allocation7 + $0x3e4] sm:$0xf] }
 0x7fc   : > { %11450 = vmatpush.bf16.msra.mxu0 %v16940_v9  ;;  %10745 = vmatpush.bf16.msra.mxu3 %v16820_v60  ;;  %v18614_v9 = vld [vmem:[#allocation7 + $0x74] sm:$0xf0]  ;;  %v19979_v57 = vpop.f32.mrf.mxu0 }
 0x7fd   : > { %11459 = vmatpush.bf16.msra.mxu1 %v17132_v58  ;;  %11424 = vmatpush.bf16.msrb.mxu2 %v17192_v23  ;;  %v17183_v58 = vld [vmem:[#allocation7 + $0x1e8] sm:$0xf]  ;;  %v16992_v40 = vor.u32 %v18614_v9, %v16991_v11  ;;  %v17433_v11 = vld [vmem:[#allocation7 + $0x3f0] sm:$0xf0]  ;;  %v16944_v9 = vor.u32 %v18602_v45, %v16943_v53 }
 0x7fe   : > { %v17184_v19 = vor.u32 %v18662_v2, %v17183_v58  ;;  %v17167_v23 = vld [vmem:[#allocation7 + $0x1c8] sm:$0xf]  ;;  %v18663_v2 = vld [vmem:[#allocation7 + $0x204] sm:$0xf]  ;;  %v17385_v45 = vld [vmem:[#allocation7 + $0x390] sm:$0xf0] }
 0x7ff   : > { %11451 = vmatmul.bf16.vlgmr.msra.gmra.mxu0 %v19951_v35  ;;  %10746 = vmatmul.bf16.vlgmr.msra.gmra.mxu3 %v19915_v31  ;;  %v17065_v31 = vld [vmem:[#allocation7 + $0x110] sm:$0xf0]  ;;  %v17168_v27 = vor.u32 %v18658_v18, %v17167_v23 }
 0x800   : > { %11495 = vmatpush.bf16.msrb.mxu0 %v17056_v8  ;;  %11430 = vmatpush.bf16.msrb.mxu3 %v17432_v3  ;;  %v18709_v8 = vld [vmem:[#allocation7 + $0x36c] sm:$0xf0]  ;;  %v17068_v60 = vor.u32 %v18631_v32, %v17065_v31  ;;  %v17241_v3 = vld [vmem:[#allocation7 + $0x270] sm:$0xf0]  ;;  %v17319_v32 = vld [vmem:[#allocation7 + $0x300] sm:$0xf] }
 0x801   : > { %11460 = vmatpush.bf16.msra.mxu1 %v17116_v55  ;;  %11469 = vmatpush.bf16.msra.mxu2 %v17308_v46  ;;  %v17368_v50 = vor.u32 %v18709_v8, %v17367_v12  ;;  %v17244_v21 = vor.u32 %v18675_v61, %v17241_v3  ;;  %v9590_v55 = vadd.f32 %v19948_v5, %v9577_v20  ;;  %v18624_v3 = vld [vmem:[#allocation7 + $0xcc] sm:$0xf]  ;;  %v18719_v20 = vld [vmem:[#allocation7 + $0x3c4] sm:$0xf] }
 0x802   : > { %11425 = vmatmul.bf16.vlgmr.msrb.gmra.mxu2 %v19974_v59  ;;  %v16976_v46 = vor.u32 %v18610_v63, %v16975_v36  ;;  %v9615_v5 = vpop.f32.mrf.mxu3  ;;  %v17436_v61 = vor.u32 %v18723_v1, %v17433_v11  ;;  %v17041_v36 = vld [vmem:[#allocation7 + $0xd8] sm:$0xf0]  ;;  %v18660_v11 = vld [vmem:[#allocation7 + $0x1ec] sm:$0xf] }
 0x803   : > { %v9603_v44 = vadd.f32 %v19967_v10, %v9590_v55  ;;  %v18650_v10 = vld [vmem:[#allocation7 + $0x194] sm:$0xf0]  ;;  %v16993_v1 = vld [vmem:[#allocation7 + $0x78] sm:$0xf0] }
 0x804   : > { %11496 = vmatpush.bf16.msrb.mxu0 %v17040_v38  ;;  %11431 = vmatpush.bf16.msrb.mxu3 %v17416_v51  ;;  %v18671_v38 = vld [vmem:[#allocation7 + $0x244] sm:$0xf]  ;;  %v18606_v51 = vld [vmem:[#allocation7 + $0x34] sm:$0xf0]  ;;  %v10606_v41 = vpop.f32.mrf.mxu0  ;;  %v17136_v58 = vor.u32 %v18650_v10, %v17135_v26 }
 0x805   : > { %11461 = vmatpush.bf16.msra.mxu1 %v17100_v39  ;;  %11470 = vmatpush.bf16.msra.mxu2 %v17292_v13  ;;  %v18701_v39 = vld [vmem:[#allocation7 + $0x32c] sm:$0xf0]  ;;  %v17228_v13 = vor.u32 %v18671_v38, %v17225_v56  ;;  %v9616_v29 = vadd.f32 %v9615_v5, %v9603_v44  ;;  %v10578_v6 = vpop.f32.mrf.mxu2  ;;  %v16960_v37 = vor.u32 %v18606_v51, %v16959_v14  ;;  %v18642_v38 = vld [vmem:[#allocation7 + $0x154] sm:$0xf0]  ;;  %v17295_v56 = vld [vmem:[#allocation7 + $0x2c8] sm:$0xf] }
 0x806   : > { %v19986_v54 = vadd.f32 %v10578_v6, %v19971_v52  ;;  %v17336_v15 = vor.u32 %v18701_v39, %v17335_v48  ;;  %v17193_v52 = vld [vmem:[#allocation7 + $0x210] sm:$0xf0]  ;;  %v18690_v14 = vld [vmem:[#allocation7 + $0x2d4] sm:$0xf0]  ;;  %v18620_v51 = vld [vmem:[#allocation7 + $0xac] sm:$0xf] }
 0x807   : > { %vm9622_vm13 = vcmp.gt.f32.partialorder %v9616_v29, 0.0  ;;  %v9626_v31 = vmul.f32 0.2, %v9616_v29  ;;  %v17196_v18 = vor.u32 %v18663_v2, %v17193_v52  ;;  %v17401_v44 = vld [vmem:[#allocation7 + $0x3b0] sm:$0xf0]  ;;  %v17296_v48 = vor.u32 %v18690_v14, %v17295_v56 }
 0x808   : > { %11497 = vmatpush.bf16.msrb.mxu0 %v17024_v33  ;;  %11432 = vmatpush.bf16.msrb.mxu3 %v17400_v28  ;;  %v17209_v33 = vld [vmem:[#allocation7 + $0x230] sm:$0xf0]  ;;  %v17152_v28 = vor.u32 %v18654_v25, %v17151_v49  ;;  %v17025_v49 = vld [vmem:[#allocation7 + $0xb8] sm:$0xf0]  ;;  %v17087_v39 = vld [vmem:[#allocation7 + $0x128] sm:$0xf] }
 0x809   : > { %11462 = vmatpush.bf16.msra.mxu1 %v17084_v17  ;;  %11471 = vmatpush.bf16.msra.mxu2 %v17276_v24  ;;  %v18628_v17 = vld [vmem:[#allocation7 + $0xec] sm:$0xf]  ;;  %v17057_v24 = vld [vmem:[#allocation7 + $0xf8] sm:$0xf0]  ;;  %v17212_v16 = vor.u32 %v18667_v47, %v17209_v33  ;;  %v17028_v5 = vor.u32 %v18620_v51, %v17025_v49  ;;  %v17279_v47 = vld [vmem:[#allocation7 + $0x2a8] sm:$0xf] }
 0x80a   : > { %v17060_v8 = vor.u32 %v18628_v17, %v17057_v24  ;;  %v9617_v63 = vpop.f32.mrf.mxu3  ;;  %v18686_v33 = vld [vmem:[#allocation7 + $0x2b4] sm:$0xf0]  ;;  %v17009_v6 = vld [vmem:[#allocation7 + $0x98] sm:$0xf0]  ;;  %v18699_v56 = vld [vmem:[#allocation7 + $0x324] sm:$0xf] }
 0x80b   : > { %v17280_v10 = vor.u32 %v18686_v33, %v17279_v47  ;;  %v18634_v17 = vld [vmem:[#allocation7 + $0x114] sm:$0xf0]  ;;  %v17353_v63 = vld [vmem:[#allocation7 + $0x350] sm:$0xf0] }
 0x80c   : > { %11498 = vmatpush.bf16.msrb.mxu0 %v17008_v43  ;;  %11433 = vmatpush.bf16.msrb.mxu3 %v17384_v7  ;;  %v18697_v43 = vld [vmem:[#allocation7 + $0x30c] sm:$0xf0]  ;;  %v9630_v7 = vsel %vm9622_vm13, %v9616_v29, %v9626_v31  ;;  %v18616_v29 = vld [vmem:[#allocation7 + $0x8c] sm:$0xf]  ;;  %v18682_v31 = vld [vmem:[#allocation7 + $0x294] sm:$0xf0] }
 0x80d   : > { %11463 = vmatpush.bf16.msra.mxu1 %v17068_v60  ;;  %11472 = vmatpush.bf16.msra.mxu2 %v17260_v62  ;;  %v9634_v12 = vadd.f32 %v9630_v7, %v19734_v30  ;;  %v17320_v60 = vor.u32 %v18697_v43, %v17319_v32  ;;  %v18646_v62 = vld [vmem:[#allocation7 + $0x174] sm:$0xf0]  ;;  %v10580_v30 = vpop.f32.mrf.mxu2  ;;  %v17012_v24 = vor.u32 %v18616_v29, %v17009_v6  ;;  %v17263_v32 = vld [vmem:[#allocation7 + $0x288] sm:$0xf]  ;;  %v18612_v43 = vld [vmem:[#allocation7 + $0x6c] sm:$0xf] }
 0x80e   : > { %v17185_v7 = vld [vmem:[#allocation7 + $0x1f8] sm:$0xf0]  ;;  %v18674_v30 = vld [vmem:[#allocation7 + $0x254] sm:$0xf0]  ;;  %v17337_v14 = vld [vmem:[#allocation7 + $0x330] sm:$0xf0] }
 0x80f   : > { %v10617_v23 = vpop.f32.mrf.mxu1  ;;  %v17340_v33 = vor.u32 %v18699_v56, %v17337_v14  ;;  %v18648_v29 = vld [vmem:[#allocation7 + $0x18c] sm:$0xf]  ;;  %v17137_v6 = vld [vmem:[#allocation7 + $0x198] sm:$0xf0] }
 0x810   : > { %11499 = vmatpush.bf16.msrb.mxu0 %v16992_v40  ;;  %11434 = vmatpush.bf16.msrb.mxu3 %v17368_v50  ;;  %v17311_v40 = vld [vmem:[#allocation7 + $0x2e8] sm:$0xf]  ;;  %v9638_v50 = vmul.f32 0.70710677, %v9634_v12  ;;  %v19990_v42 = vadd.f32 %v10617_v23, %v19979_v57  ;;  %v18715_v57 = vld [vmem:[#allocation7 + $0x3a4] sm:$0xf]  ;;  %v16996_v12 = vor.u32 %v18612_v43, %v16993_v1 }
 0x811   : > { %11508 = vmatpush.bf16.msrb.mxu1 %v17184_v19  ;;  %11473 = vmatpush.bf16.msra.mxu2 %v17244_v21  ;;  %v18694_v19 = vld [vmem:[#allocation7 + $0x2f4] sm:$0xf0]  ;;  %v17120_v21 = vor.u32 %v18646_v62, %v17119_v22  ;;  %v17404_v53 = vor.u32 %v18715_v57, %v17401_v44  ;;  %v17264_v22 = vor.u32 %v18682_v31, %v17263_v32  ;;  %v18644_v32 = vld [vmem:[#allocation7 + $0x16c] sm:$0xf]  ;;  %v17121_v31 = vld [vmem:[#allocation7 + $0x178] sm:$0xf0] }
 0x812   : > { %11464 = vmatmul.bf16.vlgmr.msra.gmra.mxu1 %v19963_v34  ;;  %v17312_v55 = vor.u32 %v18694_v19, %v17311_v40  ;;  %v19992_v25 = vpack.c.bf16 %v9638_v50, %v9638_v50  ;;  %v18678_v62 = vld [vmem:[#allocation7 + $0x274] sm:$0xf0]  ;;  %v18608_v40 = vld [vmem:[#allocation7 + $0x4c] sm:$0xf]  ;;  %v18703_v50 = vld [vmem:[#allocation7 + $0x344] sm:$0xf] }
 0x813   : > { %v18692_v43 = vld [vmem:[#allocation7 + $0x2ec] sm:$0xf]  ;;  %v17073_v56 = vld [vmem:[#allocation7 + $0x118] sm:$0xf0] }
 0x814   : > { %11500 = vmatpush.bf16.msrb.mxu0 %v16976_v46  ;;  %11435 = vmatpush.bf16.msrb.mxu3 %v17352_v0  ;;  %v17103_v46 = vld [vmem:[#allocation7 + $0x148] sm:$0xf]  ;;  %v17420_v0 = vor.u32 %v18719_v20, %v17417_v4  ;;  %v18680_v14 = vld [vmem:[#allocation7 + $0x28c] sm:$0xf] }
 0x815   : > { %11509 = vmatpush.bf16.msrb.mxu1 %v17168_v27  ;;  %11474 = vmatpush.bf16.msra.mxu2 %v17228_v13  ;;  %v17044_v27 = vor.u32 %v18624_v3, %v17041_v36  ;;  %v17104_v41 = vor.u32 %v18642_v38, %v17103_v46  ;;  %v18638_v13 = vld [vmem:[#allocation7 + $0x134] sm:$0xf0]  ;;  %v18656_v3 = vld [vmem:[#allocation7 + $0x1cc] sm:$0xf]  ;;  %v17169_v36 = vld [vmem:[#allocation7 + $0x1d8] sm:$0xf0] }
 0x816   : > { %v17088_v26 = vor.u32 %v18638_v13, %v17087_v39  ;;  %v17172_v20 = vor.u32 %v18656_v3, %v17169_v36  ;;  %v17231_v4 = vld [vmem:[#allocation7 + $0x248] sm:$0xf]  ;;  %v16961_v46 = vld [vmem:[#allocation7 + $0x38] sm:$0xf0]  ;;  %v18600_v13 = vld [vmem:[#allocation7 + $0xc] sm:$0xf] }
 0x817   : > { %v17153_v38 = vld [vmem:[#allocation7 + $0x1b8] sm:$0xf0]  ;;  %v17232_v49 = vor.u32 %v18674_v30, %v17231_v4  ;;  %v17215_v39 = vld [vmem:[#allocation7 + $0x228] sm:$0xf] }
 0x818   : > { %11501 = vmatpush.bf16.msrb.mxu0 %v16960_v37  ;;  %11436 = vmatpush.bf16.msrb.mxu3 %v17336_v15  ;;  %v10619_v37 = vpop.f32.mrf.mxu1  ;;  %v17071_v15 = vld [vmem:[#allocation7 + $0x108] sm:$0xf]  ;;  %v17281_v4 = vld [vmem:[#allocation7 + $0x2b8] sm:$0xf0] }
 0x819   : > { %11510 = vmatpush.bf16.msrb.mxu1 %v17152_v28  ;;  %11475 = vmatpush.bf16.msra.mxu2 %v17212_v16  ;;  %v18711_v28 = vld [vmem:[#allocation7 + $0x384] sm:$0xf]  ;;  %v17072_v52 = vor.u32 %v18634_v17, %v17071_v15  ;;  %v17140_v15 = vor.u32 %v18648_v29, %v17137_v6  ;;  %v17199_v17 = vld [vmem:[#allocation7 + $0x208] sm:$0xf]  ;;  %v18706_v29 = vld [vmem:[#allocation7 + $0x354] sm:$0xf0] }
 0x81a   : > { %v17388_v16 = vor.u32 %v18711_v28, %v17385_v45  ;;  %v18695_v37 = vld [vmem:[#allocation7 + $0x304] sm:$0xf]  ;;  %v17321_v28 = vld [vmem:[#allocation7 + $0x310] sm:$0xf0]  ;;  %v17439_v45 = vld [vmem:[#allocation7 + $0x3e8] sm:$0xf] }
 0x81b   : > { %v17407_v36 = vld [vmem:[#allocation7 + $0x3a8] sm:$0xf] }
 0x81c   : > { %11502 = vmatpush.bf16.msrb.mxu0 %v16944_v9  ;;  %11437 = vmatpush.bf16.msrb.mxu3 %v17320_v60  ;;  %v18707_v9 = vld [vmem:[#allocation7 + $0x364] sm:$0xf]  ;;  %v19997_v2 = vpop.f32.mrf.mxu0  ;;  %v17247_v60 = vld [vmem:[#allocation7 + $0x268] sm:$0xf] }
 0x81d   : > { %11511 = vmatpush.bf16.msrb.mxu1 %v17136_v58  ;;  %11476 = vmatpush.bf16.msra.mxu2 %v17196_v18  ;;  %v17369_v58 = vld [vmem:[#allocation7 + $0x370] sm:$0xf0]  ;;  %v17248_v23 = vor.u32 %v18678_v62, %v17247_v60  ;;  %v18640_v62 = vld [vmem:[#allocation7 + $0x14c] sm:$0xf] }
 0x81e   : > { %v17372_v19 = vor.u32 %v18707_v9, %v17369_v58  ;;  %v17423_v58 = vld [vmem:[#allocation7 + $0x3c8] sm:$0xf] }
 0x81f   : > { %11503 = vmatmul.bf16.vlgmr.msrb.gmra.mxu0 %v19951_v35  ;;  %11438 = vmatmul.bf16.vlgmr.msrb.gmra.mxu3 %v19992_v25 }
 0x820   : > { %11547 = vmatpush.bf16.msra.mxu0 %v17060_v8  ;;  %11482 = vmatpush.bf16.msra.mxu3 %v17436_v61  ;;  %v17188_v8 = vor.u32 %v18660_v11, %v17185_v7  ;;  %v16977_v61 = vld [vmem:[#allocation7 + $0x58] sm:$0xf0] }
 0x821   : > { %11512 = vmatpush.bf16.msrb.mxu1 %v17120_v21  ;;  %11521 = vmatpush.bf16.msrb.mxu2 %v17312_v55  ;;  %v16980_v18 = vor.u32 %v18608_v40, %v16977_v61  ;;  %v18604_v21 = vld [vmem:[#allocation7 + $0x2c] sm:$0xf]  ;;  %v17356_v55 = vor.u32 %v18703_v50, %v17353_v63  ;;  %v17105_v40 = vld [vmem:[#allocation7 + $0x158] sm:$0xf0]  ;;  %v18718_v50 = vld [vmem:[#allocation7 + $0x3b4] sm:$0xf0] }
 0x822   : > { %11477 = vmatmul.bf16.vlgmr.msra.gmra.mxu2 %v19974_v59  ;;  %v17297_v61 = vld [vmem:[#allocation7 + $0x2d8] sm:$0xf0]  ;;  %v17408_v30 = vor.u32 %v18718_v50, %v17407_v36  ;;  %v18716_v36 = vld [vmem:[#allocation7 + $0x3ac] sm:$0xf] }
 0x823   : > { %v17409_v50 = vld [vmem:[#allocation7 + $0x3b8] sm:$0xf0] }
 0x824   : > { %11548 = vmatpush.bf16.msra.mxu0 %v17044_v27  ;;  %11483 = vmatpush.bf16.msra.mxu3 %v17420_v0  ;;  %v18652_v27 = vld [vmem:[#allocation7 + $0x1ac] sm:$0xf]  ;;  %v10591_v0 = vpop.f32.mrf.mxu3  ;;  %v10658_v51 = vpop.f32.mrf.mxu0 }
 0x825   : > { %11513 = vmatpush.bf16.msrb.mxu1 %v17104_v41  ;;  %11522 = vmatpush.bf16.msrb.mxu2 %v17296_v48  ;;  %v20001_v57 = vadd.f32 %v10591_v0, %v19986_v54  ;;  %v10630_v44 = vpop.f32.mrf.mxu2  ;;  %v16964_v41 = vor.u32 %v18604_v21, %v16961_v46  ;;  %v17156_v48 = vor.u32 %v18652_v27, %v17153_v38  ;;  %v18714_v46 = vld [vmem:[#allocation7 + $0x394] sm:$0xf0]  ;;  %v18632_v38 = vld [vmem:[#allocation7 + $0x10c] sm:$0xf]  ;;  %v17265_v0 = vld [vmem:[#allocation7 + $0x298] sm:$0xf0] }
 0x826   : > { %v20004_v47 = vadd.f32 %v10630_v44, %v19990_v42  ;;  %v17324_v42 = vor.u32 %v18695_v37, %v17321_v28  ;;  %v18710_v44 = vld [vmem:[#allocation7 + $0x374] sm:$0xf0]  ;;  %v18672_v37 = vld [vmem:[#allocation7 + $0x24c] sm:$0xf]  ;;  %v17233_v28 = vld [vmem:[#allocation7 + $0x258] sm:$0xf0] }
 0x828   : > { %11549 = vmatpush.bf16.msra.mxu0 %v17028_v5  ;;  %11484 = vmatpush.bf16.msra.mxu3 %v17404_v53  ;;  %v18670_v5 = vld [vmem:[#allocation7 + $0x234] sm:$0xf0]  ;;  %v16945_v53 = vld [vmem:[#allocation7 + $0x18] sm:$0xf0] }
 0x829   : > { %11514 = vmatpush.bf16.msrb.mxu1 %v17088_v26  ;;  %11523 = vmatpush.bf16.msrb.mxu2 %v17280_v10  ;;  %v17216_v54 = vor.u32 %v18670_v5, %v17215_v39  ;;  %v18726_v26 = vld [vmem:[#allocation7 + $0x3f4] sm:$0xf0]  ;;  %v16948_v10 = vor.u32 %v18600_v13, %v16945_v53  ;;  %v17268_v39 = vor.u32 %v18680_v14, %v17265_v0  ;;  %v18676_v5 = vld [vmem:[#allocation7 + $0x26c] sm:$0xf]  ;;  %v17249_v13 = vld [vmem:[#allocation7 + $0x278] sm:$0xf0] }
 0x82a   : > { %v17440_v1 = vor.u32 %v18726_v26, %v17439_v45  ;;  %v17359_v53 = vld [vmem:[#allocation7 + $0x348] sm:$0xf]  ;;  %v17252_v6 = vor.u32 %v18676_v5, %v17249_v13  ;;  %v18702_v26 = vld [vmem:[#allocation7 + $0x334] sm:$0xf0] }
 0x82b   : > { %v17343_v45 = vld [vmem:[#allocation7 + $0x328] sm:$0xf] }
 0x82c   : > { %11550 = vmatpush.bf16.msra.mxu0 %v17012_v24  ;;  %11485 = vmatpush.bf16.msra.mxu3 %v17388_v16  ;;  %v18666_v24 = vld [vmem:[#allocation7 + $0x214] sm:$0xf0]  ;;  %v17313_v16 = vld [vmem:[#allocation7 + $0x2f8] sm:$0xf0]  ;;  %v10593_v11 = vpop.f32.mrf.mxu3 }
 0x82d   : > { %11515 = vmatpush.bf16.msrb.mxu1 %v17072_v52  ;;  %11524 = vmatpush.bf16.msrb.mxu2 %v17264_v22  ;;  %v17200_v9 = vor.u32 %v18666_v24, %v17199_v17  ;;  %v18722_v52 = vld [vmem:[#allocation7 + $0x3d4] sm:$0xf0]  ;;  %v17316_v60 = vor.u32 %v18692_v43, %v17313_v16  ;;  %v17236_v17 = vor.u32 %v18672_v37, %v17233_v28 }
 0x82e   : > { %v17424_v3 = vor.u32 %v18722_v52, %v17423_v58  ;;  %v17344_v16 = vor.u32 %v18702_v26, %v17343_v45  ;;  %v18698_v11 = vld [vmem:[#allocation7 + $0x314] sm:$0xf0]  ;;  %v18664_v58 = vld [vmem:[#allocation7 + $0x20c] sm:$0xf]  ;;  %v17201_v52 = vld [vmem:[#allocation7 + $0x218] sm:$0xf0] }
 0x82f   : > { %v10669_v7 = vpop.f32.mrf.mxu1 }
 0x830   : > { %11551 = vmatpush.bf16.msra.mxu0 %v16996_v12  ;;  %11486 = vmatpush.bf16.msra.mxu3 %v17372_v19  ;;  %v20007_v22 = vadd.f32 %v10669_v7, %v19997_v2  ;;  %v10632_v12 = vpop.f32.mrf.mxu2  ;;  %v18688_v19 = vld [vmem:[#allocation7 + $0x2cc] sm:$0xf]  ;;  %v17108_v2 = vor.u32 %v18640_v62, %v17105_v40  ;;  %v17204_v62 = vor.u32 %v18664_v58, %v17201_v52 }
 0x831   : > { %11560 = vmatpush.bf16.msra.mxu1 %v17188_v8  ;;  %11525 = vmatpush.bf16.msrb.mxu2 %v17248_v23  ;;  %v17124_v8 = vor.u32 %v18644_v32, %v17121_v31  ;;  %v17300_v63 = vor.u32 %v18688_v19, %v17297_v61  ;;  %v18636_v23 = vld [vmem:[#allocation7 + $0x12c] sm:$0xf]  ;;  %v17217_v31 = vld [vmem:[#allocation7 + $0x238] sm:$0xf0] }
 0x832   : > { %11516 = vmatmul.bf16.vlgmr.msrb.gmra.mxu1 %v19963_v34  ;;  %v18724_v7 = vld [vmem:[#allocation7 + $0x3ec] sm:$0xf]  ;;  %v17425_v19 = vld [vmem:[#allocation7 + $0x3d8] sm:$0xf0] }
 0x833   : > { %v18720_v40 = vld [vmem:[#allocation7 + $0x3cc] sm:$0xf] }
 0x834   : > { %11552 = vmatpush.bf16.msra.mxu0 %v16980_v18  ;;  %11487 = vmatpush.bf16.msra.mxu3 %v17356_v55  ;;  %v17089_v18 = vld [vmem:[#allocation7 + $0x138] sm:$0xf0]  ;;  %v17391_v55 = vld [vmem:[#allocation7 + $0x388] sm:$0xf] }
 0x835   : > { %11561 = vmatpush.bf16.msra.mxu1 %v17172_v20  ;;  %11526 = vmatpush.bf16.msrb.mxu2 %v17232_v49  ;;  %v18684_v20 = vld [vmem:[#allocation7 + $0x2ac] sm:$0xf]  ;;  %v17392_v51 = vor.u32 %v18714_v46, %v17391_v55  ;;  %v17375_v49 = vld [vmem:[#allocation7 + $0x368] sm:$0xf] }
 0x836   : > { %v17284_v27 = vor.u32 %v18684_v20, %v17281_v4  ;;  %v18708_v4 = vld [vmem:[#allocation7 + $0x36c] sm:$0xf] }
 0x837   : > { %v10671_v21 = vpop.f32.mrf.mxu1 }
 0x838   : > { %11553 = vmatpush.bf16.msra.mxu0 %v16964_v41  ;;  %11488 = vmatpush.bf16.msra.mxu3 %v17340_v33  ;;  %v17376_v33 = vor.u32 %v18710_v44, %v17375_v49 }
 0x839   : > { %11562 = vmatpush.bf16.msra.mxu1 %v17156_v48  ;;  %11527 = vmatpush.bf16.msrb.mxu2 %v17216_v54  ;;  %v17076_v48 = vor.u32 %v18632_v38, %v17073_v56  ;;  %v17360_v54 = vor.u32 %v18706_v29, %v17359_v53  ;;  %v18700_v56 = vld [vmem:[#allocation7 + $0x32c] sm:$0xf] }
 0x83c   : > { %11554 = vmatpush.bf16.msra.mxu0 %v16948_v10  ;;  %11489 = vmatpush.bf16.msra.mxu3 %v17324_v42  ;;  %v10708_v41 = vpop.f32.mrf.mxu0  ;;  %v18668_v42 = vld [vmem:[#allocation7 + $0x22c] sm:$0xf] }
 0x83d   : > { %11563 = vmatpush.bf16.msra.mxu1 %v17140_v15  ;;  %11528 = vmatpush.bf16.msrb.mxu2 %v17200_v9  ;;  %v17441_v9 = vld [vmem:[#allocation7 + $0x3f8] sm:$0xf0] }
 0x83f   : > { %11555 = vmatmul.bf16.vlgmr.msra.gmra.mxu0 %v19951_v35  ;;  %11490 = vmatmul.bf16.vlgmr.msra.gmra.mxu3 %v19992_v25  ;;  %v17092_v35 = vor.u32 %v18636_v23, %v17089_v18  ;;  %v18712_v23 = vld [vmem:[#allocation7 + $0x38c] sm:$0xf]  ;;  %v17393_v18 = vld [vmem:[#allocation7 + $0x398] sm:$0xf0] }
 0x840   : > { %11534 = vmatpush.bf16.msrb.mxu3 %v17440_v1  ;;  %11529 = vmatmul.bf16.vlgmr.msrb.gmra.mxu2 %v19974_v59  ;;  %v17327_v1 = vld [vmem:[#allocation7 + $0x308] sm:$0xf]  ;;  %v17396_v20 = vor.u32 %v18712_v23, %v17393_v18 }
 0x841   : > { %11564 = vmatpush.bf16.msra.mxu1 %v17124_v8  ;;  %11573 = vmatpush.bf16.msra.mxu2 %v17316_v60  ;;  %v17328_v12 = vor.u32 %v18698_v11, %v17327_v1  ;;  %v17444_v8 = vor.u32 %v18724_v7, %v17441_v9 }
 0x842   : > { %v10643_v10 = vpop.f32.mrf.mxu3 }
 0x843   : > { %v20014_v24 = vadd.f32 %v10643_v10, %v20004_v47 }
 0x844   : > { %11535 = vmatpush.bf16.msrb.mxu3 %v17424_v3  ;;  %v10710_v15 = vpop.f32.mrf.mxu0  ;;  %v17428_v3 = vor.u32 %v18720_v40, %v17425_v19 }
 0x845   : > { %11565 = vmatpush.bf16.msra.mxu1 %v17108_v2  ;;  %11574 = vmatpush.bf16.msra.mxu2 %v17300_v63  ;;  %v10682_v32 = vpop.f32.mrf.mxu2  ;;  %v17412_v2 = vor.u32 %v18716_v36, %v17409_v50 }
 0x846   : > { %v10683_v43 = vadd.f32 %v10682_v32, %v20007_v22 }
 0x848   : > { %11536 = vmatpush.bf16.msrb.mxu3 %v17408_v30  ;;  %v17377_v30 = vld [vmem:[#allocation7 + $0x378] sm:$0xf0] }
 0x849   : > { %11566 = vmatpush.bf16.msra.mxu1 %v17092_v35  ;;  %11575 = vmatpush.bf16.msra.mxu2 %v17284_v27  ;;  %v17380_v46 = vor.u32 %v18708_v4, %v17377_v30  ;;  %v18704_v35 = vld [vmem:[#allocation7 + $0x34c] sm:$0xf]  ;;  %v17361_v27 = vld [vmem:[#allocation7 + $0x358] sm:$0xf0] }
 0x84a   : > { %v10645_v47 = vpop.f32.mrf.mxu3  ;;  %v17364_v38 = vor.u32 %v18704_v35, %v17361_v27 }
 0x84c   : > { %11537 = vmatpush.bf16.msrb.mxu3 %v17392_v51 }
 0x84d   : > { %11567 = vmatpush.bf16.msra.mxu1 %v17076_v48  ;;  %11576 = vmatpush.bf16.msra.mxu2 %v17268_v39  ;;  %v10684_v61 = vpop.f32.mrf.mxu2  ;;  %v18696_v48 = vld [vmem:[#allocation7 + $0x30c] sm:$0xf]  ;;  %v17329_v39 = vld [vmem:[#allocation7 + $0x318] sm:$0xf0] }
 0x84e   : > { %v17332_v5 = vor.u32 %v18696_v48, %v17329_v39 }
 0x84f   : > { %v10721_v60 = vpop.f32.mrf.mxu1 }
 0x850   : > { %11538 = vmatpush.bf16.msrb.mxu3 %v17376_v33  ;;  %11568 = vmatmul.bf16.vlgmr.msra.gmra.mxu1 %v19963_v34  ;;  %v17220_v34 = vor.u32 %v18668_v42, %v17217_v31  ;;  %v10722_v22 = vadd.f32 %v10721_v60, %v10708_v41  ;;  %v11614_v60 = vld [vmem:[#allocation10 + $0x24] ss:$8 sm:$0xf] }
 0x851   : > { %11577 = vmatpush.bf16.msra.mxu2 %v17252_v6  ;;  %v11616_v19 = vperm.slane %v11614_v60, 0  ;;  %v11618_v39 = vperm.slane %v11614_v60, 2 }
 0x854   : > { %11539 = vmatpush.bf16.msrb.mxu3 %v17360_v54 }
 0x855   : > { %11578 = vmatpush.bf16.msra.mxu2 %v17236_v17 }
 0x857   : > { %v10723_v63 = vpop.f32.mrf.mxu1 }
 0x858   : > { %11540 = vmatpush.bf16.msrb.mxu3 %v17344_v16 }
 0x859   : > { %11579 = vmatpush.bf16.msra.mxu2 %v17220_v34 }
 0x85c   : > { %11541 = vmatpush.bf16.msrb.mxu3 %v17328_v12  ;;  %v11400_v21 = vpop.f32.mrf.mxu0 }
 0x85d   : > { %11580 = vmatpush.bf16.msra.mxu2 %v17204_v62  ;;  %v11401_v55 = vadd.f32 %v11400_v21, %v20001_v57 }
 0x85f   : > { %11542 = vmatmul.bf16.vlgmr.msrb.gmra.mxu3 %v19992_v25 }
 0x860   : > { %11586 = vmatpush.bf16.msra.mxu3 %v17444_v8  ;;  %11581 = vmatmul.bf16.vlgmr.msra.gmra.mxu2 %v19974_v59  ;;  %v17345_v59 = vld [vmem:[#allocation7 + $0x338] sm:$0xf0]  ;;  %v11599_v8 = vld [vmem:[#allocation2] sm:$0xf] }
 0x861   : > { %v17348_v41 = vor.u32 %v18700_v56, %v17345_v59  ;;  %v11601_v47 = vperm.slane %v11599_v8, 0  ;;  %v11602_v61 = vperm.slane %v11599_v8, 1 }
 0x862   : > { %v10695_v14 = vpop.f32.mrf.mxu3 }
 0x863   : > { %v10696_v51 = vadd.f32 %v10695_v14, %v10683_v43 }
 0x864   : > { %11587 = vmatpush.bf16.msra.mxu3 %v17428_v3  ;;  %v11402_v0 = vpop.f32.mrf.mxu0 }
 0x865   : > { %v10734_v49 = vpop.f32.mrf.mxu2 }
 0x866   : > { %v10735_v44 = vadd.f32 %v10734_v49, %v10722_v22 }
 0x868   : > { %11588 = vmatpush.bf16.msra.mxu3 %v17412_v2  ;;  %v11617_v2 = vperm.slane %v11614_v60, 1 }
 0x86a   : > { %v10697_v57 = vpop.f32.mrf.mxu3 }
 0x86c   : > { %11589 = vmatpush.bf16.msra.mxu3 %v17396_v20  ;;  %v11641_v20 = vld [vmem:[#allocation10 + $0x25] ss:$8 sm:$0xf] }
 0x86d   : > { %v10736_v53 = vpop.f32.mrf.mxu2  ;;  %v11643_v30 = vperm.slane %v11641_v20, 0  ;;  %v11644_v21 = vperm.slane %v11641_v20, 1 }
 0x86f   : > { %v11413_v13 = vpop.f32.mrf.mxu1 }
 0x870   : > { %11590 = vmatpush.bf16.msra.mxu3 %v17380_v46  ;;  %v11414_v33 = vadd.f32 %v11413_v13, %v11401_v55 }
 0x874   : > { %11591 = vmatpush.bf16.msra.mxu3 %v17364_v38 }
 0x877   : > { %v11415_v29 = vpop.f32.mrf.mxu1 }
 0x878   : > { %11592 = vmatpush.bf16.msra.mxu3 %v17348_v41 }
 0x87c   : > { %11593 = vmatpush.bf16.msra.mxu3 %v17332_v5  ;;  %v11452_v6 = vpop.f32.mrf.mxu0 }
 0x87d   : > { %v11453_v37 = vadd.f32 %v11452_v6, %v20014_v24 }
 0x87f   : > { %11594 = vmatmul.bf16.vlgmr.msra.gmra.mxu3 %v19992_v25 }
 0x882   : > { %v10747_v28 = vpop.f32.mrf.mxu3 }
 0x883   : > { %v20022_v45 = vadd.f32 %v10747_v28, %v10735_v44  ;;  %v11603_v44 = vperm.slane %v11599_v8, 2 }
 0x884   : > { %v11454_v54 = vpop.f32.mrf.mxu0 }
 0x885   : > { %v11426_v26 = vpop.f32.mrf.mxu2 }
 0x886   : > { %v11427_v10 = vadd.f32 %v11426_v26, %v11414_v33  ;;  %v11645_v33 = vperm.slane %v11641_v20, 2 }
 0x88a   : > { %v10749_v15 = vpop.f32.mrf.mxu3 }
 0x88d   : > { %v11428_v42 = vpop.f32.mrf.mxu2 }
 0x88f   : > { %v11465_v17 = vpop.f32.mrf.mxu1 }
 0x890   : > { %v11466_v32 = vadd.f32 %v11465_v17, %v11453_v37  ;;  %v11604_v17 = vperm.slane %v11599_v8, 3 }
 0x897   : > { %v11467_v31 = vpop.f32.mrf.mxu1 }
 0x898   : > { %v11619_v31 = vperm.slane %v11614_v60, 3 }
 0x89c   : > { %v11504_v43 = vpop.f32.mrf.mxu0 }
 0x89d   : > { %v11505_v16 = vadd.f32 %v11504_v43, %v10696_v51 }
 0x8a2   : > { %v11439_v1 = vpop.f32.mrf.mxu3 }
 0x8a3   : > { %v11440_v25 = vadd.f32 %v11439_v1, %v11427_v10  ;;  %v11646_v1 = vperm.slane %v11641_v20, 3 }
 0x8a4   : > { %v11506_v11 = vpop.f32.mrf.mxu0 }
 0x8a5   : > { %v11478_v34 = vpop.f32.mrf.mxu2  ;;  %v11609_v40 = vadd.f32 %v11601_v47, %v11440_v25 }
 0x8a6   : > { %v11479_v7 = vadd.f32 %v11478_v34, %v11466_v32 }
 0x8a7   : > { %v11624_v22 = vadd.f32 %v11616_v19, %v11609_v40 }
 0x8a9   : > { %v11632_v23 = vmul.f32 0.2, %v11624_v22  ;;  %vm11628_vm14 = vcmp.gt.f32.partialorder %v11624_v22, 0.0 }
 0x8aa   : > { %v11441_v9 = vpop.f32.mrf.mxu3 }
 0x8ab   : > { %v11636_v46 = vsel %vm11628_vm14, %v11624_v22, %v11632_v23 }
 0x8ac   : > { %v11651_v59 = vmul.f32 %v11643_v30, %v11636_v46 }
 0x8ad   : > { %v11480_v52 = vpop.f32.mrf.mxu2 }
 0x8af   : > { %v11517_v24 = vpop.f32.mrf.mxu1 }
 0x8b0   : > { %v11518_v58 = vadd.f32 %v11517_v24, %v11505_v16  ;;  %v11660_v24 = vld [vmem:[#allocation10 + $0x26] ss:$0 sm:$0xff] }
 0x8b7   : > { %v11519_v12 = vpop.f32.mrf.mxu1 }
 0x8bc   : > { %v11556_v62 = vpop.f32.mrf.mxu0 }
 0x8bd   : > { %v11557_v26 = vadd.f32 %v11556_v62, %v20022_v45 }
 0x8c2   : > { %v11491_v3 = vpop.f32.mrf.mxu3 }
 0x8c3   : > { %v11492_v50 = vadd.f32 %v11491_v3, %v11479_v7  ;;  %v11530_v63 = vpop.f32.mrf.mxu2 }
 0x8c4   : > { %v11558_v36 = vpop.f32.mrf.mxu0  ;;  %v11531_v49 = vadd.f32 %v11530_v63, %v11518_v58 }
 0x8c5   : > { %v11610_v18 = vadd.f32 %v11602_v61, %v11492_v50 }
 0x8c7   : > { %v11625_v4 = vadd.f32 %v11617_v2, %v11610_v18 }
 0x8c9   : > { %vm11629_vm15 = vcmp.gt.f32.partialorder %v11625_v4, 0.0  ;;  %v11633_v55 = vmul.f32 0.2, %v11625_v4 }
 0x8ca   : > { %v11493_v35 = vpop.f32.mrf.mxu3 }
 0x8cb   : > { %v11532_v38 = vpop.f32.mrf.mxu2  ;;  %v11637_v56 = vsel %vm11629_vm15, %v11625_v4, %v11633_v55 }
 0x8cc   : > { %v11652_v14 = vmul.f32 %v11644_v21, %v11637_v56 }
 0x8cd   : > { %v11569_v27 = vpop.f32.mrf.mxu1 }
 0x8ce   : > { %v11655_v0 = vadd.f32 %v11652_v14, %v11651_v59  ;;  %v11570_v10 = vadd.f32 %v11569_v27, %v11557_v26 }
 0x8d5   : > { %v11571_v51 = vpop.f32.mrf.mxu1 }
 0x8e2   : > { %v11543_v41 = vpop.f32.mrf.mxu3 }
 0x8e3   : > { %v11544_v48 = vadd.f32 %v11543_v41, %v11531_v49  ;;  %v11582_v5 = vpop.f32.mrf.mxu2 }
 0x8e4   : > { %v11583_v15 = vadd.f32 %v11582_v5, %v11570_v10 }
 0x8e5   : > { %v11611_v57 = vadd.f32 %v11603_v44, %v11544_v48 }
 0x8e7   : > { %v11626_v13 = vadd.f32 %v11618_v39, %v11611_v57 }
 0x8e9   : > { %v11634_v53 = vmul.f32 0.2, %v11626_v13  ;;  %vm11630_vm0 = vcmp.gt.f32.partialorder %v11626_v13, 0.0 }
 0x8ea   : > { %v11545_v29 = vpop.f32.mrf.mxu3 }
 0x8eb   : > { %v11638_v6 = vsel %vm11630_vm0, %v11626_v13, %v11634_v53  ;;  %v11584_v37 = vpop.f32.mrf.mxu2 }
 0x8ec   : > { %v11653_v28 = vmul.f32 %v11645_v33, %v11638_v6 }
 0x8ee   : > { %v11656_v54 = vadd.f32 %v11655_v0, %v11653_v28 }
 0x902   : > { %v11595_v32 = vpop.f32.mrf.mxu3 }
 0x903   : > { %v11596_v42 = vadd.f32 %v11595_v32, %v11583_v15 }
 0x905   : > { %v11612_v43 = vadd.f32 %v11604_v17, %v11596_v42 }
 0x907   : > { %v11627_v16 = vadd.f32 %v11619_v31, %v11612_v43 }
 0x909   : > { %vm11631_vm1 = vcmp.gt.f32.partialorder %v11627_v16, 0.0  ;;  %v11635_v11 = vmul.f32 0.2, %v11627_v16 }
 0x90a   : > { %v11597_v25 = vpop.f32.mrf.mxu3 }
 0x90b   : > { %v11639_v34 = vsel %vm11631_vm1, %v11627_v16, %v11635_v11 }
 0x90c   : > { %v11654_v7 = vmul.f32 %v11646_v1, %v11639_v34 }
 0x90e   : > { %v11657_v9 = vadd.f32 %v11656_v54, %v11654_v7 }
 0x910   : > { %11658 = vadd.xlane.f32.xlu1 %v11657_v9 }
 0x983   : > { %v11659_v45 = vpop.xlane.xlu1 %11658 }
 0x984   : > { %v11661_v58 = vadd.f32 %v11660_v24, %v11659_v45 }
 0x986   : > { %11663 = vst.msk [vmem:[%s413_s14] sm:$0xff] %vm11662_vm2, %v11661_v58 }
 0x987 PF: > { %s22_s27 = sadd.s32 1, %s19137_s27  }
 0x988   : > { %p19_p7 = scmp.ge.s32.totalorder %s22_s27, 4  }
 0x98a   :  { %21 = sbr.rel (!%p19_p7) target bundleno = 4 (0x4), region = 131 }
 0x98f   :  { %11683 = vsyncpa [#allocation3], 1 }
 0x990   :  { %11685 = vsyncpa [#allocation3 + $0x1], 1 }
 0x991   :  { %11686 = vsyncpa [#allocation5], 1 }
 0x992   :  { %11687 = vsyncpa [#allocation8], 1 }
 0x993   :  { %11688 = vsyncpa [#allocation11], 1 }

</bundles_post_ra>
